<compile_context>
chip_gen: v6e
topology: v6e:2x2x1
jax: 0.10.0
libtpu: 0.0.40
codegen_flags: <defaults>
</compile_context>

<pallas_src>
import jax
import jax.numpy as jnp
from jax.experimental import pallas as pl
from jax.experimental.pallas import tpu as pltpu

D_MODEL = 512
NUM_HEADS = 8
HEAD_DIM = D_MODEL // NUM_HEADS
LN_EPS = 1e-5
NEG_INF = -1e30

# MXU inputs use bf16 (f32 accumulation).  Weights are STORED in bf16 in HBM.
MXU_DTYPE = jnp.bfloat16

# 32 MiB fits every generation's scoped/physical VMEM (v7x has 64 MiB total) and
# comfortably covers the <3 MiB of resident bf16 weights + tiny activation tiles.
_VMEM_LIMIT = 32 * 1024 * 1024
_MOSAIC_PARALLEL = pltpu.CompilerParams(
    dimension_semantics=("parallel",), vmem_limit_bytes=_VMEM_LIMIT)


# ----------------------------- in-kernel helpers -----------------------------

def _layernorm(z, gamma, beta):
    mu = jnp.mean(z, axis=-1, keepdims=True)
    var = jnp.mean(jnp.square(z - mu), axis=-1, keepdims=True)
    return (z - mu) * jax.lax.rsqrt(var + LN_EPS) * gamma + beta


def _softmax_rows(s):
    m = jnp.max(s, axis=-1, keepdims=True)
    p = jnp.exp(s - m)
    return p * pl.reciprocal(jnp.sum(p, axis=-1, keepdims=True), approx=True)


def _attn_finish(data, resid, wo_ref, bo_ref, g_ref, b_ref):
    # w_o projection of the (already head-merged, quirk-ordered) context
    # + residual + LayerNorm, fused in a single VMEM-resident pass.
    y = jnp.dot(data.astype(MXU_DTYPE), wo_ref[...],
                preferred_element_type=jnp.float32) + bo_ref[...]
    return _layernorm(resid + y, g_ref[...], b_ref[...])


def _per_head_attention(q_all, k_all, v_all, ctx_ref, *, causal):
    """Per-head softmax attention for one batch element.

    q_all:(Sq,D), k_all/v_all:(Sk,D) are the already-projected (all heads,
    lane-dense) activations in f32.  Head h owns columns [h*dh,(h+1)*dh).
    ctx_ref:(H,Sq,dh) receives head h at ctx_ref[h] -- the contiguous
    (H, B, S, dh) order that the reference's `data.transpose(0,1).contiguous()`
    produces once all batch grid steps have written their blocks.
    NOTE: no 1/sqrt(dh) score scaling -- faithful to the reference code.
    """
    sq, sk = q_all.shape[0], k_all.shape[0]
    if causal:
        row = jax.lax.broadcasted_iota(jnp.int32, (sq, sk), 0)
        col = jax.lax.broadcasted_iota(jnp.int32, (sq, sk), 1)
        keep = col <= row
    # TODO(synk): switch to lax.fori_loop / a head grid axis for large row tiles.
    for h in range(NUM_HEADS):
        sl = slice(h * HEAD_DIM, (h + 1) * HEAD_DIM)
        q_h = q_all[:, sl].astype(MXU_DTYPE)
        k_h = k_all[:, sl].astype(MXU_DTYPE)
        v_h = v_all[:, sl].astype(MXU_DTYPE)
        s = jax.lax.dot_general(q_h, k_h, (((1,), (1,)), ((), ())),
                                preferred_element_type=jnp.float32)
        if causal:
            s = jnp.where(keep, s, NEG_INF)
        p = _softmax_rows(s)
        ctx_ref[h] = jnp.dot(p.astype(MXU_DTYPE), v_h,
                             preferred_element_type=jnp.float32).astype(ctx_ref.dtype)


# --------------------------------- kernels -----------------------------------

def _self_heads_kernel(x_ref, wqkv_ref, bqkv_ref, ctx_ref):
    # fused QKV projection: one (S,512)@(512,1536) bf16 MXU pass
    x = x_ref[...].astype(MXU_DTYPE)
    qkv = jnp.dot(x, wqkv_ref[...], preferred_element_type=jnp.float32) + bqkv_ref[...]
    _per_head_attention(qkv[:, :D_MODEL],
                        qkv[:, D_MODEL:2 * D_MODEL],
                        qkv[:, 2 * D_MODEL:],
                        ctx_ref, causal=True)


def _finish_self_cross_heads_kernel(data_ref, x_ref, enc_ref,
                                    wo_ref, bo_ref, g_ref, b_ref,
                                    wq_ref, bq_ref, wkv_ref, bkv_ref,
                                    y_ref, ctx_ref):
    # sublayer-1 epilogue: y = LayerNorm(x + self_attn_out)
    y = _attn_finish(data_ref[...], x_ref[...], wo_ref, bo_ref, g_ref, b_ref)
    y_ref[...] = y.astype(y_ref.dtype)
    # sublayer-2 heads: queries from y, keys/values from the encoder output
    q_all = jnp.dot(y.astype(MXU_DTYPE), wq_ref[...],
                    preferred_element_type=jnp.float32) + bq_ref[...]
    kv = jnp.dot(enc_ref[...].astype(MXU_DTYPE), wkv_ref[...],
                 preferred_element_type=jnp.float32) + bkv_ref[...]
    _per_head_attention(q_all, kv[:, :D_MODEL], kv[:, D_MODEL:],
                        ctx_ref, causal=False)


def _finish_cross_ffn_kernel(data_ref, y_ref, wo_ref, bo_ref,
                             w1_ref, b1_ref, w2_ref, b2_ref, g_ref, b_ref,
                             o_ref):
    # sublayer-2 epilogue: z = LayerNorm(y + cross_attn_out)
    z = _attn_finish(data_ref[...], y_ref[...], wo_ref, bo_ref, g_ref, b_ref)
    # FFN + residual + LayerNorm (sublayer 3)
    hdn = jnp.dot(z.astype(MXU_DTYPE), w1_ref[...],
                  preferred_element_type=jnp.float32) + b1_ref[...]
    hdn = jnp.maximum(hdn, 0.0)
    f = jnp.dot(hdn.astype(MXU_DTYPE), w2_ref[...],
                preferred_element_type=jnp.float32) + b2_ref[...]
    o_ref[...] = _layernorm(z + f, g_ref[...], b_ref[...]).astype(o_ref.dtype)


# --------------------------------- wrappers ----------------------------------

def self_attention_heads(x2d, ap, *, batch, seq):
    d = D_MODEL
    const = lambda b: (0, 0)
    row = lambda b: (b, 0)
    return pl.pallas_call(
        _self_heads_kernel,
        out_shape=jax.ShapeDtypeStruct((NUM_HEADS, batch * seq, HEAD_DIM), jnp.float32),
        grid=(batch,),
        in_specs=[
            pl.BlockSpec((seq, d), row),            # x (per batch)
            pl.BlockSpec((d, 3 * d), const),        # packed wq|wk|wv (bf16, resident)
            pl.BlockSpec((1, 3 * d), const),        # packed biases
        ],
        out_specs=pl.BlockSpec((NUM_HEADS, seq, HEAD_DIM), lambda b: (0, b, 0)),
        compiler_params=_MOSAIC_PARALLEL,
    )(x2d, ap["wqkv"], ap["bqkv"])


def finish_self_and_cross_heads(data2d, x2d, enc2d, self_ap, cross_ap,
                                ln_g, ln_b, *, batch, sq, sk):
    d = D_MODEL
    const = lambda b: (0, 0)
    row = lambda b: (b, 0)
    return pl.pallas_call(
        _finish_self_cross_heads_kernel,
        out_shape=(jax.ShapeDtypeStruct((batch * sq, d), jnp.float32),
                   jax.ShapeDtypeStruct((NUM_HEADS, batch * sq, HEAD_DIM), jnp.float32)),
        grid=(batch,),
        in_specs=[
            pl.BlockSpec((sq, d), row),             # self-attn context (quirk layout)
            pl.BlockSpec((sq, d), row),             # residual x
            pl.BlockSpec((sk, d), row),             # encoder output
            pl.BlockSpec((d, d), const), pl.BlockSpec((1, d), const),      # self wo/bo
            pl.BlockSpec((1, d), const), pl.BlockSpec((1, d), const),      # shared LN g/b
            pl.BlockSpec((d, d), const), pl.BlockSpec((1, d), const),      # cross wq/bq
            pl.BlockSpec((d, 2 * d), const), pl.BlockSpec((1, 2 * d), const),  # cross wk|wv
        ],
        out_specs=(pl.BlockSpec((sq, d), row),
                   pl.BlockSpec((NUM_HEADS, sq, HEAD_DIM), lambda b: (0, b, 0))),
        compiler_params=_MOSAIC_PARALLEL,
    )(data2d, x2d, enc2d, self_ap["wo"], self_ap["bo"], ln_g, ln_b,
      cross_ap["wq"], cross_ap["bq"], cross_ap["wkv"], cross_ap["bkv"])


def finish_cross_and_ffn(data2d, y2d, cross_ap, fp, ln_g, ln_b, *, batch, seq):
    d = D_MODEL
    dff = fp["w1"].shape[1]
    const = lambda b: (0, 0)
    row = lambda b: (b, 0)
    # Per-batch row tiles: weights stay VMEM-resident (constant index_map) while
    # the activations stream; "parallel" shards batches across v7x's 2 TCs.
    return pl.pallas_call(
        _finish_cross_ffn_kernel,
        out_shape=jax.ShapeDtypeStruct((batch * seq, d), jnp.float32),
        grid=(batch,),
        in_specs=[
            pl.BlockSpec((seq, d), row),            # cross-attn context (quirk layout)
            pl.BlockSpec((seq, d), row),            # residual y
            pl.BlockSpec((d, d), const), pl.BlockSpec((1, d), const),      # cross wo/bo
            pl.BlockSpec((d, dff), const), pl.BlockSpec((1, dff), const),  # ffn w1/b1
            pl.BlockSpec((dff, d), const), pl.BlockSpec((1, d), const),    # ffn w2/b2
            pl.BlockSpec((1, d), const), pl.BlockSpec((1, d), const),      # shared LN g/b
        ],
        out_specs=pl.BlockSpec((seq, d), row),
        compiler_params=_MOSAIC_PARALLEL,
    )(data2d, y2d, cross_ap["wo"], cross_ap["bo"],
      fp["w1"], fp["b1"], fp["w2"], fp["b2"], ln_g, ln_b)


# ------------------------- module-level forward pass -------------------------

def transformer_decoder_layer(x, encoder_output, p):
    b, s, d = x.shape
    sk = encoder_output.shape[1]
    x2 = x.reshape(b * s, d)
    e2 = encoder_output.reshape(b * sk, d)

    # sublayer 1 (masked self-attention): fused QKV + per-head attention
    ctx_self = self_attention_heads(x2, p["self_attn"], batch=b, seq=s)
    # reference quirk: data.transpose(0,1).contiguous().view(B, S, H*dh)
    # == free row-major reshape of the (H, B*S, dh) buffer to (B*S, H*dh).
    data_self = ctx_self.reshape(b * s, d)

    # sublayer-1 epilogue (w_o + residual + LN) fused with sublayer-2 heads
    y2, ctx_cross = finish_self_and_cross_heads(
        data_self, x2, e2, p["self_attn"], p["cross_attn"],
        p["ln_g"], p["ln_b"], batch=b, sq=s, sk=sk)
    data_cross = ctx_cross.reshape(b * s, d)

    # sublayer-2 epilogue fused with the whole FFN sublayer (+ residual + LN)
    out2 = finish_cross_and_ffn(data_cross, y2, p["cross_attn"], p["ffn"],
                                p["ln_g"], p["ln_b"], batch=b, seq=s)
    return out2.reshape(b, s, d)


# ------------------------------ parameter init --------------------------------

def init_params(key):
    k1, k2, k3, k4 = jax.random.split(key, 4)
    scale = 0.02

    def lin(k):
        # matmul weights stored in bf16 (HBM) -- accumulation in-kernel is f32
        return (scale * jax.random.normal(k, (D_MODEL, D_MODEL), jnp.float32)
                ).astype(MXU_DTYPE)

    ks1 = jax.random.split(k1, 4)
    self_attn = dict(
        wqkv=jnp.concatenate([lin(ks1[0]), lin(ks1[1]), lin(ks1[2])], axis=1),
        bqkv=jnp.zeros((1, 3 * D_MODEL), jnp.float32),
        wo=lin(ks1[3]), bo=jnp.zeros((1, D_MODEL), jnp.float32),
    )
    ks2 = jax.random.split(k2, 4)
    cross_attn = dict(
        wq=lin(ks2[0]), bq=jnp.zeros((1, D_MODEL), jnp.float32),
        wkv=jnp.concatenate([lin(ks2[1]), lin(ks2[2])], axis=1),
        bkv=jnp.zeros((1, 2 * D_MODEL), jnp.float32),
        wo=lin(ks2[3]), bo=jnp.zeros((1, D_MODEL), jnp.float32),
    )
    ffn = dict(
        w1=lin(k3), b1=jnp.zeros((1, D_MODEL), jnp.float32),
        w2=lin(k4), b2=jnp.zeros((1, D_MODEL), jnp.float32),
    )
    return dict(self_attn=self_attn, cross_attn=cross_attn, ffn=ffn,
                ln_g=jnp.ones((1, D_MODEL), jnp.float32),   # one shared LayerNorm (used 3x)
                ln_b=jnp.zeros((1, D_MODEL), jnp.float32))


# ----------------------------------- main --------------------------------------

if __name__ == "__main__":
    key = jax.random.PRNGKey(0)
    kx, ke, kp = jax.random.split(key, 3)

    B, S = 2, 8
    x = jax.random.normal(kx, (B, S, D_MODEL), jnp.float32)
    encoder_output = jax.random.normal(ke, (B, S, D_MODEL), jnp.float32)
    params = init_params(kp)

    out = jax.jit(transformer_decoder_layer)(x, encoder_output, params)
    jax.block_until_ready(out)
    assert out.shape == (B, S, D_MODEL)
    assert bool(jnp.all(jnp.isfinite(out)))
    print("KERNEL_OK")
</pallas_src>

<mosaic_0001>
module attributes {stable_mosaic.version = 11 : i64} {
  func.func @_self_heads_kernel(%arg0: i32, %arg1: memref<8x512xf32, #tpu.memory_space<vmem>>, %arg2: memref<512x1536xbf16, #tpu.memory_space<vmem>>, %arg3: memref<1x1536xf32, #tpu.memory_space<vmem>>, %arg4: memref<8x8x64xf32, #tpu.memory_space<vmem>>) attributes {dimension_semantics = [#tpu.dimension_semantics<parallel>], iteration_bounds = array<i64: 2>, scalar_prefetch = 0 : i64, scratch_operands = 0 : i64, tpu.core_type = #tpu.core_type<tc>, window_params = [{transform_indices = @transform_0, window_bounds = array<i64: 8, 512>}, {pipeline_mode = #tpu.pipeline_mode<synchronous>, transform_indices = @transform_1, window_bounds = array<i64: 512, 1536>}, {pipeline_mode = #tpu.pipeline_mode<synchronous>, transform_indices = @transform_2, window_bounds = array<i64: 1, 1536>}, {transform_indices = @transform_3, window_bounds = array<i64: 8, 8, 64>}]} {
    %c0 = arith.constant 0 : index
    %c0_0 = arith.constant 0 : index
    %0 = vector.load %arg1[%c0, %c0_0] : memref<8x512xf32, #tpu.memory_space<vmem>>, vector<8x512xf32>
    %1 = arith.truncf %0 : vector<8x512xf32> to vector<8x512xbf16>
    %c0_1 = arith.constant 0 : index
    %c0_2 = arith.constant 0 : index
    %2 = vector.load %arg2[%c0_1, %c0_2] : memref<512x1536xbf16, #tpu.memory_space<vmem>>, vector<512x1536xbf16>
    %cst = arith.constant dense<0.000000e+00> : vector<8x1536xf32>
    %3 = tpu.matmul %1, %2, %cst {dimension_numbers = #tpu.dot_dimension_numbers<[1], [0], [0], [1], [0, 0, 1, 1], [], []>} : vector<8x512xbf16>, vector<512x1536xbf16>, vector<8x1536xf32> -> vector<8x1536xf32>
    %c0_3 = arith.constant 0 : index
    %c0_4 = arith.constant 0 : index
    %4 = vector.load %arg3[%c0_3, %c0_4] : memref<1x1536xf32, #tpu.memory_space<vmem>>, vector<1x1536xf32>
    %5 = vector.broadcast %4 : vector<1x1536xf32> to vector<8x1536xf32>
    %6 = arith.addf %3, %5 : vector<8x1536xf32>
    %7 = vector.extract_strided_slice %6 {offsets = [0, 0], sizes = [8, 512], strides = [1, 1]} : vector<8x1536xf32> to vector<8x512xf32>
    %8 = vector.extract_strided_slice %6 {offsets = [0, 512], sizes = [8, 512], strides = [1, 1]} : vector<8x1536xf32> to vector<8x512xf32>
    %9 = vector.extract_strided_slice %6 {offsets = [0, 1024], sizes = [8, 512], strides = [1, 1]} : vector<8x1536xf32> to vector<8x512xf32>
    %10 = tpu.iota {dimensions = array<i32: 0>} : vector<8x8xi32>
    %11 = tpu.iota {dimensions = array<i32: 1>} : vector<8x8xi32>
    %12 = arith.cmpi sle, %11, %10 : vector<8x8xi32>
    %13 = vector.extract_strided_slice %7 {offsets = [0, 0], sizes = [8, 64], strides = [1, 1]} : vector<8x512xf32> to vector<8x64xf32>
    %14 = arith.truncf %13 : vector<8x64xf32> to vector<8x64xbf16>
    %15 = vector.extract_strided_slice %8 {offsets = [0, 0], sizes = [8, 64], strides = [1, 1]} : vector<8x512xf32> to vector<8x64xf32>
    %16 = arith.truncf %15 : vector<8x64xf32> to vector<8x64xbf16>
    %17 = vector.extract_strided_slice %9 {offsets = [0, 0], sizes = [8, 64], strides = [1, 1]} : vector<8x512xf32> to vector<8x64xf32>
    %18 = arith.truncf %17 : vector<8x64xf32> to vector<8x64xbf16>
    %cst_5 = arith.constant dense<0.000000e+00> : vector<8x8xf32>
    %19 = tpu.matmul %14, %16, %cst_5 {dimension_numbers = #tpu.dot_dimension_numbers<[1], [1], [0], [0], [0, 0, 1, 0], [], []>} : vector<8x64xbf16>, vector<8x64xbf16>, vector<8x8xf32> -> vector<8x8xf32>
    %cst_6 = arith.constant -1.000000e+30 : f32
    %20 = vector.broadcast %cst_6 : f32 to vector<8x8xf32>
    %21 = arith.select %12, %19, %20 : vector<8x8xi1>, vector<8x8xf32>
    %cst_7 = arith.constant dense<0xFF800000> : vector<8xf32>
    %22 = vector.multi_reduction <maximumf>, %21, %cst_7 [1] : vector<8x8xf32> to vector<8xf32>
    %23 = vector.shape_cast %22 : vector<8xf32> to vector<8x1xf32>
    %24 = vector.broadcast %23 : vector<8x1xf32> to vector<8x8xf32>
    %25 = arith.subf %21, %24 : vector<8x8xf32>
    %26 = math.exp %25 : vector<8x8xf32>
    %cst_8 = arith.constant dense<0.000000e+00> : vector<8xf32>
    %27 = vector.multi_reduction <add>, %26, %cst_8 [1] : vector<8x8xf32> to vector<8xf32>
    %28 = vector.shape_cast %27 : vector<8xf32> to vector<8x1xf32>
    %29 = tpu.reciprocal %28 {approx = true} : vector<8x1xf32> -> vector<8x1xf32>
    %30 = vector.broadcast %29 : vector<8x1xf32> to vector<8x8xf32>
    %31 = arith.mulf %26, %30 : vector<8x8xf32>
    %32 = arith.truncf %31 : vector<8x8xf32> to vector<8x8xbf16>
    %cst_9 = arith.constant dense<0.000000e+00> : vector<8x64xf32>
    %33 = tpu.matmul %32, %18, %cst_9 {dimension_numbers = #tpu.dot_dimension_numbers<[1], [0], [0], [1], [0, 0, 1, 1], [], []>} : vector<8x8xbf16>, vector<8x64xbf16>, vector<8x64xf32> -> vector<8x64xf32>
    %c0_10 = arith.constant 0 : index
    %c0_11 = arith.constant 0 : index
    %c0_12 = arith.constant 0 : index
    %34 = vector.load %arg4[%c0_10, %c0_11, %c0_12] : memref<8x8x64xf32, #tpu.memory_space<vmem>>, vector<1x8x64xf32>
    %35 = vector.shape_cast %34 : vector<1x8x64xf32> to vector<8x64xf32>
    %36 = vector.shape_cast %33 : vector<8x64xf32> to vector<1x8x64xf32>
    tpu.vector_store %arg4[%c0_10, %c0_11, %c0_12], %36 {strides = array<i32>} : memref<8x8x64xf32, #tpu.memory_space<vmem>>, vector<1x8x64xf32>,
    %37 = vector.extract_strided_slice %7 {offsets = [0, 64], sizes = [8, 64], strides = [1, 1]} : vector<8x512xf32> to vector<8x64xf32>
    %38 = arith.truncf %37 : vector<8x64xf32> to vector<8x64xbf16>
    %39 = vector.extract_strided_slice %8 {offsets = [0, 64], sizes = [8, 64], strides = [1, 1]} : vector<8x512xf32> to vector<8x64xf32>
    %40 = arith.truncf %39 : vector<8x64xf32> to vector<8x64xbf16>
    %41 = vector.extract_strided_slice %9 {offsets = [0, 64], sizes = [8, 64], strides = [1, 1]} : vector<8x512xf32> to vector<8x64xf32>
    %42 = arith.truncf %41 : vector<8x64xf32> to vector<8x64xbf16>
    %cst_13 = arith.constant dense<0.000000e+00> : vector<8x8xf32>
    %43 = tpu.matmul %38, %40, %cst_13 {dimension_numbers = #tpu.dot_dimension_numbers<[1], [1], [0], [0], [0, 0, 1, 0], [], []>} : vector<8x64xbf16>, vector<8x64xbf16>, vector<8x8xf32> -> vector<8x8xf32>
    %cst_14 = arith.constant -1.000000e+30 : f32
    %44 = vector.broadcast %cst_14 : f32 to vector<8x8xf32>
    %45 = arith.select %12, %43, %44 : vector<8x8xi1>, vector<8x8xf32>
    %cst_15 = arith.constant dense<0xFF800000> : vector<8xf32>
    %46 = vector.multi_reduction <maximumf>, %45, %cst_15 [1] : vector<8x8xf32> to vector<8xf32>
    %47 = vector.shape_cast %46 : vector<8xf32> to vector<8x1xf32>
    %48 = vector.broadcast %47 : vector<8x1xf32> to vector<8x8xf32>
    %49 = arith.subf %45, %48 : vector<8x8xf32>
    %50 = math.exp %49 : vector<8x8xf32>
    %cst_16 = arith.constant dense<0.000000e+00> : vector<8xf32>
    %51 = vector.multi_reduction <add>, %50, %cst_16 [1] : vector<8x8xf32> to vector<8xf32>
    %52 = vector.shape_cast %51 : vector<8xf32> to vector<8x1xf32>
    %53 = tpu.reciprocal %52 {approx = true} : vector<8x1xf32> -> vector<8x1xf32>
    %54 = vector.broadcast %53 : vector<8x1xf32> to vector<8x8xf32>
    %55 = arith.mulf %50, %54 : vector<8x8xf32>
    %56 = arith.truncf %55 : vector<8x8xf32> to vector<8x8xbf16>
    %cst_17 = arith.constant dense<0.000000e+00> : vector<8x64xf32>
    %57 = tpu.matmul %56, %42, %cst_17 {dimension_numbers = #tpu.dot_dimension_numbers<[1], [0], [0], [1], [0, 0, 1, 1], [], []>} : vector<8x8xbf16>, vector<8x64xbf16>, vector<8x64xf32> -> vector<8x64xf32>
    %c1 = arith.constant 1 : index
    %c0_18 = arith.constant 0 : index
    %c0_19 = arith.constant 0 : index
    %58 = vector.load %arg4[%c1, %c0_18, %c0_19] : memref<8x8x64xf32, #tpu.memory_space<vmem>>, vector<1x8x64xf32>
    %59 = vector.shape_cast %58 : vector<1x8x64xf32> to vector<8x64xf32>
    %60 = vector.shape_cast %57 : vector<8x64xf32> to vector<1x8x64xf32>
    tpu.vector_store %arg4[%c1, %c0_18, %c0_19], %60 {strides = array<i32>} : memref<8x8x64xf32, #tpu.memory_space<vmem>>, vector<1x8x64xf32>,
    %61 = vector.extract_strided_slice %7 {offsets = [0, 128], sizes = [8, 64], strides = [1, 1]} : vector<8x512xf32> to vector<8x64xf32>
    %62 = arith.truncf %61 : vector<8x64xf32> to vector<8x64xbf16>
    %63 = vector.extract_strided_slice %8 {offsets = [0, 128], sizes = [8, 64], strides = [1, 1]} : vector<8x512xf32> to vector<8x64xf32>
    %64 = arith.truncf %63 : vector<8x64xf32> to vector<8x64xbf16>
    %65 = vector.extract_strided_slice %9 {offsets = [0, 128], sizes = [8, 64], strides = [1, 1]} : vector<8x512xf32> to vector<8x64xf32>
    %66 = arith.truncf %65 : vector<8x64xf32> to vector<8x64xbf16>
    %cst_20 = arith.constant dense<0.000000e+00> : vector<8x8xf32>
    %67 = tpu.matmul %62, %64, %cst_20 {dimension_numbers = #tpu.dot_dimension_numbers<[1], [1], [0], [0], [0, 0, 1, 0], [], []>} : vector<8x64xbf16>, vector<8x64xbf16>, vector<8x8xf32> -> vector<8x8xf32>
    %cst_21 = arith.constant -1.000000e+30 : f32
    %68 = vector.broadcast %cst_21 : f32 to vector<8x8xf32>
    %69 = arith.select %12, %67, %68 : vector<8x8xi1>, vector<8x8xf32>
    %cst_22 = arith.constant dense<0xFF800000> : vector<8xf32>
    %70 = vector.multi_reduction <maximumf>, %69, %cst_22 [1] : vector<8x8xf32> to vector<8xf32>
    %71 = vector.shape_cast %70 : vector<8xf32> to vector<8x1xf32>
    %72 = vector.broadcast %71 : vector<8x1xf32> to vector<8x8xf32>
    %73 = arith.subf %69, %72 : vector<8x8xf32>
    %74 = math.exp %73 : vector<8x8xf32>
    %cst_23 = arith.constant dense<0.000000e+00> : vector<8xf32>
    %75 = vector.multi_reduction <add>, %74, %cst_23 [1] : vector<8x8xf32> to vector<8xf32>
    %76 = vector.shape_cast %75 : vector<8xf32> to vector<8x1xf32>
    %77 = tpu.reciprocal %76 {approx = true} : vector<8x1xf32> -> vector<8x1xf32>
    %78 = vector.broadcast %77 : vector<8x1xf32> to vector<8x8xf32>
    %79 = arith.mulf %74, %78 : vector<8x8xf32>
    %80 = arith.truncf %79 : vector<8x8xf32> to vector<8x8xbf16>
    %cst_24 = arith.constant dense<0.000000e+00> : vector<8x64xf32>
    %81 = tpu.matmul %80, %66, %cst_24 {dimension_numbers = #tpu.dot_dimension_numbers<[1], [0], [0], [1], [0, 0, 1, 1], [], []>} : vector<8x8xbf16>, vector<8x64xbf16>, vector<8x64xf32> -> vector<8x64xf32>
    %c2 = arith.constant 2 : index
    %c0_25 = arith.constant 0 : index
    %c0_26 = arith.constant 0 : index
    %82 = vector.load %arg4[%c2, %c0_25, %c0_26] : memref<8x8x64xf32, #tpu.memory_space<vmem>>, vector<1x8x64xf32>
    %83 = vector.shape_cast %82 : vector<1x8x64xf32> to vector<8x64xf32>
    %84 = vector.shape_cast %81 : vector<8x64xf32> to vector<1x8x64xf32>
    tpu.vector_store %arg4[%c2, %c0_25, %c0_26], %84 {strides = array<i32>} : memref<8x8x64xf32, #tpu.memory_space<vmem>>, vector<1x8x64xf32>,
    %85 = vector.extract_strided_slice %7 {offsets = [0, 192], sizes = [8, 64], strides = [1, 1]} : vector<8x512xf32> to vector<8x64xf32>
    %86 = arith.truncf %85 : vector<8x64xf32> to vector<8x64xbf16>
    %87 = vector.extract_strided_slice %8 {offsets = [0, 192], sizes = [8, 64], strides = [1, 1]} : vector<8x512xf32> to vector<8x64xf32>
    %88 = arith.truncf %87 : vector<8x64xf32> to vector<8x64xbf16>
    %89 = vector.extract_strided_slice %9 {offsets = [0, 192], sizes = [8, 64], strides = [1, 1]} : vector<8x512xf32> to vector<8x64xf32>
    %90 = arith.truncf %89 : vector<8x64xf32> to vector<8x64xbf16>
    %cst_27 = arith.constant dense<0.000000e+00> : vector<8x8xf32>
    %91 = tpu.matmul %86, %88, %cst_27 {dimension_numbers = #tpu.dot_dimension_numbers<[1], [1], [0], [0], [0, 0, 1, 0], [], []>} : vector<8x64xbf16>, vector<8x64xbf16>, vector<8x8xf32> -> vector<8x8xf32>
    %cst_28 = arith.constant -1.000000e+30 : f32
    %92 = vector.broadcast %cst_28 : f32 to vector<8x8xf32>
    %93 = arith.select %12, %91, %92 : vector<8x8xi1>, vector<8x8xf32>
    %cst_29 = arith.constant dense<0xFF800000> : vector<8xf32>
    %94 = vector.multi_reduction <maximumf>, %93, %cst_29 [1] : vector<8x8xf32> to vector<8xf32>
    %95 = vector.shape_cast %94 : vector<8xf32> to vector<8x1xf32>
    %96 = vector.broadcast %95 : vector<8x1xf32> to vector<8x8xf32>
    %97 = arith.subf %93, %96 : vector<8x8xf32>
    %98 = math.exp %97 : vector<8x8xf32>
    %cst_30 = arith.constant dense<0.000000e+00> : vector<8xf32>
    %99 = vector.multi_reduction <add>, %98, %cst_30 [1] : vector<8x8xf32> to vector<8xf32>
    %100 = vector.shape_cast %99 : vector<8xf32> to vector<8x1xf32>
    %101 = tpu.reciprocal %100 {approx = true} : vector<8x1xf32> -> vector<8x1xf32>
    %102 = vector.broadcast %101 : vector<8x1xf32> to vector<8x8xf32>
    %103 = arith.mulf %98, %102 : vector<8x8xf32>
    %104 = arith.truncf %103 : vector<8x8xf32> to vector<8x8xbf16>
    %cst_31 = arith.constant dense<0.000000e+00> : vector<8x64xf32>
    %105 = tpu.matmul %104, %90, %cst_31 {dimension_numbers = #tpu.dot_dimension_numbers<[1], [0], [0], [1], [0, 0, 1, 1], [], []>} : vector<8x8xbf16>, vector<8x64xbf16>, vector<8x64xf32> -> vector<8x64xf32>
    %c3 = arith.constant 3 : index
    %c0_32 = arith.constant 0 : index
    %c0_33 = arith.constant 0 : index
    %106 = vector.load %arg4[%c3, %c0_32, %c0_33] : memref<8x8x64xf32, #tpu.memory_space<vmem>>, vector<1x8x64xf32>
    %107 = vector.shape_cast %106 : vector<1x8x64xf32> to vector<8x64xf32>
    %108 = vector.shape_cast %105 : vector<8x64xf32> to vector<1x8x64xf32>
    tpu.vector_store %arg4[%c3, %c0_32, %c0_33], %108 {strides = array<i32>} : memref<8x8x64xf32, #tpu.memory_space<vmem>>, vector<1x8x64xf32>,
    %109 = vector.extract_strided_slice %7 {offsets = [0, 256], sizes = [8, 64], strides = [1, 1]} : vector<8x512xf32> to vector<8x64xf32>
    %110 = arith.truncf %109 : vector<8x64xf32> to vector<8x64xbf16>
    %111 = vector.extract_strided_slice %8 {offsets = [0, 256], sizes = [8, 64], strides = [1, 1]} : vector<8x512xf32> to vector<8x64xf32>
    %112 = arith.truncf %111 : vector<8x64xf32> to vector<8x64xbf16>
    %113 = vector.extract_strided_slice %9 {offsets = [0, 256], sizes = [8, 64], strides = [1, 1]} : vector<8x512xf32> to vector<8x64xf32>
    %114 = arith.truncf %113 : vector<8x64xf32> to vector<8x64xbf16>
    %cst_34 = arith.constant dense<0.000000e+00> : vector<8x8xf32>
    %115 = tpu.matmul %110, %112, %cst_34 {dimension_numbers = #tpu.dot_dimension_numbers<[1], [1], [0], [0], [0, 0, 1, 0], [], []>} : vector<8x64xbf16>, vector<8x64xbf16>, vector<8x8xf32> -> vector<8x8xf32>
    %cst_35 = arith.constant -1.000000e+30 : f32
    %116 = vector.broadcast %cst_35 : f32 to vector<8x8xf32>
    %117 = arith.select %12, %115, %116 : vector<8x8xi1>, vector<8x8xf32>
    %cst_36 = arith.constant dense<0xFF800000> : vector<8xf32>
    %118 = vector.multi_reduction <maximumf>, %117, %cst_36 [1] : vector<8x8xf32> to vector<8xf32>
    %119 = vector.shape_cast %118 : vector<8xf32> to vector<8x1xf32>
    %120 = vector.broadcast %119 : vector<8x1xf32> to vector<8x8xf32>
    %121 = arith.subf %117, %120 : vector<8x8xf32>
    %122 = math.exp %121 : vector<8x8xf32>
    %cst_37 = arith.constant dense<0.000000e+00> : vector<8xf32>
    %123 = vector.multi_reduction <add>, %122, %cst_37 [1] : vector<8x8xf32> to vector<8xf32>
    %124 = vector.shape_cast %123 : vector<8xf32> to vector<8x1xf32>
    %125 = tpu.reciprocal %124 {approx = true} : vector<8x1xf32> -> vector<8x1xf32>
    %126 = vector.broadcast %125 : vector<8x1xf32> to vector<8x8xf32>
    %127 = arith.mulf %122, %126 : vector<8x8xf32>
    %128 = arith.truncf %127 : vector<8x8xf32> to vector<8x8xbf16>
    %cst_38 = arith.constant dense<0.000000e+00> : vector<8x64xf32>
    %129 = tpu.matmul %128, %114, %cst_38 {dimension_numbers = #tpu.dot_dimension_numbers<[1], [0], [0], [1], [0, 0, 1, 1], [], []>} : vector<8x8xbf16>, vector<8x64xbf16>, vector<8x64xf32> -> vector<8x64xf32>
    %c4 = arith.constant 4 : index
    %c0_39 = arith.constant 0 : index
    %c0_40 = arith.constant 0 : index
    %130 = vector.load %arg4[%c4, %c0_39, %c0_40] : memref<8x8x64xf32, #tpu.memory_space<vmem>>, vector<1x8x64xf32>
    %131 = vector.shape_cast %130 : vector<1x8x64xf32> to vector<8x64xf32>
    %132 = vector.shape_cast %129 : vector<8x64xf32> to vector<1x8x64xf32>
    tpu.vector_store %arg4[%c4, %c0_39, %c0_40], %132 {strides = array<i32>} : memref<8x8x64xf32, #tpu.memory_space<vmem>>, vector<1x8x64xf32>,
    %133 = vector.extract_strided_slice %7 {offsets = [0, 320], sizes = [8, 64], strides = [1, 1]} : vector<8x512xf32> to vector<8x64xf32>
    %134 = arith.truncf %133 : vector<8x64xf32> to vector<8x64xbf16>
    %135 = vector.extract_strided_slice %8 {offsets = [0, 320], sizes = [8, 64], strides = [1, 1]} : vector<8x512xf32> to vector<8x64xf32>
    %136 = arith.truncf %135 : vector<8x64xf32> to vector<8x64xbf16>
    %137 = vector.extract_strided_slice %9 {offsets = [0, 320], sizes = [8, 64], strides = [1, 1]} : vector<8x512xf32> to vector<8x64xf32>
    %138 = arith.truncf %137 : vector<8x64xf32> to vector<8x64xbf16>
    %cst_41 = arith.constant dense<0.000000e+00> : vector<8x8xf32>
    %139 = tpu.matmul %134, %136, %cst_41 {dimension_numbers = #tpu.dot_dimension_numbers<[1], [1], [0], [0], [0, 0, 1, 0], [], []>} : vector<8x64xbf16>, vector<8x64xbf16>, vector<8x8xf32> -> vector<8x8xf32>
    %cst_42 = arith.constant -1.000000e+30 : f32
    %140 = vector.broadcast %cst_42 : f32 to vector<8x8xf32>
    %141 = arith.select %12, %139, %140 : vector<8x8xi1>, vector<8x8xf32>
    %cst_43 = arith.constant dense<0xFF800000> : vector<8xf32>
    %142 = vector.multi_reduction <maximumf>, %141, %cst_43 [1] : vector<8x8xf32> to vector<8xf32>
    %143 = vector.shape_cast %142 : vector<8xf32> to vector<8x1xf32>
    %144 = vector.broadcast %143 : vector<8x1xf32> to vector<8x8xf32>
    %145 = arith.subf %141, %144 : vector<8x8xf32>
    %146 = math.exp %145 : vector<8x8xf32>
    %cst_44 = arith.constant dense<0.000000e+00> : vector<8xf32>
    %147 = vector.multi_reduction <add>, %146, %cst_44 [1] : vector<8x8xf32> to vector<8xf32>
    %148 = vector.shape_cast %147 : vector<8xf32> to vector<8x1xf32>
    %149 = tpu.reciprocal %148 {approx = true} : vector<8x1xf32> -> vector<8x1xf32>
    %150 = vector.broadcast %149 : vector<8x1xf32> to vector<8x8xf32>
    %151 = arith.mulf %146, %150 : vector<8x8xf32>
    %152 = arith.truncf %151 : vector<8x8xf32> to vector<8x8xbf16>
    %cst_45 = arith.constant dense<0.000000e+00> : vector<8x64xf32>
    %153 = tpu.matmul %152, %138, %cst_45 {dimension_numbers = #tpu.dot_dimension_numbers<[1], [0], [0], [1], [0, 0, 1, 1], [], []>} : vector<8x8xbf16>, vector<8x64xbf16>, vector<8x64xf32> -> vector<8x64xf32>
    %c5 = arith.constant 5 : index
    %c0_46 = arith.constant 0 : index
    %c0_47 = arith.constant 0 : index
    %154 = vector.load %arg4[%c5, %c0_46, %c0_47] : memref<8x8x64xf32, #tpu.memory_space<vmem>>, vector<1x8x64xf32>
    %155 = vector.shape_cast %154 : vector<1x8x64xf32> to vector<8x64xf32>
    %156 = vector.shape_cast %153 : vector<8x64xf32> to vector<1x8x64xf32>
    tpu.vector_store %arg4[%c5, %c0_46, %c0_47], %156 {strides = array<i32>} : memref<8x8x64xf32, #tpu.memory_space<vmem>>, vector<1x8x64xf32>,
    %157 = vector.extract_strided_slice %7 {offsets = [0, 384], sizes = [8, 64], strides = [1, 1]} : vector<8x512xf32> to vector<8x64xf32>
    %158 = arith.truncf %157 : vector<8x64xf32> to vector<8x64xbf16>
    %159 = vector.extract_strided_slice %8 {offsets = [0, 384], sizes = [8, 64], strides = [1, 1]} : vector<8x512xf32> to vector<8x64xf32>
    %160 = arith.truncf %159 : vector<8x64xf32> to vector<8x64xbf16>
    %161 = vector.extract_strided_slice %9 {offsets = [0, 384], sizes = [8, 64], strides = [1, 1]} : vector<8x512xf32> to vector<8x64xf32>
    %162 = arith.truncf %161 : vector<8x64xf32> to vector<8x64xbf16>
    %cst_48 = arith.constant dense<0.000000e+00> : vector<8x8xf32>
    %163 = tpu.matmul %158, %160, %cst_48 {dimension_numbers = #tpu.dot_dimension_numbers<[1], [1], [0], [0], [0, 0, 1, 0], [], []>} : vector<8x64xbf16>, vector<8x64xbf16>, vector<8x8xf32> -> vector<8x8xf32>
    %cst_49 = arith.constant -1.000000e+30 : f32
    %164 = vector.broadcast %cst_49 : f32 to vector<8x8xf32>
    %165 = arith.select %12, %163, %164 : vector<8x8xi1>, vector<8x8xf32>
    %cst_50 = arith.constant dense<0xFF800000> : vector<8xf32>
    %166 = vector.multi_reduction <maximumf>, %165, %cst_50 [1] : vector<8x8xf32> to vector<8xf32>
    %167 = vector.shape_cast %166 : vector<8xf32> to vector<8x1xf32>
    %168 = vector.broadcast %167 : vector<8x1xf32> to vector<8x8xf32>
    %169 = arith.subf %165, %168 : vector<8x8xf32>
    %170 = math.exp %169 : vector<8x8xf32>
    %cst_51 = arith.constant dense<0.000000e+00> : vector<8xf32>
    %171 = vector.multi_reduction <add>, %170, %cst_51 [1] : vector<8x8xf32> to vector<8xf32>
    %172 = vector.shape_cast %171 : vector<8xf32> to vector<8x1xf32>
    %173 = tpu.reciprocal %172 {approx = true} : vector<8x1xf32> -> vector<8x1xf32>
    %174 = vector.broadcast %173 : vector<8x1xf32> to vector<8x8xf32>
    %175 = arith.mulf %170, %174 : vector<8x8xf32>
    %176 = arith.truncf %175 : vector<8x8xf32> to vector<8x8xbf16>
    %cst_52 = arith.constant dense<0.000000e+00> : vector<8x64xf32>
    %177 = tpu.matmul %176, %162, %cst_52 {dimension_numbers = #tpu.dot_dimension_numbers<[1], [0], [0], [1], [0, 0, 1, 1], [], []>} : vector<8x8xbf16>, vector<8x64xbf16>, vector<8x64xf32> -> vector<8x64xf32>
    %c6 = arith.constant 6 : index
    %c0_53 = arith.constant 0 : index
    %c0_54 = arith.constant 0 : index
    %178 = vector.load %arg4[%c6, %c0_53, %c0_54] : memref<8x8x64xf32, #tpu.memory_space<vmem>>, vector<1x8x64xf32>
    %179 = vector.shape_cast %178 : vector<1x8x64xf32> to vector<8x64xf32>
    %180 = vector.shape_cast %177 : vector<8x64xf32> to vector<1x8x64xf32>
    tpu.vector_store %arg4[%c6, %c0_53, %c0_54], %180 {strides = array<i32>} : memref<8x8x64xf32, #tpu.memory_space<vmem>>, vector<1x8x64xf32>,
    %181 = vector.extract_strided_slice %7 {offsets = [0, 448], sizes = [8, 64], strides = [1, 1]} : vector<8x512xf32> to vector<8x64xf32>
    %182 = arith.truncf %181 : vector<8x64xf32> to vector<8x64xbf16>
    %183 = vector.extract_strided_slice %8 {offsets = [0, 448], sizes = [8, 64], strides = [1, 1]} : vector<8x512xf32> to vector<8x64xf32>
    %184 = arith.truncf %183 : vector<8x64xf32> to vector<8x64xbf16>
    %185 = vector.extract_strided_slice %9 {offsets = [0, 448], sizes = [8, 64], strides = [1, 1]} : vector<8x512xf32> to vector<8x64xf32>
    %186 = arith.truncf %185 : vector<8x64xf32> to vector<8x64xbf16>
    %cst_55 = arith.constant dense<0.000000e+00> : vector<8x8xf32>
    %187 = tpu.matmul %182, %184, %cst_55 {dimension_numbers = #tpu.dot_dimension_numbers<[1], [1], [0], [0], [0, 0, 1, 0], [], []>} : vector<8x64xbf16>, vector<8x64xbf16>, vector<8x8xf32> -> vector<8x8xf32>
    %cst_56 = arith.constant -1.000000e+30 : f32
    %188 = vector.broadcast %cst_56 : f32 to vector<8x8xf32>
    %189 = arith.select %12, %187, %188 : vector<8x8xi1>, vector<8x8xf32>
    %cst_57 = arith.constant dense<0xFF800000> : vector<8xf32>
    %190 = vector.multi_reduction <maximumf>, %189, %cst_57 [1] : vector<8x8xf32> to vector<8xf32>
    %191 = vector.shape_cast %190 : vector<8xf32> to vector<8x1xf32>
    %192 = vector.broadcast %191 : vector<8x1xf32> to vector<8x8xf32>
    %193 = arith.subf %189, %192 : vector<8x8xf32>
    %194 = math.exp %193 : vector<8x8xf32>
    %cst_58 = arith.constant dense<0.000000e+00> : vector<8xf32>
    %195 = vector.multi_reduction <add>, %194, %cst_58 [1] : vector<8x8xf32> to vector<8xf32>
    %196 = vector.shape_cast %195 : vector<8xf32> to vector<8x1xf32>
    %197 = tpu.reciprocal %196 {approx = true} : vector<8x1xf32> -> vector<8x1xf32>
    %198 = vector.broadcast %197 : vector<8x1xf32> to vector<8x8xf32>
    %199 = arith.mulf %194, %198 : vector<8x8xf32>
    %200 = arith.truncf %199 : vector<8x8xf32> to vector<8x8xbf16>
    %cst_59 = arith.constant dense<0.000000e+00> : vector<8x64xf32>
    %201 = tpu.matmul %200, %186, %cst_59 {dimension_numbers = #tpu.dot_dimension_numbers<[1], [0], [0], [1], [0, 0, 1, 1], [], []>} : vector<8x8xbf16>, vector<8x64xbf16>, vector<8x64xf32> -> vector<8x64xf32>
    %c7 = arith.constant 7 : index
    %c0_60 = arith.constant 0 : index
    %c0_61 = arith.constant 0 : index
    %202 = vector.load %arg4[%c7, %c0_60, %c0_61] : memref<8x8x64xf32, #tpu.memory_space<vmem>>, vector<1x8x64xf32>
    %203 = vector.shape_cast %202 : vector<1x8x64xf32> to vector<8x64xf32>
    %204 = vector.shape_cast %201 : vector<8x64xf32> to vector<1x8x64xf32>
    tpu.vector_store %arg4[%c7, %c0_60, %c0_61], %204 {strides = array<i32>} : memref<8x8x64xf32, #tpu.memory_space<vmem>>, vector<1x8x64xf32>,
    return
  }
  func.func @transform_0(%arg0: i32) -> (i32, i32) {
    %c0_i32 = arith.constant 0 : i32
    %c0_i32_0 = arith.constant 0 : i32
    return %arg0, %c0_i32 : i32, i32
  }
  func.func @transform_1(%arg0: i32) -> (i32, i32) {
    %c0_i32 = arith.constant 0 : i32
    %c0_i32_0 = arith.constant 0 : i32
    %c0_i32_1 = arith.constant 0 : i32
    return %c0_i32, %c0_i32_0 : i32, i32
  }
  func.func @transform_2(%arg0: i32) -> (i32, i32) {
    %c0_i32 = arith.constant 0 : i32
    %c0_i32_0 = arith.constant 0 : i32
    %c0_i32_1 = arith.constant 0 : i32
    return %c0_i32, %c0_i32_0 : i32, i32
  }
  func.func @transform_3(%arg0: i32) -> (i32, i32, i32) {
    %c0_i32 = arith.constant 0 : i32
    %c0_i32_0 = arith.constant 0 : i32
    %c0_i32_1 = arith.constant 0 : i32
    return %c0_i32, %arg0, %c0_i32_0 : i32, i32, i32
  }
}

module attributes {stable_mosaic.version = 11 : i64} {
  func.func @_finish_cross_ffn_kernel(%arg0: i32, %arg1: memref<8x512xf32, #tpu.memory_space<vmem>>, %arg2: memref<8x512xf32, #tpu.memory_space<vmem>>, %arg3: memref<512x512xbf16, #tpu.memory_space<vmem>>, %arg4: memref<1x512xf32, #tpu.memory_space<vmem>>, %arg5: memref<512x512xbf16, #tpu.memory_space<vmem>>, %arg6: memref<1x512xf32, #tpu.memory_space<vmem>>, %arg7: memref<512x512xbf16, #tpu.memory_space<vmem>>, %arg8: memref<1x512xf32, #tpu.memory_space<vmem>>, %arg9: memref<1x512xf32, #tpu.memory_space<vmem>>, %arg10: memref<1x512xf32, #tpu.memory_space<vmem>>, %arg11: memref<8x512xf32, #tpu.memory_space<vmem>>) attributes {dimension_semantics = [#tpu.dimension_semantics<parallel>], iteration_bounds = array<i64: 2>, scalar_prefetch = 0 : i64, scratch_operands = 0 : i64, tpu.core_type = #tpu.core_type<tc>, window_params = [{transform_indices = @transform_0, window_bounds = array<i64: 8, 512>}, {transform_indices = @transform_1, window_bounds = array<i64: 8, 512>}, {pipeline_mode = #tpu.pipeline_mode<synchronous>, transform_indices = @transform_2, window_bounds = array<i64: 512, 512>}, {pipeline_mode = #tpu.pipeline_mode<synchronous>, transform_indices = @transform_3, window_bounds = array<i64: 1, 512>}, {pipeline_mode = #tpu.pipeline_mode<synchronous>, transform_indices = @transform_4, window_bounds = array<i64: 512, 512>}, {pipeline_mode = #tpu.pipeline_mode<synchronous>, transform_indices = @transform_5, window_bounds = array<i64: 1, 512>}, {pipeline_mode = #tpu.pipeline_mode<synchronous>, transform_indices = @transform_6, window_bounds = array<i64: 512, 512>}, {pipeline_mode = #tpu.pipeline_mode<synchronous>, transform_indices = @transform_7, window_bounds = array<i64: 1, 512>}, {pipeline_mode = #tpu.pipeline_mode<synchronous>, transform_indices = @transform_8, window_bounds = array<i64: 1, 512>}, {pipeline_mode = #tpu.pipeline_mode<synchronous>, transform_indices = @transform_9, window_bounds = array<i64: 1, 512>}, {transform_indices = @transform_10, window_bounds = array<i64: 8, 512>}]} {
    %c0 = arith.constant 0 : index
    %c0_0 = arith.constant 0 : index
    %0 = vector.load %arg1[%c0, %c0_0] : memref<8x512xf32, #tpu.memory_space<vmem>>, vector<8x512xf32>
    %c0_1 = arith.constant 0 : index
    %c0_2 = arith.constant 0 : index
    %1 = vector.load %arg2[%c0_1, %c0_2] : memref<8x512xf32, #tpu.memory_space<vmem>>, vector<8x512xf32>
    %2 = arith.truncf %0 : vector<8x512xf32> to vector<8x512xbf16>
    %c0_3 = arith.constant 0 : index
    %c0_4 = arith.constant 0 : index
    %3 = vector.load %arg3[%c0_3, %c0_4] : memref<512x512xbf16, #tpu.memory_space<vmem>>, vector<512x512xbf16>
    %cst = arith.constant dense<0.000000e+00> : vector<8x512xf32>
    %4 = tpu.matmul %2, %3, %cst {dimension_numbers = #tpu.dot_dimension_numbers<[1], [0], [0], [1], [0, 0, 1, 1], [], []>} : vector<8x512xbf16>, vector<512x512xbf16>, vector<8x512xf32> -> vector<8x512xf32>
    %c0_5 = arith.constant 0 : index
    %c0_6 = arith.constant 0 : index
    %5 = vector.load %arg4[%c0_5, %c0_6] : memref<1x512xf32, #tpu.memory_space<vmem>>, vector<1x512xf32>
    %6 = vector.broadcast %5 : vector<1x512xf32> to vector<8x512xf32>
    %7 = arith.addf %4, %6 : vector<8x512xf32>
    %8 = arith.addf %1, %7 : vector<8x512xf32>
    %c0_7 = arith.constant 0 : index
    %c0_8 = arith.constant 0 : index
    %9 = vector.load %arg9[%c0_7, %c0_8] : memref<1x512xf32, #tpu.memory_space<vmem>>, vector<1x512xf32>
    %c0_9 = arith.constant 0 : index
    %c0_10 = arith.constant 0 : index
    %10 = vector.load %arg10[%c0_9, %c0_10] : memref<1x512xf32, #tpu.memory_space<vmem>>, vector<1x512xf32>
    %cst_11 = arith.constant dense<0.000000e+00> : vector<8xf32>
    %11 = vector.multi_reduction <add>, %8, %cst_11 [1] : vector<8x512xf32> to vector<8xf32>
    %12 = vector.shape_cast %11 : vector<8xf32> to vector<8x1xf32>
    %cst_12 = arith.constant 5.120000e+02 : f32
    %13 = vector.broadcast %cst_12 : f32 to vector<8x1xf32>
    %14 = arith.divf %12, %13 : vector<8x1xf32>
    %15 = vector.broadcast %14 : vector<8x1xf32> to vector<8x512xf32>
    %16 = arith.subf %8, %15 : vector<8x512xf32>
    %17 = arith.mulf %16, %16 : vector<8x512xf32>
    %cst_13 = arith.constant dense<0.000000e+00> : vector<8xf32>
    %18 = vector.multi_reduction <add>, %17, %cst_13 [1] : vector<8x512xf32> to vector<8xf32>
    %19 = vector.shape_cast %18 : vector<8xf32> to vector<8x1xf32>
    %cst_14 = arith.constant 5.120000e+02 : f32
    %20 = vector.broadcast %cst_14 : f32 to vector<8x1xf32>
    %21 = arith.divf %19, %20 : vector<8x1xf32>
    %22 = vector.broadcast %14 : vector<8x1xf32> to vector<8x512xf32>
    %23 = arith.subf %8, %22 : vector<8x512xf32>
    %cst_15 = arith.constant 9.99999974E-6 : f32
    %24 = vector.broadcast %cst_15 : f32 to vector<8x1xf32>
    %25 = arith.addf %21, %24 : vector<8x1xf32>
    %26 = math.rsqrt %25 : vector<8x1xf32>
    %27 = vector.broadcast %26 : vector<8x1xf32> to vector<8x512xf32>
    %28 = arith.mulf %23, %27 : vector<8x512xf32>
    %29 = vector.broadcast %9 : vector<1x512xf32> to vector<8x512xf32>
    %30 = arith.mulf %28, %29 : vector<8x512xf32>
    %31 = vector.broadcast %10 : vector<1x512xf32> to vector<8x512xf32>
    %32 = arith.addf %30, %31 : vector<8x512xf32>
    %33 = arith.truncf %32 : vector<8x512xf32> to vector<8x512xbf16>
    %c0_16 = arith.constant 0 : index
    %c0_17 = arith.constant 0 : index
    %34 = vector.load %arg5[%c0_16, %c0_17] : memref<512x512xbf16, #tpu.memory_space<vmem>>, vector<512x512xbf16>
    %cst_18 = arith.constant dense<0.000000e+00> : vector<8x512xf32>
    %35 = tpu.matmul %33, %34, %cst_18 {dimension_numbers = #tpu.dot_dimension_numbers<[1], [0], [0], [1], [0, 0, 1, 1], [], []>} : vector<8x512xbf16>, vector<512x512xbf16>, vector<8x512xf32> -> vector<8x512xf32>
    %c0_19 = arith.constant 0 : index
    %c0_20 = arith.constant 0 : index
    %36 = vector.load %arg6[%c0_19, %c0_20] : memref<1x512xf32, #tpu.memory_space<vmem>>, vector<1x512xf32>
    %37 = vector.broadcast %36 : vector<1x512xf32> to vector<8x512xf32>
    %38 = arith.addf %35, %37 : vector<8x512xf32>
    %cst_21 = arith.constant 0.000000e+00 : f32
    %39 = vector.broadcast %cst_21 : f32 to vector<8x512xf32>
    %40 = arith.maximumf %38, %39 : vector<8x512xf32>
    %41 = arith.truncf %40 : vector<8x512xf32> to vector<8x512xbf16>
    %c0_22 = arith.constant 0 : index
    %c0_23 = arith.constant 0 : index
    %42 = vector.load %arg7[%c0_22, %c0_23] : memref<512x512xbf16, #tpu.memory_space<vmem>>, vector<512x512xbf16>
    %cst_24 = arith.constant dense<0.000000e+00> : vector<8x512xf32>
    %43 = tpu.matmul %41, %42, %cst_24 {dimension_numbers = #tpu.dot_dimension_numbers<[1], [0], [0], [1], [0, 0, 1, 1], [], []>} : vector<8x512xbf16>, vector<512x512xbf16>, vector<8x512xf32> -> vector<8x512xf32>
    %c0_25 = arith.constant 0 : index
    %c0_26 = arith.constant 0 : index
    %44 = vector.load %arg8[%c0_25, %c0_26] : memref<1x512xf32, #tpu.memory_space<vmem>>, vector<1x512xf32>
    %45 = vector.broadcast %44 : vector<1x512xf32> to vector<8x512xf32>
    %46 = arith.addf %43, %45 : vector<8x512xf32>
    %47 = arith.addf %32, %46 : vector<8x512xf32>
    %c0_27 = arith.constant 0 : index
    %c0_28 = arith.constant 0 : index
    %48 = vector.load %arg9[%c0_27, %c0_28] : memref<1x512xf32, #tpu.memory_space<vmem>>, vector<1x512xf32>
    %c0_29 = arith.constant 0 : index
    %c0_30 = arith.constant 0 : index
    %49 = vector.load %arg10[%c0_29, %c0_30] : memref<1x512xf32, #tpu.memory_space<vmem>>, vector<1x512xf32>
    %cst_31 = arith.constant dense<0.000000e+00> : vector<8xf32>
    %50 = vector.multi_reduction <add>, %47, %cst_31 [1] : vector<8x512xf32> to vector<8xf32>
    %51 = vector.shape_cast %50 : vector<8xf32> to vector<8x1xf32>
    %cst_32 = arith.constant 5.120000e+02 : f32
    %52 = vector.broadcast %cst_32 : f32 to vector<8x1xf32>
    %53 = arith.divf %51, %52 : vector<8x1xf32>
    %54 = vector.broadcast %53 : vector<8x1xf32> to vector<8x512xf32>
    %55 = arith.subf %47, %54 : vector<8x512xf32>
    %56 = arith.mulf %55, %55 : vector<8x512xf32>
    %cst_33 = arith.constant dense<0.000000e+00> : vector<8xf32>
    %57 = vector.multi_reduction <add>, %56, %cst_33 [1] : vector<8x512xf32> to vector<8xf32>
    %58 = vector.shape_cast %57 : vector<8xf32> to vector<8x1xf32>
    %cst_34 = arith.constant 5.120000e+02 : f32
    %59 = vector.broadcast %cst_34 : f32 to vector<8x1xf32>
    %60 = arith.divf %58, %59 : vector<8x1xf32>
    %61 = vector.broadcast %53 : vector<8x1xf32> to vector<8x512xf32>
    %62 = arith.subf %47, %61 : vector<8x512xf32>
    %cst_35 = arith.constant 9.99999974E-6 : f32
    %63 = vector.broadcast %cst_35 : f32 to vector<8x1xf32>
    %64 = arith.addf %60, %63 : vector<8x1xf32>
    %65 = math.rsqrt %64 : vector<8x1xf32>
    %66 = vector.broadcast %65 : vector<8x1xf32> to vector<8x512xf32>
    %67 = arith.mulf %62, %66 : vector<8x512xf32>
    %68 = vector.broadcast %48 : vector<1x512xf32> to vector<8x512xf32>
    %69 = arith.mulf %67, %68 : vector<8x512xf32>
    %70 = vector.broadcast %49 : vector<1x512xf32> to vector<8x512xf32>
    %71 = arith.addf %69, %70 : vector<8x512xf32>
    %c0_36 = arith.constant 0 : index
    %c0_37 = arith.constant 0 : index
    %72 = vector.load %arg11[%c0_36, %c0_37] : memref<8x512xf32, #tpu.memory_space<vmem>>, vector<8x512xf32>
    tpu.vector_store %arg11[%c0_36, %c0_37], %71 {strides = array<i32>} : memref<8x512xf32, #tpu.memory_space<vmem>>, vector<8x512xf32>,
    return
  }
  func.func @transform_0(%arg0: i32) -> (i32, i32) {
    %c0_i32 = arith.constant 0 : i32
    %c0_i32_0 = arith.constant 0 : i32
    return %arg0, %c0_i32 : i32, i32
  }
  func.func @transform_1(%arg0: i32) -> (i32, i32) {
    %c0_i32 = arith.constant 0 : i32
    %c0_i32_0 = arith.constant 0 : i32
    return %arg0, %c0_i32 : i32, i32
  }
  func.func @transform_2(%arg0: i32) -> (i32, i32) {
    %c0_i32 = arith.constant 0 : i32
    %c0_i32_0 = arith.constant 0 : i32
    %c0_i32_1 = arith.constant 0 : i32
    return %c0_i32, %c0_i32_0 : i32, i32
  }
  func.func @transform_3(%arg0: i32) -> (i32, i32) {
    %c0_i32 = arith.constant 0 : i32
    %c0_i32_0 = arith.constant 0 : i32
    %c0_i32_1 = arith.constant 0 : i32
    return %c0_i32, %c0_i32_0 : i32, i32
  }
  func.func @transform_4(%arg0: i32) -> (i32, i32) {
    %c0_i32 = arith.constant 0 : i32
    %c0_i32_0 = arith.constant 0 : i32
    %c0_i32_1 = arith.constant 0 : i32
    return %c0_i32, %c0_i32_0 : i32, i32
  }
  func.func @transform_5(%arg0: i32) -> (i32, i32) {
    %c0_i32 = arith.constant 0 : i32
    %c0_i32_0 = arith.constant 0 : i32
    %c0_i32_1 = arith.constant 0 : i32
    return %c0_i32, %c0_i32_0 : i32, i32
  }
  func.func @transform_6(%arg0: i32) -> (i32, i32) {
    %c0_i32 = arith.constant 0 : i32
    %c0_i32_0 = arith.constant 0 : i32
    %c0_i32_1 = arith.constant 0 : i32
    return %c0_i32, %c0_i32_0 : i32, i32
  }
  func.func @transform_7(%arg0: i32) -> (i32, i32) {
    %c0_i32 = arith.constant 0 : i32
    %c0_i32_0 = arith.constant 0 : i32
    %c0_i32_1 = arith.constant 0 : i32
    return %c0_i32, %c0_i32_0 : i32, i32
  }
  func.func @transform_8(%arg0: i32) -> (i32, i32) {
    %c0_i32 = arith.constant 0 : i32
    %c0_i32_0 = arith.constant 0 : i32
    %c0_i32_1 = arith.constant 0 : i32
    return %c0_i32, %c0_i32_0 : i32, i32
  }
  func.func @transform_9(%arg0: i32) -> (i32, i32) {
    %c0_i32 = arith.constant 0 : i32
    %c0_i32_0 = arith.constant 0 : i32
    %c0_i32_1 = arith.constant 0 : i32
    return %c0_i32, %c0_i32_0 : i32, i32
  }
  func.func @transform_10(%arg0: i32) -> (i32, i32) {
    %c0_i32 = arith.constant 0 : i32
    %c0_i32_0 = arith.constant 0 : i32
    return %arg0, %c0_i32 : i32, i32
  }
}

module attributes {stable_mosaic.version = 11 : i64} {
  func.func @_finish_self_cross_heads_kernel(%arg0: i32, %arg1: memref<8x512xf32, #tpu.memory_space<vmem>>, %arg2: memref<8x512xf32, #tpu.memory_space<vmem>>, %arg3: memref<8x512xf32, #tpu.memory_space<vmem>>, %arg4: memref<512x512xbf16, #tpu.memory_space<vmem>>, %arg5: memref<1x512xf32, #tpu.memory_space<vmem>>, %arg6: memref<1x512xf32, #tpu.memory_space<vmem>>, %arg7: memref<1x512xf32, #tpu.memory_space<vmem>>, %arg8: memref<512x512xbf16, #tpu.memory_space<vmem>>, %arg9: memref<1x512xf32, #tpu.memory_space<vmem>>, %arg10: memref<512x1024xbf16, #tpu.memory_space<vmem>>, %arg11: memref<1x1024xf32, #tpu.memory_space<vmem>>, %arg12: memref<8x512xf32, #tpu.memory_space<vmem>>, %arg13: memref<8x8x64xf32, #tpu.memory_space<vmem>>) attributes {dimension_semantics = [#tpu.dimension_semantics<parallel>], iteration_bounds = array<i64: 2>, scalar_prefetch = 0 : i64, scratch_operands = 0 : i64, tpu.core_type = #tpu.core_type<tc>, window_params = [{transform_indices = @transform_0, window_bounds = array<i64: 8, 512>}, {transform_indices = @transform_1, window_bounds = array<i64: 8, 512>}, {transform_indices = @transform_2, window_bounds = array<i64: 8, 512>}, {pipeline_mode = #tpu.pipeline_mode<synchronous>, transform_indices = @transform_3, window_bounds = array<i64: 512, 512>}, {pipeline_mode = #tpu.pipeline_mode<synchronous>, transform_indices = @transform_4, window_bounds = array<i64: 1, 512>}, {pipeline_mode = #tpu.pipeline_mode<synchronous>, transform_indices = @transform_5, window_bounds = array<i64: 1, 512>}, {pipeline_mode = #tpu.pipeline_mode<synchronous>, transform_indices = @transform_6, window_bounds = array<i64: 1, 512>}, {pipeline_mode = #tpu.pipeline_mode<synchronous>, transform_indices = @transform_7, window_bounds = array<i64: 512, 512>}, {pipeline_mode = #tpu.pipeline_mode<synchronous>, transform_indices = @transform_8, window_bounds = array<i64: 1, 512>}, {pipeline_mode = #tpu.pipeline_mode<synchronous>, transform_indices = @transform_9, window_bounds = array<i64: 512, 1024>}, {pipeline_mode = #tpu.pipeline_mode<synchronous>, transform_indices = @transform_10, window_bounds = array<i64: 1, 1024>}, {transform_indices = @transform_11, window_bounds = array<i64: 8, 512>}, {transform_indices = @transform_12, window_bounds = array<i64: 8, 8, 64>}]} {
    %c0 = arith.constant 0 : index
    %c0_0 = arith.constant 0 : index
    %0 = vector.load %arg1[%c0, %c0_0] : memref<8x512xf32, #tpu.memory_space<vmem>>, vector<8x512xf32>
    %c0_1 = arith.constant 0 : index
    %c0_2 = arith.constant 0 : index
    %1 = vector.load %arg2[%c0_1, %c0_2] : memref<8x512xf32, #tpu.memory_space<vmem>>, vector<8x512xf32>
    %2 = arith.truncf %0 : vector<8x512xf32> to vector<8x512xbf16>
    %c0_3 = arith.constant 0 : index
    %c0_4 = arith.constant 0 : index
    %3 = vector.load %arg4[%c0_3, %c0_4] : memref<512x512xbf16, #tpu.memory_space<vmem>>, vector<512x512xbf16>
    %cst = arith.constant dense<0.000000e+00> : vector<8x512xf32>
    %4 = tpu.matmul %2, %3, %cst {dimension_numbers = #tpu.dot_dimension_numbers<[1], [0], [0], [1], [0, 0, 1, 1], [], []>} : vector<8x512xbf16>, vector<512x512xbf16>, vector<8x512xf32> -> vector<8x512xf32>
    %c0_5 = arith.constant 0 : index
    %c0_6 = arith.constant 0 : index
    %5 = vector.load %arg5[%c0_5, %c0_6] : memref<1x512xf32, #tpu.memory_space<vmem>>, vector<1x512xf32>
    %6 = vector.broadcast %5 : vector<1x512xf32> to vector<8x512xf32>
    %7 = arith.addf %4, %6 : vector<8x512xf32>
    %8 = arith.addf %1, %7 : vector<8x512xf32>
    %c0_7 = arith.constant 0 : index
    %c0_8 = arith.constant 0 : index
    %9 = vector.load %arg6[%c0_7, %c0_8] : memref<1x512xf32, #tpu.memory_space<vmem>>, vector<1x512xf32>
    %c0_9 = arith.constant 0 : index
    %c0_10 = arith.constant 0 : index
    %10 = vector.load %arg7[%c0_9, %c0_10] : memref<1x512xf32, #tpu.memory_space<vmem>>, vector<1x512xf32>
    %cst_11 = arith.constant dense<0.000000e+00> : vector<8xf32>
    %11 = vector.multi_reduction <add>, %8, %cst_11 [1] : vector<8x512xf32> to vector<8xf32>
    %12 = vector.shape_cast %11 : vector<8xf32> to vector<8x1xf32>
    %cst_12 = arith.constant 5.120000e+02 : f32
    %13 = vector.broadcast %cst_12 : f32 to vector<8x1xf32>
    %14 = arith.divf %12, %13 : vector<8x1xf32>
    %15 = vector.broadcast %14 : vector<8x1xf32> to vector<8x512xf32>
    %16 = arith.subf %8, %15 : vector<8x512xf32>
    %17 = arith.mulf %16, %16 : vector<8x512xf32>
    %cst_13 = arith.constant dense<0.000000e+00> : vector<8xf32>
    %18 = vector.multi_reduction <add>, %17, %cst_13 [1] : vector<8x512xf32> to vector<8xf32>
    %19 = vector.shape_cast %18 : vector<8xf32> to vector<8x1xf32>
    %cst_14 = arith.constant 5.120000e+02 : f32
    %20 = vector.broadcast %cst_14 : f32 to vector<8x1xf32>
    %21 = arith.divf %19, %20 : vector<8x1xf32>
    %22 = vector.broadcast %14 : vector<8x1xf32> to vector<8x512xf32>
    %23 = arith.subf %8, %22 : vector<8x512xf32>
    %cst_15 = arith.constant 9.99999974E-6 : f32
    %24 = vector.broadcast %cst_15 : f32 to vector<8x1xf32>
    %25 = arith.addf %21, %24 : vector<8x1xf32>
    %26 = math.rsqrt %25 : vector<8x1xf32>
    %27 = vector.broadcast %26 : vector<8x1xf32> to vector<8x512xf32>
    %28 = arith.mulf %23, %27 : vector<8x512xf32>
    %29 = vector.broadcast %9 : vector<1x512xf32> to vector<8x512xf32>
    %30 = arith.mulf %28, %29 : vector<8x512xf32>
    %31 = vector.broadcast %10 : vector<1x512xf32> to vector<8x512xf32>
    %32 = arith.addf %30, %31 : vector<8x512xf32>
    %c0_16 = arith.constant 0 : index
    %c0_17 = arith.constant 0 : index
    %33 = vector.load %arg12[%c0_16, %c0_17] : memref<8x512xf32, #tpu.memory_space<vmem>>, vector<8x512xf32>
    tpu.vector_store %arg12[%c0_16, %c0_17], %32 {strides = array<i32>} : memref<8x512xf32, #tpu.memory_space<vmem>>, vector<8x512xf32>,
    %34 = arith.truncf %32 : vector<8x512xf32> to vector<8x512xbf16>
    %c0_18 = arith.constant 0 : index
    %c0_19 = arith.constant 0 : index
    %35 = vector.load %arg8[%c0_18, %c0_19] : memref<512x512xbf16, #tpu.memory_space<vmem>>, vector<512x512xbf16>
    %cst_20 = arith.constant dense<0.000000e+00> : vector<8x512xf32>
    %36 = tpu.matmul %34, %35, %cst_20 {dimension_numbers = #tpu.dot_dimension_numbers<[1], [0], [0], [1], [0, 0, 1, 1], [], []>} : vector<8x512xbf16>, vector<512x512xbf16>, vector<8x512xf32> -> vector<8x512xf32>
    %c0_21 = arith.constant 0 : index
    %c0_22 = arith.constant 0 : index
    %37 = vector.load %arg9[%c0_21, %c0_22] : memref<1x512xf32, #tpu.memory_space<vmem>>, vector<1x512xf32>
    %38 = vector.broadcast %37 : vector<1x512xf32> to vector<8x512xf32>
    %39 = arith.addf %36, %38 : vector<8x512xf32>
    %c0_23 = arith.constant 0 : index
    %c0_24 = arith.constant 0 : index
    %40 = vector.load %arg3[%c0_23, %c0_24] : memref<8x512xf32, #tpu.memory_space<vmem>>, vector<8x512xf32>
    %41 = arith.truncf %40 : vector<8x512xf32> to vector<8x512xbf16>
    %c0_25 = arith.constant 0 : index
    %c0_26 = arith.constant 0 : index
    %42 = vector.load %arg10[%c0_25, %c0_26] : memref<512x1024xbf16, #tpu.memory_space<vmem>>, vector<512x1024xbf16>
    %cst_27 = arith.constant dense<0.000000e+00> : vector<8x1024xf32>
    %43 = tpu.matmul %41, %42, %cst_27 {dimension_numbers = #tpu.dot_dimension_numbers<[1], [0], [0], [1], [0, 0, 1, 1], [], []>} : vector<8x512xbf16>, vector<512x1024xbf16>, vector<8x1024xf32> -> vector<8x1024xf32>
    %c0_28 = arith.constant 0 : index
    %c0_29 = arith.constant 0 : index
    %44 = vector.load %arg11[%c0_28, %c0_29] : memref<1x1024xf32, #tpu.memory_space<vmem>>, vector<1x1024xf32>
    %45 = vector.broadcast %44 : vector<1x1024xf32> to vector<8x1024xf32>
    %46 = arith.addf %43, %45 : vector<8x1024xf32>
    %47 = vector.extract_strided_slice %46 {offsets = [0, 0], sizes = [8, 512], strides = [1, 1]} : vector<8x1024xf32> to vector<8x512xf32>
    %48 = vector.extract_strided_slice %46 {offsets = [0, 512], sizes = [8, 512], strides = [1, 1]} : vector<8x1024xf32> to vector<8x512xf32>
    %49 = vector.extract_strided_slice %39 {offsets = [0, 0], sizes = [8, 64], strides = [1, 1]} : vector<8x512xf32> to vector<8x64xf32>
    %50 = arith.truncf %49 : vector<8x64xf32> to vector<8x64xbf16>
    %51 = vector.extract_strided_slice %47 {offsets = [0, 0], sizes = [8, 64], strides = [1, 1]} : vector<8x512xf32> to vector<8x64xf32>
    %52 = arith.truncf %51 : vector<8x64xf32> to vector<8x64xbf16>
    %53 = vector.extract_strided_slice %48 {offsets = [0, 0], sizes = [8, 64], strides = [1, 1]} : vector<8x512xf32> to vector<8x64xf32>
    %54 = arith.truncf %53 : vector<8x64xf32> to vector<8x64xbf16>
    %cst_30 = arith.constant dense<0.000000e+00> : vector<8x8xf32>
    %55 = tpu.matmul %50, %52, %cst_30 {dimension_numbers = #tpu.dot_dimension_numbers<[1], [1], [0], [0], [0, 0, 1, 0], [], []>} : vector<8x64xbf16>, vector<8x64xbf16>, vector<8x8xf32> -> vector<8x8xf32>
    %cst_31 = arith.constant dense<0xFF800000> : vector<8xf32>
    %56 = vector.multi_reduction <maximumf>, %55, %cst_31 [1] : vector<8x8xf32> to vector<8xf32>
    %57 = vector.shape_cast %56 : vector<8xf32> to vector<8x1xf32>
    %58 = vector.broadcast %57 : vector<8x1xf32> to vector<8x8xf32>
    %59 = arith.subf %55, %58 : vector<8x8xf32>
    %60 = math.exp %59 : vector<8x8xf32>
    %cst_32 = arith.constant dense<0.000000e+00> : vector<8xf32>
    %61 = vector.multi_reduction <add>, %60, %cst_32 [1] : vector<8x8xf32> to vector<8xf32>
    %62 = vector.shape_cast %61 : vector<8xf32> to vector<8x1xf32>
    %63 = tpu.reciprocal %62 {approx = true} : vector<8x1xf32> -> vector<8x1xf32>
    %64 = vector.broadcast %63 : vector<8x1xf32> to vector<8x8xf32>
    %65 = arith.mulf %60, %64 : vector<8x8xf32>
    %66 = arith.truncf %65 : vector<8x8xf32> to vector<8x8xbf16>
    %cst_33 = arith.constant dense<0.000000e+00> : vector<8x64xf32>
    %67 = tpu.matmul %66, %54, %cst_33 {dimension_numbers = #tpu.dot_dimension_numbers<[1], [0], [0], [1], [0, 0, 1, 1], [], []>} : vector<8x8xbf16>, vector<8x64xbf16>, vector<8x64xf32> -> vector<8x64xf32>
    %c0_34 = arith.constant 0 : index
    %c0_35 = arith.constant 0 : index
    %c0_36 = arith.constant 0 : index
    %68 = vector.load %arg13[%c0_34, %c0_35, %c0_36] : memref<8x8x64xf32, #tpu.memory_space<vmem>>, vector<1x8x64xf32>
    %69 = vector.shape_cast %68 : vector<1x8x64xf32> to vector<8x64xf32>
    %70 = vector.shape_cast %67 : vector<8x64xf32> to vector<1x8x64xf32>
    tpu.vector_store %arg13[%c0_34, %c0_35, %c0_36], %70 {strides = array<i32>} : memref<8x8x64xf32, #tpu.memory_space<vmem>>, vector<1x8x64xf32>,
    %71 = vector.extract_strided_slice %39 {offsets = [0, 64], sizes = [8, 64], strides = [1, 1]} : vector<8x512xf32> to vector<8x64xf32>
    %72 = arith.truncf %71 : vector<8x64xf32> to vector<8x64xbf16>
    %73 = vector.extract_strided_slice %47 {offsets = [0, 64], sizes = [8, 64], strides = [1, 1]} : vector<8x512xf32> to vector<8x64xf32>
    %74 = arith.truncf %73 : vector<8x64xf32> to vector<8x64xbf16>
    %75 = vector.extract_strided_slice %48 {offsets = [0, 64], sizes = [8, 64], strides = [1, 1]} : vector<8x512xf32> to vector<8x64xf32>
    %76 = arith.truncf %75 : vector<8x64xf32> to vector<8x64xbf16>
    %cst_37 = arith.constant dense<0.000000e+00> : vector<8x8xf32>
    %77 = tpu.matmul %72, %74, %cst_37 {dimension_numbers = #tpu.dot_dimension_numbers<[1], [1], [0], [0], [0, 0, 1, 0], [], []>} : vector<8x64xbf16>, vector<8x64xbf16>, vector<8x8xf32> -> vector<8x8xf32>
    %cst_38 = arith.constant dense<0xFF800000> : vector<8xf32>
    %78 = vector.multi_reduction <maximumf>, %77, %cst_38 [1] : vector<8x8xf32> to vector<8xf32>
    %79 = vector.shape_cast %78 : vector<8xf32> to vector<8x1xf32>
    %80 = vector.broadcast %79 : vector<8x1xf32> to vector<8x8xf32>
    %81 = arith.subf %77, %80 : vector<8x8xf32>
    %82 = math.exp %81 : vector<8x8xf32>
    %cst_39 = arith.constant dense<0.000000e+00> : vector<8xf32>
    %83 = vector.multi_reduction <add>, %82, %cst_39 [1] : vector<8x8xf32> to vector<8xf32>
    %84 = vector.shape_cast %83 : vector<8xf32> to vector<8x1xf32>
    %85 = tpu.reciprocal %84 {approx = true} : vector<8x1xf32> -> vector<8x1xf32>
    %86 = vector.broadcast %85 : vector<8x1xf32> to vector<8x8xf32>
    %87 = arith.mulf %82, %86 : vector<8x8xf32>
    %88 = arith.truncf %87 : vector<8x8xf32> to vector<8x8xbf16>
    %cst_40 = arith.constant dense<0.000000e+00> : vector<8x64xf32>
    %89 = tpu.matmul %88, %76, %cst_40 {dimension_numbers = #tpu.dot_dimension_numbers<[1], [0], [0], [1], [0, 0, 1, 1], [], []>} : vector<8x8xbf16>, vector<8x64xbf16>, vector<8x64xf32> -> vector<8x64xf32>
    %c1 = arith.constant 1 : index
    %c0_41 = arith.constant 0 : index
    %c0_42 = arith.constant 0 : index
    %90 = vector.load %arg13[%c1, %c0_41, %c0_42] : memref<8x8x64xf32, #tpu.memory_space<vmem>>, vector<1x8x64xf32>
    %91 = vector.shape_cast %90 : vector<1x8x64xf32> to vector<8x64xf32>
    %92 = vector.shape_cast %89 : vector<8x64xf32> to vector<1x8x64xf32>
    tpu.vector_store %arg13[%c1, %c0_41, %c0_42], %92 {strides = array<i32>} : memref<8x8x64xf32, #tpu.memory_space<vmem>>, vector<1x8x64xf32>,
    %93 = vector.extract_strided_slice %39 {offsets = [0, 128], sizes = [8, 64], strides = [1, 1]} : vector<8x512xf32> to vector<8x64xf32>
    %94 = arith.truncf %93 : vector<8x64xf32> to vector<8x64xbf16>
    %95 = vector.extract_strided_slice %47 {offsets = [0, 128], sizes = [8, 64], strides = [1, 1]} : vector<8x512xf32> to vector<8x64xf32>
    %96 = arith.truncf %95 : vector<8x64xf32> to vector<8x64xbf16>
    %97 = vector.extract_strided_slice %48 {offsets = [0, 128], sizes = [8, 64], strides = [1, 1]} : vector<8x512xf32> to vector<8x64xf32>
    %98 = arith.truncf %97 : vector<8x64xf32> to vector<8x64xbf16>
    %cst_43 = arith.constant dense<0.000000e+00> : vector<8x8xf32>
    %99 = tpu.matmul %94, %96, %cst_43 {dimension_numbers = #tpu.dot_dimension_numbers<[1], [1], [0], [0], [0, 0, 1, 0], [], []>} : vector<8x64xbf16>, vector<8x64xbf16>, vector<8x8xf32> -> vector<8x8xf32>
    %cst_44 = arith.constant dense<0xFF800000> : vector<8xf32>
    %100 = vector.multi_reduction <maximumf>, %99, %cst_44 [1] : vector<8x8xf32> to vector<8xf32>
    %101 = vector.shape_cast %100 : vector<8xf32> to vector<8x1xf32>
    %102 = vector.broadcast %101 : vector<8x1xf32> to vector<8x8xf32>
    %103 = arith.subf %99, %102 : vector<8x8xf32>
    %104 = math.exp %103 : vector<8x8xf32>
    %cst_45 = arith.constant dense<0.000000e+00> : vector<8xf32>
    %105 = vector.multi_reduction <add>, %104, %cst_45 [1] : vector<8x8xf32> to vector<8xf32>
    %106 = vector.shape_cast %105 : vector<8xf32> to vector<8x1xf32>
    %107 = tpu.reciprocal %106 {approx = true} : vector<8x1xf32> -> vector<8x1xf32>
    %108 = vector.broadcast %107 : vector<8x1xf32> to vector<8x8xf32>
    %109 = arith.mulf %104, %108 : vector<8x8xf32>
    %110 = arith.truncf %109 : vector<8x8xf32> to vector<8x8xbf16>
    %cst_46 = arith.constant dense<0.000000e+00> : vector<8x64xf32>
    %111 = tpu.matmul %110, %98, %cst_46 {dimension_numbers = #tpu.dot_dimension_numbers<[1], [0], [0], [1], [0, 0, 1, 1], [], []>} : vector<8x8xbf16>, vector<8x64xbf16>, vector<8x64xf32> -> vector<8x64xf32>
    %c2 = arith.constant 2 : index
    %c0_47 = arith.constant 0 : index
    %c0_48 = arith.constant 0 : index
    %112 = vector.load %arg13[%c2, %c0_47, %c0_48] : memref<8x8x64xf32, #tpu.memory_space<vmem>>, vector<1x8x64xf32>
    %113 = vector.shape_cast %112 : vector<1x8x64xf32> to vector<8x64xf32>
    %114 = vector.shape_cast %111 : vector<8x64xf32> to vector<1x8x64xf32>
    tpu.vector_store %arg13[%c2, %c0_47, %c0_48], %114 {strides = array<i32>} : memref<8x8x64xf32, #tpu.memory_space<vmem>>, vector<1x8x64xf32>,
    %115 = vector.extract_strided_slice %39 {offsets = [0, 192], sizes = [8, 64], strides = [1, 1]} : vector<8x512xf32> to vector<8x64xf32>
    %116 = arith.truncf %115 : vector<8x64xf32> to vector<8x64xbf16>
    %117 = vector.extract_strided_slice %47 {offsets = [0, 192], sizes = [8, 64], strides = [1, 1]} : vector<8x512xf32> to vector<8x64xf32>
    %118 = arith.truncf %117 : vector<8x64xf32> to vector<8x64xbf16>
    %119 = vector.extract_strided_slice %48 {offsets = [0, 192], sizes = [8, 64], strides = [1, 1]} : vector<8x512xf32> to vector<8x64xf32>
    %120 = arith.truncf %119 : vector<8x64xf32> to vector<8x64xbf16>
    %cst_49 = arith.constant dense<0.000000e+00> : vector<8x8xf32>
    %121 = tpu.matmul %116, %118, %cst_49 {dimension_numbers = #tpu.dot_dimension_numbers<[1], [1], [0], [0], [0, 0, 1, 0], [], []>} : vector<8x64xbf16>, vector<8x64xbf16>, vector<8x8xf32> -> vector<8x8xf32>
    %cst_50 = arith.constant dense<0xFF800000> : vector<8xf32>
    %122 = vector.multi_reduction <maximumf>, %121, %cst_50 [1] : vector<8x8xf32> to vector<8xf32>
    %123 = vector.shape_cast %122 : vector<8xf32> to vector<8x1xf32>
    %124 = vector.broadcast %123 : vector<8x1xf32> to vector<8x8xf32>
    %125 = arith.subf %121, %124 : vector<8x8xf32>
    %126 = math.exp %125 : vector<8x8xf32>
    %cst_51 = arith.constant dense<0.000000e+00> : vector<8xf32>
    %127 = vector.multi_reduction <add>, %126, %cst_51 [1] : vector<8x8xf32> to vector<8xf32>
    %128 = vector.shape_cast %127 : vector<8xf32> to vector<8x1xf32>
    %129 = tpu.reciprocal %128 {approx = true} : vector<8x1xf32> -> vector<8x1xf32>
    %130 = vector.broadcast %129 : vector<8x1xf32> to vector<8x8xf32>
    %131 = arith.mulf %126, %130 : vector<8x8xf32>
    %132 = arith.truncf %131 : vector<8x8xf32> to vector<8x8xbf16>
    %cst_52 = arith.constant dense<0.000000e+00> : vector<8x64xf32>
    %133 = tpu.matmul %132, %120, %cst_52 {dimension_numbers = #tpu.dot_dimension_numbers<[1], [0], [0], [1], [0, 0, 1, 1], [], []>} : vector<8x8xbf16>, vector<8x64xbf16>, vector<8x64xf32> -> vector<8x64xf32>
    %c3 = arith.constant 3 : index
    %c0_53 = arith.constant 0 : index
    %c0_54 = arith.constant 0 : index
    %134 = vector.load %arg13[%c3, %c0_53, %c0_54] : memref<8x8x64xf32, #tpu.memory_space<vmem>>, vector<1x8x64xf32>
    %135 = vector.shape_cast %134 : vector<1x8x64xf32> to vector<8x64xf32>
    %136 = vector.shape_cast %133 : vector<8x64xf32> to vector<1x8x64xf32>
    tpu.vector_store %arg13[%c3, %c0_53, %c0_54], %136 {strides = array<i32>} : memref<8x8x64xf32, #tpu.memory_space<vmem>>, vector<1x8x64xf32>,
    %137 = vector.extract_strided_slice %39 {offsets = [0, 256], sizes = [8, 64], strides = [1, 1]} : vector<8x512xf32> to vector<8x64xf32>
    %138 = arith.truncf %137 : vector<8x64xf32> to vector<8x64xbf16>
    %139 = vector.extract_strided_slice %47 {offsets = [0, 256], sizes = [8, 64], strides = [1, 1]} : vector<8x512xf32> to vector<8x64xf32>
    %140 = arith.truncf %139 : vector<8x64xf32> to vector<8x64xbf16>
    %141 = vector.extract_strided_slice %48 {offsets = [0, 256], sizes = [8, 64], strides = [1, 1]} : vector<8x512xf32> to vector<8x64xf32>
    %142 = arith.truncf %141 : vector<8x64xf32> to vector<8x64xbf16>
    %cst_55 = arith.constant dense<0.000000e+00> : vector<8x8xf32>
    %143 = tpu.matmul %138, %140, %cst_55 {dimension_numbers = #tpu.dot_dimension_numbers<[1], [1], [0], [0], [0, 0, 1, 0], [], []>} : vector<8x64xbf16>, vector<8x64xbf16>, vector<8x8xf32> -> vector<8x8xf32>
    %cst_56 = arith.constant dense<0xFF800000> : vector<8xf32>
    %144 = vector.multi_reduction <maximumf>, %143, %cst_56 [1] : vector<8x8xf32> to vector<8xf32>
    %145 = vector.shape_cast %144 : vector<8xf32> to vector<8x1xf32>
    %146 = vector.broadcast %145 : vector<8x1xf32> to vector<8x8xf32>
    %147 = arith.subf %143, %146 : vector<8x8xf32>
    %148 = math.exp %147 : vector<8x8xf32>
    %cst_57 = arith.constant dense<0.000000e+00> : vector<8xf32>
    %149 = vector.multi_reduction <add>, %148, %cst_57 [1] : vector<8x8xf32> to vector<8xf32>
    %150 = vector.shape_cast %149 : vector<8xf32> to vector<8x1xf32>
    %151 = tpu.reciprocal %150 {approx = true} : vector<8x1xf32> -> vector<8x1xf32>
    %152 = vector.broadcast %151 : vector<8x1xf32> to vector<8x8xf32>
    %153 = arith.mulf %148, %152 : vector<8x8xf32>
    %154 = arith.truncf %153 : vector<8x8xf32> to vector<8x8xbf16>
    %cst_58 = arith.constant dense<0.000000e+00> : vector<8x64xf32>
    %155 = tpu.matmul %154, %142, %cst_58 {dimension_numbers = #tpu.dot_dimension_numbers<[1], [0], [0], [1], [0, 0, 1, 1], [], []>} : vector<8x8xbf16>, vector<8x64xbf16>, vector<8x64xf32> -> vector<8x64xf32>
    %c4 = arith.constant 4 : index
    %c0_59 = arith.constant 0 : index
    %c0_60 = arith.constant 0 : index
    %156 = vector.load %arg13[%c4, %c0_59, %c0_60] : memref<8x8x64xf32, #tpu.memory_space<vmem>>, vector<1x8x64xf32>
    %157 = vector.shape_cast %156 : vector<1x8x64xf32> to vector<8x64xf32>
    %158 = vector.shape_cast %155 : vector<8x64xf32> to vector<1x8x64xf32>
    tpu.vector_store %arg13[%c4, %c0_59, %c0_60], %158 {strides = array<i32>} : memref<8x8x64xf32, #tpu.memory_space<vmem>>, vector<1x8x64xf32>,
    %159 = vector.extract_strided_slice %39 {offsets = [0, 320], sizes = [8, 64], strides = [1, 1]} : vector<8x512xf32> to vector<8x64xf32>
    %160 = arith.truncf %159 : vector<8x64xf32> to vector<8x64xbf16>
    %161 = vector.extract_strided_slice %47 {offsets = [0, 320], sizes = [8, 64], strides = [1, 1]} : vector<8x512xf32> to vector<8x64xf32>
    %162 = arith.truncf %161 : vector<8x64xf32> to vector<8x64xbf16>
    %163 = vector.extract_strided_slice %48 {offsets = [0, 320], sizes = [8, 64], strides = [1, 1]} : vector<8x512xf32> to vector<8x64xf32>
    %164 = arith.truncf %163 : vector<8x64xf32> to vector<8x64xbf16>
    %cst_61 = arith.constant dense<0.000000e+00> : vector<8x8xf32>
    %165 = tpu.matmul %160, %162, %cst_61 {dimension_numbers = #tpu.dot_dimension_numbers<[1], [1], [0], [0], [0, 0, 1, 0], [], []>} : vector<8x64xbf16>, vector<8x64xbf16>, vector<8x8xf32> -> vector<8x8xf32>
    %cst_62 = arith.constant dense<0xFF800000> : vector<8xf32>
    %166 = vector.multi_reduction <maximumf>, %165, %cst_62 [1] : vector<8x8xf32> to vector<8xf32>
    %167 = vector.shape_cast %166 : vector<8xf32> to vector<8x1xf32>
    %168 = vector.broadcast %167 : vector<8x1xf32> to vector<8x8xf32>
    %169 = arith.subf %165, %168 : vector<8x8xf32>
    %170 = math.exp %169 : vector<8x8xf32>
    %cst_63 = arith.constant dense<0.000000e+00> : vector<8xf32>
    %171 = vector.multi_reduction <add>, %170, %cst_63 [1] : vector<8x8xf32> to vector<8xf32>
    %172 = vector.shape_cast %171 : vector<8xf32> to vector<8x1xf32>
    %173 = tpu.reciprocal %172 {approx = true} : vector<8x1xf32> -> vector<8x1xf32>
    %174 = vector.broadcast %173 : vector<8x1xf32> to vector<8x8xf32>
    %175 = arith.mulf %170, %174 : vector<8x8xf32>
    %176 = arith.truncf %175 : vector<8x8xf32> to vector<8x8xbf16>
    %cst_64 = arith.constant dense<0.000000e+00> : vector<8x64xf32>
    %177 = tpu.matmul %176, %164, %cst_64 {dimension_numbers = #tpu.dot_dimension_numbers<[1], [0], [0], [1], [0, 0, 1, 1], [], []>} : vector<8x8xbf16>, vector<8x64xbf16>, vector<8x64xf32> -> vector<8x64xf32>
    %c5 = arith.constant 5 : index
    %c0_65 = arith.constant 0 : index
    %c0_66 = arith.constant 0 : index
    %178 = vector.load %arg13[%c5, %c0_65, %c0_66] : memref<8x8x64xf32, #tpu.memory_space<vmem>>, vector<1x8x64xf32>
    %179 = vector.shape_cast %178 : vector<1x8x64xf32> to vector<8x64xf32>
    %180 = vector.shape_cast %177 : vector<8x64xf32> to vector<1x8x64xf32>
    tpu.vector_store %arg13[%c5, %c0_65, %c0_66], %180 {strides = array<i32>} : memref<8x8x64xf32, #tpu.memory_space<vmem>>, vector<1x8x64xf32>,
    %181 = vector.extract_strided_slice %39 {offsets = [0, 384], sizes = [8, 64], strides = [1, 1]} : vector<8x512xf32> to vector<8x64xf32>
    %182 = arith.truncf %181 : vector<8x64xf32> to vector<8x64xbf16>
    %183 = vector.extract_strided_slice %47 {offsets = [0, 384], sizes = [8, 64], strides = [1, 1]} : vector<8x512xf32> to vector<8x64xf32>
    %184 = arith.truncf %183 : vector<8x64xf32> to vector<8x64xbf16>
    %185 = vector.extract_strided_slice %48 {offsets = [0, 384], sizes = [8, 64], strides = [1, 1]} : vector<8x512xf32> to vector<8x64xf32>
    %186 = arith.truncf %185 : vector<8x64xf32> to vector<8x64xbf16>
    %cst_67 = arith.constant dense<0.000000e+00> : vector<8x8xf32>
    %187 = tpu.matmul %182, %184, %cst_67 {dimension_numbers = #tpu.dot_dimension_numbers<[1], [1], [0], [0], [0, 0, 1, 0], [], []>} : vector<8x64xbf16>, vector<8x64xbf16>, vector<8x8xf32> -> vector<8x8xf32>
    %cst_68 = arith.constant dense<0xFF800000> : vector<8xf32>
    %188 = vector.multi_reduction <maximumf>, %187, %cst_68 [1] : vector<8x8xf32> to vector<8xf32>
    %189 = vector.shape_cast %188 : vector<8xf32> to vector<8x1xf32>
    %190 = vector.broadcast %189 : vector<8x1xf32> to vector<8x8xf32>
    %191 = arith.subf %187, %190 : vector<8x8xf32>
    %192 = math.exp %191 : vector<8x8xf32>
    %cst_69 = arith.constant dense<0.000000e+00> : vector<8xf32>
    %193 = vector.multi_reduction <add>, %192, %cst_69 [1] : vector<8x8xf32> to vector<8xf32>
    %194 = vector.shape_cast %193 : vector<8xf32> to vector<8x1xf32>
    %195 = tpu.reciprocal %194 {approx = true} : vector<8x1xf32> -> vector<8x1xf32>
    %196 = vector.broadcast %195 : vector<8x1xf32> to vector<8x8xf32>
    %197 = arith.mulf %192, %196 : vector<8x8xf32>
    %198 = arith.truncf %197 : vector<8x8xf32> to vector<8x8xbf16>
    %cst_70 = arith.constant dense<0.000000e+00> : vector<8x64xf32>
    %199 = tpu.matmul %198, %186, %cst_70 {dimension_numbers = #tpu.dot_dimension_numbers<[1], [0], [0], [1], [0, 0, 1, 1], [], []>} : vector<8x8xbf16>, vector<8x64xbf16>, vector<8x64xf32> -> vector<8x64xf32>
    %c6 = arith.constant 6 : index
    %c0_71 = arith.constant 0 : index
    %c0_72 = arith.constant 0 : index
    %200 = vector.load %arg13[%c6, %c0_71, %c0_72] : memref<8x8x64xf32, #tpu.memory_space<vmem>>, vector<1x8x64xf32>
    %201 = vector.shape_cast %200 : vector<1x8x64xf32> to vector<8x64xf32>
    %202 = vector.shape_cast %199 : vector<8x64xf32> to vector<1x8x64xf32>
    tpu.vector_store %arg13[%c6, %c0_71, %c0_72], %202 {strides = array<i32>} : memref<8x8x64xf32, #tpu.memory_space<vmem>>, vector<1x8x64xf32>,
    %203 = vector.extract_strided_slice %39 {offsets = [0, 448], sizes = [8, 64], strides = [1, 1]} : vector<8x512xf32> to vector<8x64xf32>
    %204 = arith.truncf %203 : vector<8x64xf32> to vector<8x64xbf16>
    %205 = vector.extract_strided_slice %47 {offsets = [0, 448], sizes = [8, 64], strides = [1, 1]} : vector<8x512xf32> to vector<8x64xf32>
    %206 = arith.truncf %205 : vector<8x64xf32> to vector<8x64xbf16>
    %207 = vector.extract_strided_slice %48 {offsets = [0, 448], sizes = [8, 64], strides = [1, 1]} : vector<8x512xf32> to vector<8x64xf32>
    %208 = arith.truncf %207 : vector<8x64xf32> to vector<8x64xbf16>
    %cst_73 = arith.constant dense<0.000000e+00> : vector<8x8xf32>
    %209 = tpu.matmul %204, %206, %cst_73 {dimension_numbers = #tpu.dot_dimension_numbers<[1], [1], [0], [0], [0, 0, 1, 0], [], []>} : vector<8x64xbf16>, vector<8x64xbf16>, vector<8x8xf32> -> vector<8x8xf32>
    %cst_74 = arith.constant dense<0xFF800000> : vector<8xf32>
    %210 = vector.multi_reduction <maximumf>, %209, %cst_74 [1] : vector<8x8xf32> to vector<8xf32>
    %211 = vector.shape_cast %210 : vector<8xf32> to vector<8x1xf32>
    %212 = vector.broadcast %211 : vector<8x1xf32> to vector<8x8xf32>
    %213 = arith.subf %209, %212 : vector<8x8xf32>
    %214 = math.exp %213 : vector<8x8xf32>
    %cst_75 = arith.constant dense<0.000000e+00> : vector<8xf32>
    %215 = vector.multi_reduction <add>, %214, %cst_75 [1] : vector<8x8xf32> to vector<8xf32>
    %216 = vector.shape_cast %215 : vector<8xf32> to vector<8x1xf32>
    %217 = tpu.reciprocal %216 {approx = true} : vector<8x1xf32> -> vector<8x1xf32>
    %218 = vector.broadcast %217 : vector<8x1xf32> to vector<8x8xf32>
    %219 = arith.mulf %214, %218 : vector<8x8xf32>
    %220 = arith.truncf %219 : vector<8x8xf32> to vector<8x8xbf16>
    %cst_76 = arith.constant dense<0.000000e+00> : vector<8x64xf32>
    %221 = tpu.matmul %220, %208, %cst_76 {dimension_numbers = #tpu.dot_dimension_numbers<[1], [0], [0], [1], [0, 0, 1, 1], [], []>} : vector<8x8xbf16>, vector<8x64xbf16>, vector<8x64xf32> -> vector<8x64xf32>
    %c7 = arith.constant 7 : index
    %c0_77 = arith.constant 0 : index
    %c0_78 = arith.constant 0 : index
    %222 = vector.load %arg13[%c7, %c0_77, %c0_78] : memref<8x8x64xf32, #tpu.memory_space<vmem>>, vector<1x8x64xf32>
    %223 = vector.shape_cast %222 : vector<1x8x64xf32> to vector<8x64xf32>
    %224 = vector.shape_cast %221 : vector<8x64xf32> to vector<1x8x64xf32>
    tpu.vector_store %arg13[%c7, %c0_77, %c0_78], %224 {strides = array<i32>} : memref<8x8x64xf32, #tpu.memory_space<vmem>>, vector<1x8x64xf32>,
    return
  }
  func.func @transform_0(%arg0: i32) -> (i32, i32) {
    %c0_i32 = arith.constant 0 : i32
    %c0_i32_0 = arith.constant 0 : i32
    return %arg0, %c0_i32 : i32, i32
  }
  func.func @transform_1(%arg0: i32) -> (i32, i32) {
    %c0_i32 = arith.constant 0 : i32
    %c0_i32_0 = arith.constant 0 : i32
    return %arg0, %c0_i32 : i32, i32
  }
  func.func @transform_2(%arg0: i32) -> (i32, i32) {
    %c0_i32 = arith.constant 0 : i32
    %c0_i32_0 = arith.constant 0 : i32
    return %arg0, %c0_i32 : i32, i32
  }
  func.func @transform_3(%arg0: i32) -> (i32, i32) {
    %c0_i32 = arith.constant 0 : i32
    %c0_i32_0 = arith.constant 0 : i32
    %c0_i32_1 = arith.constant 0 : i32
    return %c0_i32, %c0_i32_0 : i32, i32
  }
  func.func @transform_4(%arg0: i32) -> (i32, i32) {
    %c0_i32 = arith.constant 0 : i32
    %c0_i32_0 = arith.constant 0 : i32
    %c0_i32_1 = arith.constant 0 : i32
    return %c0_i32, %c0_i32_0 : i32, i32
  }
  func.func @transform_5(%arg0: i32) -> (i32, i32) {
    %c0_i32 = arith.constant 0 : i32
    %c0_i32_0 = arith.constant 0 : i32
    %c0_i32_1 = arith.constant 0 : i32
    return %c0_i32, %c0_i32_0 : i32, i32
  }
  func.func @transform_6(%arg0: i32) -> (i32, i32) {
    %c0_i32 = arith.constant 0 : i32
    %c0_i32_0 = arith.constant 0 : i32
    %c0_i32_1 = arith.constant 0 : i32
    return %c0_i32, %c0_i32_0 : i32, i32
  }
  func.func @transform_7(%arg0: i32) -> (i32, i32) {
    %c0_i32 = arith.constant 0 : i32
    %c0_i32_0 = arith.constant 0 : i32
    %c0_i32_1 = arith.constant 0 : i32
    return %c0_i32, %c0_i32_0 : i32, i32
  }
  func.func @transform_8(%arg0: i32) -> (i32, i32) {
    %c0_i32 = arith.constant 0 : i32
    %c0_i32_0 = arith.constant 0 : i32
    %c0_i32_1 = arith.constant 0 : i32
    return %c0_i32, %c0_i32_0 : i32, i32
  }
  func.func @transform_9(%arg0: i32) -> (i32, i32) {
    %c0_i32 = arith.constant 0 : i32
    %c0_i32_0 = arith.constant 0 : i32
    %c0_i32_1 = arith.constant 0 : i32
    return %c0_i32, %c0_i32_0 : i32, i32
  }
  func.func @transform_10(%arg0: i32) -> (i32, i32) {
    %c0_i32 = arith.constant 0 : i32
    %c0_i32_0 = arith.constant 0 : i32
    %c0_i32_1 = arith.constant 0 : i32
    return %c0_i32, %c0_i32_0 : i32, i32
  }
  func.func @transform_11(%arg0: i32) -> (i32, i32) {
    %c0_i32 = arith.constant 0 : i32
    %c0_i32_0 = arith.constant 0 : i32
    return %arg0, %c0_i32 : i32, i32
  }
  func.func @transform_12(%arg0: i32) -> (i32, i32, i32) {
    %c0_i32 = arith.constant 0 : i32
    %c0_i32_0 = arith.constant 0 : i32
    %c0_i32_1 = arith.constant 0 : i32
    return %c0_i32, %arg0, %c0_i32_0 : i32, i32, i32
  }
}

</mosaic_0001>

<bundles_post_ra>
// kernel: transformer_decoder_layer.3
= control target key start
LH: loop header
LB: loop body
LE: loop exit
PB: predicated region body
PF: predicated region fallthrough
CT: control target
= control target key end

     0   :  { %8 = vsyncpa [#allocation3], 0  ;;  %s5955_s0 = inlined_call_operand.hbm [shape: f32[16,512], index: 0, kind: input, shape index: {}]   ;;  %s5956_s1 = inlined_call_operand.hbm [shape: bf16[512,1536], index: 1, kind: input, shape index: {}]   ;;  %s5957_s2 = inlined_call_operand.hbm [shape: f32[1,1536], index: 2, kind: input, shape index: {}]   ;;  %s5958_s3 = inlined_call_operand.vmem [shape: f32[8,16,64], index: 3, kind: output, shape index: {}]  }
   0x1   :  { %10 = vsyncpa [#allocation3 + $0x1], 0 }
   0x2   :  { %11 = vsyncpa [#allocation5], 0  ;;  %s5515_s12 = smov 0   ;;  %s5517_s13 = smov 0  }
   0x3   :  { %s5519_s14 = smov 0   ;;  %s5521_s15 = smov 0  }
   0x4 LB: > { %s5534_s16 = sadd.s32 4294967295, %s5485_s15   ;;  %p37_p0 = scmp.ne.s32.totalorder %s5477_s13, %s5473_s12  ;;  %s5485_s15 = sphi %s5521_s15, %s5978_s15   ;;  %s5481_s14 = sphi %s5519_s14, %s5977_s14   ;;  %s5477_s13 = sphi %s5517_s13, %s5976_s13   ;;  %s5473_s12 = sphi %s5515_s12, %s5975_s12  }
   0x5   : > { %p5959_p1 = scmp.eq.s32.totalorder %s5534_s16, 0  ;;  %p4142_p3 = scmp.ge.s32.totalorder %s5485_s15, 1 }
   0x6   : > { %p116_p4 = scmp.lt.s32.totalorder %s5485_s15, 3  ;;  %s5487_s19 = smov [#allocation4]  }
   0x7   : > { %p5543_p5 = por %p5959_p1, %p37_p0  ;;  %s128_s20 = sshll.u32 %s5487_s19, 4  ;;  %s129_s20 = int_to_ptr.vmem [resolvable:$true] %s128_s20 }
   0x8   : > { %p5547_p6 = pnand %p4142_p3, %p116_p4  ;;  %s5488_s22 = smov [#allocation6]  }
   0x9   : > { %s5962_s17 = scalar_select %p5543_p5, 1, 0 }
   0xa   : > { %s5963_s18 = scalar_select %p5547_p6, 1, 0 }
   0xb   : > { %p4704_p7 = pneg %p5547_p6  ;;  %s142_s23 = sshll.u32 %s5488_s22, 4  ;;  %s143_s23 = int_to_ptr.vmem [resolvable:$true] %s142_s23 }
   0xc   : > { %s5378_s24 = scalar_lea.vmem %s129_s20, 49152  ;;  %p5386_p13 = scmp.lt.s32.totalorder %s129_s20, %s129_s20 }
   0xd   : > { %p5555_p8 = pnand %p4704_p7, %p5959_p1  ;;  %p5379_p10 = scmp.ne.s32.totalorder %s129_s20, %s5378_s24 }
   0xe   : > { %p5387_p0 = scmp.lt.s32.totalorder %s5378_s24, %s5378_s24 }
   0xf   : > { %p5369_p9 = pneg %p5555_p8 }
  0x10   : > { %p5388_p3 = por %p5387_p0, %p5386_p13 }
  0x11   : > { %p5381_p11 = pnand %p5379_p10, %p5369_p9 }
  0x13   : > { %p5382_p12 = pneg %p5381_p11 }
  0x15   : > { %p5389_p4 = pnand %p5388_p3, %p5382_p12 }
  0x17   : > { %5392 = shalt.err (!%p5389_p4)
}
  0x18   : > { %s5489_s25 = smov 768   ;;  %s5490_s26 = smov 48  }
  0x19   : > { %4707 = dma.hbm_to_vmem [thread:$0]  (!%p5555_p8), %s5956_s1, 49152, %s129_s20, [#allocation5], %s5489_s25, %s5489_s25, %s5490_s26  }
  0x1a   : > { %s5404_s29 = scalar_lea.vmem %s143_s23, 192  ;;  %p5412_p1 = scmp.lt.s32.totalorder %s143_s23, %s143_s23 }
  0x1b   : > { %p5405_p7 = scmp.ne.s32.totalorder %s143_s23, %s5404_s29  ;;  %p5413_p2 = scmp.lt.s32.totalorder %s5404_s29, %s5404_s29 }
  0x1d   : > { %p5407_p10 = pnand %p5405_p7, %p5369_p9  ;;  %p5414_p13 = por %p5413_p2, %p5412_p1 }
  0x1f   : > { %p5408_p11 = pneg %p5407_p10 }
  0x21   : > { %p5415_p12 = pnand %p5414_p13, %p5408_p11 }
  0x23   : > { %5418 = shalt.err (!%p5415_p12)
}
  0x24   : > { %4710 = dma.hbm_to_vmem [thread:$0]  (!%p5555_p8), %s5957_s2, 192, %s143_s23, [#allocation5]  }
  0x25   : > { %s5578_s5 = sadd.s32 1, %s5485_s15   ;;  %s24_s7 = sadd.s32 1, %s5481_s14 }
  0x26   : > { %s21_s6 = ssub.s32 %s5485_s15, %s5578_s5  ;;  %p31_p2 = scmp.ne.s32.totalorder %s5481_s14, %s5477_s13 }
  0x27   : > { %p22_p1 = scmp.eq.s32.totalorder %s21_s6, 0  ;;  %p32_p9 = scmp.eq.s32.totalorder %s5485_s15, 0 }
  0x28   : > { %p4717_p0 = scmp.lt.s32.totalorder %s5485_s15, 2  ;;  %p5965_p4 = scmp.eq.s32.totalorder %s5534_s16, 1 }
  0x29   : > { %s5588_s8 = scalar_select %p22_p1, %s5481_s14, %s24_s7  }
  0x2a   : > { %p33_p3 = por %p32_p9, %p31_p2  ;;  %p5592_p7 = por %p5965_p4, %p31_p2 }
  0x2b   : > { %s153_s10 = sand.u32 1, %s5481_s14   ;;  %s4565_s11 = sshll.u32 %s5485_s15, 9 }
  0x2c   : > { %s5966_s9 = scalar_select %p5592_p7, 1, 0 }
  0x2d   : > { %s4146_s12 = sshll.u32 %s153_s10, 5  ;;  %s5601_s21 = scalar_lea.hbm %s5955_s0, %s4565_s11 }
  0x2e   : > { %s157_s22 = scalar_lea.vmem [#allocation2], %s4146_s12  ;;  %p5603_p8 = pnand %p4717_p0, %p33_p3 }
  0x2f   : > { %s165_s23 = sshll.u32 %s157_s22, 4  ;;  %s154_s25 = scalar_lea.sflag [#allocation3], %s153_s10  ;;  %s166_s23 = int_to_ptr.vmem [resolvable:$true] %s165_s23 }
  0x30   : > { %s5419_s26 = scalar_lea.hbm %s5601_s21, 512  ;;  %p5421_p11 = pneg %p5603_p8 }
  0x31   : > { %p5420_p10 = scmp.ne.s32.totalorder %s5601_s21, %s5419_s26  ;;  %s5424_s28 = scalar_lea.hbm %s5955_s0, 1024 }
  0x32   : > { %p5425_p1 = scmp.lt.s32.totalorder %s5601_s21, %s5955_s0  ;;  %p5426_p2 = scmp.lt.s32.totalorder %s5424_s28, %s5419_s26 }
  0x33   : > { %p5422_p13 = pnand %p5421_p11, %p5420_p10 }
  0x34   : > { %p5427_p9 = por %p5426_p2, %p5425_p1 }
  0x35   : > { %p5423_p12 = pneg %p5422_p13 }
  0x37   : > { %p5428_p0 = pnand %p5427_p9, %p5423_p12 }
  0x39   : > { %5431 = shalt.err (!%p5428_p0)
}
  0x3a   : > { %s5432_s4 = scalar_lea.vmem %s166_s23, 512  ;;  %s5491_s6 = smov [#allocation2]  }
  0x3b   : > { %p5433_p3 = scmp.ne.s32.totalorder %s166_s23, %s5432_s4  ;;  %s5437_s7 = sshll.u32 %s5491_s6, 4  ;;  %s5438_s7 = int_to_ptr.vmem [resolvable:$false] %s5437_s7 }
  0x3c   : > { %s5439_s10 = scalar_lea.vmem %s5438_s7, 1024  ;;  %p5440_p10 = scmp.lt.s32.totalorder %s166_s23, %s5438_s7 }
  0x3d   : > { %p5435_p4 = pnand %p5433_p3, %p5421_p11  ;;  %p5441_p13 = scmp.lt.s32.totalorder %s5439_s10, %s5432_s4 }
  0x3f   : > { %p5436_p7 = pneg %p5435_p4  ;;  %p5442_p5 = por %p5441_p13, %p5440_p10 }
  0x41   : > { %p5443_p6 = pnand %p5442_p5, %p5436_p7 }
  0x43   : > { %5446 = shalt.err (!%p5443_p6)
}
  0x44   : > { %4714 = dma.hbm_to_vmem [thread:$0]  (!%p5603_p8), %s5601_s21, 512, %s166_s23, %s154_s25  }
  0x45   : > { %p5968_p12 = scmp.ne.s32.totalorder %s5963_s18, 0 }
  0x46   : > { %s5624_s11 = sand.u32 (!%p5968_p12), 1, %s5477_s13   ;;  %p5969_p11 = scmp.ne.s32.totalorder (!%p5968_p12), %s5962_s17, 0 }
  0x47   : > { %174 = sbr.rel (%p5968_p12) target bundleno = 1390 (0x56e), region = 32  ;;  %s4150_s12 = sshll.u32 (!%p5968_p12), %s5624_s11, 5 }
  0x48   : > { %s177_s19 = scalar_lea.sflag (!%p5968_p12), [#allocation3], %s5624_s11  ;;  %s5628_s20 = scalar_lea.vmem (!%p5968_p12), [#allocation2], %s4150_s12 }
  0x4c   : > { %5464 = dma.done.wait (%p5969_p11), %s177_s19, 512  }
  0x4d   : > { %5466 = vsyncadd (%p5969_p11), %s177_s19, 4294966784  ;;  %p5970_p5 = scmp.eq.s32.totalorder %s5534_s16, 0 }
  0x4f   : > { %5468 = dma.done.wait (%p5970_p5), [#allocation5], 49344   ;;  %p5971_p6 = pmov %p5970_p5 }
  0x50   : > { %v4759_v0 = vld [vmem:[#allocation4 + $0x2a4] ss:$48 sps:$4 sm:$0xff]   ;;  %v4763_v2 = vld [vmem:[#allocation4 + $0x2a0] ss:$48 sps:$4 sm:$0xff]   ;;  %v212_v46 = vld [vmem:[%s5628_s20 + $0x8] sm:$0xff]  ;;  %vm5493_vm0 = vmmov 0  }
  0x51   : > { %5470 = vsyncadd (%p5971_p6), [#allocation5], 4294917952  ;;  %v4761_v1 = vld [vmem:[#allocation4 + $0x8a4] ss:$48 sps:$4 sm:$0xff]   ;;  %2587 = vmatprep.subr.bf16.mxu0 %v4759_v0  ;;  %v4764_v3 = vld [vmem:[#allocation4 + $0x8a0] ss:$48 sps:$4 sm:$0xff]   ;;  %v5639_v49 = vpack.c.bf16 %v212_v46, %v212_v46 }
  0x52   : > { %2628 = vmatprep.subr.bf16.mxu1 %v4761_v1  ;;  %v4765_v4 = vld [vmem:[#allocation4 + $0x244] ss:$48 sps:$4 sm:$0xff]   ;;  %2588 = vmatpush1.bf16.msra.mxu0 %v4763_v2  ;;  %v4769_v6 = vld [vmem:[#allocation4 + $0x240] ss:$48 sps:$4 sm:$0xff]   ;;  %v214_v50 = vld [vmem:[%s5628_s20 + $0x18] sm:$0xff]  ;;  %vm3087_vm1 = vcmask 523264  }
  0x53   : > { %2629 = vmatpush1.bf16.msra.mxu1 %v4764_v3  ;;  %v4767_v5 = vld [vmem:[#allocation4 + $0x844] ss:$48 sps:$4 sm:$0xff]   ;;  %2589 = vmatprep.subr.bf16.mxu0 %v4765_v4  ;;  %v4770_v7 = vld [vmem:[#allocation4 + $0x840] ss:$48 sps:$4 sm:$0xff]   ;;  %v5642_v52 = vpack.c.bf16 %v214_v50, %v214_v50  ;;  %v4909_v46 = vld [vmem:[#allocation4 + $0x548] ss:$48 sps:$4 sm:$0xff]  }
  0x54   : > { %2630 = vmatprep.subr.bf16.mxu1 %v4767_v5  ;;  %v4771_v8 = vld [vmem:[#allocation4 + $0x1e4] ss:$48 sps:$4 sm:$0xff]   ;;  %v4775_v10 = vld [vmem:[#allocation4 + $0x1e0] ss:$48 sps:$4 sm:$0xff]   ;;  %2619 = vmatprep.mubr.bf16.mxu0 %v5639_v49  ;;  %v4920_v50 = vld [vmem:[#allocation4 + $0xaec] ss:$48 sps:$4 sm:$0xff]  }
  0x55   : > { %v4773_v9 = vld [vmem:[#allocation4 + $0x7e4] ss:$48 sps:$4 sm:$0xff]   ;;  %v4776_v11 = vld [vmem:[#allocation4 + $0x7e0] ss:$48 sps:$4 sm:$0xff]   ;;  %2660 = vmatprep.mubr.bf16.mxu1 %v5642_v52  ;;  %s5494_s17 = smov 64   ;;  %vm3151_vm2 = vcmask 1043456  }
  0x56   : > { %2590 = vmatpush1.bf16.msra.mxu0 %v4769_v6  ;;  %v4777_v12 = vld [vmem:[#allocation4 + $0x184] ss:$48 sps:$4 sm:$0xff]   ;;  %v4781_v14 = vld [vmem:[#allocation4 + $0x180] ss:$48 sps:$4 sm:$0xff]   ;;  %v4857_v6 = vld [vmem:[#allocation4 + $0x2ac] ss:$48 sps:$4 sm:$0xff]  }
  0x57   : > { %2631 = vmatpush1.bf16.msra.mxu1 %v4770_v7  ;;  %2591 = vmatprep.subr.bf16.mxu0 %v4771_v8  ;;  %v4779_v13 = vld [vmem:[#allocation4 + $0x784] ss:$48 sps:$4 sm:$0xff]   ;;  %v4782_v15 = vld [vmem:[#allocation4 + $0x780] ss:$48 sps:$4 sm:$0xff]   ;;  %v4860_v7 = vld [vmem:[#allocation4 + $0x8ac] ss:$48 sps:$4 sm:$0xff]  }
  0x58   : > { %2632 = vmatprep.subr.bf16.mxu1 %v4773_v9  ;;  %v4783_v16 = vld [vmem:[#allocation4 + $0x124] ss:$48 sps:$4 sm:$0xff]   ;;  %v4787_v18 = vld [vmem:[#allocation4 + $0x120] ss:$48 sps:$4 sm:$0xff]   ;;  %vm3135_vm4 = vcmask 64512   ;;  %s4153_s18 = sshll.u32 %s5624_s11, 6 }
  0x59   : > { %v4785_v17 = vld [vmem:[#allocation4 + $0x724] ss:$48 sps:$4 sm:$0xff]   ;;  %v4788_v19 = vld [vmem:[#allocation4 + $0x720] ss:$48 sps:$4 sm:$0xff]   ;;  %s5910_s21 = scalar_lea.vmem [#allocation7], %s4153_s18  ;;  %p5974_p7 = scmp.ne.s32.totalorder %s5966_s9, 0 }
  0x5a   : > { %2592 = vmatpush1.bf16.msra.mxu0 %v4775_v10  ;;  %v4789_v20 = vld [vmem:[#allocation4 + $0xc4] ss:$48 sps:$4 sm:$0xff]   ;;  %v4793_v22 = vld [vmem:[#allocation4 + $0xc0] ss:$48 sps:$4 sm:$0xff]   ;;  %v4855_v10 = vld [vmem:[#allocation4 + $0x2a8] ss:$48 sps:$4 sm:$0xff]  }
  0x5b   : > { %2633 = vmatpush1.bf16.msra.mxu1 %v4776_v11  ;;  %2593 = vmatprep.subr.bf16.mxu0 %v4777_v12  ;;  %v4791_v21 = vld [vmem:[#allocation4 + $0x6c4] ss:$48 sps:$4 sm:$0xff]   ;;  %v4794_v23 = vld [vmem:[#allocation4 + $0x6c0] ss:$48 sps:$4 sm:$0xff]   ;;  %v4858_v11 = vld [vmem:[#allocation4 + $0x8a8] ss:$48 sps:$4 sm:$0xff]  }
  0x5c   : > { %2634 = vmatprep.subr.bf16.mxu1 %v4779_v13  ;;  %v4795_v24 = vld [vmem:[#allocation4 + $0x64] ss:$48 sps:$4 sm:$0xff]   ;;  %v4799_v26 = vld [vmem:[#allocation4 + $0x60] ss:$48 sps:$4 sm:$0xff]   ;;  %v4863_v12 = vld [vmem:[#allocation4 + $0x24c] ss:$48 sps:$4 sm:$0xff]  }
  0x5d   : > { %v4797_v25 = vld [vmem:[#allocation4 + $0x664] ss:$48 sps:$4 sm:$0xff]   ;;  %v4800_v27 = vld [vmem:[#allocation4 + $0x660] ss:$48 sps:$4 sm:$0xff]   ;;  %v4866_v13 = vld [vmem:[#allocation4 + $0x84c] ss:$48 sps:$4 sm:$0xff]  }
  0x5e   : > { %2594 = vmatpush1.bf16.msra.mxu0 %v4781_v14  ;;  %v4801_v28 = vld [vmem:[#allocation4 + $0x4] ss:$48 sps:$4 sm:$0xff]   ;;  %v4805_v30 = vld [vmem:[#allocation4] ss:$48 sps:$4 sm:$0xff]   ;;  %v4861_v14 = vld [vmem:[#allocation4 + $0x248] ss:$48 sps:$4 sm:$0xff]  }
  0x5f   : > { %2635 = vmatpush1.bf16.msra.mxu1 %v4782_v15  ;;  %2595 = vmatprep.subr.bf16.mxu0 %v4783_v16  ;;  %v4803_v29 = vld [vmem:[#allocation4 + $0x604] ss:$48 sps:$4 sm:$0xff]   ;;  %v4806_v31 = vld [vmem:[#allocation4 + $0x600] ss:$48 sps:$4 sm:$0xff]   ;;  %v4864_v15 = vld [vmem:[#allocation4 + $0x848] ss:$48 sps:$4 sm:$0xff]  }
  0x60   : > { %2636 = vmatprep.subr.bf16.mxu1 %v4785_v17  ;;  %v4807_v32 = vld [vmem:[#allocation4 + $0x5a4] ss:$48 sps:$4 sm:$0xff]   ;;  %v4811_v34 = vld [vmem:[#allocation4 + $0x5a0] ss:$48 sps:$4 sm:$0xff]   ;;  %v4869_v16 = vld [vmem:[#allocation4 + $0x1ec] ss:$48 sps:$4 sm:$0xff]  }
  0x61   : > { %v4809_v33 = vld [vmem:[#allocation4 + $0xba4] ss:$48 sps:$4 sm:$0xff]   ;;  %v4812_v35 = vld [vmem:[#allocation4 + $0xba0] ss:$48 sps:$4 sm:$0xff]   ;;  %v4872_v17 = vld [vmem:[#allocation4 + $0x7ec] ss:$48 sps:$4 sm:$0xff]  }
  0x62   : > { %2596 = vmatpush1.bf16.msra.mxu0 %v4787_v18  ;;  %v4813_v36 = vld [vmem:[#allocation4 + $0x544] ss:$48 sps:$4 sm:$0xff]   ;;  %v4817_v38 = vld [vmem:[#allocation4 + $0x540] ss:$48 sps:$4 sm:$0xff]   ;;  %v4867_v18 = vld [vmem:[#allocation4 + $0x1e8] ss:$48 sps:$4 sm:$0xff]  }
  0x63   : > { %2637 = vmatpush1.bf16.msra.mxu1 %v4788_v19  ;;  %2597 = vmatprep.subr.bf16.mxu0 %v4789_v20  ;;  %v4815_v37 = vld [vmem:[#allocation4 + $0xb44] ss:$48 sps:$4 sm:$0xff]   ;;  %v4818_v39 = vld [vmem:[#allocation4 + $0xb40] ss:$48 sps:$4 sm:$0xff]   ;;  %v4870_v19 = vld [vmem:[#allocation4 + $0x7e8] ss:$48 sps:$4 sm:$0xff]  }
  0x64   : > { %2638 = vmatprep.subr.bf16.mxu1 %v4791_v21  ;;  %v4819_v40 = vld [vmem:[#allocation4 + $0x4e4] ss:$48 sps:$4 sm:$0xff]   ;;  %v4823_v42 = vld [vmem:[#allocation4 + $0x4e0] ss:$48 sps:$4 sm:$0xff]   ;;  %v4875_v20 = vld [vmem:[#allocation4 + $0x18c] ss:$48 sps:$4 sm:$0xff]  }
  0x65   : > { %v4821_v41 = vld [vmem:[#allocation4 + $0xae4] ss:$48 sps:$4 sm:$0xff]   ;;  %v4824_v43 = vld [vmem:[#allocation4 + $0xae0] ss:$48 sps:$4 sm:$0xff]   ;;  %v4878_v21 = vld [vmem:[#allocation4 + $0x78c] ss:$48 sps:$4 sm:$0xff]  }
  0x66   : > { %2598 = vmatpush1.bf16.msra.mxu0 %v4793_v22  ;;  %v4825_v44 = vld [vmem:[#allocation4 + $0x484] ss:$48 sps:$4 sm:$0xff]   ;;  %v4829_v47 = vld [vmem:[#allocation4 + $0x480] ss:$48 sps:$4 sm:$0xff]   ;;  %v4873_v22 = vld [vmem:[#allocation4 + $0x188] ss:$48 sps:$4 sm:$0xff]  }
  0x67   : > { %2639 = vmatpush1.bf16.msra.mxu1 %v4794_v23  ;;  %2599 = vmatprep.subr.bf16.mxu0 %v4795_v24  ;;  %v4827_v45 = vld [vmem:[#allocation4 + $0xa84] ss:$48 sps:$4 sm:$0xff]   ;;  %v4830_v48 = vld [vmem:[#allocation4 + $0xa80] ss:$48 sps:$4 sm:$0xff]   ;;  %v4876_v23 = vld [vmem:[#allocation4 + $0x788] ss:$48 sps:$4 sm:$0xff]  }
  0x68   : > { %2640 = vmatprep.subr.bf16.mxu1 %v4797_v25  ;;  %v4831_v51 = vld [vmem:[#allocation4 + $0x424] ss:$48 sps:$4 sm:$0xff]   ;;  %v4835_v54 = vld [vmem:[#allocation4 + $0x420] ss:$48 sps:$4 sm:$0xff]   ;;  %v4881_v24 = vld [vmem:[#allocation4 + $0x12c] ss:$48 sps:$4 sm:$0xff]  }
  0x69   : > { %v4833_v53 = vld [vmem:[#allocation4 + $0xa24] ss:$48 sps:$4 sm:$0xff]   ;;  %v4836_v55 = vld [vmem:[#allocation4 + $0xa20] ss:$48 sps:$4 sm:$0xff]   ;;  %v4884_v25 = vld [vmem:[#allocation4 + $0x72c] ss:$48 sps:$4 sm:$0xff]  }
  0x6a   : > { %2600 = vmatpush1.bf16.msra.mxu0 %v4799_v26  ;;  %v4837_v56 = vld [vmem:[#allocation4 + $0x3c4] ss:$48 sps:$4 sm:$0xff]   ;;  %v4841_v58 = vld [vmem:[#allocation4 + $0x3c0] ss:$48 sps:$4 sm:$0xff]   ;;  %v4879_v26 = vld [vmem:[#allocation4 + $0x128] ss:$48 sps:$4 sm:$0xff]  }
  0x6b   : > { %2641 = vmatpush1.bf16.msra.mxu1 %v4800_v27  ;;  %2601 = vmatprep.subr.bf16.mxu0 %v4801_v28  ;;  %v4839_v57 = vld [vmem:[#allocation4 + $0x9c4] ss:$48 sps:$4 sm:$0xff]   ;;  %v4842_v59 = vld [vmem:[#allocation4 + $0x9c0] ss:$48 sps:$4 sm:$0xff]   ;;  %v4882_v27 = vld [vmem:[#allocation4 + $0x728] ss:$48 sps:$4 sm:$0xff]  }
  0x6c   : > { %2642 = vmatprep.subr.bf16.mxu1 %v4803_v29  ;;  %v4843_v60 = vld [vmem:[#allocation4 + $0x364] ss:$48 sps:$4 sm:$0xff]   ;;  %v4847_v62 = vld [vmem:[#allocation4 + $0x360] ss:$48 sps:$4 sm:$0xff]   ;;  %v4887_v28 = vld [vmem:[#allocation4 + $0xcc] ss:$48 sps:$4 sm:$0xff]  }
  0x6d   : > { %v4845_v61 = vld [vmem:[#allocation4 + $0x964] ss:$48 sps:$4 sm:$0xff]   ;;  %v4848_v63 = vld [vmem:[#allocation4 + $0x960] ss:$48 sps:$4 sm:$0xff]   ;;  %v4890_v29 = vld [vmem:[#allocation4 + $0x6cc] ss:$48 sps:$4 sm:$0xff]  }
  0x6e   : > { %2602 = vmatpush1.bf16.msra.mxu0 %v4805_v30  ;;  %v4849_v0 = vld [vmem:[#allocation4 + $0x304] ss:$48 sps:$4 sm:$0xff]   ;;  %v4853_v2 = vld [vmem:[#allocation4 + $0x300] ss:$48 sps:$4 sm:$0xff]   ;;  %v4885_v30 = vld [vmem:[#allocation4 + $0xc8] ss:$48 sps:$4 sm:$0xff]  }
  0x6f   : > { %2643 = vmatpush1.bf16.msra.mxu1 %v4806_v31  ;;  %2603 = vmatprep.subr.bf16.mxu0 %v4807_v32  ;;  %v4851_v1 = vld [vmem:[#allocation4 + $0x904] ss:$48 sps:$4 sm:$0xff]   ;;  %v4854_v3 = vld [vmem:[#allocation4 + $0x900] ss:$48 sps:$4 sm:$0xff]   ;;  %v4888_v31 = vld [vmem:[#allocation4 + $0x6c8] ss:$48 sps:$4 sm:$0xff]  }
  0x70   : > { %2644 = vmatprep.subr.bf16.mxu1 %v4809_v33  ;;  %v211_v4 = vld [vmem:[%s5628_s20] sm:$0xff]  ;;  %v213_v5 = vld [vmem:[%s5628_s20 + $0x10] sm:$0xff]  ;;  %v4893_v32 = vld [vmem:[#allocation4 + $0x6c] ss:$48 sps:$4 sm:$0xff]   ;;  %s4562_s22 = sshll.u32 (%p5974_p7), %s5534_s16, 3 }
  0x71   : > { %v5648_v8 = vpack.c.bf16 %v211_v4, %v211_v4  ;;  %v5650_v9 = vpack.c.bf16 %v213_v5, %v213_v5  ;;  %v4896_v33 = vld [vmem:[#allocation4 + $0x66c] ss:$48 sps:$4 sm:$0xff]   ;;  %v4939_v4 = vld [vmem:[#allocation4 + $0x368] ss:$48 sps:$4 sm:$0xff]   ;;  %s3998_s25 = scalar_lea.vmem (%p5974_p7), %s5958_s3, %s4562_s22 }
  0x72   : > { %2604 = vmatpush2.bf16.msra.mxu0 %v4811_v34  ;;  %v4891_v34 = vld [vmem:[#allocation4 + $0x68] ss:$48 sps:$4 sm:$0xff]  }
  0x73   : > { %2645 = vmatpush2.bf16.msra.mxu1 %v4812_v35  ;;  %2605 = vmatprep.subr.bf16.mxu0 %v4813_v36  ;;  %v4894_v35 = vld [vmem:[#allocation4 + $0x668] ss:$48 sps:$4 sm:$0xff]   ;;  %v4899_v36 = vld [vmem:[#allocation4 + $0xc] ss:$48 sps:$4 sm:$0xff]  }
  0x74   : > { %2646 = vmatprep.subr.bf16.mxu1 %v4815_v37  ;;  %v4902_v37 = vld [vmem:[#allocation4 + $0x60c] ss:$48 sps:$4 sm:$0xff]   ;;  %v4942_v5 = vld [vmem:[#allocation4 + $0x968] ss:$48 sps:$4 sm:$0xff]  }
  0x76   : > { %2606 = vmatpush2.bf16.msra.mxu0 %v4817_v38  ;;  %v4897_v38 = vld [vmem:[#allocation4 + $0x8] ss:$48 sps:$4 sm:$0xff]  }
  0x77   : > { %2647 = vmatpush2.bf16.msra.mxu1 %v4818_v39  ;;  %2607 = vmatprep.subr.bf16.mxu0 %v4819_v40  ;;  %v4900_v39 = vld [vmem:[#allocation4 + $0x608] ss:$48 sps:$4 sm:$0xff]   ;;  %v4905_v40 = vld [vmem:[#allocation4 + $0x5ac] ss:$48 sps:$4 sm:$0xff]  }
  0x78   : > { %2648 = vmatprep.subr.bf16.mxu1 %v4821_v41  ;;  %v4908_v41 = vld [vmem:[#allocation4 + $0xbac] ss:$48 sps:$4 sm:$0xff]  }
  0x7a   : > { %2608 = vmatpush2.bf16.msra.mxu0 %v4823_v42  ;;  %v4903_v42 = vld [vmem:[#allocation4 + $0x5a8] ss:$48 sps:$4 sm:$0xff]  }
  0x7b   : > { %2649 = vmatpush2.bf16.msra.mxu1 %v4824_v43  ;;  %2609 = vmatprep.subr.bf16.mxu0 %v4825_v44  ;;  %v4906_v43 = vld [vmem:[#allocation4 + $0xba8] ss:$48 sps:$4 sm:$0xff]   ;;  %v4911_v44 = vld [vmem:[#allocation4 + $0x54c] ss:$48 sps:$4 sm:$0xff]  }
  0x7c   : > { %2650 = vmatprep.subr.bf16.mxu1 %v4827_v45  ;;  %v4914_v45 = vld [vmem:[#allocation4 + $0xb4c] ss:$48 sps:$4 sm:$0xff]  }
  0x7e   : > { %2610 = vmatpush2.bf16.msra.mxu0 %v4829_v47  ;;  %v4912_v47 = vld [vmem:[#allocation4 + $0xb48] ss:$48 sps:$4 sm:$0xff]  }
  0x7f   : > { %2651 = vmatpush2.bf16.msra.mxu1 %v4830_v48  ;;  %2611 = vmatprep.subr.bf16.mxu0 %v4831_v51  ;;  %v4917_v48 = vld [vmem:[#allocation4 + $0x4ec] ss:$48 sps:$4 sm:$0xff]   ;;  %v4915_v51 = vld [vmem:[#allocation4 + $0x4e8] ss:$48 sps:$4 sm:$0xff]  }
  0x80   : > { %2652 = vmatprep.subr.bf16.mxu1 %v4833_v53  ;;  %v4918_v53 = vld [vmem:[#allocation4 + $0xae8] ss:$48 sps:$4 sm:$0xff]  }
  0x82   : > { %2612 = vmatpush2.bf16.msra.mxu0 %v4835_v54  ;;  %v4923_v54 = vld [vmem:[#allocation4 + $0x48c] ss:$48 sps:$4 sm:$0xff]  }
  0x83   : > { %2653 = vmatpush2.bf16.msra.mxu1 %v4836_v55  ;;  %2613 = vmatprep.subr.bf16.mxu0 %v4837_v56  ;;  %v4926_v55 = vld [vmem:[#allocation4 + $0xa8c] ss:$48 sps:$4 sm:$0xff]   ;;  %v4921_v56 = vld [vmem:[#allocation4 + $0x488] ss:$48 sps:$4 sm:$0xff]  }
  0x84   : > { %2654 = vmatprep.subr.bf16.mxu1 %v4839_v57  ;;  %v4924_v57 = vld [vmem:[#allocation4 + $0xa88] ss:$48 sps:$4 sm:$0xff]  }
  0x86   : > { %2614 = vmatpush2.bf16.msra.mxu0 %v4841_v58  ;;  %v4929_v58 = vld [vmem:[#allocation4 + $0x42c] ss:$48 sps:$4 sm:$0xff]  }
  0x87   : > { %2655 = vmatpush2.bf16.msra.mxu1 %v4842_v59  ;;  %2615 = vmatprep.subr.bf16.mxu0 %v4843_v60  ;;  %v4932_v59 = vld [vmem:[#allocation4 + $0xa2c] ss:$48 sps:$4 sm:$0xff]   ;;  %v4927_v60 = vld [vmem:[#allocation4 + $0x428] ss:$48 sps:$4 sm:$0xff]  }
  0x88   : > { %2656 = vmatprep.subr.bf16.mxu1 %v4845_v61  ;;  %v4930_v61 = vld [vmem:[#allocation4 + $0xa28] ss:$48 sps:$4 sm:$0xff]  }
  0x8a   : > { %2616 = vmatpush2.bf16.msra.mxu0 %v4847_v62  ;;  %v4935_v62 = vld [vmem:[#allocation4 + $0x3cc] ss:$48 sps:$4 sm:$0xff]  }
  0x8b   : > { %2657 = vmatpush2.bf16.msra.mxu1 %v4848_v63  ;;  %2617 = vmatprep.subr.bf16.mxu0 %v4849_v0  ;;  %v4938_v63 = vld [vmem:[#allocation4 + $0x9cc] ss:$48 sps:$4 sm:$0xff]   ;;  %v4933_v0 = vld [vmem:[#allocation4 + $0x3c8] ss:$48 sps:$4 sm:$0xff]  }
  0x8c   : > { %2658 = vmatprep.subr.bf16.mxu1 %v4851_v1  ;;  %v4936_v1 = vld [vmem:[#allocation4 + $0x9c8] ss:$48 sps:$4 sm:$0xff]  }
  0x8e   : > { %2618 = vmatpush2.bf16.msra.mxu0 %v4853_v2  ;;  %v4941_v2 = vld [vmem:[#allocation4 + $0x36c] ss:$48 sps:$4 sm:$0xff]  }
  0x8f   : > { %2659 = vmatpush2.bf16.msra.mxu1 %v4854_v3  ;;  %2669 = vmatprep.subr.bf16.mxu0 %v4857_v6  ;;  %v4944_v3 = vld [vmem:[#allocation4 + $0x96c] ss:$48 sps:$4 sm:$0xff]  }
  0x90   : > { %2710 = vmatprep.subr.bf16.mxu1 %v4860_v7  ;;  %v4947_v6 = vld [vmem:[#allocation4 + $0x30c] ss:$48 sps:$4 sm:$0xff]  }
  0x91   : > { %2620 = vmatmul.mubr.bf16.vlgmr.msra.gmra.mxu0 %v5648_v8  ;;  %v4950_v7 = vld [vmem:[#allocation4 + $0x90c] ss:$48 sps:$4 sm:$0xff]  }
  0x92   : > { %2661 = vmatmul.mubr.bf16.vlgmr.msra.gmra.mxu1 %v5650_v9  ;;  %2670 = vmatpush1.bf16.msra.mxu0 %v4855_v10  ;;  %v4945_v10 = vld [vmem:[#allocation4 + $0x308] ss:$48 sps:$4 sm:$0xff]  }
  0x93   : > { %2711 = vmatpush1.bf16.msra.mxu1 %v4858_v11  ;;  %2671 = vmatprep.subr.bf16.mxu0 %v4863_v12  ;;  %v4948_v11 = vld [vmem:[#allocation4 + $0x908] ss:$48 sps:$4 sm:$0xff]   ;;  %v4953_v12 = vld [vmem:[#allocation4 + $0x2b4] ss:$48 sps:$4 sm:$0xff]  }
  0x94   : > { %2712 = vmatprep.subr.bf16.mxu1 %v4866_v13  ;;  %2701 = vmatprep.mubr.bf16.mxu0 %v5639_v49  ;;  %v4956_v13 = vld [vmem:[#allocation4 + $0x8b4] ss:$48 sps:$4 sm:$0xff]  }
  0x95   : > { %2742 = vmatprep.mubr.bf16.mxu1 %v5642_v52 }
  0x96   : > { %2672 = vmatpush1.bf16.msra.mxu0 %v4861_v14  ;;  %v4951_v14 = vld [vmem:[#allocation4 + $0x2b0] ss:$48 sps:$4 sm:$0xff]  }
  0x97   : > { %2713 = vmatpush1.bf16.msra.mxu1 %v4864_v15  ;;  %2673 = vmatprep.subr.bf16.mxu0 %v4869_v16  ;;  %v4954_v15 = vld [vmem:[#allocation4 + $0x8b0] ss:$48 sps:$4 sm:$0xff]   ;;  %v4959_v16 = vld [vmem:[#allocation4 + $0x254] ss:$48 sps:$4 sm:$0xff]  }
  0x98   : > { %2714 = vmatprep.subr.bf16.mxu1 %v4872_v17  ;;  %v4962_v17 = vld [vmem:[#allocation4 + $0x854] ss:$48 sps:$4 sm:$0xff]  }
  0x9a   : > { %2674 = vmatpush1.bf16.msra.mxu0 %v4867_v18  ;;  %v4957_v18 = vld [vmem:[#allocation4 + $0x250] ss:$48 sps:$4 sm:$0xff]  }
  0x9b   : > { %2715 = vmatpush1.bf16.msra.mxu1 %v4870_v19  ;;  %2675 = vmatprep.subr.bf16.mxu0 %v4875_v20  ;;  %v4960_v19 = vld [vmem:[#allocation4 + $0x850] ss:$48 sps:$4 sm:$0xff]   ;;  %v4965_v20 = vld [vmem:[#allocation4 + $0x1f4] ss:$48 sps:$4 sm:$0xff]  }
  0x9c   : > { %2716 = vmatprep.subr.bf16.mxu1 %v4878_v21  ;;  %v4968_v21 = vld [vmem:[#allocation4 + $0x7f4] ss:$48 sps:$4 sm:$0xff]  }
  0x9e   : > { %2676 = vmatpush1.bf16.msra.mxu0 %v4873_v22  ;;  %v4963_v22 = vld [vmem:[#allocation4 + $0x1f0] ss:$48 sps:$4 sm:$0xff]  }
  0x9f   : > { %2717 = vmatpush1.bf16.msra.mxu1 %v4876_v23  ;;  %2677 = vmatprep.subr.bf16.mxu0 %v4881_v24  ;;  %v4966_v23 = vld [vmem:[#allocation4 + $0x7f0] ss:$48 sps:$4 sm:$0xff]   ;;  %v4971_v24 = vld [vmem:[#allocation4 + $0x194] ss:$48 sps:$4 sm:$0xff]  }
  0xa0   : > { %2718 = vmatprep.subr.bf16.mxu1 %v4884_v25  ;;  %v4974_v25 = vld [vmem:[#allocation4 + $0x794] ss:$48 sps:$4 sm:$0xff]  }
  0xa2   : > { %2678 = vmatpush1.bf16.msra.mxu0 %v4879_v26  ;;  %v4969_v26 = vld [vmem:[#allocation4 + $0x190] ss:$48 sps:$4 sm:$0xff]  }
  0xa3   : > { %2719 = vmatpush1.bf16.msra.mxu1 %v4882_v27  ;;  %2679 = vmatprep.subr.bf16.mxu0 %v4887_v28  ;;  %v4972_v27 = vld [vmem:[#allocation4 + $0x790] ss:$48 sps:$4 sm:$0xff]   ;;  %v4977_v28 = vld [vmem:[#allocation4 + $0x134] ss:$48 sps:$4 sm:$0xff]  }
  0xa4   : > { %2720 = vmatprep.subr.bf16.mxu1 %v4890_v29  ;;  %v4980_v29 = vld [vmem:[#allocation4 + $0x734] ss:$48 sps:$4 sm:$0xff]  }
  0xa6   : > { %2680 = vmatpush1.bf16.msra.mxu0 %v4885_v30  ;;  %v4975_v30 = vld [vmem:[#allocation4 + $0x130] ss:$48 sps:$4 sm:$0xff]  }
  0xa7   : > { %2721 = vmatpush1.bf16.msra.mxu1 %v4888_v31  ;;  %2681 = vmatprep.subr.bf16.mxu0 %v4893_v32  ;;  %v4978_v31 = vld [vmem:[#allocation4 + $0x730] ss:$48 sps:$4 sm:$0xff]   ;;  %v4983_v32 = vld [vmem:[#allocation4 + $0xd4] ss:$48 sps:$4 sm:$0xff]  }
  0xa8   : > { %2722 = vmatprep.subr.bf16.mxu1 %v4896_v33  ;;  %v4986_v33 = vld [vmem:[#allocation4 + $0x6d4] ss:$48 sps:$4 sm:$0xff]  }
  0xaa   : > { %2682 = vmatpush1.bf16.msra.mxu0 %v4891_v34  ;;  %v4981_v34 = vld [vmem:[#allocation4 + $0xd0] ss:$48 sps:$4 sm:$0xff]  }
  0xab   : > { %2723 = vmatpush1.bf16.msra.mxu1 %v4894_v35  ;;  %2683 = vmatprep.subr.bf16.mxu0 %v4899_v36  ;;  %v4984_v35 = vld [vmem:[#allocation4 + $0x6d0] ss:$48 sps:$4 sm:$0xff]   ;;  %v4989_v36 = vld [vmem:[#allocation4 + $0x74] ss:$48 sps:$4 sm:$0xff]  }
  0xac   : > { %2724 = vmatprep.subr.bf16.mxu1 %v4902_v37  ;;  %v4992_v37 = vld [vmem:[#allocation4 + $0x674] ss:$48 sps:$4 sm:$0xff]  }
  0xae   : > { %2684 = vmatpush1.bf16.msra.mxu0 %v4897_v38  ;;  %v4987_v38 = vld [vmem:[#allocation4 + $0x70] ss:$48 sps:$4 sm:$0xff]  }
  0xaf   : > { %2725 = vmatpush1.bf16.msra.mxu1 %v4900_v39  ;;  %2685 = vmatprep.subr.bf16.mxu0 %v4905_v40  ;;  %v4990_v39 = vld [vmem:[#allocation4 + $0x670] ss:$48 sps:$4 sm:$0xff]   ;;  %v4995_v40 = vld [vmem:[#allocation4 + $0x14] ss:$48 sps:$4 sm:$0xff]  }
  0xb0   : > { %2726 = vmatprep.subr.bf16.mxu1 %v4908_v41  ;;  %v4998_v41 = vld [vmem:[#allocation4 + $0x614] ss:$48 sps:$4 sm:$0xff]  }
  0xb2   : > { %2686 = vmatpush2.bf16.msra.mxu0 %v4903_v42  ;;  %v4993_v42 = vld [vmem:[#allocation4 + $0x10] ss:$48 sps:$4 sm:$0xff]  }
  0xb3   : > { %2727 = vmatpush2.bf16.msra.mxu1 %v4906_v43  ;;  %2687 = vmatprep.subr.bf16.mxu0 %v4911_v44  ;;  %v4996_v43 = vld [vmem:[#allocation4 + $0x610] ss:$48 sps:$4 sm:$0xff]   ;;  %v5001_v44 = vld [vmem:[#allocation4 + $0x5b4] ss:$48 sps:$4 sm:$0xff]  }
  0xb4   : > { %2728 = vmatprep.subr.bf16.mxu1 %v4914_v45  ;;  %v5004_v45 = vld [vmem:[#allocation4 + $0xbb4] ss:$48 sps:$4 sm:$0xff]  }
  0xb6   : > { %2688 = vmatpush2.bf16.msra.mxu0 %v4909_v46  ;;  %v4999_v46 = vld [vmem:[#allocation4 + $0x5b0] ss:$48 sps:$4 sm:$0xff]  }
  0xb7   : > { %2729 = vmatpush2.bf16.msra.mxu1 %v4912_v47  ;;  %2689 = vmatprep.subr.bf16.mxu0 %v4917_v48  ;;  %v5002_v47 = vld [vmem:[#allocation4 + $0xbb0] ss:$48 sps:$4 sm:$0xff]   ;;  %v5007_v48 = vld [vmem:[#allocation4 + $0x554] ss:$48 sps:$4 sm:$0xff]  }
  0xb8   : > { %2730 = vmatprep.subr.bf16.mxu1 %v4920_v50  ;;  %v5010_v50 = vld [vmem:[#allocation4 + $0xb54] ss:$48 sps:$4 sm:$0xff]  }
  0xba   : > { %2690 = vmatpush2.bf16.msra.mxu0 %v4915_v51  ;;  %v5005_v51 = vld [vmem:[#allocation4 + $0x550] ss:$48 sps:$4 sm:$0xff]  }
  0xbb   : > { %2731 = vmatpush2.bf16.msra.mxu1 %v4918_v53  ;;  %2691 = vmatprep.subr.bf16.mxu0 %v4923_v54  ;;  %v5008_v53 = vld [vmem:[#allocation4 + $0xb50] ss:$48 sps:$4 sm:$0xff]   ;;  %v5013_v54 = vld [vmem:[#allocation4 + $0x4f4] ss:$48 sps:$4 sm:$0xff]  }
  0xbc   : > { %2732 = vmatprep.subr.bf16.mxu1 %v4926_v55  ;;  %v5016_v55 = vld [vmem:[#allocation4 + $0xaf4] ss:$48 sps:$4 sm:$0xff]  }
  0xbe   : > { %2692 = vmatpush2.bf16.msra.mxu0 %v4921_v56  ;;  %v5011_v56 = vld [vmem:[#allocation4 + $0x4f0] ss:$48 sps:$4 sm:$0xff]  }
  0xbf   : > { %2733 = vmatpush2.bf16.msra.mxu1 %v4924_v57  ;;  %2693 = vmatprep.subr.bf16.mxu0 %v4929_v58  ;;  %v5014_v57 = vld [vmem:[#allocation4 + $0xaf0] ss:$48 sps:$4 sm:$0xff]   ;;  %v5019_v58 = vld [vmem:[#allocation4 + $0x494] ss:$48 sps:$4 sm:$0xff]  }
  0xc0   : > { %2734 = vmatprep.subr.bf16.mxu1 %v4932_v59  ;;  %v5022_v59 = vld [vmem:[#allocation4 + $0xa94] ss:$48 sps:$4 sm:$0xff]  }
  0xc2   : > { %2694 = vmatpush2.bf16.msra.mxu0 %v4927_v60  ;;  %v5017_v60 = vld [vmem:[#allocation4 + $0x490] ss:$48 sps:$4 sm:$0xff]  }
  0xc3   : > { %2735 = vmatpush2.bf16.msra.mxu1 %v4930_v61  ;;  %2695 = vmatprep.subr.bf16.mxu0 %v4935_v62  ;;  %v5020_v61 = vld [vmem:[#allocation4 + $0xa90] ss:$48 sps:$4 sm:$0xff]   ;;  %v5025_v62 = vld [vmem:[#allocation4 + $0x434] ss:$48 sps:$4 sm:$0xff]  }
  0xc4   : > { %2736 = vmatprep.subr.bf16.mxu1 %v4938_v63  ;;  %v5028_v63 = vld [vmem:[#allocation4 + $0xa34] ss:$48 sps:$4 sm:$0xff]  }
  0xc6   : > { %2696 = vmatpush2.bf16.msra.mxu0 %v4933_v0  ;;  %v5023_v0 = vld [vmem:[#allocation4 + $0x430] ss:$48 sps:$4 sm:$0xff]  }
  0xc7   : > { %2737 = vmatpush2.bf16.msra.mxu1 %v4936_v1  ;;  %2697 = vmatprep.subr.bf16.mxu0 %v4941_v2  ;;  %v5026_v1 = vld [vmem:[#allocation4 + $0xa30] ss:$48 sps:$4 sm:$0xff]   ;;  %v5031_v2 = vld [vmem:[#allocation4 + $0x3d4] ss:$48 sps:$4 sm:$0xff]  }
  0xc8   : > { %2738 = vmatprep.subr.bf16.mxu1 %v4944_v3  ;;  %v5034_v3 = vld [vmem:[#allocation4 + $0x9d4] ss:$48 sps:$4 sm:$0xff]  }
  0xca   : > { %2698 = vmatpush2.bf16.msra.mxu0 %v4939_v4  ;;  %v5029_v4 = vld [vmem:[#allocation4 + $0x3d0] ss:$48 sps:$4 sm:$0xff]  }
  0xcb   : > { %2739 = vmatpush2.bf16.msra.mxu1 %v4942_v5  ;;  %2699 = vmatprep.subr.bf16.mxu0 %v4947_v6  ;;  %v5032_v5 = vld [vmem:[#allocation4 + $0x9d0] ss:$48 sps:$4 sm:$0xff]   ;;  %v5037_v6 = vld [vmem:[#allocation4 + $0x374] ss:$48 sps:$4 sm:$0xff]  }
  0xcc   : > { %2740 = vmatprep.subr.bf16.mxu1 %v4950_v7  ;;  %v5040_v7 = vld [vmem:[#allocation4 + $0x974] ss:$48 sps:$4 sm:$0xff]  }
  0xce   : > { %2700 = vmatpush2.bf16.msra.mxu0 %v4945_v10  ;;  %v5035_v10 = vld [vmem:[#allocation4 + $0x370] ss:$48 sps:$4 sm:$0xff]  }
  0xcf   : > { %2741 = vmatpush2.bf16.msra.mxu1 %v4948_v11  ;;  %2751 = vmatprep.subr.bf16.mxu0 %v4953_v12  ;;  %v5038_v11 = vld [vmem:[#allocation4 + $0x970] ss:$48 sps:$4 sm:$0xff]   ;;  %v5043_v12 = vld [vmem:[#allocation4 + $0x314] ss:$48 sps:$4 sm:$0xff]  }
  0xd0   : > { %2792 = vmatprep.subr.bf16.mxu1 %v4956_v13  ;;  %v5046_v13 = vld [vmem:[#allocation4 + $0x914] ss:$48 sps:$4 sm:$0xff]  }
  0xd1   : > { %2702 = vmatmul.mubr.bf16.vlgmr.msra.gmra.mxu0 %v5648_v8 }
  0xd2   : > { %2743 = vmatmul.mubr.bf16.vlgmr.msra.gmra.mxu1 %v5650_v9  ;;  %2752 = vmatpush1.bf16.msra.mxu0 %v4951_v14  ;;  %v5041_v14 = vld [vmem:[#allocation4 + $0x310] ss:$48 sps:$4 sm:$0xff]  }
  0xd3   : > { %2793 = vmatpush1.bf16.msra.mxu1 %v4954_v15  ;;  %2753 = vmatprep.subr.bf16.mxu0 %v4959_v16  ;;  %v5044_v15 = vld [vmem:[#allocation4 + $0x910] ss:$48 sps:$4 sm:$0xff]   ;;  %v5049_v16 = vld [vmem:[#allocation4 + $0x2bc] ss:$48 sps:$4 sm:$0xff]  }
  0xd4   : > { %2794 = vmatprep.subr.bf16.mxu1 %v4962_v17  ;;  %2783 = vmatprep.mubr.bf16.mxu0 %v5639_v49  ;;  %v5052_v17 = vld [vmem:[#allocation4 + $0x8bc] ss:$48 sps:$4 sm:$0xff]  }
  0xd5   : > { %2824 = vmatprep.mubr.bf16.mxu1 %v5642_v52 }
  0xd6   : > { %2754 = vmatpush1.bf16.msra.mxu0 %v4957_v18  ;;  %v5047_v18 = vld [vmem:[#allocation4 + $0x2b8] ss:$48 sps:$4 sm:$0xff]  }
  0xd7   : > { %2795 = vmatpush1.bf16.msra.mxu1 %v4960_v19  ;;  %2755 = vmatprep.subr.bf16.mxu0 %v4965_v20  ;;  %v5050_v19 = vld [vmem:[#allocation4 + $0x8b8] ss:$48 sps:$4 sm:$0xff]   ;;  %v5055_v20 = vld [vmem:[#allocation4 + $0x25c] ss:$48 sps:$4 sm:$0xff]  }
  0xd8   : > { %2796 = vmatprep.subr.bf16.mxu1 %v4968_v21  ;;  %v5058_v21 = vld [vmem:[#allocation4 + $0x85c] ss:$48 sps:$4 sm:$0xff]  }
  0xda   : > { %2756 = vmatpush1.bf16.msra.mxu0 %v4963_v22  ;;  %v5053_v22 = vld [vmem:[#allocation4 + $0x258] ss:$48 sps:$4 sm:$0xff]  }
  0xdb   : > { %2797 = vmatpush1.bf16.msra.mxu1 %v4966_v23  ;;  %2757 = vmatprep.subr.bf16.mxu0 %v4971_v24  ;;  %v5056_v23 = vld [vmem:[#allocation4 + $0x858] ss:$48 sps:$4 sm:$0xff]   ;;  %v5061_v24 = vld [vmem:[#allocation4 + $0x1fc] ss:$48 sps:$4 sm:$0xff]  }
  0xdc   : > { %2798 = vmatprep.subr.bf16.mxu1 %v4974_v25  ;;  %v5064_v25 = vld [vmem:[#allocation4 + $0x7fc] ss:$48 sps:$4 sm:$0xff]  }
  0xde   : > { %2758 = vmatpush1.bf16.msra.mxu0 %v4969_v26  ;;  %v5059_v26 = vld [vmem:[#allocation4 + $0x1f8] ss:$48 sps:$4 sm:$0xff]  }
  0xdf   : > { %2799 = vmatpush1.bf16.msra.mxu1 %v4972_v27  ;;  %2759 = vmatprep.subr.bf16.mxu0 %v4977_v28  ;;  %v5062_v27 = vld [vmem:[#allocation4 + $0x7f8] ss:$48 sps:$4 sm:$0xff]   ;;  %v5067_v28 = vld [vmem:[#allocation4 + $0x19c] ss:$48 sps:$4 sm:$0xff]  }
  0xe0   : > { %2800 = vmatprep.subr.bf16.mxu1 %v4980_v29  ;;  %v5070_v29 = vld [vmem:[#allocation4 + $0x79c] ss:$48 sps:$4 sm:$0xff]  }
  0xe2   : > { %2760 = vmatpush1.bf16.msra.mxu0 %v4975_v30  ;;  %v5065_v30 = vld [vmem:[#allocation4 + $0x198] ss:$48 sps:$4 sm:$0xff]  }
  0xe3   : > { %2801 = vmatpush1.bf16.msra.mxu1 %v4978_v31  ;;  %2761 = vmatprep.subr.bf16.mxu0 %v4983_v32  ;;  %v5068_v31 = vld [vmem:[#allocation4 + $0x798] ss:$48 sps:$4 sm:$0xff]   ;;  %v5073_v32 = vld [vmem:[#allocation4 + $0x13c] ss:$48 sps:$4 sm:$0xff]  }
  0xe4   : > { %2802 = vmatprep.subr.bf16.mxu1 %v4986_v33  ;;  %v5076_v33 = vld [vmem:[#allocation4 + $0x73c] ss:$48 sps:$4 sm:$0xff]  }
  0xe6   : > { %2762 = vmatpush1.bf16.msra.mxu0 %v4981_v34  ;;  %v5071_v34 = vld [vmem:[#allocation4 + $0x138] ss:$48 sps:$4 sm:$0xff]  }
  0xe7   : > { %2803 = vmatpush1.bf16.msra.mxu1 %v4984_v35  ;;  %2763 = vmatprep.subr.bf16.mxu0 %v4989_v36  ;;  %v5074_v35 = vld [vmem:[#allocation4 + $0x738] ss:$48 sps:$4 sm:$0xff]   ;;  %v5079_v36 = vld [vmem:[#allocation4 + $0xdc] ss:$48 sps:$4 sm:$0xff]  }
  0xe8   : > { %2804 = vmatprep.subr.bf16.mxu1 %v4992_v37  ;;  %v5082_v37 = vld [vmem:[#allocation4 + $0x6dc] ss:$48 sps:$4 sm:$0xff]  }
  0xea   : > { %2764 = vmatpush1.bf16.msra.mxu0 %v4987_v38  ;;  %v5077_v38 = vld [vmem:[#allocation4 + $0xd8] ss:$48 sps:$4 sm:$0xff]  }
  0xeb   : > { %2805 = vmatpush1.bf16.msra.mxu1 %v4990_v39  ;;  %2765 = vmatprep.subr.bf16.mxu0 %v4995_v40  ;;  %v5080_v39 = vld [vmem:[#allocation4 + $0x6d8] ss:$48 sps:$4 sm:$0xff]   ;;  %v5085_v40 = vld [vmem:[#allocation4 + $0x7c] ss:$48 sps:$4 sm:$0xff]  }
  0xec   : > { %2806 = vmatprep.subr.bf16.mxu1 %v4998_v41  ;;  %v5088_v41 = vld [vmem:[#allocation4 + $0x67c] ss:$48 sps:$4 sm:$0xff]  }
  0xee   : > { %2766 = vmatpush1.bf16.msra.mxu0 %v4993_v42  ;;  %v5083_v42 = vld [vmem:[#allocation4 + $0x78] ss:$48 sps:$4 sm:$0xff]  }
  0xef   : > { %2807 = vmatpush1.bf16.msra.mxu1 %v4996_v43  ;;  %2767 = vmatprep.subr.bf16.mxu0 %v5001_v44  ;;  %v5086_v43 = vld [vmem:[#allocation4 + $0x678] ss:$48 sps:$4 sm:$0xff]   ;;  %v5091_v44 = vld [vmem:[#allocation4 + $0x1c] ss:$48 sps:$4 sm:$0xff]  }
  0xf0   : > { %2808 = vmatprep.subr.bf16.mxu1 %v5004_v45  ;;  %v5094_v45 = vld [vmem:[#allocation4 + $0x61c] ss:$48 sps:$4 sm:$0xff]  }
  0xf2   : > { %2768 = vmatpush2.bf16.msra.mxu0 %v4999_v46  ;;  %v5089_v46 = vld [vmem:[#allocation4 + $0x18] ss:$48 sps:$4 sm:$0xff]  }
  0xf3   : > { %2809 = vmatpush2.bf16.msra.mxu1 %v5002_v47  ;;  %2769 = vmatprep.subr.bf16.mxu0 %v5007_v48  ;;  %v5092_v47 = vld [vmem:[#allocation4 + $0x618] ss:$48 sps:$4 sm:$0xff]   ;;  %v5097_v48 = vld [vmem:[#allocation4 + $0x5bc] ss:$48 sps:$4 sm:$0xff]  }
  0xf4   : > { %2810 = vmatprep.subr.bf16.mxu1 %v5010_v50  ;;  %v5100_v50 = vld [vmem:[#allocation4 + $0xbbc] ss:$48 sps:$4 sm:$0xff]  }
  0xf6   : > { %2770 = vmatpush2.bf16.msra.mxu0 %v5005_v51  ;;  %v5095_v51 = vld [vmem:[#allocation4 + $0x5b8] ss:$48 sps:$4 sm:$0xff]  }
  0xf7   : > { %2811 = vmatpush2.bf16.msra.mxu1 %v5008_v53  ;;  %2771 = vmatprep.subr.bf16.mxu0 %v5013_v54  ;;  %v5098_v53 = vld [vmem:[#allocation4 + $0xbb8] ss:$48 sps:$4 sm:$0xff]   ;;  %v5103_v54 = vld [vmem:[#allocation4 + $0x55c] ss:$48 sps:$4 sm:$0xff]  }
  0xf8   : > { %2812 = vmatprep.subr.bf16.mxu1 %v5016_v55  ;;  %v5106_v55 = vld [vmem:[#allocation4 + $0xb5c] ss:$48 sps:$4 sm:$0xff]  }
  0xfa   : > { %2772 = vmatpush2.bf16.msra.mxu0 %v5011_v56  ;;  %v5101_v56 = vld [vmem:[#allocation4 + $0x558] ss:$48 sps:$4 sm:$0xff]  }
  0xfb   : > { %2813 = vmatpush2.bf16.msra.mxu1 %v5014_v57  ;;  %2773 = vmatprep.subr.bf16.mxu0 %v5019_v58  ;;  %v5104_v57 = vld [vmem:[#allocation4 + $0xb58] ss:$48 sps:$4 sm:$0xff]   ;;  %v5109_v58 = vld [vmem:[#allocation4 + $0x4fc] ss:$48 sps:$4 sm:$0xff]  }
  0xfc   : > { %2814 = vmatprep.subr.bf16.mxu1 %v5022_v59  ;;  %v5112_v59 = vld [vmem:[#allocation4 + $0xafc] ss:$48 sps:$4 sm:$0xff]  }
  0xfe   : > { %2774 = vmatpush2.bf16.msra.mxu0 %v5017_v60  ;;  %v5107_v60 = vld [vmem:[#allocation4 + $0x4f8] ss:$48 sps:$4 sm:$0xff]  }
  0xff   : > { %2815 = vmatpush2.bf16.msra.mxu1 %v5020_v61  ;;  %2775 = vmatprep.subr.bf16.mxu0 %v5025_v62  ;;  %v5110_v61 = vld [vmem:[#allocation4 + $0xaf8] ss:$48 sps:$4 sm:$0xff]   ;;  %v5115_v62 = vld [vmem:[#allocation4 + $0x49c] ss:$48 sps:$4 sm:$0xff]  }
 0x100   : > { %2816 = vmatprep.subr.bf16.mxu1 %v5028_v63  ;;  %v5118_v63 = vld [vmem:[#allocation4 + $0xa9c] ss:$48 sps:$4 sm:$0xff]  }
 0x102   : > { %2776 = vmatpush2.bf16.msra.mxu0 %v5023_v0  ;;  %v5113_v0 = vld [vmem:[#allocation4 + $0x498] ss:$48 sps:$4 sm:$0xff]  }
 0x103   : > { %2817 = vmatpush2.bf16.msra.mxu1 %v5026_v1  ;;  %2777 = vmatprep.subr.bf16.mxu0 %v5031_v2  ;;  %v5116_v1 = vld [vmem:[#allocation4 + $0xa98] ss:$48 sps:$4 sm:$0xff]   ;;  %v5121_v2 = vld [vmem:[#allocation4 + $0x43c] ss:$48 sps:$4 sm:$0xff]  }
 0x104   : > { %2818 = vmatprep.subr.bf16.mxu1 %v5034_v3  ;;  %v5124_v3 = vld [vmem:[#allocation4 + $0xa3c] ss:$48 sps:$4 sm:$0xff]  }
 0x106   : > { %2778 = vmatpush2.bf16.msra.mxu0 %v5029_v4  ;;  %v5119_v4 = vld [vmem:[#allocation4 + $0x438] ss:$48 sps:$4 sm:$0xff]  }
 0x107   : > { %2819 = vmatpush2.bf16.msra.mxu1 %v5032_v5  ;;  %2779 = vmatprep.subr.bf16.mxu0 %v5037_v6  ;;  %v5122_v5 = vld [vmem:[#allocation4 + $0xa38] ss:$48 sps:$4 sm:$0xff]   ;;  %v5127_v6 = vld [vmem:[#allocation4 + $0x3dc] ss:$48 sps:$4 sm:$0xff]  }
 0x108   : > { %2820 = vmatprep.subr.bf16.mxu1 %v5040_v7  ;;  %v5130_v7 = vld [vmem:[#allocation4 + $0x9dc] ss:$48 sps:$4 sm:$0xff]  }
 0x10a   : > { %2780 = vmatpush2.bf16.msra.mxu0 %v5035_v10  ;;  %v5125_v10 = vld [vmem:[#allocation4 + $0x3d8] ss:$48 sps:$4 sm:$0xff]  }
 0x10b   : > { %2821 = vmatpush2.bf16.msra.mxu1 %v5038_v11  ;;  %2781 = vmatprep.subr.bf16.mxu0 %v5043_v12  ;;  %v5128_v11 = vld [vmem:[#allocation4 + $0x9d8] ss:$48 sps:$4 sm:$0xff]   ;;  %v607_v12 = vlaneseq }
 0x10c   : > { %2822 = vmatprep.subr.bf16.mxu1 %v5046_v13  ;;  %v5133_v13 = vld [vmem:[#allocation4 + $0x37c] ss:$48 sps:$4 sm:$0xff]  }
 0x10e   : > { %2782 = vmatpush2.bf16.msra.mxu0 %v5041_v14  ;;  %v5136_v14 = vld [vmem:[#allocation4 + $0x97c] ss:$48 sps:$4 sm:$0xff]  }
 0x10f   : > { %2823 = vmatpush2.bf16.msra.mxu1 %v5044_v15  ;;  %2833 = vmatprep.subr.bf16.mxu0 %v5049_v16  ;;  %v5131_v15 = vld [vmem:[#allocation4 + $0x378] ss:$48 sps:$4 sm:$0xff]  }
 0x110   : > { %2874 = vmatprep.subr.bf16.mxu1 %v5052_v17  ;;  %v5134_v16 = vld [vmem:[#allocation4 + $0x978] ss:$48 sps:$4 sm:$0xff]   ;;  %v5665_v17 = vshrl.u32 %v607_v12, 7 }
 0x111   : > { %2784 = vmatmul.mubr.bf16.vlgmr.msra.gmra.mxu0 %v5648_v8 }
 0x112   : > { %2825 = vmatmul.mubr.bf16.vlgmr.msra.gmra.mxu1 %v5650_v9  ;;  %2834 = vmatpush1.bf16.msra.mxu0 %v5047_v18  ;;  %v5139_v18 = vld [vmem:[#allocation4 + $0x31c] ss:$48 sps:$4 sm:$0xff]  }
 0x113   : > { %2875 = vmatpush1.bf16.msra.mxu1 %v5050_v19  ;;  %2835 = vmatprep.subr.bf16.mxu0 %v5055_v20  ;;  %v5142_v19 = vld [vmem:[#allocation4 + $0x91c] ss:$48 sps:$4 sm:$0xff]   ;;  %v5137_v20 = vld [vmem:[#allocation4 + $0x318] ss:$48 sps:$4 sm:$0xff]  }
 0x114   : > { %2876 = vmatprep.subr.bf16.mxu1 %v5058_v21  ;;  %2865 = vmatprep.mubr.bf16.mxu0 %v5639_v49  ;;  %v5140_v21 = vld [vmem:[#allocation4 + $0x918] ss:$48 sps:$4 sm:$0xff]  }
 0x115   : > { %2906 = vmatprep.mubr.bf16.mxu1 %v5642_v52 }
 0x116   : > { %2836 = vmatpush1.bf16.msra.mxu0 %v5053_v22  ;;  %v609_v22 = vsub.s32 0, %v5665_v17 }
 0x117   : > { %2877 = vmatpush1.bf16.msra.mxu1 %v5056_v23  ;;  %2837 = vmatprep.subr.bf16.mxu0 %v5061_v24  ;;  %v5668_v23 = vld [vmem:[#allocation6] sm:$0xff] }
 0x118   : > { %2878 = vmatprep.subr.bf16.mxu1 %v5064_v25  ;;  %v5145_v24 = vld [vmem:[#allocation4 + $0x2c4] ss:$48 sps:$4 sm:$0xff]  }
 0x119   : > { %v5226_v25 = vld [vmem:[#allocation4 + $0x8c4] ss:$48 sps:$4 sm:$0xff]  }
 0x11a   : > { %2838 = vmatpush1.bf16.msra.mxu0 %v5059_v26  ;;  %v613_v26 = vsub.s32 1, %v5665_v17 }
 0x11b   : > { %2879 = vmatpush1.bf16.msra.mxu1 %v5062_v27  ;;  %2839 = vmatprep.subr.bf16.mxu0 %v5067_v28  ;;  %v610_v27 = vrot.slane %v5668_v23, %v609_v22  ;;  %v5143_v28 = vld [vmem:[#allocation4 + $0x2c0] ss:$48 sps:$4 sm:$0xff]  }
 0x11c   : > { %2880 = vmatprep.subr.bf16.mxu1 %v5070_v29  ;;  %v5148_v29 = vld [vmem:[#allocation4 + $0x264] ss:$48 sps:$4 sm:$0xff]  }
 0x11e   : > { %2840 = vmatpush1.bf16.msra.mxu0 %v5065_v30  ;;  %v5224_v30 = vld [vmem:[#allocation4 + $0x8c0] ss:$48 sps:$4 sm:$0xff]  }
 0x11f   : > { %2881 = vmatpush1.bf16.msra.mxu1 %v5068_v31  ;;  %2841 = vmatprep.subr.bf16.mxu0 %v5073_v32  ;;  %v614_v31 = vrot.slane %v5668_v23, %v613_v26  ;;  %v5232_v32 = vld [vmem:[#allocation4 + $0x864] ss:$48 sps:$4 sm:$0xff]  }
 0x120   : > { %2882 = vmatprep.subr.bf16.mxu1 %v5076_v33 }
 0x122   : > { %2842 = vmatpush1.bf16.msra.mxu0 %v5071_v34 }
 0x123   : > { %2883 = vmatpush1.bf16.msra.mxu1 %v5074_v35  ;;  %2843 = vmatprep.subr.bf16.mxu0 %v5079_v36  ;;  %v5146_v36 = vld [vmem:[#allocation4 + $0x260] ss:$48 sps:$4 sm:$0xff]  }
 0x124   : > { %2884 = vmatprep.subr.bf16.mxu1 %v5082_v37 }
 0x126   : > { %2844 = vmatpush1.bf16.msra.mxu0 %v5077_v38 }
 0x127   : > { %2885 = vmatpush1.bf16.msra.mxu1 %v5080_v39  ;;  %2845 = vmatprep.subr.bf16.mxu0 %v5085_v40  ;;  %v5151_v39 = vld [vmem:[#allocation4 + $0x204] ss:$48 sps:$4 sm:$0xff]   ;;  %v5230_v40 = vld [vmem:[#allocation4 + $0x860] ss:$48 sps:$4 sm:$0xff]  }
 0x128   : > { %2886 = vmatprep.subr.bf16.mxu1 %v5088_v41 }
 0x12a   : > { %2846 = vmatpush1.bf16.msra.mxu0 %v5083_v42 }
 0x12b   : > { %2887 = vmatpush1.bf16.msra.mxu1 %v5086_v43  ;;  %2847 = vmatprep.subr.bf16.mxu0 %v5091_v44  ;;  %v5238_v43 = vld [vmem:[#allocation4 + $0x804] ss:$48 sps:$4 sm:$0xff]  }
 0x12c   : > { %2888 = vmatprep.subr.bf16.mxu1 %v5094_v45 }
 0x12e   : > { %2848 = vmatpush1.bf16.msra.mxu0 %v5089_v46 }
 0x12f   : > { %2889 = vmatpush1.bf16.msra.mxu1 %v5092_v47  ;;  %2849 = vmatprep.subr.bf16.mxu0 %v5097_v48  ;;  %v5149_v47 = vld [vmem:[#allocation4 + $0x200] ss:$48 sps:$4 sm:$0xff]  }
 0x130   : > { %2890 = vmatprep.subr.bf16.mxu1 %v5100_v50 }
 0x132   : > { %2850 = vmatpush2.bf16.msra.mxu0 %v5095_v51  ;;  %v5154_v51 = vld [vmem:[#allocation4 + $0x1a4] ss:$48 sps:$4 sm:$0xff]  }
 0x133   : > { %2891 = vmatpush2.bf16.msra.mxu1 %v5098_v53  ;;  %2851 = vmatprep.subr.bf16.mxu0 %v5103_v54  ;;  %v5236_v53 = vld [vmem:[#allocation4 + $0x800] ss:$48 sps:$4 sm:$0xff]   ;;  %v5244_v54 = vld [vmem:[#allocation4 + $0x7a4] ss:$48 sps:$4 sm:$0xff]  }
 0x134   : > { %2892 = vmatprep.subr.bf16.mxu1 %v5106_v55  ;;  %v5152_v55 = vld [vmem:[#allocation4 + $0x1a0] ss:$48 sps:$4 sm:$0xff]  }
 0x136   : > { %2852 = vmatpush2.bf16.msra.mxu0 %v5101_v56  ;;  %v5157_v56 = vld [vmem:[#allocation4 + $0x144] ss:$48 sps:$4 sm:$0xff]  }
 0x137   : > { %2893 = vmatpush2.bf16.msra.mxu1 %v5104_v57  ;;  %2853 = vmatprep.subr.bf16.mxu0 %v5109_v58  ;;  %v5242_v57 = vld [vmem:[#allocation4 + $0x7a0] ss:$48 sps:$4 sm:$0xff]   ;;  %v5250_v58 = vld [vmem:[#allocation4 + $0x744] ss:$48 sps:$4 sm:$0xff]  }
 0x138   : > { %2894 = vmatprep.subr.bf16.mxu1 %v5112_v59  ;;  %v5155_v59 = vld [vmem:[#allocation4 + $0x140] ss:$48 sps:$4 sm:$0xff]  }
 0x13a   : > { %2854 = vmatpush2.bf16.msra.mxu0 %v5107_v60  ;;  %v5160_v60 = vld [vmem:[#allocation4 + $0xe4] ss:$48 sps:$4 sm:$0xff]  }
 0x13b   : > { %2895 = vmatpush2.bf16.msra.mxu1 %v5110_v61  ;;  %2855 = vmatprep.subr.bf16.mxu0 %v5115_v62  ;;  %v5248_v61 = vld [vmem:[#allocation4 + $0x740] ss:$48 sps:$4 sm:$0xff]   ;;  %v5256_v62 = vld [vmem:[#allocation4 + $0x6e4] ss:$48 sps:$4 sm:$0xff]  }
 0x13c   : > { %2896 = vmatprep.subr.bf16.mxu1 %v5118_v63  ;;  %v5158_v63 = vld [vmem:[#allocation4 + $0xe0] ss:$48 sps:$4 sm:$0xff]  }
 0x13e   : > { %2856 = vmatpush2.bf16.msra.mxu0 %v5113_v0  ;;  %v5163_v0 = vld [vmem:[#allocation4 + $0x84] ss:$48 sps:$4 sm:$0xff]  }
 0x13f   : > { %2897 = vmatpush2.bf16.msra.mxu1 %v5116_v1  ;;  %2857 = vmatprep.subr.bf16.mxu0 %v5121_v2  ;;  %v5254_v1 = vld [vmem:[#allocation4 + $0x6e0] ss:$48 sps:$4 sm:$0xff]   ;;  %v5259_v2 = vld [vmem:[#allocation4 + $0x684] ss:$48 sps:$4 sm:$0xff]  }
 0x140   : > { %2898 = vmatprep.subr.bf16.mxu1 %v5124_v3  ;;  %v5161_v3 = vld [vmem:[#allocation4 + $0x80] ss:$48 sps:$4 sm:$0xff]  }
 0x142   : > { %2858 = vmatpush2.bf16.msra.mxu0 %v5119_v4  ;;  %v5166_v4 = vld [vmem:[#allocation4 + $0x24] ss:$48 sps:$4 sm:$0xff]  }
 0x143   : > { %2899 = vmatpush2.bf16.msra.mxu1 %v5122_v5  ;;  %2859 = vmatprep.subr.bf16.mxu0 %v5127_v6  ;;  %v5257_v5 = vld [vmem:[#allocation4 + $0x680] ss:$48 sps:$4 sm:$0xff]   ;;  %v5262_v6 = vld [vmem:[#allocation4 + $0x624] ss:$48 sps:$4 sm:$0xff]  }
 0x144   : > { %2900 = vmatprep.subr.bf16.mxu1 %v5130_v7  ;;  %v5164_v7 = vld [vmem:[#allocation4 + $0x20] ss:$48 sps:$4 sm:$0xff]  }
 0x146   : > { %2860 = vmatpush2.bf16.msra.mxu0 %v5125_v10  ;;  %v5169_v10 = vld [vmem:[#allocation4 + $0x5c4] ss:$48 sps:$4 sm:$0xff]  }
 0x147   : > { %2901 = vmatpush2.bf16.msra.mxu1 %v5128_v11  ;;  %2861 = vmatprep.subr.bf16.mxu0 %v5133_v13  ;;  %v5260_v11 = vld [vmem:[#allocation4 + $0x620] ss:$48 sps:$4 sm:$0xff]   ;;  %v5265_v13 = vld [vmem:[#allocation4 + $0xbc4] ss:$48 sps:$4 sm:$0xff]  }
 0x148   : > { %2902 = vmatprep.subr.bf16.mxu1 %v5136_v14  ;;  %v5167_v14 = vld [vmem:[#allocation4 + $0x5c0] ss:$48 sps:$4 sm:$0xff]  }
 0x14a   : > { %2862 = vmatpush2.bf16.msra.mxu0 %v5131_v15  ;;  %v5172_v15 = vld [vmem:[#allocation4 + $0x564] ss:$48 sps:$4 sm:$0xff]  }
 0x14b   : > { %2903 = vmatpush2.bf16.msra.mxu1 %v5134_v16  ;;  %2863 = vmatprep.subr.bf16.mxu0 %v5139_v18  ;;  %v5263_v16 = vld [vmem:[#allocation4 + $0xbc0] ss:$48 sps:$4 sm:$0xff]   ;;  %v5268_v18 = vld [vmem:[#allocation4 + $0xb64] ss:$48 sps:$4 sm:$0xff]  }
 0x14c   : > { %2904 = vmatprep.subr.bf16.mxu1 %v5142_v19  ;;  %v5170_v19 = vld [vmem:[#allocation4 + $0x560] ss:$48 sps:$4 sm:$0xff]  }
 0x14e   : > { %2864 = vmatpush2.bf16.msra.mxu0 %v5137_v20  ;;  %v5175_v20 = vld [vmem:[#allocation4 + $0x504] ss:$48 sps:$4 sm:$0xff]  }
 0x14f   : > { %2905 = vmatpush2.bf16.msra.mxu1 %v5140_v21  ;;  %2915 = vmatprep.subr.bf16.mxu0 %v5145_v24  ;;  %v5266_v21 = vld [vmem:[#allocation4 + $0xb60] ss:$48 sps:$4 sm:$0xff]   ;;  %v5271_v24 = vld [vmem:[#allocation4 + $0xb04] ss:$48 sps:$4 sm:$0xff]  }
 0x150   : > { %2956 = vmatprep.subr.bf16.mxu1 %v5226_v25  ;;  %v5173_v25 = vld [vmem:[#allocation4 + $0x500] ss:$48 sps:$4 sm:$0xff]  }
 0x151   : > { %v2621_v33 = vpop.f32.mrf.mxu0  ;;  %2866 = vmatmul.mubr.bf16.vlgmr.msra.gmra.mxu0 %v5648_v8 }
 0x152   : > { %v2662_v34 = vpop.f32.mrf.mxu1  ;;  %2907 = vmatmul.mubr.bf16.vlgmr.msra.gmra.mxu1 %v5650_v9  ;;  %v2622_v35 = vadd.f32 %v2621_v33, %v610_v27  ;;  %2916 = vmatpush1.bf16.msra.mxu0 %v5143_v28  ;;  %v5178_v27 = vld [vmem:[#allocation4 + $0x4a4] ss:$48 sps:$4 sm:$0xff]   ;;  %v5269_v28 = vld [vmem:[#allocation4 + $0xb00] ss:$48 sps:$4 sm:$0xff]  }
 0x153   : > { %2947 = vmatprep.mubr.bf16.mxu0 %v5639_v49  ;;  %v2623_v37 = vpop.f32.mrf.mxu0  ;;  %2917 = vmatprep.subr.bf16.mxu0 %v5148_v29  ;;  %v5274_v29 = vld [vmem:[#allocation4 + $0xaa4] ss:$48 sps:$4 sm:$0xff]  }
 0x154   : > { %v2664_v38 = vpop.f32.mrf.mxu1  ;;  %2957 = vmatpush1.bf16.msra.mxu1 %v5224_v30  ;;  %v5680_v41 = vadd.f32 %v2662_v34, %v2622_v35  ;;  %v2624_v42 = vadd.f32 %v2623_v37, %v614_v31  ;;  %2988 = vmatprep.mubr.bf16.mxu1 %v5642_v52  ;;  %v5176_v30 = vld [vmem:[#allocation4 + $0x4a0] ss:$48 sps:$4 sm:$0xff]   ;;  %v5181_v31 = vld [vmem:[#allocation4 + $0x444] ss:$48 sps:$4 sm:$0xff]  }
 0x155   : > { %2958 = vmatprep.subr.bf16.mxu1 %v5232_v32  ;;  %v2625_v44 = vpop.f32.mrf.mxu0  ;;  %v5272_v32 = vld [vmem:[#allocation4 + $0xaa0] ss:$48 sps:$4 sm:$0xff]   ;;  %v5277_v33 = vld [vmem:[#allocation4 + $0xa44] ss:$48 sps:$4 sm:$0xff]  }
 0x156   : > { %v2666_v45 = vpop.f32.mrf.mxu1  ;;  %v5683_v46 = vadd.f32 %v2664_v38, %v2624_v42  ;;  %2918 = vmatpush1.bf16.msra.mxu0 %v5146_v36  ;;  %v5179_v34 = vld [vmem:[#allocation4 + $0x440] ss:$48 sps:$4 sm:$0xff]   ;;  %v5184_v35 = vld [vmem:[#allocation4 + $0x3e4] ss:$48 sps:$4 sm:$0xff]  }
 0x157   : > { %v2626_v48 = vpop.f32.mrf.mxu0  ;;  %2919 = vmatprep.subr.bf16.mxu0 %v5151_v39  ;;  %v5275_v36 = vld [vmem:[#allocation4 + $0xa40] ss:$48 sps:$4 sm:$0xff]   ;;  %v5280_v37 = vld [vmem:[#allocation4 + $0x9e4] ss:$48 sps:$4 sm:$0xff]  }
 0x158   : > { %v2667_v50 = vpop.f32.mrf.mxu1  ;;  %2959 = vmatpush1.bf16.msra.mxu1 %v5230_v40  ;;  %v5182_v38 = vld [vmem:[#allocation4 + $0x3e0] ss:$48 sps:$4 sm:$0xff]   ;;  %v5187_v39 = vld [vmem:[#allocation4 + $0x384] ss:$48 sps:$4 sm:$0xff]   ;;  %v617_v48 = vsub.s32 2, %v5665_v17 }
 0x159   : > { %2960 = vmatprep.subr.bf16.mxu1 %v5238_v43  ;;  %v5278_v40 = vld [vmem:[#allocation4 + $0x9e0] ss:$48 sps:$4 sm:$0xff]   ;;  %v5283_v42 = vld [vmem:[#allocation4 + $0x984] ss:$48 sps:$4 sm:$0xff]  }
 0x15a   : > { %2920 = vmatpush1.bf16.msra.mxu0 %v5149_v47  ;;  %v5185_v43 = vld [vmem:[#allocation4 + $0x380] ss:$48 sps:$4 sm:$0xff]   ;;  %v5190_v44 = vld [vmem:[#allocation4 + $0x324] ss:$48 sps:$4 sm:$0xff]  }
 0x15b   : > { %2921 = vmatprep.subr.bf16.mxu0 %v5154_v51  ;;  %v5281_v45 = vld [vmem:[#allocation4 + $0x980] ss:$48 sps:$4 sm:$0xff]   ;;  %v5286_v47 = vld [vmem:[#allocation4 + $0x924] ss:$48 sps:$4 sm:$0xff]   ;;  %v5193_v51 = vld [vmem:[#allocation4 + $0x2cc] ss:$48 sps:$4 sm:$0xff]  }
 0x15c   : > { %2961 = vmatpush1.bf16.msra.mxu1 %v5236_v53  ;;  %v5188_v50 = vld [vmem:[#allocation4 + $0x320] ss:$48 sps:$4 sm:$0xff]  }
 0x15d   : > { %2962 = vmatprep.subr.bf16.mxu1 %v5244_v54  ;;  %v5284_v53 = vld [vmem:[#allocation4 + $0x920] ss:$48 sps:$4 sm:$0xff]   ;;  %v621_v54 = vsub.s32 3, %v5665_v17 }
 0x15e   : > { %2922 = vmatpush1.bf16.msra.mxu0 %v5152_v55  ;;  %v5289_v55 = vld [vmem:[#allocation4 + $0x8cc] ss:$48 sps:$4 sm:$0xff]  }
 0x15f   : > { %2923 = vmatprep.subr.bf16.mxu0 %v5157_v56  ;;  %v618_v56 = vrot.slane %v5668_v23, %v617_v48 }
 0x160   : > { %2963 = vmatpush1.bf16.msra.mxu1 %v5242_v57  ;;  %v5191_v57 = vld [vmem:[#allocation4 + $0x2c8] ss:$48 sps:$4 sm:$0xff]  }
 0x161   : > { %2964 = vmatprep.subr.bf16.mxu1 %v5250_v58  ;;  %v5196_v58 = vld [vmem:[#allocation4 + $0x26c] ss:$48 sps:$4 sm:$0xff]  }
 0x162   : > { %2924 = vmatpush1.bf16.msra.mxu0 %v5155_v59  ;;  %v622_v59 = vrot.slane %v5668_v23, %v621_v54 }
 0x163   : > { %2925 = vmatprep.subr.bf16.mxu0 %v5160_v60  ;;  %v5287_v60 = vld [vmem:[#allocation4 + $0x8c8] ss:$48 sps:$4 sm:$0xff]  }
 0x164   : > { %2965 = vmatpush1.bf16.msra.mxu1 %v5248_v61 }
 0x165   : > { %2966 = vmatprep.subr.bf16.mxu1 %v5256_v62 }
 0x166   : > { %2926 = vmatpush1.bf16.msra.mxu0 %v5158_v63  ;;  %v5292_v63 = vld [vmem:[#allocation4 + $0x86c] ss:$48 sps:$4 sm:$0xff]  }
 0x167   : > { %2927 = vmatprep.subr.bf16.mxu0 %v5163_v0 }
 0x168   : > { %2967 = vmatpush1.bf16.msra.mxu1 %v5254_v1  ;;  %v5194_v1 = vld [vmem:[#allocation4 + $0x268] ss:$48 sps:$4 sm:$0xff]  }
 0x169   : > { %2968 = vmatprep.subr.bf16.mxu1 %v5259_v2 }
 0x16a   : > { %2928 = vmatpush1.bf16.msra.mxu0 %v5161_v3 }
 0x16b   : > { %2929 = vmatprep.subr.bf16.mxu0 %v5166_v4  ;;  %v5199_v4 = vld [vmem:[#allocation4 + $0x20c] ss:$48 sps:$4 sm:$0xff]  }
 0x16c   : > { %2969 = vmatpush1.bf16.msra.mxu1 %v5257_v5 }
 0x16d   : > { %2970 = vmatprep.subr.bf16.mxu1 %v5262_v6 }
 0x16e   : > { %2930 = vmatpush1.bf16.msra.mxu0 %v5164_v7  ;;  %v5290_v7 = vld [vmem:[#allocation4 + $0x868] ss:$48 sps:$4 sm:$0xff]  }
 0x16f   : > { %2931 = vmatprep.subr.bf16.mxu0 %v5169_v10 }
 0x170   : > { %2971 = vmatpush1.bf16.msra.mxu1 %v5260_v11 }
 0x171   : > { %2972 = vmatprep.subr.bf16.mxu1 %v5265_v13  ;;  %v5295_v13 = vld [vmem:[#allocation4 + $0x80c] ss:$48 sps:$4 sm:$0xff]  }
 0x172   : > { %2932 = vmatpush2.bf16.msra.mxu0 %v5167_v14 }
 0x173   : > { %2933 = vmatprep.subr.bf16.mxu0 %v5172_v15 }
 0x174   : > { %2973 = vmatpush2.bf16.msra.mxu1 %v5263_v16 }
 0x175   : > { %2974 = vmatprep.subr.bf16.mxu1 %v5268_v18  ;;  %v5202_v18 = vld [vmem:[#allocation4 + $0x1ac] ss:$48 sps:$4 sm:$0xff]  }
 0x176   : > { %2934 = vmatpush2.bf16.msra.mxu0 %v5170_v19  ;;  %v5293_v19 = vld [vmem:[#allocation4 + $0x808] ss:$48 sps:$4 sm:$0xff]  }
 0x177   : > { %2935 = vmatprep.subr.bf16.mxu0 %v5175_v20  ;;  %v5298_v20 = vld [vmem:[#allocation4 + $0x7ac] ss:$48 sps:$4 sm:$0xff]  }
 0x178   : > { %2975 = vmatpush2.bf16.msra.mxu1 %v5266_v21  ;;  %v5200_v21 = vld [vmem:[#allocation4 + $0x1a8] ss:$48 sps:$4 sm:$0xff]  }
 0x179   : > { %2976 = vmatprep.subr.bf16.mxu1 %v5271_v24  ;;  %v5296_v24 = vld [vmem:[#allocation4 + $0x7a8] ss:$48 sps:$4 sm:$0xff]  }
 0x17a   : > { %2936 = vmatpush2.bf16.msra.mxu0 %v5173_v25  ;;  %v5301_v25 = vld [vmem:[#allocation4 + $0x74c] ss:$48 sps:$4 sm:$0xff]  }
 0x17b   : > { %2937 = vmatprep.subr.bf16.mxu0 %v5178_v27  ;;  %v5203_v27 = vld [vmem:[#allocation4 + $0x148] ss:$48 sps:$4 sm:$0xff]  }
 0x17c   : > { %2977 = vmatpush2.bf16.msra.mxu1 %v5269_v28  ;;  %v5208_v28 = vld [vmem:[#allocation4 + $0xec] ss:$48 sps:$4 sm:$0xff]  }
 0x17d   : > { %2978 = vmatprep.subr.bf16.mxu1 %v5274_v29  ;;  %v5299_v29 = vld [vmem:[#allocation4 + $0x748] ss:$48 sps:$4 sm:$0xff]  }
 0x17e   : > { %2938 = vmatpush2.bf16.msra.mxu0 %v5176_v30  ;;  %v5304_v30 = vld [vmem:[#allocation4 + $0x6ec] ss:$48 sps:$4 sm:$0xff]  }
 0x17f   : > { %2939 = vmatprep.subr.bf16.mxu0 %v5181_v31  ;;  %v5206_v31 = vld [vmem:[#allocation4 + $0xe8] ss:$48 sps:$4 sm:$0xff]  }
 0x180   : > { %2979 = vmatpush2.bf16.msra.mxu1 %v5272_v32  ;;  %v5211_v32 = vld [vmem:[#allocation4 + $0x8c] ss:$48 sps:$4 sm:$0xff]  }
 0x181   : > { %2980 = vmatprep.subr.bf16.mxu1 %v5277_v33  ;;  %v5302_v33 = vld [vmem:[#allocation4 + $0x6e8] ss:$48 sps:$4 sm:$0xff]  }
 0x182   : > { %2940 = vmatpush2.bf16.msra.mxu0 %v5179_v34  ;;  %v5307_v34 = vld [vmem:[#allocation4 + $0x68c] ss:$48 sps:$4 sm:$0xff]  }
 0x183   : > { %2941 = vmatprep.subr.bf16.mxu0 %v5184_v35  ;;  %v5209_v35 = vld [vmem:[#allocation4 + $0x88] ss:$48 sps:$4 sm:$0xff]  }
 0x184   : > { %2981 = vmatpush2.bf16.msra.mxu1 %v5275_v36  ;;  %v5214_v36 = vld [vmem:[#allocation4 + $0x2c] ss:$48 sps:$4 sm:$0xff]  }
 0x185   : > { %2982 = vmatprep.subr.bf16.mxu1 %v5280_v37  ;;  %v5305_v37 = vld [vmem:[#allocation4 + $0x688] ss:$48 sps:$4 sm:$0xff]  }
 0x186   : > { %2942 = vmatpush2.bf16.msra.mxu0 %v5182_v38  ;;  %v5310_v38 = vld [vmem:[#allocation4 + $0x62c] ss:$48 sps:$4 sm:$0xff]  }
 0x187   : > { %2943 = vmatprep.subr.bf16.mxu0 %v5187_v39  ;;  %v5212_v39 = vld [vmem:[#allocation4 + $0x28] ss:$48 sps:$4 sm:$0xff]  }
 0x188   : > { %2983 = vmatpush2.bf16.msra.mxu1 %v5278_v40  ;;  %v5217_v40 = vld [vmem:[#allocation4 + $0x5cc] ss:$48 sps:$4 sm:$0xff]  }
 0x189   : > { %2984 = vmatprep.subr.bf16.mxu1 %v5283_v42  ;;  %v5308_v42 = vld [vmem:[#allocation4 + $0x628] ss:$48 sps:$4 sm:$0xff]  }
 0x18a   : > { %2944 = vmatpush2.bf16.msra.mxu0 %v5185_v43  ;;  %v5313_v43 = vld [vmem:[#allocation4 + $0xbcc] ss:$48 sps:$4 sm:$0xff]  }
 0x18b   : > { %2945 = vmatprep.subr.bf16.mxu0 %v5190_v44  ;;  %v5215_v44 = vld [vmem:[#allocation4 + $0x5c8] ss:$48 sps:$4 sm:$0xff]  }
 0x18c   : > { %2985 = vmatpush2.bf16.msra.mxu1 %v5281_v45  ;;  %v5220_v45 = vld [vmem:[#allocation4 + $0x56c] ss:$48 sps:$4 sm:$0xff]  }
 0x18d   : > { %2986 = vmatprep.subr.bf16.mxu1 %v5286_v47  ;;  %v5311_v47 = vld [vmem:[#allocation4 + $0xbc8] ss:$48 sps:$4 sm:$0xff]  }
 0x18e   : > { %2946 = vmatpush2.bf16.msra.mxu0 %v5188_v50  ;;  %v5316_v50 = vld [vmem:[#allocation4 + $0xb6c] ss:$48 sps:$4 sm:$0xff]  }
 0x18f   : > { %2997 = vmatprep.subr.bf16.mxu0 %v5193_v51  ;;  %v5218_v51 = vld [vmem:[#allocation4 + $0x568] ss:$48 sps:$4 sm:$0xff]  }
 0x190   : > { %2987 = vmatpush2.bf16.msra.mxu1 %v5284_v53  ;;  %v5223_v53 = vld [vmem:[#allocation4 + $0x50c] ss:$48 sps:$4 sm:$0xff]  }
 0x191   : > { %3038 = vmatprep.subr.bf16.mxu1 %v5289_v55  ;;  %v2703_v61 = vpop.f32.mrf.mxu0  ;;  %2948 = vmatmul.mubr.bf16.vlgmr.msra.gmra.mxu0 %v5648_v8  ;;  %v5314_v55 = vld [vmem:[#allocation4 + $0xb68] ss:$48 sps:$4 sm:$0xff]  }
 0x192   : > { %v2744_v62 = vpop.f32.mrf.mxu1  ;;  %v2704_v0 = vadd.f32 %v2703_v61, %v618_v56  ;;  %2998 = vmatpush1.bf16.msra.mxu0 %v5191_v57  ;;  %3029 = vmatprep.mubr.bf16.mxu0 %v5639_v49  ;;  %v5197_v49 = vld [vmem:[#allocation4 + $0x208] ss:$48 sps:$4 sm:$0xff]   ;;  %v5319_v56 = vld [vmem:[#allocation4 + $0xb0c] ss:$48 sps:$4 sm:$0xff]  }
 0x193   : > { %v2705_v2 = vpop.f32.mrf.mxu0  ;;  %2999 = vmatprep.subr.bf16.mxu0 %v5196_v58  ;;  %2989 = vmatmul.mubr.bf16.vlgmr.msra.gmra.mxu1 %v5650_v9  ;;  %v5221_v57 = vld [vmem:[#allocation4 + $0x508] ss:$48 sps:$4 sm:$0xff]   ;;  %v5229_v58 = vld [vmem:[#allocation4 + $0x4ac] ss:$48 sps:$4 sm:$0xff]  }
 0x194   : > { %v2746_v3 = vpop.f32.mrf.mxu1  ;;  %v5696_v5 = vadd.f32 %v2744_v62, %v2704_v0  ;;  %v2706_v6 = vadd.f32 %v2705_v2, %v622_v59  ;;  %3039 = vmatpush1.bf16.msra.mxu1 %v5287_v60  ;;  %3070 = vmatprep.mubr.bf16.mxu1 %v5642_v52  ;;  %v5205_v52 = vld [vmem:[#allocation4 + $0x14c] ss:$48 sps:$4 sm:$0xff]   ;;  %v5317_v59 = vld [vmem:[#allocation4 + $0xb08] ss:$48 sps:$4 sm:$0xff]  }
 0x195   : > { %v2707_v10 = vpop.f32.mrf.mxu0  ;;  %3040 = vmatprep.subr.bf16.mxu1 %v5292_v63  ;;  %v5322_v60 = vld [vmem:[#allocation4 + $0xaac] ss:$48 sps:$4 sm:$0xff]   ;;  %v5227_v61 = vld [vmem:[#allocation4 + $0x4a8] ss:$48 sps:$4 sm:$0xff]  }
 0x196   : > { %v2748_v11 = vpop.f32.mrf.mxu1  ;;  %v5699_v14 = vadd.f32 %v2746_v3, %v2706_v6  ;;  %3000 = vmatpush1.bf16.msra.mxu0 %v5194_v1  ;;  %v5235_v62 = vld [vmem:[#allocation4 + $0x44c] ss:$48 sps:$4 sm:$0xff]   ;;  %v5320_v63 = vld [vmem:[#allocation4 + $0xaa8] ss:$48 sps:$4 sm:$0xff]  }
 0x197   : > { %v2708_v15 = vpop.f32.mrf.mxu0  ;;  %3001 = vmatprep.subr.bf16.mxu0 %v5199_v4  ;;  %v5325_v0 = vld [vmem:[#allocation4 + $0xa4c] ss:$48 sps:$4 sm:$0xff]   ;;  %v5233_v1 = vld [vmem:[#allocation4 + $0x448] ss:$48 sps:$4 sm:$0xff]  }
 0x198   : > { %v2749_v16 = vpop.f32.mrf.mxu1  ;;  %3041 = vmatpush1.bf16.msra.mxu1 %v5290_v7  ;;  %v5241_v2 = vld [vmem:[#allocation4 + $0x3ec] ss:$48 sps:$4 sm:$0xff]   ;;  %v5323_v3 = vld [vmem:[#allocation4 + $0xa48] ss:$48 sps:$4 sm:$0xff]  }
 0x199   : > { %3042 = vmatprep.subr.bf16.mxu1 %v5295_v13  ;;  %v5328_v4 = vld [vmem:[#allocation4 + $0x9ec] ss:$48 sps:$4 sm:$0xff]   ;;  %v5239_v6 = vld [vmem:[#allocation4 + $0x3e8] ss:$48 sps:$4 sm:$0xff]  }
 0x19a   : > { %3002 = vmatpush1.bf16.msra.mxu0 %v5197_v49  ;;  %v5247_v7 = vld [vmem:[#allocation4 + $0x38c] ss:$48 sps:$4 sm:$0xff]   ;;  %v5326_v10 = vld [vmem:[#allocation4 + $0x9e8] ss:$48 sps:$4 sm:$0xff]  }
 0x19b   : > { %3003 = vmatprep.subr.bf16.mxu0 %v5202_v18  ;;  %v5331_v11 = vld [vmem:[#allocation4 + $0x98c] ss:$48 sps:$4 sm:$0xff]   ;;  %v5245_v13 = vld [vmem:[#allocation4 + $0x388] ss:$48 sps:$4 sm:$0xff]   ;;  %v625_v18 = vsub.s32 4, %v5665_v17 }
 0x19c   : > { %3043 = vmatpush1.bf16.msra.mxu1 %v5293_v19  ;;  %v5253_v49 = vld [vmem:[#allocation4 + $0x32c] ss:$48 sps:$4 sm:$0xff]   ;;  %v5329_v15 = vld [vmem:[#allocation4 + $0x988] ss:$48 sps:$4 sm:$0xff]  }
 0x19d   : > { %3044 = vmatprep.subr.bf16.mxu1 %v5298_v20  ;;  %v5334_v16 = vld [vmem:[#allocation4 + $0x92c] ss:$48 sps:$4 sm:$0xff]   ;;  %v5251_v19 = vld [vmem:[#allocation4 + $0x328] ss:$48 sps:$4 sm:$0xff]   ;;  %v629_v20 = vsub.s32 5, %v5665_v17 }
 0x19e   : > { %3004 = vmatpush1.bf16.msra.mxu0 %v5200_v21  ;;  %v5332_v21 = vld [vmem:[#allocation4 + $0x928] ss:$48 sps:$4 sm:$0xff]  }
 0x19f   : > { %3005 = vmatprep.subr.bf16.mxu0 %v5205_v52  ;;  %v626_v52 = vrot.slane %v5668_v23, %v625_v18 }
 0x1a0   : > { %3045 = vmatpush1.bf16.msra.mxu1 %v5296_v24  ;;  %v5492_v24 = vmov 0.0  }
 0x1a1   : > { %3046 = vmatprep.subr.bf16.mxu1 %v5301_v25  ;;  %v630_v25 = vrot.slane %v5668_v23, %v629_v20 }
 0x1a2   : > { %3006 = vmatpush1.bf16.msra.mxu0 %v5203_v27 }
 0x1a3   : > { %3007 = vmatprep.subr.bf16.mxu0 %v5208_v28 }
 0x1a4   : > { %3047 = vmatpush1.bf16.msra.mxu1 %v5299_v29 }
 0x1a5   : > { %3048 = vmatprep.subr.bf16.mxu1 %v5304_v30 }
 0x1a6   : > { %3008 = vmatpush1.bf16.msra.mxu0 %v5206_v31 }
 0x1a7   : > { %3009 = vmatprep.subr.bf16.mxu0 %v5211_v32 }
 0x1a8   : > { %3049 = vmatpush1.bf16.msra.mxu1 %v5302_v33 }
 0x1a9   : > { %3050 = vmatprep.subr.bf16.mxu1 %v5307_v34 }
 0x1aa   : > { %3010 = vmatpush1.bf16.msra.mxu0 %v5209_v35 }
 0x1ab   : > { %3011 = vmatprep.subr.bf16.mxu0 %v5214_v36 }
 0x1ac   : > { %3051 = vmatpush1.bf16.msra.mxu1 %v5305_v37 }
 0x1ad   : > { %3052 = vmatprep.subr.bf16.mxu1 %v5310_v38 }
 0x1ae   : > { %3012 = vmatpush1.bf16.msra.mxu0 %v5212_v39 }
 0x1af   : > { %3013 = vmatprep.subr.bf16.mxu0 %v5217_v40 }
 0x1b0   : > { %3053 = vmatpush1.bf16.msra.mxu1 %v5308_v42  ;;  %v3312_v42 = vpack.c.bf16 %v5683_v46, %v5683_v46  ;;  %v633_v46 = vsub.s32 6, %v5665_v17 }
 0x1b1   : > { %3054 = vmatprep.subr.bf16.mxu1 %v5313_v43  ;;  %v5725_v43 = vpack.c.bf16 %v5696_v5, %v5696_v5  ;;  %v637_v5 = vsub.s32 7, %v5665_v17 }
 0x1b2   : > { %3014 = vmatpush2.bf16.msra.mxu0 %v5215_v44  ;;  %v634_v44 = vrot.slane %v5668_v23, %v633_v46 }
 0x1b3   : > { %3015 = vmatprep.subr.bf16.mxu0 %v5220_v45  ;;  %v638_v45 = vrot.slane %v5668_v23, %v637_v5 }
 0x1b4   : > { %3055 = vmatpush2.bf16.msra.mxu1 %v5311_v47 }
 0x1b5   : > { %3056 = vmatprep.subr.bf16.mxu1 %v5316_v50 }
 0x1b6   : > { %3016 = vmatpush2.bf16.msra.mxu0 %v5218_v51 }
 0x1b7   : > { %3017 = vmatprep.subr.bf16.mxu0 %v5223_v53 }
 0x1b8   : > { %3057 = vmatpush2.bf16.msra.mxu1 %v5314_v55 }
 0x1b9   : > { %3058 = vmatprep.subr.bf16.mxu1 %v5319_v56 }
 0x1ba   : > { %3018 = vmatpush2.bf16.msra.mxu0 %v5221_v57 }
 0x1bb   : > { %3019 = vmatprep.subr.bf16.mxu0 %v5229_v58 }
 0x1bc   : > { %3059 = vmatpush2.bf16.msra.mxu1 %v5317_v59 }
 0x1bd   : > { %3060 = vmatprep.subr.bf16.mxu1 %v5322_v60 }
 0x1be   : > { %3020 = vmatpush2.bf16.msra.mxu0 %v5227_v61 }
 0x1bf   : > { %3021 = vmatprep.subr.bf16.mxu0 %v5235_v62 }
 0x1c0   : > { %3061 = vmatpush2.bf16.msra.mxu1 %v5320_v63 }
 0x1c1   : > { %3062 = vmatprep.subr.bf16.mxu1 %v5325_v0 }
 0x1c2   : > { %3022 = vmatpush2.bf16.msra.mxu0 %v5233_v1  ;;  %v604_v1 = vld [vmem:[#allocation6 + $0x8] sm:$0xf] }
 0x1c3   : > { %3023 = vmatprep.subr.bf16.mxu0 %v5241_v2  ;;  %v642_v2 = vrot.slane %v604_v1, %v609_v22 }
 0x1c4   : > { %3063 = vmatpush2.bf16.msra.mxu1 %v5323_v3  ;;  %v646_v3 = vrot.slane %v604_v1, %v613_v26 }
 0x1c5   : > { %3064 = vmatprep.subr.bf16.mxu1 %v5328_v4 }
 0x1c6   : > { %3024 = vmatpush2.bf16.msra.mxu0 %v5239_v6 }
 0x1c7   : > { %3025 = vmatprep.subr.bf16.mxu0 %v5247_v7 }
 0x1c8   : > { %3065 = vmatpush2.bf16.msra.mxu1 %v5326_v10 }
 0x1c9   : > { %3066 = vmatprep.subr.bf16.mxu1 %v5331_v11 }
 0x1ca   : > { %3026 = vmatpush2.bf16.msra.mxu0 %v5245_v13 }
 0x1cb   : > { %3027 = vmatprep.subr.bf16.mxu0 %v5253_v49 }
 0x1cc   : > { %3067 = vmatpush2.bf16.msra.mxu1 %v5329_v15 }
 0x1cd   : > { %3068 = vmatprep.subr.bf16.mxu1 %v5334_v16 }
 0x1ce   : > { %3028 = vmatpush2.bf16.msra.mxu0 %v5251_v19 }
 0x1cf   : > { %4598 = vmatprep.subr.bf16.mxu0 %v5492_v24 }
 0x1d0   : > { %3069 = vmatpush2.bf16.msra.mxu1 %v5332_v21 }
 0x1d1   : > { %v2785_v27 = vpop.f32.mrf.mxu0  ;;  %3030 = vmatmul.mubr.bf16.vlgmr.msra.gmra.mxu0 %v5648_v8  ;;  %4604 = vmatprep.subr.bf16.mxu1 %v5492_v24 }
 0x1d2   : > { %v2826_v28 = vpop.f32.mrf.mxu1  ;;  %v2786_v29 = vadd.f32 %v2785_v27, %v626_v52  ;;  %4600 = vmatprep.mubr.msk.bf16.mxu0 %vm5493_vm0, %v5492_v24 }
 0x1d3   : > { %v2787_v30 = vpop.f32.mrf.mxu0  ;;  %3071 = vmatmul.mubr.bf16.vlgmr.msra.gmra.mxu1 %v5650_v9  ;;  %v3084_v9 = vpack.c.bf16 %v5680_v41, %v5680_v41  ;;  %v5734_v41 = vpack.c.bf16 %v5699_v14, %v5699_v14 }
 0x1d4   : > { %v2828_v31 = vpop.f32.mrf.mxu1  ;;  %v2827_v32 = vadd.f32 %v2826_v28, %v2786_v29  ;;  %v2788_v33 = vadd.f32 %v2787_v30, %v630_v25  ;;  %4606 = vmatprep.mubr.msk.bf16.mxu1 %vm5493_vm0, %v5492_v24 }
 0x1d5   : > { %v2789_v34 = vpop.f32.mrf.mxu0 }
 0x1d6   : > { %v2830_v35 = vpop.f32.mrf.mxu1  ;;  %v3085_v8 = vpack.c.bf16 %v2827_v32, %v2827_v32  ;;  %v2829_v36 = vadd.f32 %v2828_v31, %v2788_v33  ;;  %v650_v32 = vrot.slane %v604_v1, %v617_v48  ;;  %v654_v33 = vrot.slane %v604_v1, %v621_v54 }
 0x1d7   : > { %v2790_v37 = vpop.f32.mrf.mxu0 }
 0x1d8   : > { %v2831_v38 = vpop.f32.mrf.mxu1  ;;  %v3092_v39 = vsel %vm3087_vm1, %v3085_v8, 0  ;;  %v3313_v40 = vpack.c.bf16 %v2829_v36, %v2829_v36  ;;  %3200 = vrot.lane.b32.xlu0 %v3085_v8, %s5494_s17 }
 0x1d9   : > { %4599 = vmatpush3.bf16.xpose.msra.mxu0 %v3092_v39 }
 0x1da   : > { %3426 = vrot.lane.b32.xlu1 %v3313_v40, %s5494_s17  ;;  %4610 = vmatprep.subr.bf16.mxu0 %v5492_v24  ;;  %v3319_v10 = vsel %vm3087_vm1, %v3313_v40, 0 }
 0x1dc   : > { %3197 = vrot.lane.b32.xlu0 %v3084_v9, %s5494_s17 }
 0x1de   : > { %3423 = vrot.lane.b32.xlu1 %v3312_v42, %s5494_s17 }
 0x1e0   : > { %4601 = vmatmul.mubr.msk.bf16.vlgmr.msra.gmra.mxu0 %vm3087_vm1, %v3084_v9 }
 0x1e1   : > { %4612 = vmatprep.mubr.msk.bf16.mxu0 %vm5493_vm0, %v5492_v24 }
 0x1e2   : > { %3649 = vrot.lane.b32.xlu1 %v5725_v43, %s5494_s17 }
 0x1e6   : > { %3875 = vrot.lane.b32.xlu1 %v5734_v41, %s5494_s17 }
 0x211   : > { %v2867_v47 = vpop.f32.mrf.mxu0 }
 0x212   : > { %v2908_v50 = vpop.f32.mrf.mxu1  ;;  %v2868_v51 = vadd.f32 %v2867_v47, %v634_v44  ;;  %v3082_v44 = vand.u32 127, %v607_v12 }
 0x213   : > { %v2869_v53 = vpop.f32.mrf.mxu0 }
 0x214   : > { %v2910_v55 = vpop.f32.mrf.mxu1  ;;  %v2909_v56 = vadd.f32 %v2908_v50, %v2868_v51  ;;  %v2870_v57 = vadd.f32 %v2869_v53, %v638_v45  ;;  %vm5798_vm3 = vcmp.le.s32.totalorder %v3082_v44, %v5665_v17 }
 0x215   : > { %v2871_v14 = vpop.f32.mrf.mxu0 }
 0x216   : > { %v2912_v58 = vpop.f32.mrf.mxu1  ;;  %v3539_v59 = vpack.c.bf16 %v2909_v56, %v2909_v56  ;;  %v2911_v60 = vadd.f32 %v2910_v55, %v2870_v57 }
 0x217   : > { %v2872_v61 = vpop.f32.mrf.mxu0 }
 0x218   : > { %v2913_v62 = vpop.f32.mrf.mxu1  ;;  %v3765_v63 = vpack.c.bf16 %v2911_v60, %v2911_v60  ;;  %3652 = vrot.lane.b32.xlu0 %v3539_v59, %s5494_s17  ;;  %v3545_v29 = vsel %vm3087_vm1, %v3539_v59, 0 }
 0x21a   : > { %v3771_v36 = vsel %vm3087_vm1, %v3765_v63, 0 }
 0x21c   : > { %3878 = vrot.lane.b32.xlu0 %v3765_v63, %s5494_s17 }
 0x24a   : > { %v3201_v0 = vpop.permute.xlu0 %3200 }
 0x24b   : > { %v3206_v23 = vsel %vm3087_vm1, %v3201_v0, 0 }
 0x24c   : > { %4611 = vmatpush3.bf16.xpose.msra.mxu0 %v3206_v23  ;;  %v3427_v21 = vpop.permute.xlu1 %3426 }
 0x24d   : > { %4622 = vmatprep.subr.bf16.mxu0 %v5492_v24  ;;  %v3432_v27 = vsel %vm3087_vm1, %v3427_v21, 0 }
 0x24e   : > { %v3198_v6 = vpop.permute.xlu0 %3197 }
 0x250   : > { %v3424_v28 = vpop.permute.xlu1 %3423 }
 0x251   : > { %v2949_v4 = vpop.f32.mrf.mxu0 }
 0x252   : > { %v2950_v7 = vadd.f32 %v2949_v4, %v642_v2 }
 0x253   : > { %4613 = vmatmul.mubr.msk.bf16.vlgmr.msra.gmra.mxu0 %vm3087_vm1, %v3198_v6  ;;  %v2951_v11 = vpop.f32.mrf.mxu0  ;;  %v2990_v13 = vpop.f32.mrf.mxu1 }
 0x254   : > { %4623 = vmatpush3.bf16.xpose.msra.mxu0 %v3319_v10  ;;  %4624 = vmatprep.mubr.msk.bf16.mxu0 %vm5493_vm0, %v5492_v24  ;;  %v2952_v49 = vadd.f32 %v2951_v11, %v646_v3  ;;  %v2991_v15 = vadd.f32 %v2990_v13, %v2950_v7  ;;  %v3650_v35 = vpop.permute.xlu1 %3649 }
 0x255   : > { %4634 = vmatprep.subr.bf16.mxu0 %v5492_v24  ;;  %v2953_v22 = vpop.f32.mrf.mxu0  ;;  %v2992_v26 = vpop.f32.mrf.mxu1 }
 0x256   : > { %v5755_v16 = vpack.c.bf16 %v2991_v15, %v2991_v15  ;;  %v5757_v18 = vadd.f32 %v2992_v26, %v2952_v49 }
 0x257   : > { %v2954_v19 = vpop.f32.mrf.mxu0  ;;  %v2994_v20 = vpop.f32.mrf.mxu1 }
 0x258   : > { %v3153_v52 = vsel %vm3151_vm2, %v5755_v16, 0  ;;  %v3876_v12 = vpop.permute.xlu1 %3875 }
 0x259   : > { %4605 = vmatpush3.bf16.msra.mxu1 %v3153_v52  ;;  %v2995_v25 = vpop.f32.mrf.mxu1 }
 0x25a   : > { %4616 = vmatprep.subr.bf16.mxu1 %v5492_v24 }
 0x25b   : > { %4625 = vmatmul.mubr.msk.bf16.vlgmr.msra.gmra.mxu0 %vm3087_vm1, %v3312_v42 }
 0x25c   : > { %4635 = vmatpush3.bf16.xpose.msra.mxu0 %v3432_v27  ;;  %4636 = vmatprep.mubr.msk.bf16.mxu0 %vm5493_vm0, %v5492_v24 }
 0x25d   : > { %4646 = vmatprep.subr.bf16.mxu0 %v5492_v24 }
 0x263   : > { %4637 = vmatmul.mubr.msk.bf16.vlgmr.msra.gmra.mxu0 %vm3087_vm1, %v3424_v28 }
 0x264   : > { %4647 = vmatpush3.bf16.xpose.msra.mxu0 %v3545_v29  ;;  %4648 = vmatprep.mubr.msk.bf16.mxu0 %vm5493_vm0, %v5492_v24 }
 0x265   : > { %4658 = vmatprep.subr.bf16.mxu0 %v5492_v24 }
 0x26b   : > { %4649 = vmatmul.mubr.msk.bf16.vlgmr.msra.gmra.mxu0 %vm3087_vm1, %v5725_v43 }
 0x26c   : > { %4660 = vmatprep.mubr.msk.bf16.mxu0 %vm5493_vm0, %v5492_v24 }
 0x28a   : > { %v3653_v30 = vpop.permute.xlu0 %3652 }
 0x28b   : > { %v3658_v31 = vsel %vm3087_vm1, %v3653_v30, 0 }
 0x28c   : > { %4659 = vmatpush3.bf16.xpose.msra.mxu0 %v3658_v31 }
 0x28d   : > { %4670 = vmatprep.subr.bf16.mxu0 %v5492_v24 }
 0x28e   : > { %v3879_v46 = vpop.permute.xlu0 %3878 }
 0x28f   : > { %v3884_v45 = vsel %vm3087_vm1, %v3879_v46, 0 }
 0x291   : > { %v3031_v34 = vpop.f32.mrf.mxu0 }
 0x292   : > { %v3032_v8 = vadd.f32 %v3031_v34, %v650_v32 }
 0x293   : > { %4661 = vmatmul.mubr.msk.bf16.vlgmr.msra.gmra.mxu0 %vm3087_vm1, %v3650_v35  ;;  %v3033_v37 = vpop.f32.mrf.mxu0  ;;  %v3072_v38 = vpop.f32.mrf.mxu1 }
 0x294   : > { %4671 = vmatpush3.bf16.xpose.msra.mxu0 %v3771_v36  ;;  %v3034_v39 = vadd.f32 %v3033_v37, %v654_v33  ;;  %4672 = vmatprep.mubr.msk.bf16.mxu0 %vm5493_vm0, %v5492_v24  ;;  %v5786_v40 = vadd.f32 %v3072_v38, %v3032_v8 }
 0x295   : > { %4682 = vmatprep.subr.bf16.mxu0 %v5492_v24  ;;  %v3035_v48 = vpop.f32.mrf.mxu0  ;;  %v3074_v54 = vpop.f32.mrf.mxu1 }
 0x296   : > { %v5789_v9 = vadd.f32 %v3074_v54, %v3034_v39 }
 0x297   : > { %v3036_v42 = vpop.f32.mrf.mxu0  ;;  %v3076_v43 = vpop.f32.mrf.mxu1 }
 0x299   : > { %v3077_v5 = vpop.f32.mrf.mxu1 }
 0x29b   : > { %4673 = vmatmul.mubr.msk.bf16.vlgmr.msra.gmra.mxu0 %vm3087_vm1, %v5734_v41 }
 0x29c   : > { %4683 = vmatpush3.bf16.xpose.msra.mxu0 %v3884_v45  ;;  %4684 = vmatprep.mubr.msk.bf16.mxu0 %vm5493_vm0, %v5492_v24 }
 0x2a0   : > { %v3128_v50 = vpop.f32.mrf.mxu0 }
 0x2a1   : > { %v3134_v51 = vsel %vm5798_vm3, %v3128_v50, -1e+30 }
 0x2a2   : > { %v4602_v53 = vpop.f32.mrf.mxu0  ;;  %v3136_v55 = vsel %vm3135_vm4, %v3134_v51, -inf }
 0x2a3   : > { %4685 = vmatmul.mubr.msk.bf16.vlgmr.msra.gmra.mxu0 %vm3087_vm1, %v3876_v12  ;;  %3137 = vmax.xlane.f32.xlu0 %v3136_v55 }
 0x2a4   : > { %v3131_v41 = vpop.f32.mrf.mxu0 }
 0x2a6   : > { %v4603_v56 = vpop.f32.mrf.mxu0 }
 0x313   : > { %v3242_v57 = vpop.f32.mrf.mxu0 }
 0x314   : > { %v3248_v17 = vsel %vm5798_vm3, %v3242_v57, -1e+30 }
 0x315   : > { %v4614_v14 = vpop.f32.mrf.mxu0  ;;  %v3249_v58 = vsel %vm3135_vm4, %v3248_v17, -inf }
 0x316   : > { %3250 = vmax.xlane.f32.xlu1 %v3249_v58  ;;  %v3314_v58 = vpack.c.bf16 %v5757_v18, %v5757_v18 }
 0x317   : > { %v3245_v59 = vpop.f32.mrf.mxu0 }
 0x319   : > { %v4615_v60 = vpop.f32.mrf.mxu0 }
 0x31b   : > { %v3355_v61 = vpop.f32.mrf.mxu0 }
 0x31c   : > { %v3361_v62 = vsel %vm5798_vm3, %v3355_v61, -1e+30 }
 0x31d   : > { %v4626_v63 = vpop.f32.mrf.mxu0  ;;  %v3362_v0 = vsel %vm3135_vm4, %v3361_v62, -inf }
 0x31e   : > { %3363 = vmax.xlane.f32.xlu0 %v3362_v0 }
 0x31f   : > { %v3358_v23 = vpop.f32.mrf.mxu0 }
 0x321   : > { %v4627_v1 = vpop.f32.mrf.mxu0 }
 0x323   : > { %v3468_v2 = vpop.f32.mrf.mxu0 }
 0x324   : > { %v3474_v3 = vsel %vm5798_vm3, %v3468_v2, -1e+30 }
 0x325   : > { %v4638_v4 = vpop.f32.mrf.mxu0  ;;  %v3475_v6 = vsel %vm3135_vm4, %v3474_v3, -inf }
 0x326   : > { %3476 = vmax.xlane.f32.xlu0 %v3475_v6 }
 0x327   : > { %v3471_v7 = vpop.f32.mrf.mxu0 }
 0x329   : > { %v4639_v10 = vpop.f32.mrf.mxu0 }
 0x32b   : > { %v3581_v11 = vpop.f32.mrf.mxu0 }
 0x32c   : > { %v3587_v13 = vsel %vm5798_vm3, %v3581_v11, -1e+30  ;;  %v3138_v19 = vpop.xlane.xlu0 %3137 }
 0x32d   : > { %v4650_v49 = vpop.f32.mrf.mxu0  ;;  %v3588_v15 = vsel %vm3135_vm4, %v3587_v13, -inf  ;;  %v3139_v20 = vsub.f32 %v3134_v51, %v3138_v19 }
 0x32e   : > { %3589 = vmax.xlane.f32.xlu1 %v3588_v15 }
 0x32f   : > { %v3584_v22 = vpop.f32.mrf.mxu0  ;;  %v3140_v21 = vmul.f32 1.442695, %v3139_v20 }
 0x331   : > { %v4651_v26 = vpop.f32.mrf.mxu0  ;;  %5335 = vpow2.f32 %v3140_v21  ;;  %v3540_v21 = vpack.c.bf16 %v5786_v40, %v5786_v40 }
 0x33e   : > { %v5824_v35 = vpop.eup %5335 }
 0x33f   : > { %v3142_v37 = vsel %vm3135_vm4, %v5824_v35, 0.0 }
 0x353   : > { %v3694_v52 = vpop.f32.mrf.mxu0 }
 0x354   : > { %v3700_v25 = vsel %vm5798_vm3, %v3694_v52, -1e+30  ;;  %v3766_v52 = vpack.c.bf16 %v5789_v9, %v5789_v9  ;;  %v3378_v9 = vsel %vm3151_vm2, %v3314_v58, 0 }
 0x355   : > { %v4662_v27 = vpop.f32.mrf.mxu0  ;;  %v3701_v28 = vsel %vm3135_vm4, %v3700_v25, -inf }
 0x356   : > { %3702 = vmax.xlane.f32.xlu0 %v3701_v28 }
 0x357   : > { %v3697_v29 = vpop.f32.mrf.mxu0 }
 0x359   : > { %v4663_v30 = vpop.f32.mrf.mxu0 }
 0x35b   : > { %v3807_v31 = vpop.f32.mrf.mxu0 }
 0x35c   : > { %v3813_v32 = vsel %vm5798_vm3, %v3807_v31, -1e+30 }
 0x35d   : > { %v4674_v33 = vpop.f32.mrf.mxu0  ;;  %v3814_v34 = vsel %vm3135_vm4, %v3813_v32, -inf }
 0x35e   : > { %3815 = vmax.xlane.f32.xlu1 %v3814_v34 }
 0x35f   : > { %v3810_v8 = vpop.f32.mrf.mxu0 }
 0x361   : > { %v4675_v36 = vpop.f32.mrf.mxu0 }
 0x362   : > { %3143 = vadd.xlane.f32.xlu1 %v3142_v37 }
 0x363   : > { %v3920_v38 = vpop.f32.mrf.mxu0 }
 0x364   : > { %v3926_v39 = vsel %vm5798_vm3, %v3920_v38, -1e+30 }
 0x365   : > { %v4686_v48 = vpop.f32.mrf.mxu0  ;;  %v3927_v54 = vsel %vm3135_vm4, %v3926_v39, -inf }
 0x366   : > { %3928 = vmax.xlane.f32.xlu0 %v3927_v54  ;;  %v3604_v48 = vsel %vm3151_vm2, %v3540_v21, 0 }
 0x367   : > { %v3923_v42 = vpop.f32.mrf.mxu0 }
 0x369   : > { %v4687_v43 = vpop.f32.mrf.mxu0 }
 0x39f   : > { %v3251_v46 = vpop.xlane.xlu1 %3250 }
 0x3a0   : > { %v3252_v5 = vsub.f32 %v3248_v17, %v3251_v46 }
 0x3a2   : > { %v3253_v44 = vmul.f32 1.442695, %v3252_v5 }
 0x3a4   : > { %5337 = vpow2.f32 %v3253_v44 }
 0x3a7   : > { %v3364_v45 = vpop.xlane.xlu0 %3363 }
 0x3a8   : > { %v3365_v50 = vsub.f32 %v3361_v62, %v3364_v45 }
 0x3aa   : > { %v3366_v51 = vmul.f32 1.442695, %v3365_v50 }
 0x3ac   : > { %5339 = vpow2.f32 %v3366_v51 }
 0x3af   : > { %v3477_v12 = vpop.xlane.xlu0 %3476 }
 0x3b0   : > { %v3478_v53 = vsub.f32 %v3474_v3, %v3477_v12 }
 0x3b1   : > { %v5338_v55 = vpop.eup %5337 }
 0x3b2   : > { %v3479_v41 = vmul.f32 1.442695, %v3478_v53  ;;  %v3255_v47 = vsel %vm3135_vm4, %v5338_v55, 0.0 }
 0x3b3   : > { %3256 = vadd.xlane.f32.xlu0 %v3255_v47  ;;  %v3830_v47 = vsel %vm3151_vm2, %v3766_v52, 0 }
 0x3b4   : > { %5341 = vpow2.f32 %v3479_v41 }
 0x3b7   : > { %v3590_v59 = vpop.xlane.xlu1 %3589 }
 0x3b8   : > { %v3591_v60 = vsub.f32 %v3587_v13, %v3590_v59 }
 0x3b9   : > { %v5832_v56 = vpop.eup %5339 }
 0x3ba   : > { %v3368_v57 = vsel %vm3135_vm4, %v5832_v56, 0.0  ;;  %v3592_v61 = vmul.f32 1.442695, %v3591_v60 }
 0x3bb   : > { %3369 = vadd.xlane.f32.xlu1 %v3368_v57 }
 0x3bc   : > { %5343 = vpow2.f32 %v3592_v61 }
 0x3c1   : > { %v5836_v17 = vpop.eup %5341 }
 0x3c2   : > { %v3481_v14 = vsel %vm3135_vm4, %v5836_v17, 0.0 }
 0x3c3   : > { %3482 = vadd.xlane.f32.xlu0 %v3481_v14 }
 0x3c9   : > { %v5845_v4 = vpop.eup %5343 }
 0x3ca   : > { %v3594_v6 = vsel %vm3135_vm4, %v5845_v4, 0.0 }
 0x3cc   : > { %3488 = vrot.lane.b32.xlu1 %v3314_v58, %s5494_s17 }
 0x3d9   : > { %3262 = vrot.lane.b32.xlu0 %v5755_v16, %s5494_s17 }
 0x3df   : > { %v3703_v62 = vpop.xlane.xlu0 %3702 }
 0x3e0   : > { %v3704_v63 = vsub.f32 %v3700_v25, %v3703_v62 }
 0x3e2   : > { %v3705_v0 = vmul.f32 1.442695, %v3704_v63 }
 0x3e4   : > { %5345 = vpow2.f32 %v3705_v0 }
 0x3e7   : > { %v3816_v23 = vpop.xlane.xlu1 %3815 }
 0x3e8   : > { %v3817_v1 = vsub.f32 %v3813_v32, %v3816_v23 }
 0x3ea   : > { %v3818_v2 = vmul.f32 1.442695, %v3817_v1 }
 0x3eb   : > { %v3144_v3 = vpop.xlane.xlu1 %3143 }
 0x3ec   : > { %5347 = vpow2.f32 %v3818_v2 }
 0x3ed   : > { %5349 = vrcp.f32 %v3144_v3 }
 0x3ef   : > { %v3929_v18 = vpop.xlane.xlu0 %3928 }
 0x3f0   : > { %v3930_v7 = vsub.f32 %v3926_v39, %v3929_v18  ;;  %3595 = vadd.xlane.f32.xlu1 %v3594_v6 }
 0x3f1   : > { %v5849_v16 = vpop.eup %5345 }
 0x3f2   : > { %v3931_v10 = vmul.f32 1.442695, %v3930_v7  ;;  %v3707_v11 = vsel %vm3135_vm4, %v5849_v16, 0.0 }
 0x3f4   : > { %5351 = vpow2.f32 %v3931_v10  ;;  %3708 = vadd.xlane.f32.xlu1 %v3707_v11 }
 0x3f9   : > { %v5853_v13 = vpop.eup %5347 }
 0x3fa   : > { %v5350_v49 = vpop.eup %5349  ;;  %v3820_v15 = vsel %vm3135_vm4, %v5853_v13, 0.0 }
 0x3fb   : > { %3821 = vadd.xlane.f32.xlu1 %v3820_v15  ;;  %v3146_v22 = vmul.f32 %v5350_v49, %v5824_v35 }
 0x3fd   : > { %v3147_v26 = vpack.c.bf16 %v3146_v22, %v3146_v22 }
 0x3ff   : > { %4607 = vmatmul.mubr.msk.bf16.vlgmr.msra.gmra.mxu1 %vm3135_vm4, %v3147_v26 }
 0x400   : > { %4618 = vmatprep.mubr.msk.bf16.mxu1 %vm5493_vm0, %v5492_v24 }
 0x401   : > { %v5861_v19 = vpop.eup %5351 }
 0x402   : > { %v3933_v20 = vsel %vm3135_vm4, %v5861_v19, 0.0 }
 0x403   : > { %3934 = vadd.xlane.f32.xlu0 %v3933_v20 }
 0x40c   : > { %3714 = vrot.lane.b32.xlu1 %v3540_v21, %s5494_s17 }
 0x410   : > { %3940 = vrot.lane.b32.xlu1 %v3766_v52, %s5494_s17 }
 0x43c   : > { %v3257_v25 = vpop.xlane.xlu0 %3256 }
 0x43d   : > { %5353 = vrcp.f32 %v3257_v25 }
 0x444   : > { %v3370_v27 = vpop.xlane.xlu1 %3369 }
 0x445   : > { %5355 = vrcp.f32 %v3370_v27 }
 0x448   : > { %v3489_v35 = vpop.permute.xlu1 %3488 }
 0x449   : > { %v3494_v37 = vsel %vm3151_vm2, %v3489_v35, 0 }
 0x44a   : > { %v5354_v28 = vpop.eup %5353 }
 0x44b   : > { %v3259_v30 = vmul.f32 %v5354_v28, %v5338_v55 }
 0x44c   : > { %v3483_v29 = vpop.xlane.xlu0 %3482 }
 0x44d   : > { %5357 = vrcp.f32 %v3483_v29  ;;  %v3260_v40 = vpack.c.bf16 %v3259_v30, %v3259_v30 }
 0x450   : > { %v3263_v31 = vpop.permute.xlu0 %3262 }
 0x451   : > { %v3268_v32 = vsel %vm3151_vm2, %v3263_v31, 0 }
 0x452   : > { %4617 = vmatpush3.bf16.msra.mxu1 %v3268_v32  ;;  %v5356_v33 = vpop.eup %5355 }
 0x453   : > { %4628 = vmatprep.subr.bf16.mxu1 %v5492_v24  ;;  %v3372_v34 = vmul.f32 %v5356_v33, %v5832_v56 }
 0x455   : > { %4619 = vmatmul.mubr.msk.bf16.vlgmr.msra.gmra.mxu1 %vm3135_vm4, %v3260_v40  ;;  %v3373_v8 = vpack.c.bf16 %v3372_v34, %v3372_v34 }
 0x456   : > { %4629 = vmatpush3.bf16.msra.mxu1 %v3378_v9  ;;  %4630 = vmatprep.mubr.msk.bf16.mxu1 %vm5493_vm0, %v5492_v24 }
 0x457   : > { %4640 = vmatprep.subr.bf16.mxu1 %v5492_v24 }
 0x45a   : > { %v5358_v36 = vpop.eup %5357 }
 0x45b   : > { %v3485_v38 = vmul.f32 %v5358_v36, %v5836_v17 }
 0x45d   : > { %4631 = vmatmul.mubr.msk.bf16.vlgmr.msra.gmra.mxu1 %vm3135_vm4, %v3373_v8  ;;  %v3486_v39 = vpack.c.bf16 %v3485_v38, %v3485_v38 }
 0x45e   : > { %4641 = vmatpush3.bf16.msra.mxu1 %v3494_v37  ;;  %4642 = vmatprep.mubr.msk.bf16.mxu1 %vm5493_vm0, %v5492_v24 }
 0x45f   : > { %4652 = vmatprep.subr.bf16.mxu1 %v5492_v24 }
 0x465   : > { %4643 = vmatmul.mubr.msk.bf16.vlgmr.msra.gmra.mxu1 %vm3135_vm4, %v3486_v39 }
 0x466   : > { %4653 = vmatpush3.bf16.msra.mxu1 %v3604_v48  ;;  %4654 = vmatprep.mubr.msk.bf16.mxu1 %vm5493_vm0, %v5492_v24 }
 0x467   : > { %4664 = vmatprep.subr.bf16.mxu1 %v5492_v24 }
 0x479   : > { %v3596_v54 = vpop.xlane.xlu1 %3595 }
 0x47a   : > { %5359 = vrcp.f32 %v3596_v54 }
 0x47d   : > { %v3709_v42 = vpop.xlane.xlu1 %3708 }
 0x47e   : > { %5361 = vrcp.f32 %v3709_v42 }
 0x484   : > { %v3822_v43 = vpop.xlane.xlu1 %3821 }
 0x485   : > { %5363 = vrcp.f32 %v3822_v43 }
 0x487   : > { %v5360_v46 = vpop.eup %5359 }
 0x488   : > { %v3598_v5 = vmul.f32 %v5360_v46, %v5845_v4  ;;  %v3715_v44 = vpop.permute.xlu1 %3714 }
 0x489   : > { %v3720_v51 = vsel %vm3151_vm2, %v3715_v44, 0 }
 0x48a   : > { %v3599_v45 = vpack.c.bf16 %v3598_v5, %v3598_v5 }
 0x48b   : > { %v5362_v50 = vpop.eup %5361 }
 0x48c   : > { %4655 = vmatmul.mubr.msk.bf16.vlgmr.msra.gmra.mxu1 %vm3135_vm4, %v3599_v45  ;;  %v3935_v12 = vpop.xlane.xlu0 %3934  ;;  %v3711_v53 = vmul.f32 %v5362_v50, %v5849_v16  ;;  %v3941_v57 = vpop.permute.xlu1 %3940 }
 0x48d   : > { %4665 = vmatpush3.bf16.msra.mxu1 %v3720_v51  ;;  %4666 = vmatprep.mubr.msk.bf16.mxu1 %vm5493_vm0, %v5492_v24  ;;  %5365 = vrcp.f32 %v3935_v12  ;;  %v3946_v58 = vsel %vm3151_vm2, %v3941_v57, 0 }
 0x48e   : > { %4676 = vmatprep.subr.bf16.mxu1 %v5492_v24  ;;  %v3712_v55 = vpack.c.bf16 %v3711_v53, %v3711_v53 }
 0x492   : > { %v5364_v41 = vpop.eup %5363 }
 0x493   : > { %v3824_v56 = vmul.f32 %v5364_v41, %v5853_v13 }
 0x494   : > { %4667 = vmatmul.mubr.msk.bf16.vlgmr.msra.gmra.mxu1 %vm3135_vm4, %v3712_v55 }
 0x495   : > { %4677 = vmatpush3.bf16.msra.mxu1 %v3830_v47  ;;  %4678 = vmatprep.mubr.msk.bf16.mxu1 %vm5493_vm0, %v5492_v24  ;;  %v3825_v17 = vpack.c.bf16 %v3824_v56, %v3824_v56 }
 0x496   : > { %4688 = vmatprep.subr.bf16.mxu1 %v5492_v24 }
 0x49a   : > { %v5366_v14 = vpop.eup %5365 }
 0x49b   : > { %v3937_v59 = vmul.f32 %v5366_v14, %v5861_v19 }
 0x49c   : > { %4679 = vmatmul.mubr.msk.bf16.vlgmr.msra.gmra.mxu1 %vm3135_vm4, %v3825_v17 }
 0x49d   : > { %4689 = vmatpush3.bf16.msra.mxu1 %v3946_v58  ;;  %4690 = vmatprep.mubr.msk.bf16.mxu1 %vm5493_vm0, %v5492_v24  ;;  %v3938_v60 = vpack.c.bf16 %v3937_v59, %v3937_v59 }
 0x4a4   : > { %4691 = vmatmul.mubr.msk.bf16.vlgmr.msra.gmra.mxu1 %vm3135_vm4, %v3938_v60 }
 0x4bf   : > { %v3189_v61 = vpop.f32.mrf.mxu1 }
 0x4c0   : > { %3195 = vst.msk [vmem:[%s5910_s21] sm:$0xff] %vm3087_vm1, %v3189_v61 }
 0x4c1   : > { %v4608_v62 = vpop.f32.mrf.mxu1 }
 0x4c3   : > { %v3192_v63 = vpop.f32.mrf.mxu1 }
 0x4c5   : > { %v4609_v0 = vpop.f32.mrf.mxu1 }
 0x4c7   : > { %v4041_v40 = vld [vmem:[%s5910_s21] sm:$0xff] (%p5974_p7) }
 0x4c8   : > { %4042 = vst [vmem:[%s3998_s25] sm:$0xff] (%p5974_p7), %v4041_v40 }
 0x515   : > { %v3304_v23 = vpop.f32.mrf.mxu1 }
 0x516   : > { %4542 = vst.msk [vmem:[%s5910_s21 + $0x8] sm:$0xff] %vm3087_vm1, %v3304_v23 }
 0x517   : > { %v4620_v24 = vpop.f32.mrf.mxu1 }
 0x519   : > { %v3307_v1 = vpop.f32.mrf.mxu1 }
 0x51b   : > { %v4621_v2 = vpop.f32.mrf.mxu1 }
 0x51d   : > { %v3414_v3 = vpop.f32.mrf.mxu1  ;;  %v4043_v33 = vld [vmem:[%s5910_s21 + $0x8] sm:$0xff] (%p5974_p7) }
 0x51e   : > { %4545 = vst.msk [vmem:[%s5910_s21 + $0x10] sm:$0xff] %vm3087_vm1, %v3414_v3  ;;  %4044 = vst [vmem:[%s3998_s25 + $0x10] sm:$0xff] (%p5974_p7), %v4043_v33 }
 0x51f   : > { %v4632_v4 = vpop.f32.mrf.mxu1 }
 0x521   : > { %v3417_v18 = vpop.f32.mrf.mxu1 }
 0x523   : > { %v4633_v6 = vpop.f32.mrf.mxu1 }
 0x525   : > { %v3530_v7 = vpop.f32.mrf.mxu1  ;;  %v4045_v9 = vld [vmem:[%s5910_s21 + $0x10] sm:$0xff] (%p5974_p7) }
 0x526   : > { %4548 = vst.msk [vmem:[%s5910_s21 + $0x18] sm:$0xff] %vm3087_vm1, %v3530_v7  ;;  %4046 = vst [vmem:[%s3998_s25 + $0x20] sm:$0xff] (%p5974_p7), %v4045_v9 }
 0x527   : > { %v4644_v16 = vpop.f32.mrf.mxu1 }
 0x529   : > { %v3533_v10 = vpop.f32.mrf.mxu1 }
 0x52b   : > { %v4645_v11 = vpop.f32.mrf.mxu1 }
 0x52d   : > { %v4047_v34 = vld [vmem:[%s5910_s21 + $0x18] sm:$0xff] (%p5974_p7) }
 0x52e   : > { %4048 = vst [vmem:[%s3998_s25 + $0x30] sm:$0xff] (%p5974_p7), %v4047_v34 }
 0x54c   : > { %v3640_v13 = vpop.f32.mrf.mxu1 }
 0x54d   : > { %4551 = vst.msk [vmem:[%s5910_s21 + $0x20] sm:$0xff] %vm3087_vm1, %v3640_v13 }
 0x54e   : > { %v4656_v49 = vpop.f32.mrf.mxu1 }
 0x550   : > { %v3643_v15 = vpop.f32.mrf.mxu1 }
 0x552   : > { %v4657_v22 = vpop.f32.mrf.mxu1 }
 0x554   : > { %v3756_v26 = vpop.f32.mrf.mxu1  ;;  %v4049_v35 = vld [vmem:[%s5910_s21 + $0x20] sm:$0xff] (%p5974_p7) }
 0x555   : > { %4554 = vst.msk [vmem:[%s5910_s21 + $0x28] sm:$0xff] %vm3087_vm1, %v3756_v26  ;;  %4050 = vst [vmem:[%s3998_s25 + $0x40] sm:$0xff] (%p5974_p7), %v4049_v35 }
 0x556   : > { %v4668_v19 = vpop.f32.mrf.mxu1 }
 0x558   : > { %v3759_v20 = vpop.f32.mrf.mxu1 }
 0x55a   : > { %v4669_v21 = vpop.f32.mrf.mxu1 }
 0x55c   : > { %v3866_v52 = vpop.f32.mrf.mxu1  ;;  %v4051_v8 = vld [vmem:[%s5910_s21 + $0x28] sm:$0xff] (%p5974_p7) }
 0x55d   : > { %4557 = vst.msk [vmem:[%s5910_s21 + $0x30] sm:$0xff] %vm3087_vm1, %v3866_v52  ;;  %4052 = vst [vmem:[%s3998_s25 + $0x50] sm:$0xff] (%p5974_p7), %v4051_v8 }
 0x55e   : > { %v4680_v25 = vpop.f32.mrf.mxu1 }
 0x560   : > { %v3869_v27 = vpop.f32.mrf.mxu1 }
 0x562   : > { %v4681_v28 = vpop.f32.mrf.mxu1 }
 0x564   : > { %v3982_v29 = vpop.f32.mrf.mxu1  ;;  %v4053_v36 = vld [vmem:[%s5910_s21 + $0x30] sm:$0xff] (%p5974_p7) }
 0x565   : > { %4560 = vst.msk [vmem:[%s5910_s21 + $0x38] sm:$0xff] %vm3087_vm1, %v3982_v29  ;;  %4054 = vst [vmem:[%s3998_s25 + $0x60] sm:$0xff] (%p5974_p7), %v4053_v36 }
 0x566   : > { %v4692_v30 = vpop.f32.mrf.mxu1  ;;  %3996 = sbr.rel (!%p5974_p7) target bundleno = 1390 (0x56e), region = 48 }
 0x568   : > { %v3985_v31 = vpop.f32.mrf.mxu1 }
 0x56a   : > { %v4693_v32 = vpop.f32.mrf.mxu1 }
 0x56c   : > { %v4055_v37 = vld [vmem:[%s5910_s21 + $0x38] sm:$0xff] }
 0x56d   : > { %4056 = vst [vmem:[%s3998_s25 + $0x70] sm:$0xff] %v4055_v37 }
 0x56e PF: > { %p14_p8 = scmp.ge.s32.totalorder %s5578_s5, 4   ;;  %s5975_s12 = smov %s5477_s13 }
 0x56f   : > { %s5976_s13 = smov %s5481_s14  ;;  %s5977_s14 = smov %s5588_s8 }
 0x570   : > { %s5978_s15 = smov %s5578_s5  ;;  %16 = sbr.rel (!%p14_p8) target bundleno = 4 (0x4), region = 125 }
 0x575   :  { %4072 = vsyncpa [#allocation3], 1 }
 0x576   :  { %4074 = vsyncpa [#allocation3 + $0x1], 1 }
 0x577   :  { %4075 = vsyncpa [#allocation5], 1 }

// kernel: transformer_decoder_layer.5
= control target key start
LH: loop header
LB: loop body
LE: loop exit
PB: predicated region body
PF: predicated region fallthrough
CT: control target
= control target key end

     0   :  { %15 = vsyncpa [#allocation3], 0  ;;  %s6045_s0 = inlined_call_operand.vmem [shape: f32[16,512], index: 0, kind: input, shape index: {}]   ;;  %s6046_s1 = inlined_call_operand.vmem [shape: f32[16,512], index: 1, kind: input, shape index: {}]   ;;  %s6047_s2 = inlined_call_operand.vmem [shape: bf16[512,512], index: 2, kind: input, shape index: {}]   ;;  %s6048_s3 = inlined_call_operand.vmem [shape: f32[1,512], index: 3, kind: input, shape index: {}]   ;;  %s6049_s4 = inlined_call_operand.vmem [shape: bf16[512,512], index: 4, kind: input, shape index: {}]   ;;  %s6050_s5 = inlined_call_operand.vmem [shape: f32[1,512], index: 5, kind: input, shape index: {}]   ;;  %s6051_s6 = inlined_call_operand.vmem [shape: bf16[512,512], index: 6, kind: input, shape index: {}]   ;;  %s6052_s7 = inlined_call_operand.vmem [shape: f32[1,512], index: 7, kind: input, shape index: {}]   ;;  %s6053_s8 = inlined_call_operand.vmem [shape: f32[1,512], index: 8, kind: input, shape index: {}]   ;;  %s6054_s9 = inlined_call_operand.vmem [shape: f32[1,512], index: 9, kind: input, shape index: {}]   ;;  %s6055_s10 = inlined_call_operand.hbm [shape: f32[16,512], index: 10, kind: output, shape index: {}]  }
   0x1   :  { %17 = vsyncpa [#allocation3 + $0x1], 0  ;;  %s4613_s13 = smov 0   ;;  %s4615_s14 = smov 0  }
   0x2   :  { %s4617_s15 = smov 0   ;;  %s4619_s16 = smov 0  }
   0x3 LB: > { %s4634_s17 = sadd.s32 4294967295, %s4555_s16   ;;  %s3475_s18 = sadd.s32 4294967294, %s4555_s16   ;;  %s4555_s16 = sphi %s4619_s16, %s6065_s16   ;;  %s4551_s15 = sphi %s4617_s15, %s6064_s15   ;;  %s4547_s14 = sphi %s4615_s14, %s6063_s14   ;;  %s4543_s13 = sphi %s4613_s13, %s6062_s13  }
   0x4   : > { %s4638_s19 = sadd.s32 1, %s4555_s16   ;;  %s250_s20 = sadd.s32 1, %s4551_s15 }
   0x5   : > { %s247_s21 = ssub.s32 %s4555_s16, %s4638_s19  ;;  %p260_p0 = scmp.ne.s32.totalorder %s4551_s15, %s4547_s14 }
   0x6   : > { %p248_p1 = scmp.eq.s32.totalorder %s247_s21, 0  ;;  %p261_p2 = scmp.eq.s32.totalorder %s4634_s17, 1 }
   0x7   : > { %p266_p3 = scmp.ne.s32.totalorder %s4547_s14, %s4543_s13  ;;  %p267_p4 = scmp.eq.s32.totalorder %s3475_s18, 1 }
   0x8   : > { %s4649_s22 = scalar_select %p248_p1, %s4551_s15, %s250_s20  }
   0x9   : > { %p4651_p5 = por %p261_p2, %p260_p0  ;;  %p4655_p6 = por %p267_p4, %p266_p3 }
   0xa   : > { %6057 = sst [smem:[#allocation5_spill]] %s4649_s22  ;;  %p3478_p7 = scmp.ge.s32.totalorder %s4555_s16, 1 }
   0xb   : > { %p325_p8 = scmp.lt.s32.totalorder %s4555_s16, 3 }
   0xd   : > { %p326_p9 = pnand %p3478_p7, %p325_p8 }
   0xe   : > { %p368_p10 = scmp.lt.s32.totalorder (!%p326_p9), %s4634_s17, 1  ;;  %s365_s26 = sand.u32 (!%p326_p9), 1, %s4547_s14  }
   0xf   : > { %329 = sbr.rel (%p326_p9) target bundleno = 1526 (0x5f6), region = 60  ;;  %s3875_s27 = sshll.u32 (!%p326_p9), %s4634_s17, 9 }
  0x10   : > { %s6004_s12 = scalar_lea.hbm (!%p326_p9), %s6055_s10, %s3875_s27  ;;  %s4557_s21 = smov (!%p326_p9), [#allocation2]  }
  0x11   : > { %s4499_s22 = sshll.u32 (!%p326_p9), %s4557_s21, 4  ;;  %s4500_s22 = int_to_ptr.vmem [resolvable:$false] %s4499_s22 }
  0x12   : > { %s4501_s25 = scalar_lea.vmem (!%p326_p9), %s4500_s22, 1024 }
  0x14   : > { %v3915_v0 = vld [vmem:[%s6047_s2 + $0xe4] ss:$16 sps:$4 sm:$0xff]   ;;  %v3919_v2 = vld [vmem:[%s6047_s2 + $0xe0] ss:$16 sps:$4 sm:$0xff]   ;;  %s4774_s18 = scalar_select %p368_p10, %s4634_s17, 1 }
  0x15   : > { %v3917_v1 = vld [vmem:[%s6047_s2 + $0x2e4] ss:$16 sps:$4 sm:$0xff]   ;;  %1180 = vmatprep.subr.bf16.mxu0 %v3915_v0  ;;  %v3920_v3 = vld [vmem:[%s6047_s2 + $0x2e0] ss:$16 sps:$4 sm:$0xff]  }
  0x16   : > { %1221 = vmatprep.subr.bf16.mxu1 %v3917_v1  ;;  %v3921_v4 = vld [vmem:[%s6047_s2 + $0xc4] ss:$16 sps:$4 sm:$0xff]   ;;  %1181 = vmatpush1.bf16.msra.mxu0 %v3919_v2  ;;  %v3925_v6 = vld [vmem:[%s6047_s2 + $0xc0] ss:$16 sps:$4 sm:$0xff]   ;;  %s6056_s11 = sshll.u32 %s4774_s18, 5 }
  0x17   : > { %1222 = vmatpush1.bf16.msra.mxu1 %v3920_v3  ;;  %v3923_v5 = vld [vmem:[%s6047_s2 + $0x2c4] ss:$16 sps:$4 sm:$0xff]   ;;  %1182 = vmatprep.subr.bf16.mxu0 %v3921_v4  ;;  %v3926_v7 = vld [vmem:[%s6047_s2 + $0x2c0] ss:$16 sps:$4 sm:$0xff]   ;;  %s4803_s29 = scalar_lea.vmem %s6045_s0, %s6056_s11  ;;  %s6060_s11 = sshll.u32 %s4774_s18, 5 }
  0x18   : > { %1223 = vmatprep.subr.bf16.mxu1 %v3923_v5  ;;  %v3927_v8 = vld [vmem:[%s6047_s2 + $0xa4] ss:$16 sps:$4 sm:$0xff]   ;;  %v3931_v10 = vld [vmem:[%s6047_s2 + $0xa0] ss:$16 sps:$4 sm:$0xff]   ;;  %v379_v46 = vld [vmem:[%s4803_s29 + $0x8] sm:$0xff]  ;;  %s377_s20 = scalar_lea.vmem %s6046_s1, %s6060_s11 }
  0x19   : > { %v3929_v9 = vld [vmem:[%s6047_s2 + $0x2a4] ss:$16 sps:$4 sm:$0xff]   ;;  %v3932_v11 = vld [vmem:[%s6047_s2 + $0x2a0] ss:$16 sps:$4 sm:$0xff]   ;;  %v4818_v49 = vpack.c.bf16 %v379_v46, %v379_v46  ;;  %v381_v50 = vld [vmem:[%s4803_s29 + $0x18] sm:$0xff] }
  0x1a   : > { %1183 = vmatpush1.bf16.msra.mxu0 %v3925_v6  ;;  %v3933_v12 = vld [vmem:[%s6047_s2 + $0x84] ss:$16 sps:$4 sm:$0xff]   ;;  %v3937_v14 = vld [vmem:[%s6047_s2 + $0x80] ss:$16 sps:$4 sm:$0xff]   ;;  %v389_v52 = vpack.c.bf16 %v381_v50, %v381_v50  ;;  %v4013_v6 = vld [vmem:[%s6047_s2 + $0xec] ss:$16 sps:$4 sm:$0xff]  }
  0x1b   : > { %1224 = vmatpush1.bf16.msra.mxu1 %v3926_v7  ;;  %1184 = vmatprep.subr.bf16.mxu0 %v3927_v8  ;;  %v3935_v13 = vld [vmem:[%s6047_s2 + $0x284] ss:$16 sps:$4 sm:$0xff]   ;;  %v3938_v15 = vld [vmem:[%s6047_s2 + $0x280] ss:$16 sps:$4 sm:$0xff]   ;;  %v4016_v7 = vld [vmem:[%s6047_s2 + $0x2ec] ss:$16 sps:$4 sm:$0xff]  }
  0x1c   : > { %1225 = vmatprep.subr.bf16.mxu1 %v3929_v9  ;;  %v3939_v16 = vld [vmem:[%s6047_s2 + $0x64] ss:$16 sps:$4 sm:$0xff]   ;;  %v3943_v18 = vld [vmem:[%s6047_s2 + $0x60] ss:$16 sps:$4 sm:$0xff]   ;;  %1212 = vmatprep.mubr.bf16.mxu0 %v4818_v49  ;;  %v4065_v46 = vld [vmem:[%s6047_s2 + $0x1c8] ss:$16 sps:$4 sm:$0xff]  }
  0x1d   : > { %v3941_v17 = vld [vmem:[%s6047_s2 + $0x264] ss:$16 sps:$4 sm:$0xff]   ;;  %v3944_v19 = vld [vmem:[%s6047_s2 + $0x260] ss:$16 sps:$4 sm:$0xff]   ;;  %1253 = vmatprep.mubr.bf16.mxu1 %v389_v52  ;;  %v4071_v50 = vld [vmem:[%s6047_s2 + $0x1a8] ss:$16 sps:$4 sm:$0xff]  }
  0x1e   : > { %1185 = vmatpush1.bf16.msra.mxu0 %v3931_v10  ;;  %v3945_v20 = vld [vmem:[%s6047_s2 + $0x44] ss:$16 sps:$4 sm:$0xff]   ;;  %v3949_v22 = vld [vmem:[%s6047_s2 + $0x40] ss:$16 sps:$4 sm:$0xff]   ;;  %v4011_v10 = vld [vmem:[%s6047_s2 + $0xe8] ss:$16 sps:$4 sm:$0xff]  }
  0x1f   : > { %1226 = vmatpush1.bf16.msra.mxu1 %v3932_v11  ;;  %1186 = vmatprep.subr.bf16.mxu0 %v3933_v12  ;;  %v3947_v21 = vld [vmem:[%s6047_s2 + $0x244] ss:$16 sps:$4 sm:$0xff]   ;;  %v3950_v23 = vld [vmem:[%s6047_s2 + $0x240] ss:$16 sps:$4 sm:$0xff]   ;;  %v4014_v11 = vld [vmem:[%s6047_s2 + $0x2e8] ss:$16 sps:$4 sm:$0xff]  }
  0x20   : > { %1227 = vmatprep.subr.bf16.mxu1 %v3935_v13  ;;  %v3951_v24 = vld [vmem:[%s6047_s2 + $0x24] ss:$16 sps:$4 sm:$0xff]   ;;  %v3955_v26 = vld [vmem:[%s6047_s2 + $0x20] ss:$16 sps:$4 sm:$0xff]   ;;  %v4019_v12 = vld [vmem:[%s6047_s2 + $0xcc] ss:$16 sps:$4 sm:$0xff]  }
  0x21   : > { %v3953_v25 = vld [vmem:[%s6047_s2 + $0x224] ss:$16 sps:$4 sm:$0xff]   ;;  %v3956_v27 = vld [vmem:[%s6047_s2 + $0x220] ss:$16 sps:$4 sm:$0xff]   ;;  %v4022_v13 = vld [vmem:[%s6047_s2 + $0x2cc] ss:$16 sps:$4 sm:$0xff]  }
  0x22   : > { %1187 = vmatpush1.bf16.msra.mxu0 %v3937_v14  ;;  %v3957_v28 = vld [vmem:[%s6047_s2 + $0x4] ss:$16 sps:$4 sm:$0xff]   ;;  %v3961_v30 = vld [vmem:[%s6047_s2] ss:$16 sps:$4 sm:$0xff]   ;;  %v4017_v14 = vld [vmem:[%s6047_s2 + $0xc8] ss:$16 sps:$4 sm:$0xff]  }
  0x23   : > { %1228 = vmatpush1.bf16.msra.mxu1 %v3938_v15  ;;  %1188 = vmatprep.subr.bf16.mxu0 %v3939_v16  ;;  %v3959_v29 = vld [vmem:[%s6047_s2 + $0x204] ss:$16 sps:$4 sm:$0xff]   ;;  %v3962_v31 = vld [vmem:[%s6047_s2 + $0x200] ss:$16 sps:$4 sm:$0xff]   ;;  %v4020_v15 = vld [vmem:[%s6047_s2 + $0x2c8] ss:$16 sps:$4 sm:$0xff]  }
  0x24   : > { %1229 = vmatprep.subr.bf16.mxu1 %v3941_v17  ;;  %v3963_v32 = vld [vmem:[%s6047_s2 + $0x1e4] ss:$16 sps:$4 sm:$0xff]   ;;  %v3967_v34 = vld [vmem:[%s6047_s2 + $0x1e0] ss:$16 sps:$4 sm:$0xff]   ;;  %v4025_v16 = vld [vmem:[%s6047_s2 + $0xac] ss:$16 sps:$4 sm:$0xff]  }
  0x25   : > { %v3965_v33 = vld [vmem:[%s6047_s2 + $0x3e4] ss:$16 sps:$4 sm:$0xff]   ;;  %v3968_v35 = vld [vmem:[%s6047_s2 + $0x3e0] ss:$16 sps:$4 sm:$0xff]   ;;  %v4028_v17 = vld [vmem:[%s6047_s2 + $0x2ac] ss:$16 sps:$4 sm:$0xff]  }
  0x26   : > { %1189 = vmatpush1.bf16.msra.mxu0 %v3943_v18  ;;  %v3969_v36 = vld [vmem:[%s6047_s2 + $0x1c4] ss:$16 sps:$4 sm:$0xff]   ;;  %v3973_v38 = vld [vmem:[%s6047_s2 + $0x1c0] ss:$16 sps:$4 sm:$0xff]   ;;  %v4023_v18 = vld [vmem:[%s6047_s2 + $0xa8] ss:$16 sps:$4 sm:$0xff]  }
  0x27   : > { %1230 = vmatpush1.bf16.msra.mxu1 %v3944_v19  ;;  %1190 = vmatprep.subr.bf16.mxu0 %v3945_v20  ;;  %v3971_v37 = vld [vmem:[%s6047_s2 + $0x3c4] ss:$16 sps:$4 sm:$0xff]   ;;  %v3974_v39 = vld [vmem:[%s6047_s2 + $0x3c0] ss:$16 sps:$4 sm:$0xff]   ;;  %v4026_v19 = vld [vmem:[%s6047_s2 + $0x2a8] ss:$16 sps:$4 sm:$0xff]  }
  0x28   : > { %1231 = vmatprep.subr.bf16.mxu1 %v3947_v21  ;;  %v3975_v40 = vld [vmem:[%s6047_s2 + $0x1a4] ss:$16 sps:$4 sm:$0xff]   ;;  %v3979_v42 = vld [vmem:[%s6047_s2 + $0x1a0] ss:$16 sps:$4 sm:$0xff]   ;;  %v4031_v20 = vld [vmem:[%s6047_s2 + $0x8c] ss:$16 sps:$4 sm:$0xff]  }
  0x29   : > { %v3977_v41 = vld [vmem:[%s6047_s2 + $0x3a4] ss:$16 sps:$4 sm:$0xff]   ;;  %v3980_v43 = vld [vmem:[%s6047_s2 + $0x3a0] ss:$16 sps:$4 sm:$0xff]   ;;  %v4034_v21 = vld [vmem:[%s6047_s2 + $0x28c] ss:$16 sps:$4 sm:$0xff]  }
  0x2a   : > { %1191 = vmatpush1.bf16.msra.mxu0 %v3949_v22  ;;  %v3981_v44 = vld [vmem:[%s6047_s2 + $0x184] ss:$16 sps:$4 sm:$0xff]   ;;  %v3985_v47 = vld [vmem:[%s6047_s2 + $0x180] ss:$16 sps:$4 sm:$0xff]   ;;  %v4029_v22 = vld [vmem:[%s6047_s2 + $0x88] ss:$16 sps:$4 sm:$0xff]  }
  0x2b   : > { %1232 = vmatpush1.bf16.msra.mxu1 %v3950_v23  ;;  %1192 = vmatprep.subr.bf16.mxu0 %v3951_v24  ;;  %v3983_v45 = vld [vmem:[%s6047_s2 + $0x384] ss:$16 sps:$4 sm:$0xff]   ;;  %v3986_v48 = vld [vmem:[%s6047_s2 + $0x380] ss:$16 sps:$4 sm:$0xff]   ;;  %v4032_v23 = vld [vmem:[%s6047_s2 + $0x288] ss:$16 sps:$4 sm:$0xff]  }
  0x2c   : > { %1233 = vmatprep.subr.bf16.mxu1 %v3953_v25  ;;  %v3987_v51 = vld [vmem:[%s6047_s2 + $0x164] ss:$16 sps:$4 sm:$0xff]   ;;  %v3991_v54 = vld [vmem:[%s6047_s2 + $0x160] ss:$16 sps:$4 sm:$0xff]   ;;  %v4037_v24 = vld [vmem:[%s6047_s2 + $0x6c] ss:$16 sps:$4 sm:$0xff]  }
  0x2d   : > { %v3989_v53 = vld [vmem:[%s6047_s2 + $0x364] ss:$16 sps:$4 sm:$0xff]   ;;  %v3992_v55 = vld [vmem:[%s6047_s2 + $0x360] ss:$16 sps:$4 sm:$0xff]   ;;  %v4040_v25 = vld [vmem:[%s6047_s2 + $0x26c] ss:$16 sps:$4 sm:$0xff]  }
  0x2e   : > { %1193 = vmatpush1.bf16.msra.mxu0 %v3955_v26  ;;  %v3993_v56 = vld [vmem:[%s6047_s2 + $0x144] ss:$16 sps:$4 sm:$0xff]   ;;  %v3997_v58 = vld [vmem:[%s6047_s2 + $0x140] ss:$16 sps:$4 sm:$0xff]   ;;  %v4035_v26 = vld [vmem:[%s6047_s2 + $0x68] ss:$16 sps:$4 sm:$0xff]  }
  0x2f   : > { %1234 = vmatpush1.bf16.msra.mxu1 %v3956_v27  ;;  %1194 = vmatprep.subr.bf16.mxu0 %v3957_v28  ;;  %v3995_v57 = vld [vmem:[%s6047_s2 + $0x344] ss:$16 sps:$4 sm:$0xff]   ;;  %v3998_v59 = vld [vmem:[%s6047_s2 + $0x340] ss:$16 sps:$4 sm:$0xff]   ;;  %v4038_v27 = vld [vmem:[%s6047_s2 + $0x268] ss:$16 sps:$4 sm:$0xff]  }
  0x30   : > { %1235 = vmatprep.subr.bf16.mxu1 %v3959_v29  ;;  %v3999_v60 = vld [vmem:[%s6047_s2 + $0x124] ss:$16 sps:$4 sm:$0xff]   ;;  %v4003_v62 = vld [vmem:[%s6047_s2 + $0x120] ss:$16 sps:$4 sm:$0xff]   ;;  %v4043_v28 = vld [vmem:[%s6047_s2 + $0x4c] ss:$16 sps:$4 sm:$0xff]  }
  0x31   : > { %v4001_v61 = vld [vmem:[%s6047_s2 + $0x324] ss:$16 sps:$4 sm:$0xff]   ;;  %v4004_v63 = vld [vmem:[%s6047_s2 + $0x320] ss:$16 sps:$4 sm:$0xff]   ;;  %v4046_v29 = vld [vmem:[%s6047_s2 + $0x24c] ss:$16 sps:$4 sm:$0xff]  }
  0x32   : > { %1195 = vmatpush1.bf16.msra.mxu0 %v3961_v30  ;;  %v4005_v0 = vld [vmem:[%s6047_s2 + $0x104] ss:$16 sps:$4 sm:$0xff]   ;;  %v4009_v2 = vld [vmem:[%s6047_s2 + $0x100] ss:$16 sps:$4 sm:$0xff]   ;;  %v4041_v30 = vld [vmem:[%s6047_s2 + $0x48] ss:$16 sps:$4 sm:$0xff]  }
  0x33   : > { %1236 = vmatpush1.bf16.msra.mxu1 %v3962_v31  ;;  %1196 = vmatprep.subr.bf16.mxu0 %v3963_v32  ;;  %v4007_v1 = vld [vmem:[%s6047_s2 + $0x304] ss:$16 sps:$4 sm:$0xff]   ;;  %v4010_v3 = vld [vmem:[%s6047_s2 + $0x300] ss:$16 sps:$4 sm:$0xff]   ;;  %v4044_v31 = vld [vmem:[%s6047_s2 + $0x248] ss:$16 sps:$4 sm:$0xff]  }
  0x34   : > { %1237 = vmatprep.subr.bf16.mxu1 %v3965_v33  ;;  %v378_v4 = vld [vmem:[%s4803_s29] sm:$0xff]  ;;  %v380_v5 = vld [vmem:[%s4803_s29 + $0x10] sm:$0xff]  ;;  %v4049_v32 = vld [vmem:[%s6047_s2 + $0x2c] ss:$16 sps:$4 sm:$0xff]   ;;  %s3479_s29 = sshll.u32 %s365_s26, 5 }
  0x35   : > { %v4878_v8 = vpack.c.bf16 %v378_v4, %v378_v4  ;;  %v4880_v9 = vpack.c.bf16 %v380_v5, %v380_v5  ;;  %v4052_v33 = vld [vmem:[%s6047_s2 + $0x22c] ss:$16 sps:$4 sm:$0xff]   ;;  %s367_s28 = scalar_lea.vmem [#allocation2], %s3479_s29 }
  0x36   : > { %1197 = vmatpush2.bf16.msra.mxu0 %v3967_v34  ;;  %v4047_v34 = vld [vmem:[%s6047_s2 + $0x28] ss:$16 sps:$4 sm:$0xff]   ;;  %v4103_v4 = vld [vmem:[%s6047_s2 + $0x10c] ss:$16 sps:$4 sm:$0xff]   ;;  %s3404_s11 = sshll.u32 %s367_s28, 4  ;;  %s6006_s11 = int_to_ptr.vmem [resolvable:$true] %s3404_s11 }
  0x37   : > { %1238 = vmatpush2.bf16.msra.mxu1 %v3968_v35  ;;  %1198 = vmatprep.subr.bf16.mxu0 %v3969_v36  ;;  %v4050_v35 = vld [vmem:[%s6047_s2 + $0x228] ss:$16 sps:$4 sm:$0xff]   ;;  %v4055_v36 = vld [vmem:[%s6047_s2 + $0xc] ss:$16 sps:$4 sm:$0xff]   ;;  %s4495_s18 = scalar_lea.vmem %s6006_s11, 512  ;;  %p4502_p0 = scmp.lt.s32.totalorder %s6006_s11, %s4500_s22 }
  0x38   : > { %1239 = vmatprep.subr.bf16.mxu1 %v3971_v37  ;;  %v4058_v37 = vld [vmem:[%s6047_s2 + $0x20c] ss:$16 sps:$4 sm:$0xff]   ;;  %p4496_p11 = scmp.ne.s32.totalorder %s6006_s11, %s4495_s18  ;;  %p4503_p1 = scmp.lt.s32.totalorder %s4501_s25, %s4495_s18 }
  0x39   : > { %v4106_v5 = vld [vmem:[%s6047_s2 + $0x30c] ss:$16 sps:$4 sm:$0xff]  }
  0x3a   : > { %1199 = vmatpush2.bf16.msra.mxu0 %v3973_v38  ;;  %v4053_v38 = vld [vmem:[%s6047_s2 + $0x8] ss:$16 sps:$4 sm:$0xff]   ;;  %p4497_p12 = pnand %p4496_p11, %p4651_p5  ;;  %p4504_p2 = por %p4503_p1, %p4502_p0 }
  0x3b   : > { %1240 = vmatpush2.bf16.msra.mxu1 %v3974_v39  ;;  %1200 = vmatprep.subr.bf16.mxu0 %v3975_v40  ;;  %v4056_v39 = vld [vmem:[%s6047_s2 + $0x208] ss:$16 sps:$4 sm:$0xff]   ;;  %v4061_v40 = vld [vmem:[%s6047_s2 + $0x1ec] ss:$16 sps:$4 sm:$0xff]  }
  0x3c   : > { %1241 = vmatprep.subr.bf16.mxu1 %v3977_v41  ;;  %v4064_v41 = vld [vmem:[%s6047_s2 + $0x3ec] ss:$16 sps:$4 sm:$0xff]   ;;  %p4498_p13 = pneg %p4497_p12 }
  0x3e   : > { %1201 = vmatpush2.bf16.msra.mxu0 %v3979_v42  ;;  %v4059_v42 = vld [vmem:[%s6047_s2 + $0x1e8] ss:$16 sps:$4 sm:$0xff]   ;;  %p4505_p3 = pnand %p4504_p2, %p4498_p13 }
  0x3f   : > { %1242 = vmatpush2.bf16.msra.mxu1 %v3980_v43  ;;  %1202 = vmatprep.subr.bf16.mxu0 %v3981_v44  ;;  %v4062_v43 = vld [vmem:[%s6047_s2 + $0x3e8] ss:$16 sps:$4 sm:$0xff]   ;;  %v4067_v44 = vld [vmem:[%s6047_s2 + $0x1cc] ss:$16 sps:$4 sm:$0xff]  }
  0x40   : > { %1243 = vmatprep.subr.bf16.mxu1 %v3983_v45  ;;  %v4070_v45 = vld [vmem:[%s6047_s2 + $0x3cc] ss:$16 sps:$4 sm:$0xff]  }
  0x42   : > { %1203 = vmatpush2.bf16.msra.mxu0 %v3985_v47  ;;  %v4068_v47 = vld [vmem:[%s6047_s2 + $0x3c8] ss:$16 sps:$4 sm:$0xff]  }
  0x43   : > { %1244 = vmatpush2.bf16.msra.mxu1 %v3986_v48  ;;  %1204 = vmatprep.subr.bf16.mxu0 %v3987_v51  ;;  %v4073_v48 = vld [vmem:[%s6047_s2 + $0x1ac] ss:$16 sps:$4 sm:$0xff]   ;;  %v4074_v51 = vld [vmem:[%s6047_s2 + $0x3a8] ss:$16 sps:$4 sm:$0xff]  }
  0x44   : > { %1245 = vmatprep.subr.bf16.mxu1 %v3989_v53  ;;  %v4082_v53 = vld [vmem:[%s6047_s2 + $0x38c] ss:$16 sps:$4 sm:$0xff]  }
  0x46   : > { %1205 = vmatpush2.bf16.msra.mxu0 %v3991_v54  ;;  %v4077_v54 = vld [vmem:[%s6047_s2 + $0x188] ss:$16 sps:$4 sm:$0xff]  }
  0x47   : > { %1246 = vmatpush2.bf16.msra.mxu1 %v3992_v55  ;;  %1206 = vmatprep.subr.bf16.mxu0 %v3993_v56  ;;  %v4080_v55 = vld [vmem:[%s6047_s2 + $0x388] ss:$16 sps:$4 sm:$0xff]   ;;  %v4085_v56 = vld [vmem:[%s6047_s2 + $0x16c] ss:$16 sps:$4 sm:$0xff]  }
  0x48   : > { %1247 = vmatprep.subr.bf16.mxu1 %v3995_v57  ;;  %v4088_v57 = vld [vmem:[%s6047_s2 + $0x36c] ss:$16 sps:$4 sm:$0xff]  }
  0x4a   : > { %1207 = vmatpush2.bf16.msra.mxu0 %v3997_v58  ;;  %v4083_v58 = vld [vmem:[%s6047_s2 + $0x168] ss:$16 sps:$4 sm:$0xff]  }
  0x4b   : > { %1248 = vmatpush2.bf16.msra.mxu1 %v3998_v59  ;;  %1208 = vmatprep.subr.bf16.mxu0 %v3999_v60  ;;  %v4086_v59 = vld [vmem:[%s6047_s2 + $0x368] ss:$16 sps:$4 sm:$0xff]   ;;  %v4091_v60 = vld [vmem:[%s6047_s2 + $0x14c] ss:$16 sps:$4 sm:$0xff]  }
  0x4c   : > { %1249 = vmatprep.subr.bf16.mxu1 %v4001_v61  ;;  %v4094_v61 = vld [vmem:[%s6047_s2 + $0x34c] ss:$16 sps:$4 sm:$0xff]  }
  0x4e   : > { %1209 = vmatpush2.bf16.msra.mxu0 %v4003_v62  ;;  %v4089_v62 = vld [vmem:[%s6047_s2 + $0x148] ss:$16 sps:$4 sm:$0xff]  }
  0x4f   : > { %1250 = vmatpush2.bf16.msra.mxu1 %v4004_v63  ;;  %1210 = vmatprep.subr.bf16.mxu0 %v4005_v0  ;;  %v4092_v63 = vld [vmem:[%s6047_s2 + $0x348] ss:$16 sps:$4 sm:$0xff]   ;;  %v4097_v0 = vld [vmem:[%s6047_s2 + $0x12c] ss:$16 sps:$4 sm:$0xff]  }
  0x50   : > { %1251 = vmatprep.subr.bf16.mxu1 %v4007_v1  ;;  %v4100_v1 = vld [vmem:[%s6047_s2 + $0x32c] ss:$16 sps:$4 sm:$0xff]  }
  0x52   : > { %1211 = vmatpush2.bf16.msra.mxu0 %v4009_v2  ;;  %v4095_v2 = vld [vmem:[%s6047_s2 + $0x128] ss:$16 sps:$4 sm:$0xff]  }
  0x53   : > { %1252 = vmatpush2.bf16.msra.mxu1 %v4010_v3  ;;  %1262 = vmatprep.subr.bf16.mxu0 %v4013_v6  ;;  %v4098_v3 = vld [vmem:[%s6047_s2 + $0x328] ss:$16 sps:$4 sm:$0xff]  }
  0x54   : > { %1303 = vmatprep.subr.bf16.mxu1 %v4016_v7  ;;  %v4101_v6 = vld [vmem:[%s6047_s2 + $0x108] ss:$16 sps:$4 sm:$0xff]  }
  0x55   : > { %1213 = vmatmul.mubr.bf16.vlgmr.msra.gmra.mxu0 %v4878_v8  ;;  %v4104_v7 = vld [vmem:[%s6047_s2 + $0x308] ss:$16 sps:$4 sm:$0xff]  }
  0x56   : > { %1254 = vmatmul.mubr.bf16.vlgmr.msra.gmra.mxu1 %v4880_v9  ;;  %1263 = vmatpush1.bf16.msra.mxu0 %v4011_v10 }
  0x57   : > { %1304 = vmatpush1.bf16.msra.mxu1 %v4014_v11  ;;  %1264 = vmatprep.subr.bf16.mxu0 %v4019_v12 }
  0x58   : > { %1305 = vmatprep.subr.bf16.mxu1 %v4022_v13  ;;  %1294 = vmatprep.mubr.bf16.mxu0 %v4818_v49  ;;  %v4076_v49 = vld [vmem:[%s6047_s2 + $0x3ac] ss:$16 sps:$4 sm:$0xff]  }
  0x59   : > { %1335 = vmatprep.mubr.bf16.mxu1 %v389_v52  ;;  %v4079_v52 = vld [vmem:[%s6047_s2 + $0x18c] ss:$16 sps:$4 sm:$0xff]  }
  0x5a   : > { %1265 = vmatpush1.bf16.msra.mxu0 %v4017_v14 }
  0x5b   : > { %1306 = vmatpush1.bf16.msra.mxu1 %v4020_v15  ;;  %1266 = vmatprep.subr.bf16.mxu0 %v4025_v16 }
  0x5c   : > { %1307 = vmatprep.subr.bf16.mxu1 %v4028_v17 }
  0x5e   : > { %1267 = vmatpush1.bf16.msra.mxu0 %v4023_v18  ;;  %v520_v18 = vlaneseq }
  0x5f   : > { %1308 = vmatpush1.bf16.msra.mxu1 %v4026_v19  ;;  %1268 = vmatprep.subr.bf16.mxu0 %v4031_v20 }
  0x60   : > { %1309 = vmatprep.subr.bf16.mxu1 %v4034_v21  ;;  %v521_v19 = vshrl.u32 %v520_v18, 7  ;;  %v4143_v18 = vld [vmem:[%s6049_s4 + $0x20] ss:$16 sps:$4 sm:$0xff]  }
  0x62   : > { %1269 = vmatpush1.bf16.msra.mxu0 %v4029_v22  ;;  %v5073_v20 = vsub.s32 0, %v521_v19  ;;  %v5075_v21 = vsub.s32 1, %v521_v19 }
  0x63   : > { %1310 = vmatpush1.bf16.msra.mxu1 %v4032_v23  ;;  %1270 = vmatprep.subr.bf16.mxu0 %v4037_v24 }
  0x64   : > { %1311 = vmatprep.subr.bf16.mxu1 %v4040_v25  ;;  %v5082_v25 = vsub.s32 2, %v521_v19 }
  0x66   : > { %1271 = vmatpush1.bf16.msra.mxu0 %v4035_v26  ;;  %v5089_v26 = vsub.s32 3, %v521_v19  ;;  %v4146_v19 = vld [vmem:[%s6049_s4 + $0x220] ss:$16 sps:$4 sm:$0xff]  }
  0x67   : > { %1312 = vmatpush1.bf16.msra.mxu1 %v4038_v27  ;;  %1272 = vmatprep.subr.bf16.mxu0 %v4043_v28 }
  0x68   : > { %1313 = vmatprep.subr.bf16.mxu1 %v4046_v29 }
  0x6a   : > { %1273 = vmatpush1.bf16.msra.mxu0 %v4041_v30  ;;  %v382_v30 = vld [vmem:[%s377_s20] sm:$0xff] }
  0x6b   : > { %1314 = vmatpush1.bf16.msra.mxu1 %v4044_v31  ;;  %1274 = vmatprep.subr.bf16.mxu0 %v4049_v32  ;;  %v383_v31 = vld [vmem:[%s377_s20 + $0x8] sm:$0xff] }
  0x6c   : > { %1315 = vmatprep.subr.bf16.mxu1 %v4052_v33 }
  0x6e   : > { %1275 = vmatpush1.bf16.msra.mxu0 %v4047_v34 }
  0x6f   : > { %1316 = vmatpush1.bf16.msra.mxu1 %v4050_v35  ;;  %1276 = vmatprep.subr.bf16.mxu0 %v4055_v36 }
  0x70   : > { %1317 = vmatprep.subr.bf16.mxu1 %v4058_v37 }
  0x72   : > { %1277 = vmatpush1.bf16.msra.mxu0 %v4053_v38  ;;  %v384_v38 = vld [vmem:[%s377_s20 + $0x10] sm:$0xff] }
  0x73   : > { %1318 = vmatpush1.bf16.msra.mxu1 %v4056_v39  ;;  %1278 = vmatprep.subr.bf16.mxu0 %v4061_v40 }
  0x74   : > { %1319 = vmatprep.subr.bf16.mxu1 %v4064_v41 }
  0x76   : > { %1279 = vmatpush2.bf16.msra.mxu0 %v4059_v42 }
  0x77   : > { %1320 = vmatpush2.bf16.msra.mxu1 %v4062_v43  ;;  %1280 = vmatprep.subr.bf16.mxu0 %v4067_v44 }
  0x78   : > { %1321 = vmatprep.subr.bf16.mxu1 %v4070_v45  ;;  %v385_v45 = vld [vmem:[%s377_s20 + $0x18] sm:$0xff]  ;;  %s3390_s20 = scalar_lea.sflag [#allocation3], %s365_s26 }
  0x7a   : > { %1281 = vmatpush2.bf16.msra.mxu0 %v4065_v46 }
  0x7b   : > { %1322 = vmatpush2.bf16.msra.mxu1 %v4068_v47  ;;  %1282 = vmatprep.subr.bf16.mxu0 %v4073_v48 }
  0x7c   : > { %1323 = vmatprep.subr.bf16.mxu1 %v4076_v49 }
  0x7e   : > { %1283 = vmatpush2.bf16.msra.mxu0 %v4071_v50 }
  0x7f   : > { %1324 = vmatpush2.bf16.msra.mxu1 %v4074_v51  ;;  %1284 = vmatprep.subr.bf16.mxu0 %v4079_v52 }
  0x80   : > { %1325 = vmatprep.subr.bf16.mxu1 %v4082_v53 }
  0x82   : > { %1285 = vmatpush2.bf16.msra.mxu0 %v4077_v54  ;;  %v4107_v54 = vld [vmem:[%s6049_s4 + $0xe0] ss:$16 sps:$4 sm:$0xff]  }
  0x83   : > { %1326 = vmatpush2.bf16.msra.mxu1 %v4080_v55  ;;  %1286 = vmatprep.subr.bf16.mxu0 %v4085_v56  ;;  %v4109_v55 = vld [vmem:[%s6049_s4 + $0xe4] ss:$16 sps:$4 sm:$0xff]   ;;  %v4110_v56 = vld [vmem:[%s6049_s4 + $0x2e0] ss:$16 sps:$4 sm:$0xff]  }
  0x84   : > { %1327 = vmatprep.subr.bf16.mxu1 %v4088_v57  ;;  %v4112_v57 = vld [vmem:[%s6049_s4 + $0x2e4] ss:$16 sps:$4 sm:$0xff]  }
  0x86   : > { %1287 = vmatpush2.bf16.msra.mxu0 %v4083_v58  ;;  %v4115_v58 = vld [vmem:[%s6049_s4 + $0xc4] ss:$16 sps:$4 sm:$0xff]  }
  0x87   : > { %1328 = vmatpush2.bf16.msra.mxu1 %v4086_v59  ;;  %1288 = vmatprep.subr.bf16.mxu0 %v4091_v60  ;;  %v4118_v59 = vld [vmem:[%s6049_s4 + $0x2c4] ss:$16 sps:$4 sm:$0xff]   ;;  %v4113_v60 = vld [vmem:[%s6049_s4 + $0xc0] ss:$16 sps:$4 sm:$0xff]  }
  0x88   : > { %1329 = vmatprep.subr.bf16.mxu1 %v4094_v61  ;;  %v4116_v61 = vld [vmem:[%s6049_s4 + $0x2c0] ss:$16 sps:$4 sm:$0xff]  }
  0x8a   : > { %1289 = vmatpush2.bf16.msra.mxu0 %v4089_v62  ;;  %v4121_v62 = vld [vmem:[%s6049_s4 + $0xa4] ss:$16 sps:$4 sm:$0xff]  }
  0x8b   : > { %1330 = vmatpush2.bf16.msra.mxu1 %v4092_v63  ;;  %1290 = vmatprep.subr.bf16.mxu0 %v4097_v0  ;;  %v4124_v63 = vld [vmem:[%s6049_s4 + $0x2a4] ss:$16 sps:$4 sm:$0xff]   ;;  %v4119_v0 = vld [vmem:[%s6049_s4 + $0xa0] ss:$16 sps:$4 sm:$0xff]  }
  0x8c   : > { %1331 = vmatprep.subr.bf16.mxu1 %v4100_v1  ;;  %v4122_v1 = vld [vmem:[%s6049_s4 + $0x2a0] ss:$16 sps:$4 sm:$0xff]  }
  0x8e   : > { %1291 = vmatpush2.bf16.msra.mxu0 %v4095_v2  ;;  %v4127_v2 = vld [vmem:[%s6049_s4 + $0x84] ss:$16 sps:$4 sm:$0xff]  }
  0x8f   : > { %1332 = vmatpush2.bf16.msra.mxu1 %v4098_v3  ;;  %1292 = vmatprep.subr.bf16.mxu0 %v4103_v4  ;;  %v4130_v3 = vld [vmem:[%s6049_s4 + $0x284] ss:$16 sps:$4 sm:$0xff]   ;;  %v4125_v4 = vld [vmem:[%s6049_s4 + $0x80] ss:$16 sps:$4 sm:$0xff]  }
  0x90   : > { %1333 = vmatprep.subr.bf16.mxu1 %v4106_v5  ;;  %v4128_v5 = vld [vmem:[%s6049_s4 + $0x280] ss:$16 sps:$4 sm:$0xff]  }
  0x92   : > { %1293 = vmatpush2.bf16.msra.mxu0 %v4101_v6  ;;  %v4133_v6 = vld [vmem:[%s6049_s4 + $0x64] ss:$16 sps:$4 sm:$0xff]  }
  0x93   : > { %1334 = vmatpush2.bf16.msra.mxu1 %v4104_v7  ;;  %2221 = vmatprep.subr.bf16.mxu0 %v4109_v55  ;;  %v4136_v7 = vld [vmem:[%s6049_s4 + $0x264] ss:$16 sps:$4 sm:$0xff]  }
  0x94   : > { %2262 = vmatprep.subr.bf16.mxu1 %v4112_v57  ;;  %v4181_v55 = vld [vmem:[%s6049_s4 + $0x164] ss:$16 sps:$4 sm:$0xff]   ;;  %v4179_v57 = vld [vmem:[%s6049_s4 + $0x160] ss:$16 sps:$4 sm:$0xff]  }
  0x95   : > { %1295 = vmatmul.mubr.bf16.vlgmr.msra.gmra.mxu0 %v4878_v8  ;;  %v518_v8 = vld [vmem:[%s6048_s3] sm:$0xf] }
  0x96   : > { %1336 = vmatmul.mubr.bf16.vlgmr.msra.gmra.mxu1 %v4880_v9  ;;  %v523_v9 = vrot.slane %v518_v8, %v5073_v20  ;;  %v527_v22 = vrot.slane %v518_v8, %v5075_v21  ;;  %v531_v29 = vrot.slane %v518_v8, %v5082_v25  ;;  %v535_v32 = vrot.slane %v518_v8, %v5089_v26  ;;  %v4151_v8 = vld [vmem:[%s6049_s4 + $0x4] ss:$16 sps:$4 sm:$0xff]  }
  0x97   : > { %2222 = vmatpush1.bf16.msra.mxu0 %v4107_v54  ;;  %2263 = vmatpush1.bf16.msra.mxu1 %v4110_v56  ;;  %v4178_v54 = vld [vmem:[%s6049_s4 + $0x384] ss:$16 sps:$4 sm:$0xff]  }
  0x98   : > { %2223 = vmatprep.subr.bf16.mxu0 %v4115_v58  ;;  %2264 = vmatprep.subr.bf16.mxu1 %v4118_v59  ;;  %v4184_v56 = vld [vmem:[%s6049_s4 + $0x364] ss:$16 sps:$4 sm:$0xff]   ;;  %v4182_v58 = vld [vmem:[%s6049_s4 + $0x360] ss:$16 sps:$4 sm:$0xff]  }
  0x99   : > { %v4187_v59 = vld [vmem:[%s6049_s4 + $0x144] ss:$16 sps:$4 sm:$0xff]  }
  0x9b   : > { %2224 = vmatpush1.bf16.msra.mxu0 %v4113_v60  ;;  %2265 = vmatpush1.bf16.msra.mxu1 %v4116_v61  ;;  %v4190_v60 = vld [vmem:[%s6049_s4 + $0x344] ss:$16 sps:$4 sm:$0xff]   ;;  %v4185_v61 = vld [vmem:[%s6049_s4 + $0x140] ss:$16 sps:$4 sm:$0xff]  }
  0x9c   : > { %2225 = vmatprep.subr.bf16.mxu0 %v4121_v62  ;;  %2266 = vmatprep.subr.bf16.mxu1 %v4124_v63  ;;  %v4188_v62 = vld [vmem:[%s6049_s4 + $0x340] ss:$16 sps:$4 sm:$0xff]   ;;  %v4193_v63 = vld [vmem:[%s6049_s4 + $0x124] ss:$16 sps:$4 sm:$0xff]  }
  0x9f   : > { %2226 = vmatpush1.bf16.msra.mxu0 %v4119_v0  ;;  %2267 = vmatpush1.bf16.msra.mxu1 %v4122_v1  ;;  %v4196_v0 = vld [vmem:[%s6049_s4 + $0x324] ss:$16 sps:$4 sm:$0xff]   ;;  %v4191_v1 = vld [vmem:[%s6049_s4 + $0x120] ss:$16 sps:$4 sm:$0xff]  }
  0xa0   : > { %2227 = vmatprep.subr.bf16.mxu0 %v4127_v2  ;;  %2268 = vmatprep.subr.bf16.mxu1 %v4130_v3  ;;  %v4194_v2 = vld [vmem:[%s6049_s4 + $0x320] ss:$16 sps:$4 sm:$0xff]   ;;  %v4199_v3 = vld [vmem:[%s6049_s4 + $0x104] ss:$16 sps:$4 sm:$0xff]  }
  0xa3   : > { %2228 = vmatpush1.bf16.msra.mxu0 %v4125_v4  ;;  %2269 = vmatpush1.bf16.msra.mxu1 %v4128_v5  ;;  %v4202_v4 = vld [vmem:[%s6049_s4 + $0x304] ss:$16 sps:$4 sm:$0xff]   ;;  %v4197_v5 = vld [vmem:[%s6049_s4 + $0x100] ss:$16 sps:$4 sm:$0xff]  }
  0xa4   : > { %2229 = vmatprep.subr.bf16.mxu0 %v4133_v6  ;;  %2270 = vmatprep.subr.bf16.mxu1 %v4136_v7  ;;  %v4200_v6 = vld [vmem:[%s6049_s4 + $0x300] ss:$16 sps:$4 sm:$0xff]   ;;  %v4205_v7 = vld [vmem:[%s6049_s4 + $0xec] ss:$16 sps:$4 sm:$0xff]  }
 0x115   : > { %v1214_v10 = vpop.f32.mrf.mxu0 }
 0x116   : > { %v1255_v11 = vpop.f32.mrf.mxu1  ;;  %v1215_v23 = vadd.f32 %v1214_v10, %v523_v9  ;;  %v4131_v10 = vld [vmem:[%s6049_s4 + $0x60] ss:$16 sps:$4 sm:$0xff]   ;;  %v4154_v9 = vld [vmem:[%s6049_s4 + $0x204] ss:$16 sps:$4 sm:$0xff]  }
 0x117   : > { %v1216_v12 = vpop.f32.mrf.mxu0  ;;  %2230 = vmatpush1.bf16.msra.mxu0 %v4131_v10  ;;  %v4208_v10 = vld [vmem:[%s6049_s4 + $0x2ec] ss:$16 sps:$4 sm:$0xff]  }
 0x118   : > { %v1257_v13 = vpop.f32.mrf.mxu1  ;;  %v1217_v24 = vadd.f32 %v1216_v12, %v527_v22  ;;  %v1256_v27 = vadd.f32 %v1255_v11, %v1215_v23  ;;  %v4134_v11 = vld [vmem:[%s6049_s4 + $0x260] ss:$16 sps:$4 sm:$0xff]   ;;  %v4139_v12 = vld [vmem:[%s6049_s4 + $0x44] ss:$16 sps:$4 sm:$0xff]  }
 0x119   : > { %v1218_v14 = vpop.f32.mrf.mxu0  ;;  %2271 = vmatpush1.bf16.msra.mxu1 %v4134_v11  ;;  %2231 = vmatprep.subr.bf16.mxu0 %v4139_v12  ;;  %v4149_v22 = vld [vmem:[%s6049_s4] ss:$16 sps:$4 sm:$0xff]  }
 0x11a   : > { %v1259_v15 = vpop.f32.mrf.mxu1  ;;  %v1258_v28 = vadd.f32 %v1257_v13, %v1217_v24  ;;  %v5093_v35 = vadd.f32 %v1256_v27, %v382_v30  ;;  %v4142_v13 = vld [vmem:[%s6049_s4 + $0x244] ss:$16 sps:$4 sm:$0xff]   ;;  %v4137_v14 = vld [vmem:[%s6049_s4 + $0x40] ss:$16 sps:$4 sm:$0xff]  }
 0x11b   : > { %v1219_v16 = vpop.f32.mrf.mxu0  ;;  %v4140_v15 = vld [vmem:[%s6049_s4 + $0x240] ss:$16 sps:$4 sm:$0xff]   ;;  %2272 = vmatprep.subr.bf16.mxu1 %v4142_v13  ;;  %2232 = vmatpush1.bf16.msra.mxu0 %v4137_v14  ;;  %v4157_v24 = vld [vmem:[%s6049_s4 + $0x1e4] ss:$16 sps:$4 sm:$0xff]  }
 0x11c   : > { %v1260_v17 = vpop.f32.mrf.mxu1  ;;  %v5095_v36 = vadd.f32 %v1258_v28, %v383_v31  ;;  %v4145_v16 = vld [vmem:[%s6049_s4 + $0x24] ss:$16 sps:$4 sm:$0xff]   ;;  %v4152_v23 = vld [vmem:[%s6049_s4 + $0x200] ss:$16 sps:$4 sm:$0xff]  }
 0x11d   : > { %v4148_v17 = vld [vmem:[%s6049_s4 + $0x224] ss:$16 sps:$4 sm:$0xff]   ;;  %2273 = vmatpush1.bf16.msra.mxu1 %v4140_v15  ;;  %2233 = vmatprep.subr.bf16.mxu0 %v4145_v16  ;;  %v4155_v28 = vld [vmem:[%s6049_s4 + $0x1e0] ss:$16 sps:$4 sm:$0xff]  }
 0x11e   : > { %v1350_v48 = vadd.f32 %v5095_v36, %v5093_v35  ;;  %2274 = vmatprep.subr.bf16.mxu1 %v4148_v17  ;;  %v4160_v27 = vld [vmem:[%s6049_s4 + $0x3e4] ss:$16 sps:$4 sm:$0xff]   ;;  %v1348_v14 = vld [vmem:[%s6053_s8] sm:$0xf] }
 0x11f   : > { %2234 = vmatpush1.bf16.msra.mxu0 %v4143_v18  ;;  %v4163_v30 = vld [vmem:[%s6049_s4 + $0x1c4] ss:$16 sps:$4 sm:$0xff]   ;;  %v1349_v15 = vld [vmem:[%s6054_s9] sm:$0xf]  ;;  %v5330_v16 = vrot.slane %v1348_v14, %v5075_v21  ;;  %v5333_v17 = vrot.slane %v1348_v14, %v5089_v26  ;;  %v5336_v18 = vrot.slane %v1348_v14, %v5073_v20 }
 0x120   : > { %2235 = vmatprep.subr.bf16.mxu0 %v4151_v8  ;;  %v4166_v31 = vld [vmem:[%s6049_s4 + $0x3c4] ss:$16 sps:$4 sm:$0xff]  }
 0x121   : > { %2275 = vmatpush1.bf16.msra.mxu1 %v4146_v19  ;;  %v5339_v19 = vrot.slane %v1348_v14, %v5082_v25  ;;  %v4254_v14 = vld [vmem:[%s6049_s4 + $0x3e8] ss:$16 sps:$4 sm:$0xff]  }
 0x122   : > { %2276 = vmatprep.subr.bf16.mxu1 %v4154_v9  ;;  %v5342_v9 = vrot.slane %v1349_v15, %v5075_v21 }
 0x123   : > { %2236 = vmatpush1.bf16.msra.mxu0 %v4149_v22  ;;  %v5345_v22 = vrot.slane %v1349_v15, %v5089_v26 }
 0x124   : > { %2237 = vmatprep.subr.bf16.mxu0 %v4157_v24  ;;  %v5351_v24 = vrot.slane %v1349_v15, %v5082_v25 }
 0x125   : > { %2277 = vmatpush1.bf16.msra.mxu1 %v4152_v23  ;;  %v5348_v23 = vrot.slane %v1349_v15, %v5073_v20  ;;  %v4259_v15 = vld [vmem:[%s6049_s4 + $0x1cc] ss:$16 sps:$4 sm:$0xff]  }
 0x126   : > { %2278 = vmatprep.subr.bf16.mxu1 %v4160_v27 }
 0x127   : > { %2238 = vmatpush2.bf16.msra.mxu0 %v4155_v28 }
 0x128   : > { %2239 = vmatprep.subr.bf16.mxu0 %v4163_v30 }
 0x155   : > { %v1296_v33 = vpop.f32.mrf.mxu0 }
 0x156   : > { %v1337_v34 = vpop.f32.mrf.mxu1  ;;  %v1297_v37 = vadd.f32 %v1296_v33, %v531_v29  ;;  %v4158_v29 = vld [vmem:[%s6049_s4 + $0x3e0] ss:$16 sps:$4 sm:$0xff]  }
 0x157   : > { %v1298_v39 = vpop.f32.mrf.mxu0  ;;  %2279 = vmatpush2.bf16.msra.mxu1 %v4158_v29  ;;  %v4164_v33 = vld [vmem:[%s6049_s4 + $0x3c0] ss:$16 sps:$4 sm:$0xff]  }
 0x158   : > { %v1339_v40 = vpop.f32.mrf.mxu1  ;;  %v1338_v41 = vadd.f32 %v1337_v34, %v1297_v37  ;;  %v1299_v42 = vadd.f32 %v1298_v39, %v535_v32  ;;  %v4161_v32 = vld [vmem:[%s6049_s4 + $0x1c0] ss:$16 sps:$4 sm:$0xff]   ;;  %2280 = vmatprep.subr.bf16.mxu1 %v4166_v31 }
 0x159   : > { %v1300_v43 = vpop.f32.mrf.mxu0  ;;  %2240 = vmatpush2.bf16.msra.mxu0 %v4161_v32 }
 0x15a   : > { %v1341_v44 = vpop.f32.mrf.mxu1  ;;  %v5097_v46 = vadd.f32 %v1338_v41, %v384_v38  ;;  %v1340_v47 = vadd.f32 %v1339_v40, %v1299_v42 }
 0x15b   : > { %v1301_v49 = vpop.f32.mrf.mxu0  ;;  %2281 = vmatpush2.bf16.msra.mxu1 %v4164_v33 }
 0x15c   : > { %v1342_v50 = vpop.f32.mrf.mxu1  ;;  %v5101_v51 = vadd.f32 %v1340_v47, %v385_v45  ;;  %v1351_v52 = vadd.f32 %v1350_v48, %v5097_v46  ;;  %v4172_v48 = vld [vmem:[%s6049_s4 + $0x3a4] ss:$16 sps:$4 sm:$0xff]   ;;  %v4167_v49 = vld [vmem:[%s6049_s4 + $0x1a0] ss:$16 sps:$4 sm:$0xff]  }
 0x15d   : > { %v4170_v50 = vld [vmem:[%s6049_s4 + $0x3a0] ss:$16 sps:$4 sm:$0xff]   ;;  %2282 = vmatprep.subr.bf16.mxu1 %v4172_v48  ;;  %v4212_v48 = vld [vmem:[%s6049_s4 + $0x2c8] ss:$16 sps:$4 sm:$0xff]  }
 0x15e   : > { %v1352_v53 = vadd.f32 %v1351_v52, %v5101_v51  ;;  %v4175_v52 = vld [vmem:[%s6049_s4 + $0x184] ss:$16 sps:$4 sm:$0xff]  }
 0x15f   : > { %2283 = vmatpush2.bf16.msra.mxu1 %v4170_v50  ;;  %v4220_v50 = vld [vmem:[%s6049_s4 + $0x2ac] ss:$16 sps:$4 sm:$0xff]  }
 0x160   : > { %1353 = vadd.xlane.f32.xlu0 %v1352_v53  ;;  %v4176_v53 = vld [vmem:[%s6049_s4 + $0x380] ss:$16 sps:$4 sm:$0xff]   ;;  %2284 = vmatprep.subr.bf16.mxu1 %v4178_v54  ;;  %v4226_v54 = vld [vmem:[%s6049_s4 + $0x28c] ss:$16 sps:$4 sm:$0xff]  }
 0x163   : > { %2285 = vmatpush2.bf16.msra.mxu1 %v4176_v53  ;;  %v4223_v53 = vld [vmem:[%s6049_s4 + $0x8c] ss:$16 sps:$4 sm:$0xff]  }
 0x164   : > { %2286 = vmatprep.subr.bf16.mxu1 %v4184_v56  ;;  %v4224_v56 = vld [vmem:[%s6049_s4 + $0x288] ss:$16 sps:$4 sm:$0xff]  }
 0x167   : > { %2287 = vmatpush2.bf16.msra.mxu1 %v4182_v58  ;;  %v4232_v58 = vld [vmem:[%s6049_s4 + $0x26c] ss:$16 sps:$4 sm:$0xff]  }
 0x168   : > { %2288 = vmatprep.subr.bf16.mxu1 %v4190_v60  ;;  %v4230_v60 = vld [vmem:[%s6049_s4 + $0x268] ss:$16 sps:$4 sm:$0xff]  }
 0x16b   : > { %2289 = vmatpush2.bf16.msra.mxu1 %v4188_v62  ;;  %v4238_v62 = vld [vmem:[%s6049_s4 + $0x24c] ss:$16 sps:$4 sm:$0xff]  }
 0x16c   : > { %2290 = vmatprep.subr.bf16.mxu1 %v4196_v0  ;;  %v4236_v0 = vld [vmem:[%s6049_s4 + $0x248] ss:$16 sps:$4 sm:$0xff]  }
 0x16f   : > { %2291 = vmatpush2.bf16.msra.mxu1 %v4194_v2  ;;  %v4244_v2 = vld [vmem:[%s6049_s4 + $0x22c] ss:$16 sps:$4 sm:$0xff]  }
 0x170   : > { %2292 = vmatprep.subr.bf16.mxu1 %v4202_v4  ;;  %v4242_v4 = vld [vmem:[%s6049_s4 + $0x228] ss:$16 sps:$4 sm:$0xff]  }
 0x173   : > { %2293 = vmatpush2.bf16.msra.mxu1 %v4200_v6  ;;  %v4250_v6 = vld [vmem:[%s6049_s4 + $0x20c] ss:$16 sps:$4 sm:$0xff]  }
 0x174   : > { %2344 = vmatprep.subr.bf16.mxu1 %v4208_v10  ;;  %v4248_v10 = vld [vmem:[%s6049_s4 + $0x208] ss:$16 sps:$4 sm:$0xff]  }
 0x1e9   : > { %v1354_v34 = vpop.xlane.xlu0 %1353 }
 0x1ea   : > { %v1356_v37 = vmul.f32 0.001953125, %v1354_v34 }
 0x1ec   : > { %v5226_v38 = vsub.f32 %v5093_v35, %v1356_v37  ;;  %v5229_v39 = vsub.f32 %v5095_v36, %v1356_v37  ;;  %v5232_v40 = vsub.f32 %v5097_v46, %v1356_v37  ;;  %v5235_v41 = vsub.f32 %v5101_v51, %v1356_v37  ;;  %v4169_v46 = vld [vmem:[%s6049_s4 + $0x1a4] ss:$16 sps:$4 sm:$0xff]   ;;  %v4173_v51 = vld [vmem:[%s6049_s4 + $0x180] ss:$16 sps:$4 sm:$0xff]  }
 0x1ed   : > { %2241 = vmatprep.subr.bf16.mxu0 %v4169_v46  ;;  %v4209_v46 = vld [vmem:[%s6049_s4 + $0xc8] ss:$16 sps:$4 sm:$0xff]  }
 0x1ee   : > { %v1361_v42 = vmul.f32 %v5226_v38, %v5226_v38  ;;  %v1362_v43 = vmul.f32 %v5229_v39, %v5229_v39  ;;  %v1363_v44 = vmul.f32 %v5232_v40, %v5232_v40  ;;  %v1364_v36 = vmul.f32 %v5235_v41, %v5235_v41  ;;  %2242 = vmatpush2.bf16.msra.mxu0 %v4167_v49  ;;  %v4217_v49 = vld [vmem:[%s6049_s4 + $0xac] ss:$16 sps:$4 sm:$0xff]  }
 0x1ef   : > { %2243 = vmatprep.subr.bf16.mxu0 %v4175_v52  ;;  %v4218_v52 = vld [vmem:[%s6049_s4 + $0x2a8] ss:$16 sps:$4 sm:$0xff]  }
 0x1f0   : > { %v1365_v35 = vadd.f32 %v1362_v43, %v1361_v42  ;;  %v4203_v43 = vld [vmem:[%s6049_s4 + $0xe8] ss:$16 sps:$4 sm:$0xff]  }
 0x1f2   : > { %v1366_v45 = vadd.f32 %v1365_v35, %v1363_v44  ;;  %2244 = vmatpush2.bf16.msra.mxu0 %v4173_v51  ;;  %v4206_v44 = vld [vmem:[%s6049_s4 + $0x2e8] ss:$16 sps:$4 sm:$0xff]  }
 0x1f3   : > { %2245 = vmatprep.subr.bf16.mxu0 %v4181_v55  ;;  %v4215_v51 = vld [vmem:[%s6049_s4 + $0xa8] ss:$16 sps:$4 sm:$0xff]  }
 0x1f4   : > { %v1367_v47 = vadd.f32 %v1366_v45, %v1364_v36  ;;  %v4211_v45 = vld [vmem:[%s6049_s4 + $0xcc] ss:$16 sps:$4 sm:$0xff]   ;;  %v4221_v55 = vld [vmem:[%s6049_s4 + $0x88] ss:$16 sps:$4 sm:$0xff]  }
 0x1f6   : > { %1368 = vadd.xlane.f32.xlu0 %v1367_v47  ;;  %2246 = vmatpush2.bf16.msra.mxu0 %v4179_v57  ;;  %v4214_v47 = vld [vmem:[%s6049_s4 + $0x2cc] ss:$16 sps:$4 sm:$0xff]  }
 0x1f7   : > { %2247 = vmatprep.subr.bf16.mxu0 %v4187_v59  ;;  %v4229_v57 = vld [vmem:[%s6049_s4 + $0x6c] ss:$16 sps:$4 sm:$0xff]   ;;  %v4227_v59 = vld [vmem:[%s6049_s4 + $0x68] ss:$16 sps:$4 sm:$0xff]  }
 0x1fa   : > { %2248 = vmatpush2.bf16.msra.mxu0 %v4185_v61  ;;  %v4235_v61 = vld [vmem:[%s6049_s4 + $0x4c] ss:$16 sps:$4 sm:$0xff]  }
 0x1fb   : > { %2249 = vmatprep.subr.bf16.mxu0 %v4193_v63  ;;  %v4233_v63 = vld [vmem:[%s6049_s4 + $0x48] ss:$16 sps:$4 sm:$0xff]  }
 0x1fe   : > { %2250 = vmatpush2.bf16.msra.mxu0 %v4191_v1  ;;  %v4241_v1 = vld [vmem:[%s6049_s4 + $0x2c] ss:$16 sps:$4 sm:$0xff]  }
 0x1ff   : > { %2251 = vmatprep.subr.bf16.mxu0 %v4199_v3  ;;  %v4239_v3 = vld [vmem:[%s6049_s4 + $0x28] ss:$16 sps:$4 sm:$0xff]  }
 0x202   : > { %2252 = vmatpush2.bf16.msra.mxu0 %v4197_v5  ;;  %v4247_v5 = vld [vmem:[%s6049_s4 + $0xc] ss:$16 sps:$4 sm:$0xff]  }
 0x203   : > { %2303 = vmatprep.subr.bf16.mxu0 %v4205_v7  ;;  %v4245_v7 = vld [vmem:[%s6049_s4 + $0x8] ss:$16 sps:$4 sm:$0xff]  }
 0x27f   : > { %v1369_v11 = vpop.xlane.xlu0 %1368 }
 0x280   : > { %v1370_v12 = vmul.f32 0.001953125, %v1369_v11  ;;  %v4253_v11 = vld [vmem:[%s6049_s4 + $0x1ec] ss:$16 sps:$4 sm:$0xff]  }
 0x282   : > { %v1371_v13 = vadd.f32 1e-05, %v1370_v12  ;;  %v4256_v12 = vld [vmem:[%s6049_s4 + $0x3ec] ss:$16 sps:$4 sm:$0xff]  }
 0x284   : > { %4491 = vrsqrt.f32 %v1371_v13  ;;  %v4251_v13 = vld [vmem:[%s6049_s4 + $0x1e8] ss:$16 sps:$4 sm:$0xff]  }
 0x291   : > { %v4492_v8 = vpop.eup %4491 }
 0x292   : > { %v1374_v27 = vmul.f32 %v4492_v8, %v5229_v39  ;;  %v1376_v28 = vmul.f32 %v4492_v8, %v5235_v41  ;;  %v1373_v29 = vmul.f32 %v4492_v8, %v5226_v38  ;;  %v1375_v30 = vmul.f32 %v4492_v8, %v5232_v40  ;;  %v4262_v8 = vld [vmem:[%s6049_s4 + $0x3cc] ss:$16 sps:$4 sm:$0xff]  }
 0x294   : > { %v1399_v31 = vmul.f32 %v5330_v16, %v1374_v27  ;;  %v1401_v32 = vmul.f32 %v5333_v17, %v1376_v28  ;;  %v1398_v33 = vmul.f32 %v5336_v18, %v1373_v29  ;;  %v1400_v34 = vmul.f32 %v5339_v19, %v1375_v30  ;;  %v4257_v27 = vld [vmem:[%s6049_s4 + $0x1c8] ss:$16 sps:$4 sm:$0xff]   ;;  %v4265_v29 = vld [vmem:[%s6049_s4 + $0x1ac] ss:$16 sps:$4 sm:$0xff]  }
 0x295   : > { %v4260_v28 = vld [vmem:[%s6049_s4 + $0x3c8] ss:$16 sps:$4 sm:$0xff]   ;;  %v4268_v30 = vld [vmem:[%s6049_s4 + $0x3ac] ss:$16 sps:$4 sm:$0xff]  }
 0x296   : > { %v5362_v37 = vadd.f32 %v5342_v9, %v1399_v31  ;;  %v5365_v42 = vadd.f32 %v5345_v22, %v1401_v32  ;;  %v5368_v39 = vadd.f32 %v5348_v23, %v1398_v33  ;;  %v5371_v38 = vadd.f32 %v5351_v24, %v1400_v34  ;;  %v4263_v31 = vld [vmem:[%s6049_s4 + $0x1a8] ss:$16 sps:$4 sm:$0xff]   ;;  %v4271_v33 = vld [vmem:[%s6049_s4 + $0x18c] ss:$16 sps:$4 sm:$0xff]  }
 0x297   : > { %v4266_v32 = vld [vmem:[%s6049_s4 + $0x3a8] ss:$16 sps:$4 sm:$0xff]   ;;  %v4274_v34 = vld [vmem:[%s6049_s4 + $0x38c] ss:$16 sps:$4 sm:$0xff]  }
 0x298   : > { %v1428_v40 = vpack.c.bf16 %v5362_v37, %v5362_v37  ;;  %v1430_v41 = vpack.c.bf16 %v5365_v42, %v5365_v42  ;;  %v5385_v35 = vpack.c.bf16 %v5368_v39, %v5368_v39  ;;  %v5389_v36 = vpack.c.bf16 %v5371_v38, %v5371_v38 }
 0x29a   : > { %2253 = vmatprep.mubr.bf16.mxu0 %v1428_v40  ;;  %2294 = vmatprep.mubr.bf16.mxu1 %v1430_v41 }
 0x29b   : > { %2254 = vmatmul.mubr.bf16.vlgmr.msra.gmra.mxu0 %v5385_v35  ;;  %2295 = vmatmul.mubr.bf16.vlgmr.msra.gmra.mxu1 %v5389_v36 }
 0x29c   : > { %2304 = vmatpush1.bf16.msra.mxu0 %v4203_v43  ;;  %2345 = vmatpush1.bf16.msra.mxu1 %v4206_v44  ;;  %v4277_v43 = vld [vmem:[%s6049_s4 + $0x16c] ss:$16 sps:$4 sm:$0xff]  }
 0x29d   : > { %2335 = vmatprep.mubr.bf16.mxu0 %v1428_v40  ;;  %2376 = vmatprep.mubr.bf16.mxu1 %v1430_v41  ;;  %v4269_v40 = vld [vmem:[%s6049_s4 + $0x188] ss:$16 sps:$4 sm:$0xff]   ;;  %v4280_v44 = vld [vmem:[%s6049_s4 + $0x36c] ss:$16 sps:$4 sm:$0xff]  }
 0x29e   : > { %2305 = vmatprep.subr.bf16.mxu0 %v4211_v45  ;;  %2346 = vmatprep.subr.bf16.mxu1 %v4214_v47  ;;  %v4272_v41 = vld [vmem:[%s6049_s4 + $0x388] ss:$16 sps:$4 sm:$0xff]  }
 0x29f   : > { %v4275_v45 = vld [vmem:[%s6049_s4 + $0x168] ss:$16 sps:$4 sm:$0xff]  }
 0x2a0   : > { %2306 = vmatpush1.bf16.msra.mxu0 %v4209_v46  ;;  %2347 = vmatpush1.bf16.msra.mxu1 %v4212_v48  ;;  %v4278_v47 = vld [vmem:[%s6049_s4 + $0x368] ss:$16 sps:$4 sm:$0xff]   ;;  %v4283_v46 = vld [vmem:[%s6049_s4 + $0x14c] ss:$16 sps:$4 sm:$0xff]  }
 0x2a1   : > { %2307 = vmatprep.subr.bf16.mxu0 %v4217_v49  ;;  %2348 = vmatprep.subr.bf16.mxu1 %v4220_v50  ;;  %v4286_v48 = vld [vmem:[%s6049_s4 + $0x34c] ss:$16 sps:$4 sm:$0xff]   ;;  %v4281_v49 = vld [vmem:[%s6049_s4 + $0x148] ss:$16 sps:$4 sm:$0xff]  }
 0x2a2   : > { %v4284_v50 = vld [vmem:[%s6049_s4 + $0x348] ss:$16 sps:$4 sm:$0xff]  }
 0x2a4   : > { %2308 = vmatpush1.bf16.msra.mxu0 %v4215_v51  ;;  %2349 = vmatpush1.bf16.msra.mxu1 %v4218_v52  ;;  %v4289_v51 = vld [vmem:[%s6049_s4 + $0x12c] ss:$16 sps:$4 sm:$0xff]  }
 0x2a5   : > { %2309 = vmatprep.subr.bf16.mxu0 %v4223_v53  ;;  %2350 = vmatprep.subr.bf16.mxu1 %v4226_v54  ;;  %v4292_v52 = vld [vmem:[%s6049_s4 + $0x32c] ss:$16 sps:$4 sm:$0xff]   ;;  %v4287_v53 = vld [vmem:[%s6049_s4 + $0x128] ss:$16 sps:$4 sm:$0xff]  }
 0x2a6   : > { %v4290_v54 = vld [vmem:[%s6049_s4 + $0x328] ss:$16 sps:$4 sm:$0xff]  }
 0x2a8   : > { %2310 = vmatpush1.bf16.msra.mxu0 %v4221_v55  ;;  %2351 = vmatpush1.bf16.msra.mxu1 %v4224_v56  ;;  %v4295_v55 = vld [vmem:[%s6049_s4 + $0x10c] ss:$16 sps:$4 sm:$0xff]  }
 0x2a9   : > { %2311 = vmatprep.subr.bf16.mxu0 %v4229_v57  ;;  %2352 = vmatprep.subr.bf16.mxu1 %v4232_v58  ;;  %v4298_v56 = vld [vmem:[%s6049_s4 + $0x30c] ss:$16 sps:$4 sm:$0xff]   ;;  %v4293_v57 = vld [vmem:[%s6049_s4 + $0x108] ss:$16 sps:$4 sm:$0xff]  }
 0x2aa   : > { %v4296_v58 = vld [vmem:[%s6049_s4 + $0x308] ss:$16 sps:$4 sm:$0xff]  }
 0x2ac   : > { %2312 = vmatpush1.bf16.msra.mxu0 %v4227_v59  ;;  %2353 = vmatpush1.bf16.msra.mxu1 %v4230_v60  ;;  %v4301_v59 = vld [vmem:[%s6051_s6 + $0xe4] ss:$16 sps:$4 sm:$0xff]   ;;  %v4299_v60 = vld [vmem:[%s6051_s6 + $0xe0] ss:$16 sps:$4 sm:$0xff]  }
 0x2ad   : > { %2313 = vmatprep.subr.bf16.mxu0 %v4235_v61  ;;  %2354 = vmatprep.subr.bf16.mxu1 %v4238_v62  ;;  %v4304_v61 = vld [vmem:[%s6051_s6 + $0xc4] ss:$16 sps:$4 sm:$0xff]   ;;  %v4302_v62 = vld [vmem:[%s6051_s6 + $0xc0] ss:$16 sps:$4 sm:$0xff]  }
 0x2b0   : > { %2314 = vmatpush1.bf16.msra.mxu0 %v4233_v63  ;;  %2355 = vmatpush1.bf16.msra.mxu1 %v4236_v0  ;;  %v4307_v63 = vld [vmem:[%s6051_s6 + $0xa4] ss:$16 sps:$4 sm:$0xff]   ;;  %v4305_v0 = vld [vmem:[%s6051_s6 + $0xa0] ss:$16 sps:$4 sm:$0xff]  }
 0x2b1   : > { %2315 = vmatprep.subr.bf16.mxu0 %v4241_v1  ;;  %2356 = vmatprep.subr.bf16.mxu1 %v4244_v2  ;;  %v4347_v1 = vld [vmem:[%s6051_s6 + $0x2e0] ss:$16 sps:$4 sm:$0xff]   ;;  %v4349_v2 = vld [vmem:[%s6051_s6 + $0x2e4] ss:$16 sps:$4 sm:$0xff]  }
 0x2b4   : > { %2316 = vmatpush1.bf16.msra.mxu0 %v4239_v3  ;;  %2357 = vmatpush1.bf16.msra.mxu1 %v4242_v4  ;;  %v4313_v3 = vld [vmem:[%s6051_s6 + $0x64] ss:$16 sps:$4 sm:$0xff]   ;;  %v4311_v4 = vld [vmem:[%s6051_s6 + $0x60] ss:$16 sps:$4 sm:$0xff]  }
 0x2b5   : > { %2317 = vmatprep.subr.bf16.mxu0 %v4247_v5  ;;  %2358 = vmatprep.subr.bf16.mxu1 %v4250_v6  ;;  %v4353_v5 = vld [vmem:[%s6051_s6 + $0x2c0] ss:$16 sps:$4 sm:$0xff]   ;;  %v4355_v6 = vld [vmem:[%s6051_s6 + $0x2c4] ss:$16 sps:$4 sm:$0xff]  }
 0x2b8   : > { %2318 = vmatpush1.bf16.msra.mxu0 %v4245_v7  ;;  %2359 = vmatpush1.bf16.msra.mxu1 %v4248_v10  ;;  %v4316_v7 = vld [vmem:[%s6051_s6 + $0x44] ss:$16 sps:$4 sm:$0xff]   ;;  %v4314_v10 = vld [vmem:[%s6051_s6 + $0x40] ss:$16 sps:$4 sm:$0xff]  }
 0x2b9   : > { %2319 = vmatprep.subr.bf16.mxu0 %v4253_v11  ;;  %2360 = vmatprep.subr.bf16.mxu1 %v4256_v12  ;;  %v4359_v11 = vld [vmem:[%s6051_s6 + $0x2a0] ss:$16 sps:$4 sm:$0xff]   ;;  %v4361_v12 = vld [vmem:[%s6051_s6 + $0x2a4] ss:$16 sps:$4 sm:$0xff]  }
 0x2bc   : > { %2320 = vmatpush2.bf16.msra.mxu0 %v4251_v13  ;;  %2361 = vmatpush2.bf16.msra.mxu1 %v4254_v14  ;;  %v4319_v13 = vld [vmem:[%s6051_s6 + $0x24] ss:$16 sps:$4 sm:$0xff]   ;;  %v4317_v14 = vld [vmem:[%s6051_s6 + $0x20] ss:$16 sps:$4 sm:$0xff]  }
 0x2bd   : > { %2321 = vmatprep.subr.bf16.mxu0 %v4259_v15  ;;  %2362 = vmatprep.subr.bf16.mxu1 %v4262_v8  ;;  %v4365_v15 = vld [vmem:[%s6051_s6 + $0x280] ss:$16 sps:$4 sm:$0xff]   ;;  %v4367_v8 = vld [vmem:[%s6051_s6 + $0x284] ss:$16 sps:$4 sm:$0xff]  }
 0x2c0   : > { %2322 = vmatpush2.bf16.msra.mxu0 %v4257_v27  ;;  %2363 = vmatpush2.bf16.msra.mxu1 %v4260_v28  ;;  %v4322_v27 = vld [vmem:[%s6051_s6 + $0x4] ss:$16 sps:$4 sm:$0xff]   ;;  %v4320_v28 = vld [vmem:[%s6051_s6] ss:$16 sps:$4 sm:$0xff]  }
 0x2c1   : > { %2323 = vmatprep.subr.bf16.mxu0 %v4265_v29  ;;  %2364 = vmatprep.subr.bf16.mxu1 %v4268_v30  ;;  %v4371_v29 = vld [vmem:[%s6051_s6 + $0x260] ss:$16 sps:$4 sm:$0xff]   ;;  %v4373_v30 = vld [vmem:[%s6051_s6 + $0x264] ss:$16 sps:$4 sm:$0xff]  }
 0x2c4   : > { %2324 = vmatpush2.bf16.msra.mxu0 %v4263_v31  ;;  %2365 = vmatpush2.bf16.msra.mxu1 %v4266_v32  ;;  %v4325_v31 = vld [vmem:[%s6051_s6 + $0x1e4] ss:$16 sps:$4 sm:$0xff]   ;;  %v4323_v32 = vld [vmem:[%s6051_s6 + $0x1e0] ss:$16 sps:$4 sm:$0xff]  }
 0x2c5   : > { %2325 = vmatprep.subr.bf16.mxu0 %v4271_v33  ;;  %2366 = vmatprep.subr.bf16.mxu1 %v4274_v34  ;;  %v4377_v33 = vld [vmem:[%s6051_s6 + $0x240] ss:$16 sps:$4 sm:$0xff]   ;;  %v4379_v34 = vld [vmem:[%s6051_s6 + $0x244] ss:$16 sps:$4 sm:$0xff]  }
 0x2c8   : > { %2326 = vmatpush2.bf16.msra.mxu0 %v4269_v40  ;;  %2367 = vmatpush2.bf16.msra.mxu1 %v4272_v41  ;;  %v4328_v40 = vld [vmem:[%s6051_s6 + $0x1c4] ss:$16 sps:$4 sm:$0xff]   ;;  %v4326_v41 = vld [vmem:[%s6051_s6 + $0x1c0] ss:$16 sps:$4 sm:$0xff]  }
 0x2c9   : > { %2327 = vmatprep.subr.bf16.mxu0 %v4277_v43  ;;  %2368 = vmatprep.subr.bf16.mxu1 %v4280_v44  ;;  %v4383_v43 = vld [vmem:[%s6051_s6 + $0x220] ss:$16 sps:$4 sm:$0xff]   ;;  %v4385_v44 = vld [vmem:[%s6051_s6 + $0x224] ss:$16 sps:$4 sm:$0xff]  }
 0x2cc   : > { %2328 = vmatpush2.bf16.msra.mxu0 %v4275_v45  ;;  %2369 = vmatpush2.bf16.msra.mxu1 %v4278_v47  ;;  %v4331_v45 = vld [vmem:[%s6051_s6 + $0x1a4] ss:$16 sps:$4 sm:$0xff]   ;;  %v4329_v47 = vld [vmem:[%s6051_s6 + $0x1a0] ss:$16 sps:$4 sm:$0xff]  }
 0x2cd   : > { %2329 = vmatprep.subr.bf16.mxu0 %v4283_v46  ;;  %2370 = vmatprep.subr.bf16.mxu1 %v4286_v48  ;;  %v4389_v46 = vld [vmem:[%s6051_s6 + $0x200] ss:$16 sps:$4 sm:$0xff]   ;;  %v4391_v48 = vld [vmem:[%s6051_s6 + $0x204] ss:$16 sps:$4 sm:$0xff]  }
 0x2d0   : > { %2330 = vmatpush2.bf16.msra.mxu0 %v4281_v49  ;;  %2371 = vmatpush2.bf16.msra.mxu1 %v4284_v50  ;;  %v4334_v49 = vld [vmem:[%s6051_s6 + $0x184] ss:$16 sps:$4 sm:$0xff]   ;;  %v4332_v50 = vld [vmem:[%s6051_s6 + $0x180] ss:$16 sps:$4 sm:$0xff]  }
 0x2d1   : > { %2331 = vmatprep.subr.bf16.mxu0 %v4289_v51  ;;  %2372 = vmatprep.subr.bf16.mxu1 %v4292_v52  ;;  %v4395_v51 = vld [vmem:[%s6051_s6 + $0x3e0] ss:$16 sps:$4 sm:$0xff]   ;;  %v4397_v52 = vld [vmem:[%s6051_s6 + $0x3e4] ss:$16 sps:$4 sm:$0xff]  }
 0x2d4   : > { %2332 = vmatpush2.bf16.msra.mxu0 %v4287_v53  ;;  %2373 = vmatpush2.bf16.msra.mxu1 %v4290_v54  ;;  %v4337_v53 = vld [vmem:[%s6051_s6 + $0x164] ss:$16 sps:$4 sm:$0xff]   ;;  %v4335_v54 = vld [vmem:[%s6051_s6 + $0x160] ss:$16 sps:$4 sm:$0xff]  }
 0x2d5   : > { %2333 = vmatprep.subr.bf16.mxu0 %v4295_v55  ;;  %2374 = vmatprep.subr.bf16.mxu1 %v4298_v56  ;;  %v4401_v55 = vld [vmem:[%s6051_s6 + $0x3c0] ss:$16 sps:$4 sm:$0xff]   ;;  %v4403_v56 = vld [vmem:[%s6051_s6 + $0x3c4] ss:$16 sps:$4 sm:$0xff]  }
 0x2d8   : > { %2334 = vmatpush2.bf16.msra.mxu0 %v4293_v57  ;;  %2375 = vmatpush2.bf16.msra.mxu1 %v4296_v58  ;;  %v4340_v57 = vld [vmem:[%s6051_s6 + $0x144] ss:$16 sps:$4 sm:$0xff]   ;;  %v4338_v58 = vld [vmem:[%s6051_s6 + $0x140] ss:$16 sps:$4 sm:$0xff]  }
 0x2d9   : > { %3183 = vmatprep.subr.bf16.mxu0 %v4301_v59  ;;  %3224 = vmatprep.subr.bf16.mxu1 %v4349_v2  ;;  %v4407_v59 = vld [vmem:[%s6051_s6 + $0x3a0] ss:$16 sps:$4 sm:$0xff]   ;;  %v4421_v2 = vld [vmem:[%s6051_s6 + $0x364] ss:$16 sps:$4 sm:$0xff]  }
 0x2db   : > { %2336 = vmatmul.mubr.bf16.vlgmr.msra.gmra.mxu0 %v5385_v35  ;;  %2377 = vmatmul.mubr.bf16.vlgmr.msra.gmra.mxu1 %v5389_v36  ;;  %v4310_v35 = vld [vmem:[%s6051_s6 + $0x84] ss:$16 sps:$4 sm:$0xff]   ;;  %v4308_v36 = vld [vmem:[%s6051_s6 + $0x80] ss:$16 sps:$4 sm:$0xff]  }
 0x2dc   : > { %3184 = vmatpush1.bf16.msra.mxu0 %v4299_v60  ;;  %3225 = vmatpush1.bf16.msra.mxu1 %v4347_v1  ;;  %v4409_v60 = vld [vmem:[%s6051_s6 + $0x3a4] ss:$16 sps:$4 sm:$0xff]   ;;  %v4419_v1 = vld [vmem:[%s6051_s6 + $0x360] ss:$16 sps:$4 sm:$0xff]  }
 0x2dd   : > { %3185 = vmatprep.subr.bf16.mxu0 %v4304_v61  ;;  %3226 = vmatprep.subr.bf16.mxu1 %v4355_v6  ;;  %v4343_v61 = vld [vmem:[%s6051_s6 + $0x124] ss:$16 sps:$4 sm:$0xff]  }
 0x2de   : > { %v4433_v6 = vld [vmem:[%s6051_s6 + $0x324] ss:$16 sps:$4 sm:$0xff]  }
 0x2e0   : > { %3186 = vmatpush1.bf16.msra.mxu0 %v4302_v62  ;;  %3227 = vmatpush1.bf16.msra.mxu1 %v4353_v5  ;;  %v4341_v62 = vld [vmem:[%s6051_s6 + $0x120] ss:$16 sps:$4 sm:$0xff]   ;;  %v4427_v5 = vld [vmem:[%s6051_s6 + $0x344] ss:$16 sps:$4 sm:$0xff]  }
 0x2e1   : > { %3187 = vmatprep.subr.bf16.mxu0 %v4307_v63  ;;  %3228 = vmatprep.subr.bf16.mxu1 %v4361_v12  ;;  %v4413_v63 = vld [vmem:[%s6051_s6 + $0x380] ss:$16 sps:$4 sm:$0xff]   ;;  %v4445_v12 = vld [vmem:[%s6051_s6 + $0x2ec] ss:$16 sps:$4 sm:$0xff]  }
 0x2e4   : > { %3188 = vmatpush1.bf16.msra.mxu0 %v4305_v0  ;;  %3229 = vmatpush1.bf16.msra.mxu1 %v4359_v11  ;;  %v4415_v0 = vld [vmem:[%s6051_s6 + $0x384] ss:$16 sps:$4 sm:$0xff]   ;;  %v4437_v11 = vld [vmem:[%s6051_s6 + $0x300] ss:$16 sps:$4 sm:$0xff]  }
 0x2e5   : > { %3189 = vmatprep.subr.bf16.mxu0 %v4310_v35  ;;  %3230 = vmatprep.subr.bf16.mxu1 %v4367_v8  ;;  %v4346_v35 = vld [vmem:[%s6051_s6 + $0x104] ss:$16 sps:$4 sm:$0xff]  }
 0x2e8   : > { %3190 = vmatpush1.bf16.msra.mxu0 %v4308_v36  ;;  %3231 = vmatpush1.bf16.msra.mxu1 %v4365_v15  ;;  %v4344_v36 = vld [vmem:[%s6051_s6 + $0x100] ss:$16 sps:$4 sm:$0xff]  }
 0x2e9   : > { %3191 = vmatprep.subr.bf16.mxu0 %v4313_v3  ;;  %3232 = vmatprep.subr.bf16.mxu1 %v4373_v30  ;;  %v4352_v3 = vld [vmem:[%s6051_s6 + $0xec] ss:$16 sps:$4 sm:$0xff]  }
 0x2ec   : > { %3192 = vmatpush1.bf16.msra.mxu0 %v4311_v4  ;;  %3233 = vmatpush1.bf16.msra.mxu1 %v4371_v29  ;;  %v4425_v4 = vld [vmem:[%s6051_s6 + $0x340] ss:$16 sps:$4 sm:$0xff]  }
 0x2ed   : > { %3193 = vmatprep.subr.bf16.mxu0 %v4316_v7  ;;  %3234 = vmatprep.subr.bf16.mxu1 %v4379_v34  ;;  %v4431_v7 = vld [vmem:[%s6051_s6 + $0x320] ss:$16 sps:$4 sm:$0xff]  }
 0x2f0   : > { %3194 = vmatpush1.bf16.msra.mxu0 %v4314_v10  ;;  %3235 = vmatpush1.bf16.msra.mxu1 %v4377_v33  ;;  %v4439_v10 = vld [vmem:[%s6051_s6 + $0x304] ss:$16 sps:$4 sm:$0xff]  }
 0x2f1   : > { %3195 = vmatprep.subr.bf16.mxu0 %v4319_v13  ;;  %3236 = vmatprep.subr.bf16.mxu1 %v4385_v44  ;;  %v5776_v13 = vld [vmem:[%s6050_s5] sm:$0xf] }
 0x2f2   : > { %v1568_v15 = vrot.slane %v5776_v13, %v5075_v21 }
 0x2f4   : > { %3196 = vmatpush1.bf16.msra.mxu0 %v4317_v14  ;;  %3237 = vmatpush1.bf16.msra.mxu1 %v4383_v43  ;;  %v1564_v14 = vrot.slane %v5776_v13, %v5073_v20 }
 0x2f5   : > { %3197 = vmatprep.subr.bf16.mxu0 %v4322_v27  ;;  %3238 = vmatprep.subr.bf16.mxu1 %v4391_v48 }
 0x2f8   : > { %3198 = vmatpush1.bf16.msra.mxu0 %v4320_v28  ;;  %3239 = vmatpush1.bf16.msra.mxu1 %v4389_v46  ;;  %v4350_v46 = vld [vmem:[%s6051_s6 + $0xe8] ss:$16 sps:$4 sm:$0xff]  }
 0x2f9   : > { %3199 = vmatprep.subr.bf16.mxu0 %v4325_v31  ;;  %3240 = vmatprep.subr.bf16.mxu1 %v4397_v52  ;;  %v4362_v52 = vld [vmem:[%s6051_s6 + $0xa8] ss:$16 sps:$4 sm:$0xff]  }
 0x2fc   : > { %3200 = vmatpush2.bf16.msra.mxu0 %v4323_v32  ;;  %3241 = vmatpush2.bf16.msra.mxu1 %v4395_v51  ;;  %v4364_v51 = vld [vmem:[%s6051_s6 + $0xac] ss:$16 sps:$4 sm:$0xff]  }
 0x2fd   : > { %3201 = vmatprep.subr.bf16.mxu0 %v4328_v40  ;;  %3242 = vmatprep.subr.bf16.mxu1 %v4403_v56  ;;  %v4374_v56 = vld [vmem:[%s6051_s6 + $0x68] ss:$16 sps:$4 sm:$0xff]  }
 0x300   : > { %3202 = vmatpush2.bf16.msra.mxu0 %v4326_v41  ;;  %3243 = vmatpush2.bf16.msra.mxu1 %v4401_v55  ;;  %v4376_v55 = vld [vmem:[%s6051_s6 + $0x6c] ss:$16 sps:$4 sm:$0xff]  }
 0x301   : > { %3203 = vmatprep.subr.bf16.mxu0 %v4331_v45  ;;  %3244 = vmatprep.subr.bf16.mxu1 %v4409_v60  ;;  %v4386_v60 = vld [vmem:[%s6051_s6 + $0x28] ss:$16 sps:$4 sm:$0xff]  }
 0x304   : > { %3204 = vmatpush2.bf16.msra.mxu0 %v4329_v47  ;;  %3245 = vmatpush2.bf16.msra.mxu1 %v4407_v59  ;;  %v4388_v59 = vld [vmem:[%s6051_s6 + $0x2c] ss:$16 sps:$4 sm:$0xff]  }
 0x305   : > { %3205 = vmatprep.subr.bf16.mxu0 %v4334_v49  ;;  %3246 = vmatprep.subr.bf16.mxu1 %v4415_v0  ;;  %v4358_v49 = vld [vmem:[%s6051_s6 + $0xcc] ss:$16 sps:$4 sm:$0xff]   ;;  %v4398_v0 = vld [vmem:[%s6051_s6 + $0x1e8] ss:$16 sps:$4 sm:$0xff]  }
 0x308   : > { %3206 = vmatpush2.bf16.msra.mxu0 %v4332_v50  ;;  %3247 = vmatpush2.bf16.msra.mxu1 %v4413_v63  ;;  %v4356_v50 = vld [vmem:[%s6051_s6 + $0xc8] ss:$16 sps:$4 sm:$0xff]   ;;  %v4400_v63 = vld [vmem:[%s6051_s6 + $0x1ec] ss:$16 sps:$4 sm:$0xff]  }
 0x309   : > { %3207 = vmatprep.subr.bf16.mxu0 %v4337_v53  ;;  %3248 = vmatprep.subr.bf16.mxu1 %v4421_v2  ;;  %v4370_v53 = vld [vmem:[%s6051_s6 + $0x8c] ss:$16 sps:$4 sm:$0xff]   ;;  %v4410_v2 = vld [vmem:[%s6051_s6 + $0x1a8] ss:$16 sps:$4 sm:$0xff]  }
 0x30c   : > { %3208 = vmatpush2.bf16.msra.mxu0 %v4335_v54  ;;  %3249 = vmatpush2.bf16.msra.mxu1 %v4419_v1  ;;  %v4368_v54 = vld [vmem:[%s6051_s6 + $0x88] ss:$16 sps:$4 sm:$0xff]   ;;  %v4412_v1 = vld [vmem:[%s6051_s6 + $0x1ac] ss:$16 sps:$4 sm:$0xff]  }
 0x30d   : > { %3209 = vmatprep.subr.bf16.mxu0 %v4340_v57  ;;  %3250 = vmatprep.subr.bf16.mxu1 %v4427_v5  ;;  %v4382_v57 = vld [vmem:[%s6051_s6 + $0x4c] ss:$16 sps:$4 sm:$0xff]  }
 0x30e   : > { %v4424_v5 = vld [vmem:[%s6051_s6 + $0x16c] ss:$16 sps:$4 sm:$0xff]  }
 0x310   : > { %3210 = vmatpush2.bf16.msra.mxu0 %v4338_v58  ;;  %3251 = vmatpush2.bf16.msra.mxu1 %v4425_v4  ;;  %v4380_v58 = vld [vmem:[%s6051_s6 + $0x48] ss:$16 sps:$4 sm:$0xff]  }
 0x311   : > { %3211 = vmatprep.subr.bf16.mxu0 %v4343_v61  ;;  %3252 = vmatprep.subr.bf16.mxu1 %v4433_v6  ;;  %v4394_v61 = vld [vmem:[%s6051_s6 + $0xc] ss:$16 sps:$4 sm:$0xff]   ;;  %v4416_v4 = vld [vmem:[%s6051_s6 + $0x188] ss:$16 sps:$4 sm:$0xff]  }
 0x312   : > { %v4422_v6 = vld [vmem:[%s6051_s6 + $0x168] ss:$16 sps:$4 sm:$0xff]  }
 0x314   : > { %3212 = vmatpush2.bf16.msra.mxu0 %v4341_v62  ;;  %3253 = vmatpush2.bf16.msra.mxu1 %v4431_v7  ;;  %v4392_v62 = vld [vmem:[%s6051_s6 + $0x8] ss:$16 sps:$4 sm:$0xff]   ;;  %v4430_v7 = vld [vmem:[%s6051_s6 + $0x14c] ss:$16 sps:$4 sm:$0xff]  }
 0x315   : > { %3213 = vmatprep.subr.bf16.mxu0 %v4346_v35  ;;  %3254 = vmatprep.subr.bf16.mxu1 %v4439_v10  ;;  %v4406_v35 = vld [vmem:[%s6051_s6 + $0x1cc] ss:$16 sps:$4 sm:$0xff]   ;;  %v1572_v10 = vrot.slane %v5776_v13, %v5082_v25 }
 0x318   : > { %3214 = vmatpush2.bf16.msra.mxu0 %v4344_v36  ;;  %3255 = vmatpush2.bf16.msra.mxu1 %v4437_v11  ;;  %v4404_v36 = vld [vmem:[%s6051_s6 + $0x1c8] ss:$16 sps:$4 sm:$0xff]  }
 0x319   : > { %3265 = vmatprep.subr.bf16.mxu0 %v4352_v3  ;;  %3306 = vmatprep.subr.bf16.mxu1 %v4445_v12  ;;  %v4418_v3 = vld [vmem:[%s6051_s6 + $0x18c] ss:$16 sps:$4 sm:$0xff]   ;;  %v4428_v11 = vld [vmem:[%s6051_s6 + $0x148] ss:$16 sps:$4 sm:$0xff]  }
 0x31a   : > { %v4436_v12 = vld [vmem:[%s6051_s6 + $0x12c] ss:$16 sps:$4 sm:$0xff]  }
 0x35b   : > { %v2255_v8 = vpop.f32.mrf.mxu0  ;;  %v2296_v27 = vpop.f32.mrf.mxu1 }
 0x35c   : > { %v2256_v28 = vadd.f32 %v2255_v8, %v1564_v14  ;;  %v1576_v14 = vrot.slane %v5776_v13, %v5089_v26 }
 0x35d   : > { %v2257_v29 = vpop.f32.mrf.mxu0  ;;  %v2298_v30 = vpop.f32.mrf.mxu1 }
 0x35e   : > { %v2297_v31 = vadd.f32 %v2296_v27, %v2256_v28  ;;  %v2258_v32 = vadd.f32 %v2257_v29, %v1568_v15  ;;  %v4434_v28 = vld [vmem:[%s6051_s6 + $0x128] ss:$16 sps:$4 sm:$0xff]  }
 0x35f   : > { %v2259_v33 = vpop.f32.mrf.mxu0  ;;  %v2300_v34 = vpop.f32.mrf.mxu1 }
 0x360   : > { %v2299_v40 = vadd.f32 %v2298_v30, %v2258_v32  ;;  %v2385_v41 = vmax.f32 %v2297_v31, 0.0  ;;  %v4442_v31 = vld [vmem:[%s6051_s6 + $0x10c] ss:$16 sps:$4 sm:$0xff]  }
 0x361   : > { %v2260_v43 = vpop.f32.mrf.mxu0  ;;  %v2301_v44 = vpop.f32.mrf.mxu1 }
 0x362   : > { %v2386_v45 = vmax.f32 %v2299_v40, 0.0  ;;  %v5785_v48 = vpack.c.bf16 %v2385_v41, %v2385_v41  ;;  %v4440_v41 = vld [vmem:[%s6051_s6 + $0x108] ss:$16 sps:$4 sm:$0xff]  }
 0x364   : > { %v2390_v47 = vpack.c.bf16 %v2386_v45, %v2386_v45 }
 0x366   : > { %3215 = vmatprep.mubr.bf16.mxu0 %v2390_v47 }
 0x367   : > { %3216 = vmatmul.mubr.bf16.vlgmr.msra.gmra.mxu0 %v5785_v48 }
 0x368   : > { %3266 = vmatpush1.bf16.msra.mxu0 %v4350_v46  ;;  %3297 = vmatprep.mubr.bf16.mxu0 %v2390_v47 }
 0x369   : > { %3267 = vmatprep.subr.bf16.mxu0 %v4358_v49  ;;  %v4443_v49 = vld [vmem:[%s6051_s6 + $0x2e8] ss:$16 sps:$4 sm:$0xff]  }
 0x36c   : > { %3268 = vmatpush1.bf16.msra.mxu0 %v4356_v50 }
 0x36d   : > { %3269 = vmatprep.subr.bf16.mxu0 %v4364_v51  ;;  %v4448_v51 = vld [vmem:[%s6051_s6 + $0x2cc] ss:$16 sps:$4 sm:$0xff]  }
 0x370   : > { %3270 = vmatpush1.bf16.msra.mxu0 %v4362_v52  ;;  %v4446_v52 = vld [vmem:[%s6051_s6 + $0x2c8] ss:$16 sps:$4 sm:$0xff]  }
 0x371   : > { %3271 = vmatprep.subr.bf16.mxu0 %v4370_v53  ;;  %v4451_v53 = vld [vmem:[%s6051_s6 + $0x2ac] ss:$16 sps:$4 sm:$0xff]  }
 0x374   : > { %3272 = vmatpush1.bf16.msra.mxu0 %v4368_v54  ;;  %v4449_v54 = vld [vmem:[%s6051_s6 + $0x2a8] ss:$16 sps:$4 sm:$0xff]  }
 0x375   : > { %3273 = vmatprep.subr.bf16.mxu0 %v4376_v55  ;;  %v4452_v55 = vld [vmem:[%s6051_s6 + $0x288] ss:$16 sps:$4 sm:$0xff]  }
 0x378   : > { %3274 = vmatpush1.bf16.msra.mxu0 %v4374_v56  ;;  %v4457_v56 = vld [vmem:[%s6051_s6 + $0x26c] ss:$16 sps:$4 sm:$0xff]  }
 0x379   : > { %3275 = vmatprep.subr.bf16.mxu0 %v4382_v57  ;;  %v4455_v57 = vld [vmem:[%s6051_s6 + $0x268] ss:$16 sps:$4 sm:$0xff]  }
 0x37c   : > { %3276 = vmatpush1.bf16.msra.mxu0 %v4380_v58  ;;  %v4460_v58 = vld [vmem:[%s6051_s6 + $0x24c] ss:$16 sps:$4 sm:$0xff]  }
 0x37d   : > { %3277 = vmatprep.subr.bf16.mxu0 %v4388_v59  ;;  %v4458_v59 = vld [vmem:[%s6051_s6 + $0x248] ss:$16 sps:$4 sm:$0xff]  }
 0x380   : > { %3278 = vmatpush1.bf16.msra.mxu0 %v4386_v60  ;;  %v4463_v60 = vld [vmem:[%s6051_s6 + $0x22c] ss:$16 sps:$4 sm:$0xff]  }
 0x381   : > { %3279 = vmatprep.subr.bf16.mxu0 %v4394_v61  ;;  %v4461_v61 = vld [vmem:[%s6051_s6 + $0x228] ss:$16 sps:$4 sm:$0xff]  }
 0x384   : > { %3280 = vmatpush1.bf16.msra.mxu0 %v4392_v62  ;;  %v4466_v62 = vld [vmem:[%s6051_s6 + $0x20c] ss:$16 sps:$4 sm:$0xff]  }
 0x385   : > { %3281 = vmatprep.subr.bf16.mxu0 %v4400_v63  ;;  %v4464_v63 = vld [vmem:[%s6051_s6 + $0x208] ss:$16 sps:$4 sm:$0xff]  }
 0x388   : > { %3282 = vmatpush2.bf16.msra.mxu0 %v4398_v0  ;;  %v4469_v0 = vld [vmem:[%s6051_s6 + $0x3ec] ss:$16 sps:$4 sm:$0xff]  }
 0x389   : > { %3283 = vmatprep.subr.bf16.mxu0 %v4406_v35  ;;  %v4467_v35 = vld [vmem:[%s6051_s6 + $0x3e8] ss:$16 sps:$4 sm:$0xff]  }
 0x38c   : > { %3284 = vmatpush2.bf16.msra.mxu0 %v4404_v36  ;;  %v4472_v36 = vld [vmem:[%s6051_s6 + $0x3cc] ss:$16 sps:$4 sm:$0xff]  }
 0x38d   : > { %3285 = vmatprep.subr.bf16.mxu0 %v4412_v1  ;;  %v4470_v1 = vld [vmem:[%s6051_s6 + $0x3c8] ss:$16 sps:$4 sm:$0xff]  }
 0x390   : > { %3286 = vmatpush2.bf16.msra.mxu0 %v4410_v2  ;;  %v4475_v2 = vld [vmem:[%s6051_s6 + $0x3ac] ss:$16 sps:$4 sm:$0xff]  }
 0x391   : > { %3287 = vmatprep.subr.bf16.mxu0 %v4418_v3  ;;  %v4473_v3 = vld [vmem:[%s6051_s6 + $0x3a8] ss:$16 sps:$4 sm:$0xff]  }
 0x394   : > { %3288 = vmatpush2.bf16.msra.mxu0 %v4416_v4  ;;  %v4478_v4 = vld [vmem:[%s6051_s6 + $0x38c] ss:$16 sps:$4 sm:$0xff]  }
 0x395   : > { %3289 = vmatprep.subr.bf16.mxu0 %v4424_v5  ;;  %v4476_v5 = vld [vmem:[%s6051_s6 + $0x388] ss:$16 sps:$4 sm:$0xff]  }
 0x398   : > { %3290 = vmatpush2.bf16.msra.mxu0 %v4422_v6  ;;  %v4481_v6 = vld [vmem:[%s6051_s6 + $0x36c] ss:$16 sps:$4 sm:$0xff]  }
 0x399   : > { %3291 = vmatprep.subr.bf16.mxu0 %v4430_v7  ;;  %v4479_v7 = vld [vmem:[%s6051_s6 + $0x368] ss:$16 sps:$4 sm:$0xff]  }
 0x39b   : > { %v2337_v15 = vpop.f32.mrf.mxu0  ;;  %v2378_v8 = vpop.f32.mrf.mxu1 }
 0x39c   : > { %v2338_v27 = vadd.f32 %v2337_v15, %v1572_v10  ;;  %3292 = vmatpush2.bf16.msra.mxu0 %v4428_v11  ;;  %v4484_v10 = vld [vmem:[%s6051_s6 + $0x34c] ss:$16 sps:$4 sm:$0xff]   ;;  %v4482_v11 = vld [vmem:[%s6051_s6 + $0x348] ss:$16 sps:$4 sm:$0xff]  }
 0x39d   : > { %v2339_v29 = vpop.f32.mrf.mxu0  ;;  %v2380_v30 = vpop.f32.mrf.mxu1  ;;  %3293 = vmatprep.subr.bf16.mxu0 %v4436_v12  ;;  %v4487_v12 = vld [vmem:[%s6051_s6 + $0x32c] ss:$16 sps:$4 sm:$0xff]  }
 0x39e   : > { %v2379_v32 = vadd.f32 %v2378_v8, %v2338_v27  ;;  %v2340_v33 = vadd.f32 %v2339_v29, %v1576_v14  ;;  %v4485_v14 = vld [vmem:[%s6051_s6 + $0x328] ss:$16 sps:$4 sm:$0xff]   ;;  %v4490_v15 = vld [vmem:[%s6051_s6 + $0x30c] ss:$16 sps:$4 sm:$0xff]  }
 0x39f   : > { %v2341_v34 = vpop.f32.mrf.mxu0  ;;  %v2382_v40 = vpop.f32.mrf.mxu1  ;;  %v4488_v8 = vld [vmem:[%s6051_s6 + $0x308] ss:$16 sps:$4 sm:$0xff]  }
 0x3a0   : > { %v2381_v13 = vadd.f32 %v2380_v30, %v2340_v33  ;;  %3294 = vmatpush2.bf16.msra.mxu0 %v4434_v28  ;;  %v2387_v43 = vmax.f32 %v2379_v32, 0.0 }
 0x3a1   : > { %v2342_v44 = vpop.f32.mrf.mxu0  ;;  %v2383_v45 = vpop.f32.mrf.mxu1  ;;  %3295 = vmatprep.subr.bf16.mxu0 %v4442_v31 }
 0x3a2   : > { %v2388_v47 = vmax.f32 %v2381_v13, 0.0  ;;  %v5885_v50 = vpack.c.bf16 %v2387_v43, %v2387_v43  ;;  %v2521_v44 = vld [vmem:[%s6052_s7] sm:$0xf] }
 0x3a3   : > { %v2530_v45 = vrot.slane %v2521_v44, %v5075_v21 }
 0x3a4   : > { %v2392_v46 = vpack.c.bf16 %v2388_v47, %v2388_v47  ;;  %3296 = vmatpush2.bf16.msra.mxu0 %v4440_v41  ;;  %v2526_v47 = vrot.slane %v2521_v44, %v5073_v20 }
 0x3a6   : > { %3256 = vmatprep.mubr.bf16.mxu1 %v2392_v46 }
 0x3a7   : > { %3257 = vmatmul.mubr.bf16.vlgmr.msra.gmra.mxu1 %v5885_v50  ;;  %3298 = vmatmul.mubr.bf16.vlgmr.msra.gmra.mxu0 %v5785_v48  ;;  %v4454_v48 = vld [vmem:[%s6051_s6 + $0x28c] ss:$16 sps:$4 sm:$0xff]  }
 0x3a8   : > { %3307 = vmatpush1.bf16.msra.mxu1 %v4443_v49  ;;  %3338 = vmatprep.mubr.bf16.mxu1 %v2392_v46 }
 0x3a9   : > { %3308 = vmatprep.subr.bf16.mxu1 %v4448_v51 }
 0x3ac   : > { %3309 = vmatpush1.bf16.msra.mxu1 %v4446_v52 }
 0x3ad   : > { %3310 = vmatprep.subr.bf16.mxu1 %v4451_v53  ;;  %v2538_v53 = vrot.slane %v2521_v44, %v5089_v26 }
 0x3b0   : > { %3311 = vmatpush1.bf16.msra.mxu1 %v4449_v54 }
 0x3b1   : > { %3312 = vmatprep.subr.bf16.mxu1 %v4454_v48 }
 0x3b4   : > { %3313 = vmatpush1.bf16.msra.mxu1 %v4452_v55 }
 0x3b5   : > { %3314 = vmatprep.subr.bf16.mxu1 %v4457_v56 }
 0x3b8   : > { %3315 = vmatpush1.bf16.msra.mxu1 %v4455_v57 }
 0x3b9   : > { %3316 = vmatprep.subr.bf16.mxu1 %v4460_v58 }
 0x3bc   : > { %3317 = vmatpush1.bf16.msra.mxu1 %v4458_v59 }
 0x3bd   : > { %3318 = vmatprep.subr.bf16.mxu1 %v4463_v60 }
 0x3c0   : > { %3319 = vmatpush1.bf16.msra.mxu1 %v4461_v61 }
 0x3c1   : > { %3320 = vmatprep.subr.bf16.mxu1 %v4466_v62 }
 0x3c4   : > { %3321 = vmatpush1.bf16.msra.mxu1 %v4464_v63 }
 0x3c5   : > { %3322 = vmatprep.subr.bf16.mxu1 %v4469_v0 }
 0x3c8   : > { %3323 = vmatpush2.bf16.msra.mxu1 %v4467_v35 }
 0x3c9   : > { %3324 = vmatprep.subr.bf16.mxu1 %v4472_v36 }
 0x3cc   : > { %3325 = vmatpush2.bf16.msra.mxu1 %v4470_v1 }
 0x3cd   : > { %3326 = vmatprep.subr.bf16.mxu1 %v4475_v2 }
 0x3d0   : > { %3327 = vmatpush2.bf16.msra.mxu1 %v4473_v3 }
 0x3d1   : > { %3328 = vmatprep.subr.bf16.mxu1 %v4478_v4 }
 0x3d4   : > { %3329 = vmatpush2.bf16.msra.mxu1 %v4476_v5 }
 0x3d5   : > { %3330 = vmatprep.subr.bf16.mxu1 %v4481_v6 }
 0x3d8   : > { %3331 = vmatpush2.bf16.msra.mxu1 %v4479_v7 }
 0x3d9   : > { %3332 = vmatprep.subr.bf16.mxu1 %v4484_v10 }
 0x3dc   : > { %3333 = vmatpush2.bf16.msra.mxu1 %v4482_v11 }
 0x3dd   : > { %3334 = vmatprep.subr.bf16.mxu1 %v4487_v12 }
 0x3e0   : > { %3335 = vmatpush2.bf16.msra.mxu1 %v4485_v14 }
 0x3e1   : > { %3336 = vmatprep.subr.bf16.mxu1 %v4490_v15 }
 0x3e4   : > { %3337 = vmatpush2.bf16.msra.mxu1 %v4488_v8 }
 0x3e7   : > { %3339 = vmatmul.mubr.bf16.vlgmr.msra.gmra.mxu1 %v5885_v50  ;;  %v2534_v50 = vrot.slane %v2521_v44, %v5082_v25 }
 0x427   : > { %v3217_v27 = vpop.f32.mrf.mxu0 }
 0x428   : > { %v3218_v49 = vadd.f32 %v3217_v27, %v2526_v47 }
 0x429   : > { %v3219_v28 = vpop.f32.mrf.mxu0 }
 0x42a   : > { %v3220_v46 = vadd.f32 %v3219_v28, %v2530_v45 }
 0x42b   : > { %v3221_v29 = vpop.f32.mrf.mxu0 }
 0x42d   : > { %v3222_v30 = vpop.f32.mrf.mxu0 }
 0x467   : > { %v3258_v31 = vpop.f32.mrf.mxu1  ;;  %v3299_v32 = vpop.f32.mrf.mxu0 }
 0x468   : > { %v3259_v52 = vadd.f32 %v3258_v31, %v3218_v49  ;;  %v3300_v54 = vadd.f32 %v3299_v32, %v2534_v50 }
 0x469   : > { %v3260_v33 = vpop.f32.mrf.mxu1  ;;  %v3301_v34 = vpop.f32.mrf.mxu0 }
 0x46a   : > { %v3261_v51 = vadd.f32 %v3260_v33, %v3220_v46  ;;  %v3347_v56 = vadd.f32 %v3259_v52, %v5368_v39  ;;  %v3302_v57 = vadd.f32 %v3301_v34, %v2538_v53 }
 0x46b   : > { %v3262_v40 = vpop.f32.mrf.mxu1  ;;  %v3303_v13 = vpop.f32.mrf.mxu0 }
 0x46c   : > { %v3348_v48 = vadd.f32 %v3261_v51, %v5362_v37 }
 0x46d   : > { %v3263_v41 = vpop.f32.mrf.mxu1  ;;  %v3304_v43 = vpop.f32.mrf.mxu0 }
 0x46e   : > { %v3351_v60 = vadd.f32 %v3348_v48, %v3347_v56 }
 0x4a7   : > { %v3340_v55 = vpop.f32.mrf.mxu1 }
 0x4a8   : > { %v3341_v58 = vadd.f32 %v3340_v55, %v3300_v54 }
 0x4a9   : > { %v3342_v59 = vpop.f32.mrf.mxu1 }
 0x4aa   : > { %v3349_v21 = vadd.f32 %v3341_v58, %v5371_v38  ;;  %v3343_v20 = vadd.f32 %v3342_v59, %v3302_v57 }
 0x4ab   : > { %v3344_v61 = vpop.f32.mrf.mxu1 }
 0x4ac   : > { %v3350_v25 = vadd.f32 %v3343_v20, %v5365_v42  ;;  %v3352_v62 = vadd.f32 %v3351_v60, %v3349_v21 }
 0x4ad   : > { %v3345_v63 = vpop.f32.mrf.mxu1 }
 0x4ae   : > { %v3353_v0 = vadd.f32 %v3352_v62, %v3350_v25 }
 0x4b0   : > { %3354 = vadd.xlane.f32.xlu1 %v3353_v0 }
 0x539   : > { %v3355_v26 = vpop.xlane.xlu1 %3354 }
 0x53a   : > { %v3356_v35 = vmul.f32 0.001953125, %v3355_v26 }
 0x53c   : > { %v3357_v37 = vsub.f32 %v3347_v56, %v3356_v35  ;;  %v3358_v36 = vsub.f32 %v3348_v48, %v3356_v35  ;;  %v3359_v39 = vsub.f32 %v3349_v21, %v3356_v35  ;;  %v3360_v1 = vsub.f32 %v3350_v25, %v3356_v35 }
 0x53e   : > { %v3361_v2 = vmul.f32 %v3357_v37, %v3357_v37  ;;  %v3362_v3 = vmul.f32 %v3358_v36, %v3358_v36  ;;  %v3363_v4 = vmul.f32 %v3359_v39, %v3359_v39  ;;  %v3364_v5 = vmul.f32 %v3360_v1, %v3360_v1 }
 0x540   : > { %v3365_v38 = vadd.f32 %v3362_v3, %v3361_v2 }
 0x542   : > { %v3366_v6 = vadd.f32 %v3365_v38, %v3363_v4 }
 0x544   : > { %v3367_v7 = vadd.f32 %v3366_v6, %v3364_v5 }
 0x546   : > { %3368 = vadd.xlane.f32.xlu1 %v3367_v7 }
 0x5cf   : > { %v3369_v42 = vpop.xlane.xlu1 %3368 }
 0x5d0   : > { %v3370_v10 = vmul.f32 0.001953125, %v3369_v42 }
 0x5d2   : > { %v3371_v11 = vadd.f32 1e-05, %v3370_v10 }
 0x5d4   : > { %4493 = vrsqrt.f32 %v3371_v11 }
 0x5e1   : > { %v4494_v12 = vpop.eup %4493 }
 0x5e2   : > { %v3373_v14 = vmul.f32 %v4494_v12, %v3357_v37  ;;  %v3374_v15 = vmul.f32 %v4494_v12, %v3358_v36  ;;  %v3375_v8 = vmul.f32 %v4494_v12, %v3359_v39  ;;  %v3376_v27 = vmul.f32 %v4494_v12, %v3360_v1 }
 0x5e4   : > { %v3377_v28 = vmul.f32 %v3373_v14, %v5336_v18  ;;  %v3378_v29 = vmul.f32 %v3374_v15, %v5330_v16  ;;  %v3379_v30 = vmul.f32 %v3375_v8, %v5339_v19  ;;  %v3380_v31 = vmul.f32 %v3376_v27, %v5333_v17 }
 0x5e6   : > { %v3381_v32 = vadd.f32 %v3377_v28, %v5348_v23  ;;  %v3382_v33 = vadd.f32 %v3378_v29, %v5342_v9  ;;  %v3383_v34 = vadd.f32 %v3379_v30, %v5351_v24  ;;  %v3384_v40 = vadd.f32 %v3380_v31, %v5345_v22 }
 0x5e8   : > { %3385 = vst [vmem:[%s367_s28] sm:$0xff] %v3381_v32  ;;  %3386 = vst [vmem:[%s367_s28 + $0x8] sm:$0xff] %v3382_v33 }
 0x5e9   : > { %3387 = vst [vmem:[%s367_s28 + $0x10] sm:$0xff] %v3383_v34  ;;  %3388 = vst [vmem:[%s367_s28 + $0x18] sm:$0xff] %v3384_v40 }
 0x5ea   : > { %4508 = shalt.err (!%p4505_p3)
}
 0x5eb   : > { %s4509_s29 = scalar_lea.hbm %s6004_s12, 512  ;;  %s4513_s28 = scalar_lea.hbm %s6055_s10, 1024 }
 0x5ec   : > { %p4510_p4 = scmp.ne.s32.totalorder %s6004_s12, %s4509_s29  ;;  %p4514_p9 = scmp.lt.s32.totalorder %s6004_s12, %s6055_s10 }
 0x5ed   : > { %p4515_p10 = scmp.lt.s32.totalorder %s4513_s28, %s4509_s29 }
 0x5ee   : > { %p4511_p7 = pnand %p4510_p4, %p4651_p5 }
 0x5ef   : > { %p4516_p11 = por %p4515_p10, %p4514_p9 }
 0x5f0   : > { %p4512_p8 = pneg %p4511_p7 }
 0x5f2   : > { %p4517_p12 = pnand %p4516_p11, %p4512_p8 }
 0x5f4   : > { %4520 = shalt.err (!%p4517_p12)
}
 0x5f5   : > { %3876 = dma.vmem_to_hbm [thread:$0]  (%p4651_p5), %s6006_s11, 512, %s6004_s12, %s3390_s20  }
 0x5f6 PF: > { %p3882_p13 = scmp.ge.s32.totalorder %s4555_s16, 2  ;;  %s3416_s18 = sand.u32 1, %s4543_s13  }
 0x5f7   : > { %s3417_s21 = scalar_lea.sflag [#allocation3], %s3416_s18 }
 0x5f8   : > { %p3879_p0 = pnand %p3882_p13, %p4655_p6 }
 0x5fa   : > { %p3880_p1 = pneg %p3879_p0 }
 0x5fc   : > { %4538 = dma.done.wait (%p3880_p1), %s3417_s21, 512  }
 0x5fd   : > { %4540 = vsyncadd (%p3880_p1), %s3417_s21, 4294966784  ;;  %s6061_s22 = sld [smem:[#allocation5_spill]]  ;;  %p20_p2 = scmp.ge.s32.totalorder %s4638_s19, 4  }
 0x5fe   : > { %s6062_s13 = smov %s4547_s14  ;;  %s6063_s14 = smov %s4551_s15 }
 0x5ff   : > { %s6065_s16 = smov %s4638_s19  ;;  %22 = sbr.rel (!%p20_p2) target bundleno = 3 (0x3), region = 98 }
 0x603   : > { %s6064_s15 = smov %s6061_s22 }
 0x604   :  { %3422 = vsyncpa [#allocation3], 1 }
 0x605   :  { %3424 = vsyncpa [#allocation3 + $0x1], 1 }

// kernel: transformer_decoder_layer.4
= control target key start
LH: loop header
LB: loop body
LE: loop exit
PB: predicated region body
PF: predicated region fallthrough
CT: control target
= control target key end

     0   :  { %18 = vsyncpa [#allocation3], 0  ;;  %s6759_s21 = smov 0   ;;  %s6761_s22 = smov 0   ;;  %s8354_s0 = inlined_call_operand.vmem [shape: f32[16,512], index: 0, kind: input, shape index: {}]   ;;  %s8355_s1 = inlined_call_operand.vmem [shape: f32[16,512], index: 1, kind: input, shape index: {}]   ;;  %s8356_s2 = inlined_call_operand.vmem [shape: f32[16,512], index: 2, kind: input, shape index: {}]   ;;  %s8357_s3 = inlined_call_operand.vmem [shape: bf16[512,512], index: 3, kind: input, shape index: {}]   ;;  %s8358_s4 = inlined_call_operand.vmem [shape: f32[1,512], index: 4, kind: input, shape index: {}]   ;;  %s8359_s5 = inlined_call_operand.vmem [shape: f32[1,512], index: 5, kind: input, shape index: {}]   ;;  %s8360_s6 = inlined_call_operand.vmem [shape: f32[1,512], index: 6, kind: input, shape index: {}]   ;;  %s8361_s7 = inlined_call_operand.hbm [shape: bf16[512,512], index: 7, kind: input, shape index: {}]   ;;  %s8362_s8 = inlined_call_operand.vmem [shape: f32[1,512], index: 8, kind: input, shape index: {}]   ;;  %s8363_s9 = inlined_call_operand.vmem [shape: bf16[512,1024], index: 9, kind: input, shape index: {}]   ;;  %s8364_s10 = inlined_call_operand.vmem [shape: f32[1,1024], index: 10, kind: input, shape index: {}]   ;;  %s8365_s11 = inlined_call_operand.vmem [shape: f32[16,512], index: 11, kind: output, shape index: {0}]   ;;  %s8366_s12 = inlined_call_operand.vmem [shape: f32[8,16,64], index: 12, kind: output, shape index: {1}]  }
   0x1   :  { %s6763_s23 = smov 0  }
   0x2 LB: > { %s6772_s24 = sadd.s32 4294967295, %s6686_s23   ;;  %s6774_s25 = sadd.s32 1, %s6686_s23   ;;  %s6686_s23 = sphi %s6763_s23, %s8371_s23   ;;  %s6682_s22 = sphi %s6761_s22, %s8370_s22   ;;  %s6678_s21 = sphi %s6759_s21, %s8369_s21  }
   0x3   : > { %s300_s26 = ssub.s32 %s6686_s23, %s6774_s25  ;;  %s303_s27 = sadd.s32 1, %s6682_s22 }
   0x4   : > { %p301_p0 = scmp.eq.s32.totalorder %s300_s26, 0  ;;  %p313_p1 = scmp.ne.s32.totalorder %s6682_s22, %s6678_s21 }
   0x5   : > { %p314_p2 = scmp.eq.s32.totalorder %s6772_s24, 1  ;;  %p5491_p3 = scmp.ge.s32.totalorder %s6686_s23, 1 }
   0x6   : > { %s6782_s28 = scalar_select %p301_p0, %s6682_s22, %s303_s27  }
   0x7   : > { %p6784_p4 = por %p314_p2, %p313_p1  ;;  %p327_p5 = scmp.lt.s32.totalorder %s6686_s23, 3 }
   0x8   : > { %p6184_p6 = scmp.eq.s32.totalorder %s6772_s24, 0  ;;  %s6688_s13 = smov [#allocation2]  }
   0x9   : > { %p6789_p7 = pnand %p5491_p3, %p327_p5  ;;  %s351_s14 = sshll.u32 %s6688_s13, 4  ;;  %s352_s14 = int_to_ptr.vmem [resolvable:$true] %s351_s14 }
   0xa   : > { %s6645_s15 = scalar_lea.vmem %s352_s14, 16384  ;;  %p6653_p0 = scmp.lt.s32.totalorder %s352_s14, %s352_s14 }
   0xb   : > { %p6180_p8 = pneg %p6789_p7  ;;  %p6646_p11 = scmp.ne.s32.totalorder %s352_s14, %s6645_s15 }
   0xc   : > { %p6654_p1 = scmp.lt.s32.totalorder %s6645_s15, %s6645_s15 }
   0xd   : > { %p6181_p9 = pnand %p6184_p6, %p6180_p8 }
   0xe   : > { %p6655_p2 = por %p6654_p1, %p6653_p0 }
   0xf   : > { %p6636_p10 = pneg %p6181_p9 }
  0x11   : > { %p6648_p12 = pnand %p6646_p11, %p6636_p10 }
  0x13   : > { %p6649_p13 = pneg %p6648_p12 }
  0x15   : > { %p6656_p3 = pnand %p6655_p2, %p6649_p13 }
  0x17   : > { %6659 = shalt.err (!%p6656_p3)
}
  0x18   : > { %s6689_s16 = smov 256   ;;  %s6690_s17 = smov 16  }
  0x19   : > { %6183 = dma.hbm_to_vmem [thread:$0]  (!%p6181_p9), %s8361_s7, 16384, %s352_s14, [#allocation3], %s6689_s16, %s6689_s16, %s6690_s17  }
  0x1a   : > { %400 = sbr.rel (%p6789_p7) target bundleno = 1923 (0x783), region = 64 }
  0x1f   : > { %6673 = dma.done.wait (%p6184_p6), [#allocation3], 16384  }
  0x20   : > { %6675 = vsyncadd (%p6184_p6), [#allocation3], 4294950912  ;;  %v6216_v0 = vld [vmem:[%s8357_s3 + $0xe4] ss:$16 sps:$4 sm:$0xff]   ;;  %v6220_v2 = vld [vmem:[%s8357_s3 + $0xe0] ss:$16 sps:$4 sm:$0xff]  }
  0x21   : > { %v6218_v1 = vld [vmem:[%s8357_s3 + $0x2e4] ss:$16 sps:$4 sm:$0xff]   ;;  %1279 = vmatprep.subr.bf16.mxu0 %v6216_v0  ;;  %v6221_v3 = vld [vmem:[%s8357_s3 + $0x2e0] ss:$16 sps:$4 sm:$0xff]   ;;  %p456_p5 = scmp.lt.s32.totalorder %s6772_s24, 1  ;;  %vm6692_vm0 = vmmov 0  }
  0x22   : > { %1320 = vmatprep.subr.bf16.mxu1 %v6218_v1  ;;  %v6222_v4 = vld [vmem:[%s8357_s3 + $0xc4] ss:$16 sps:$4 sm:$0xff]   ;;  %1280 = vmatpush1.bf16.msra.mxu0 %v6220_v2  ;;  %v6226_v6 = vld [vmem:[%s8357_s3 + $0xc0] ss:$16 sps:$4 sm:$0xff]   ;;  %vm4405_vm1 = vcmask 523264   ;;  %vm4468_vm2 = vcmask 1043456  }
  0x23   : > { %1321 = vmatpush1.bf16.msra.mxu1 %v6221_v3  ;;  %v6224_v5 = vld [vmem:[%s8357_s3 + $0x2c4] ss:$16 sps:$4 sm:$0xff]   ;;  %1281 = vmatprep.subr.bf16.mxu0 %v6222_v4  ;;  %v6227_v7 = vld [vmem:[%s8357_s3 + $0x2c0] ss:$16 sps:$4 sm:$0xff]   ;;  %s457_s26 = scalar_select %p456_p5, %s6772_s24, 1  ;;  %vm4452_vm3 = vcmask 64512  }
  0x24   : > { %1322 = vmatprep.subr.bf16.mxu1 %v6224_v5  ;;  %v6228_v8 = vld [vmem:[%s8357_s3 + $0xa4] ss:$16 sps:$4 sm:$0xff]   ;;  %v6232_v10 = vld [vmem:[%s8357_s3 + $0xa0] ss:$16 sps:$4 sm:$0xff]   ;;  %s453_s18 = sand.u32 1, %s6678_s21   ;;  %s6041_s21 = sshll.u32 (%p6784_p4), %s6772_s24, 3 }
  0x25   : > { %v6230_v9 = vld [vmem:[%s8357_s3 + $0x2a4] ss:$16 sps:$4 sm:$0xff]   ;;  %v6233_v11 = vld [vmem:[%s8357_s3 + $0x2a0] ss:$16 sps:$4 sm:$0xff]   ;;  %s6931_s19 = sshll.u32 %s457_s26, 5  ;;  %s5496_s20 = sshll.u32 %s453_s18, 6 }
  0x26   : > { %1282 = vmatpush1.bf16.msra.mxu0 %v6226_v6  ;;  %v6234_v12 = vld [vmem:[%s8357_s3 + $0x84] ss:$16 sps:$4 sm:$0xff]   ;;  %v6238_v14 = vld [vmem:[%s8357_s3 + $0x80] ss:$16 sps:$4 sm:$0xff]   ;;  %s6946_s26 = scalar_lea.vmem %s8354_s0, %s6931_s19  ;;  %v6314_v6 = vld [vmem:[%s8357_s3 + $0xec] ss:$16 sps:$4 sm:$0xff]   ;;  %s465_s17 = scalar_lea.vmem %s8355_s1, %s6931_s19 }
  0x27   : > { %1323 = vmatpush1.bf16.msra.mxu1 %v6227_v7  ;;  %1283 = vmatprep.subr.bf16.mxu0 %v6228_v8  ;;  %v6236_v13 = vld [vmem:[%s8357_s3 + $0x284] ss:$16 sps:$4 sm:$0xff]   ;;  %v6239_v15 = vld [vmem:[%s8357_s3 + $0x280] ss:$16 sps:$4 sm:$0xff]   ;;  %v478_v46 = vld [vmem:[%s6946_s26 + $0x8] sm:$0xff]  ;;  %s475_s14 = scalar_lea.vmem %s8365_s11, %s6931_s19  ;;  %s5316_s13 = scalar_lea.vmem (%p6784_p4), %s8366_s12, %s6041_s21 }
  0x28   : > { %1324 = vmatprep.subr.bf16.mxu1 %v6230_v9  ;;  %v6240_v16 = vld [vmem:[%s8357_s3 + $0x64] ss:$16 sps:$4 sm:$0xff]   ;;  %v6244_v18 = vld [vmem:[%s8357_s3 + $0x60] ss:$16 sps:$4 sm:$0xff]   ;;  %v6961_v49 = vpack.c.bf16 %v478_v46, %v478_v46  ;;  %v480_v50 = vld [vmem:[%s6946_s26 + $0x18] sm:$0xff] }
  0x29   : > { %v6242_v17 = vld [vmem:[%s8357_s3 + $0x264] ss:$16 sps:$4 sm:$0xff]   ;;  %v6245_v19 = vld [vmem:[%s8357_s3 + $0x260] ss:$16 sps:$4 sm:$0xff]   ;;  %v488_v52 = vpack.c.bf16 %v480_v50, %v480_v50  ;;  %v6317_v7 = vld [vmem:[%s8357_s3 + $0x2ec] ss:$16 sps:$4 sm:$0xff]  }
  0x2a   : > { %1284 = vmatpush1.bf16.msra.mxu0 %v6232_v10  ;;  %v6246_v20 = vld [vmem:[%s8357_s3 + $0x44] ss:$16 sps:$4 sm:$0xff]   ;;  %v6250_v22 = vld [vmem:[%s8357_s3 + $0x40] ss:$16 sps:$4 sm:$0xff]   ;;  %1311 = vmatprep.mubr.bf16.mxu0 %v6961_v49  ;;  %v6312_v10 = vld [vmem:[%s8357_s3 + $0xe8] ss:$16 sps:$4 sm:$0xff]  }
  0x2b   : > { %1325 = vmatpush1.bf16.msra.mxu1 %v6233_v11  ;;  %1285 = vmatprep.subr.bf16.mxu0 %v6234_v12  ;;  %v6248_v21 = vld [vmem:[%s8357_s3 + $0x244] ss:$16 sps:$4 sm:$0xff]   ;;  %v6251_v23 = vld [vmem:[%s8357_s3 + $0x240] ss:$16 sps:$4 sm:$0xff]   ;;  %v6315_v11 = vld [vmem:[%s8357_s3 + $0x2e8] ss:$16 sps:$4 sm:$0xff]  }
  0x2c   : > { %1326 = vmatprep.subr.bf16.mxu1 %v6236_v13  ;;  %v6252_v24 = vld [vmem:[%s8357_s3 + $0x24] ss:$16 sps:$4 sm:$0xff]   ;;  %v6256_v26 = vld [vmem:[%s8357_s3 + $0x20] ss:$16 sps:$4 sm:$0xff]   ;;  %1352 = vmatprep.mubr.bf16.mxu1 %v488_v52  ;;  %v6320_v12 = vld [vmem:[%s8357_s3 + $0xcc] ss:$16 sps:$4 sm:$0xff]  }
  0x2d   : > { %v6254_v25 = vld [vmem:[%s8357_s3 + $0x224] ss:$16 sps:$4 sm:$0xff]   ;;  %v6257_v27 = vld [vmem:[%s8357_s3 + $0x220] ss:$16 sps:$4 sm:$0xff]   ;;  %v6323_v13 = vld [vmem:[%s8357_s3 + $0x2cc] ss:$16 sps:$4 sm:$0xff]  }
  0x2e   : > { %1286 = vmatpush1.bf16.msra.mxu0 %v6238_v14  ;;  %v6258_v28 = vld [vmem:[%s8357_s3 + $0x4] ss:$16 sps:$4 sm:$0xff]   ;;  %v6262_v30 = vld [vmem:[%s8357_s3] ss:$16 sps:$4 sm:$0xff]   ;;  %v6318_v14 = vld [vmem:[%s8357_s3 + $0xc8] ss:$16 sps:$4 sm:$0xff]  }
  0x2f   : > { %1327 = vmatpush1.bf16.msra.mxu1 %v6239_v15  ;;  %1287 = vmatprep.subr.bf16.mxu0 %v6240_v16  ;;  %v6260_v29 = vld [vmem:[%s8357_s3 + $0x204] ss:$16 sps:$4 sm:$0xff]   ;;  %v6263_v31 = vld [vmem:[%s8357_s3 + $0x200] ss:$16 sps:$4 sm:$0xff]   ;;  %v6321_v15 = vld [vmem:[%s8357_s3 + $0x2c8] ss:$16 sps:$4 sm:$0xff]  }
  0x30   : > { %1328 = vmatprep.subr.bf16.mxu1 %v6242_v17  ;;  %v6264_v32 = vld [vmem:[%s8357_s3 + $0x1e4] ss:$16 sps:$4 sm:$0xff]   ;;  %v6268_v34 = vld [vmem:[%s8357_s3 + $0x1e0] ss:$16 sps:$4 sm:$0xff]   ;;  %v6326_v16 = vld [vmem:[%s8357_s3 + $0xac] ss:$16 sps:$4 sm:$0xff]  }
  0x31   : > { %v6266_v33 = vld [vmem:[%s8357_s3 + $0x3e4] ss:$16 sps:$4 sm:$0xff]   ;;  %v6269_v35 = vld [vmem:[%s8357_s3 + $0x3e0] ss:$16 sps:$4 sm:$0xff]   ;;  %v6329_v17 = vld [vmem:[%s8357_s3 + $0x2ac] ss:$16 sps:$4 sm:$0xff]  }
  0x32   : > { %1288 = vmatpush1.bf16.msra.mxu0 %v6244_v18  ;;  %v6270_v36 = vld [vmem:[%s8357_s3 + $0x1c4] ss:$16 sps:$4 sm:$0xff]   ;;  %v6274_v38 = vld [vmem:[%s8357_s3 + $0x1c0] ss:$16 sps:$4 sm:$0xff]   ;;  %v6324_v18 = vld [vmem:[%s8357_s3 + $0xa8] ss:$16 sps:$4 sm:$0xff]  }
  0x33   : > { %1329 = vmatpush1.bf16.msra.mxu1 %v6245_v19  ;;  %1289 = vmatprep.subr.bf16.mxu0 %v6246_v20  ;;  %v6272_v37 = vld [vmem:[%s8357_s3 + $0x3c4] ss:$16 sps:$4 sm:$0xff]   ;;  %v6275_v39 = vld [vmem:[%s8357_s3 + $0x3c0] ss:$16 sps:$4 sm:$0xff]   ;;  %v6327_v19 = vld [vmem:[%s8357_s3 + $0x2a8] ss:$16 sps:$4 sm:$0xff]  }
  0x34   : > { %1330 = vmatprep.subr.bf16.mxu1 %v6248_v21  ;;  %v6276_v40 = vld [vmem:[%s8357_s3 + $0x1a4] ss:$16 sps:$4 sm:$0xff]   ;;  %v6280_v42 = vld [vmem:[%s8357_s3 + $0x1a0] ss:$16 sps:$4 sm:$0xff]   ;;  %v6332_v20 = vld [vmem:[%s8357_s3 + $0x8c] ss:$16 sps:$4 sm:$0xff]  }
  0x35   : > { %v6278_v41 = vld [vmem:[%s8357_s3 + $0x3a4] ss:$16 sps:$4 sm:$0xff]   ;;  %v6281_v43 = vld [vmem:[%s8357_s3 + $0x3a0] ss:$16 sps:$4 sm:$0xff]   ;;  %v6335_v21 = vld [vmem:[%s8357_s3 + $0x28c] ss:$16 sps:$4 sm:$0xff]  }
  0x36   : > { %1290 = vmatpush1.bf16.msra.mxu0 %v6250_v22  ;;  %v6282_v44 = vld [vmem:[%s8357_s3 + $0x184] ss:$16 sps:$4 sm:$0xff]   ;;  %v6286_v47 = vld [vmem:[%s8357_s3 + $0x180] ss:$16 sps:$4 sm:$0xff]   ;;  %v6330_v22 = vld [vmem:[%s8357_s3 + $0x88] ss:$16 sps:$4 sm:$0xff]  }
  0x37   : > { %1331 = vmatpush1.bf16.msra.mxu1 %v6251_v23  ;;  %1291 = vmatprep.subr.bf16.mxu0 %v6252_v24  ;;  %v6284_v45 = vld [vmem:[%s8357_s3 + $0x384] ss:$16 sps:$4 sm:$0xff]   ;;  %v6287_v48 = vld [vmem:[%s8357_s3 + $0x380] ss:$16 sps:$4 sm:$0xff]   ;;  %v6333_v23 = vld [vmem:[%s8357_s3 + $0x288] ss:$16 sps:$4 sm:$0xff]  }
  0x38   : > { %1332 = vmatprep.subr.bf16.mxu1 %v6254_v25  ;;  %v6288_v51 = vld [vmem:[%s8357_s3 + $0x164] ss:$16 sps:$4 sm:$0xff]   ;;  %v6292_v54 = vld [vmem:[%s8357_s3 + $0x160] ss:$16 sps:$4 sm:$0xff]   ;;  %v6338_v24 = vld [vmem:[%s8357_s3 + $0x6c] ss:$16 sps:$4 sm:$0xff]  }
  0x39   : > { %v6290_v53 = vld [vmem:[%s8357_s3 + $0x364] ss:$16 sps:$4 sm:$0xff]   ;;  %v6293_v55 = vld [vmem:[%s8357_s3 + $0x360] ss:$16 sps:$4 sm:$0xff]   ;;  %v6341_v25 = vld [vmem:[%s8357_s3 + $0x26c] ss:$16 sps:$4 sm:$0xff]  }
  0x3a   : > { %1292 = vmatpush1.bf16.msra.mxu0 %v6256_v26  ;;  %v6294_v56 = vld [vmem:[%s8357_s3 + $0x144] ss:$16 sps:$4 sm:$0xff]   ;;  %v6298_v58 = vld [vmem:[%s8357_s3 + $0x140] ss:$16 sps:$4 sm:$0xff]   ;;  %v6336_v26 = vld [vmem:[%s8357_s3 + $0x68] ss:$16 sps:$4 sm:$0xff]  }
  0x3b   : > { %1333 = vmatpush1.bf16.msra.mxu1 %v6257_v27  ;;  %1293 = vmatprep.subr.bf16.mxu0 %v6258_v28  ;;  %v6296_v57 = vld [vmem:[%s8357_s3 + $0x344] ss:$16 sps:$4 sm:$0xff]   ;;  %v6299_v59 = vld [vmem:[%s8357_s3 + $0x340] ss:$16 sps:$4 sm:$0xff]   ;;  %v6339_v27 = vld [vmem:[%s8357_s3 + $0x268] ss:$16 sps:$4 sm:$0xff]  }
  0x3c   : > { %1334 = vmatprep.subr.bf16.mxu1 %v6260_v29  ;;  %v6300_v60 = vld [vmem:[%s8357_s3 + $0x124] ss:$16 sps:$4 sm:$0xff]   ;;  %v6304_v62 = vld [vmem:[%s8357_s3 + $0x120] ss:$16 sps:$4 sm:$0xff]   ;;  %v6344_v28 = vld [vmem:[%s8357_s3 + $0x4c] ss:$16 sps:$4 sm:$0xff]  }
  0x3d   : > { %v6302_v61 = vld [vmem:[%s8357_s3 + $0x324] ss:$16 sps:$4 sm:$0xff]   ;;  %v6305_v63 = vld [vmem:[%s8357_s3 + $0x320] ss:$16 sps:$4 sm:$0xff]   ;;  %v6347_v29 = vld [vmem:[%s8357_s3 + $0x24c] ss:$16 sps:$4 sm:$0xff]  }
  0x3e   : > { %1294 = vmatpush1.bf16.msra.mxu0 %v6262_v30  ;;  %v6306_v0 = vld [vmem:[%s8357_s3 + $0x104] ss:$16 sps:$4 sm:$0xff]   ;;  %v6310_v2 = vld [vmem:[%s8357_s3 + $0x100] ss:$16 sps:$4 sm:$0xff]   ;;  %v6342_v30 = vld [vmem:[%s8357_s3 + $0x48] ss:$16 sps:$4 sm:$0xff]  }
  0x3f   : > { %1335 = vmatpush1.bf16.msra.mxu1 %v6263_v31  ;;  %1295 = vmatprep.subr.bf16.mxu0 %v6264_v32  ;;  %v6308_v1 = vld [vmem:[%s8357_s3 + $0x304] ss:$16 sps:$4 sm:$0xff]   ;;  %v6311_v3 = vld [vmem:[%s8357_s3 + $0x300] ss:$16 sps:$4 sm:$0xff]   ;;  %v6345_v31 = vld [vmem:[%s8357_s3 + $0x248] ss:$16 sps:$4 sm:$0xff]  }
  0x40   : > { %1336 = vmatprep.subr.bf16.mxu1 %v6266_v33  ;;  %v477_v4 = vld [vmem:[%s6946_s26] sm:$0xff]  ;;  %v479_v5 = vld [vmem:[%s6946_s26 + $0x10] sm:$0xff]  ;;  %v6350_v32 = vld [vmem:[%s8357_s3 + $0x2c] ss:$16 sps:$4 sm:$0xff]  }
  0x41   : > { %v7021_v8 = vpack.c.bf16 %v477_v4, %v477_v4  ;;  %v7023_v9 = vpack.c.bf16 %v479_v5, %v479_v5  ;;  %v6353_v33 = vld [vmem:[%s8357_s3 + $0x22c] ss:$16 sps:$4 sm:$0xff]   ;;  %v6366_v46 = vld [vmem:[%s8357_s3 + $0x1c8] ss:$16 sps:$4 sm:$0xff]  }
  0x42   : > { %1296 = vmatpush2.bf16.msra.mxu0 %v6268_v34  ;;  %v6348_v34 = vld [vmem:[%s8357_s3 + $0x28] ss:$16 sps:$4 sm:$0xff]   ;;  %v6404_v4 = vld [vmem:[%s8357_s3 + $0x10c] ss:$16 sps:$4 sm:$0xff]  }
  0x43   : > { %1337 = vmatpush2.bf16.msra.mxu1 %v6269_v35  ;;  %1297 = vmatprep.subr.bf16.mxu0 %v6270_v36  ;;  %v6351_v35 = vld [vmem:[%s8357_s3 + $0x228] ss:$16 sps:$4 sm:$0xff]   ;;  %v6356_v36 = vld [vmem:[%s8357_s3 + $0xc] ss:$16 sps:$4 sm:$0xff]  }
  0x44   : > { %1338 = vmatprep.subr.bf16.mxu1 %v6272_v37  ;;  %v6359_v37 = vld [vmem:[%s8357_s3 + $0x20c] ss:$16 sps:$4 sm:$0xff]   ;;  %v6372_v50 = vld [vmem:[%s8357_s3 + $0x1a8] ss:$16 sps:$4 sm:$0xff]  }
  0x45   : > { %v6407_v5 = vld [vmem:[%s8357_s3 + $0x30c] ss:$16 sps:$4 sm:$0xff]  }
  0x46   : > { %1298 = vmatpush2.bf16.msra.mxu0 %v6274_v38  ;;  %v6354_v38 = vld [vmem:[%s8357_s3 + $0x8] ss:$16 sps:$4 sm:$0xff]  }
  0x47   : > { %1339 = vmatpush2.bf16.msra.mxu1 %v6275_v39  ;;  %1299 = vmatprep.subr.bf16.mxu0 %v6276_v40  ;;  %v6357_v39 = vld [vmem:[%s8357_s3 + $0x208] ss:$16 sps:$4 sm:$0xff]   ;;  %v6362_v40 = vld [vmem:[%s8357_s3 + $0x1ec] ss:$16 sps:$4 sm:$0xff]  }
  0x48   : > { %1340 = vmatprep.subr.bf16.mxu1 %v6278_v41  ;;  %v6365_v41 = vld [vmem:[%s8357_s3 + $0x3ec] ss:$16 sps:$4 sm:$0xff]  }
  0x4a   : > { %1300 = vmatpush2.bf16.msra.mxu0 %v6280_v42  ;;  %v6360_v42 = vld [vmem:[%s8357_s3 + $0x1e8] ss:$16 sps:$4 sm:$0xff]  }
  0x4b   : > { %1341 = vmatpush2.bf16.msra.mxu1 %v6281_v43  ;;  %1301 = vmatprep.subr.bf16.mxu0 %v6282_v44  ;;  %v6363_v43 = vld [vmem:[%s8357_s3 + $0x3e8] ss:$16 sps:$4 sm:$0xff]   ;;  %v6368_v44 = vld [vmem:[%s8357_s3 + $0x1cc] ss:$16 sps:$4 sm:$0xff]  }
  0x4c   : > { %1342 = vmatprep.subr.bf16.mxu1 %v6284_v45  ;;  %v6371_v45 = vld [vmem:[%s8357_s3 + $0x3cc] ss:$16 sps:$4 sm:$0xff]  }
  0x4e   : > { %1302 = vmatpush2.bf16.msra.mxu0 %v6286_v47  ;;  %v6369_v47 = vld [vmem:[%s8357_s3 + $0x3c8] ss:$16 sps:$4 sm:$0xff]  }
  0x4f   : > { %1343 = vmatpush2.bf16.msra.mxu1 %v6287_v48  ;;  %1303 = vmatprep.subr.bf16.mxu0 %v6288_v51  ;;  %v6374_v48 = vld [vmem:[%s8357_s3 + $0x1ac] ss:$16 sps:$4 sm:$0xff]   ;;  %v6375_v51 = vld [vmem:[%s8357_s3 + $0x3a8] ss:$16 sps:$4 sm:$0xff]  }
  0x50   : > { %1344 = vmatprep.subr.bf16.mxu1 %v6290_v53  ;;  %v6383_v53 = vld [vmem:[%s8357_s3 + $0x38c] ss:$16 sps:$4 sm:$0xff]  }
  0x52   : > { %1304 = vmatpush2.bf16.msra.mxu0 %v6292_v54  ;;  %v6378_v54 = vld [vmem:[%s8357_s3 + $0x188] ss:$16 sps:$4 sm:$0xff]  }
  0x53   : > { %1345 = vmatpush2.bf16.msra.mxu1 %v6293_v55  ;;  %1305 = vmatprep.subr.bf16.mxu0 %v6294_v56  ;;  %v6381_v55 = vld [vmem:[%s8357_s3 + $0x388] ss:$16 sps:$4 sm:$0xff]   ;;  %v6386_v56 = vld [vmem:[%s8357_s3 + $0x16c] ss:$16 sps:$4 sm:$0xff]  }
  0x54   : > { %1346 = vmatprep.subr.bf16.mxu1 %v6296_v57  ;;  %v6389_v57 = vld [vmem:[%s8357_s3 + $0x36c] ss:$16 sps:$4 sm:$0xff]  }
  0x56   : > { %1306 = vmatpush2.bf16.msra.mxu0 %v6298_v58  ;;  %v6384_v58 = vld [vmem:[%s8357_s3 + $0x168] ss:$16 sps:$4 sm:$0xff]  }
  0x57   : > { %1347 = vmatpush2.bf16.msra.mxu1 %v6299_v59  ;;  %1307 = vmatprep.subr.bf16.mxu0 %v6300_v60  ;;  %v6387_v59 = vld [vmem:[%s8357_s3 + $0x368] ss:$16 sps:$4 sm:$0xff]   ;;  %v6392_v60 = vld [vmem:[%s8357_s3 + $0x14c] ss:$16 sps:$4 sm:$0xff]  }
  0x58   : > { %1348 = vmatprep.subr.bf16.mxu1 %v6302_v61  ;;  %v6395_v61 = vld [vmem:[%s8357_s3 + $0x34c] ss:$16 sps:$4 sm:$0xff]  }
  0x5a   : > { %1308 = vmatpush2.bf16.msra.mxu0 %v6304_v62  ;;  %v6390_v62 = vld [vmem:[%s8357_s3 + $0x148] ss:$16 sps:$4 sm:$0xff]  }
  0x5b   : > { %1349 = vmatpush2.bf16.msra.mxu1 %v6305_v63  ;;  %1309 = vmatprep.subr.bf16.mxu0 %v6306_v0  ;;  %v6393_v63 = vld [vmem:[%s8357_s3 + $0x348] ss:$16 sps:$4 sm:$0xff]   ;;  %v6398_v0 = vld [vmem:[%s8357_s3 + $0x12c] ss:$16 sps:$4 sm:$0xff]  }
  0x5c   : > { %1350 = vmatprep.subr.bf16.mxu1 %v6308_v1  ;;  %v6401_v1 = vld [vmem:[%s8357_s3 + $0x32c] ss:$16 sps:$4 sm:$0xff]  }
  0x5e   : > { %1310 = vmatpush2.bf16.msra.mxu0 %v6310_v2  ;;  %v6396_v2 = vld [vmem:[%s8357_s3 + $0x128] ss:$16 sps:$4 sm:$0xff]  }
  0x5f   : > { %1351 = vmatpush2.bf16.msra.mxu1 %v6311_v3  ;;  %1361 = vmatprep.subr.bf16.mxu0 %v6314_v6  ;;  %v6399_v3 = vld [vmem:[%s8357_s3 + $0x328] ss:$16 sps:$4 sm:$0xff]  }
  0x60   : > { %1402 = vmatprep.subr.bf16.mxu1 %v6317_v7  ;;  %v6402_v6 = vld [vmem:[%s8357_s3 + $0x108] ss:$16 sps:$4 sm:$0xff]  }
  0x61   : > { %1312 = vmatmul.mubr.bf16.vlgmr.msra.gmra.mxu0 %v7021_v8  ;;  %v6405_v7 = vld [vmem:[%s8357_s3 + $0x308] ss:$16 sps:$4 sm:$0xff]  }
  0x62   : > { %1353 = vmatmul.mubr.bf16.vlgmr.msra.gmra.mxu1 %v7023_v9  ;;  %1362 = vmatpush1.bf16.msra.mxu0 %v6312_v10 }
  0x63   : > { %1403 = vmatpush1.bf16.msra.mxu1 %v6315_v11  ;;  %1363 = vmatprep.subr.bf16.mxu0 %v6320_v12 }
  0x64   : > { %1404 = vmatprep.subr.bf16.mxu1 %v6323_v13  ;;  %1393 = vmatprep.mubr.bf16.mxu0 %v6961_v49  ;;  %v6377_v49 = vld [vmem:[%s8357_s3 + $0x3ac] ss:$16 sps:$4 sm:$0xff]  }
  0x65   : > { %1434 = vmatprep.mubr.bf16.mxu1 %v488_v52  ;;  %v6380_v52 = vld [vmem:[%s8357_s3 + $0x18c] ss:$16 sps:$4 sm:$0xff]  }
  0x66   : > { %1364 = vmatpush1.bf16.msra.mxu0 %v6318_v14 }
  0x67   : > { %1405 = vmatpush1.bf16.msra.mxu1 %v6321_v15  ;;  %1365 = vmatprep.subr.bf16.mxu0 %v6326_v16 }
  0x68   : > { %1406 = vmatprep.subr.bf16.mxu1 %v6329_v17 }
  0x6a   : > { %1366 = vmatpush1.bf16.msra.mxu0 %v6324_v18  ;;  %v619_v18 = vlaneseq }
  0x6b   : > { %1407 = vmatpush1.bf16.msra.mxu1 %v6327_v19  ;;  %1367 = vmatprep.subr.bf16.mxu0 %v6332_v20 }
  0x6c   : > { %1408 = vmatprep.subr.bf16.mxu1 %v6335_v21  ;;  %v7216_v19 = vshrl.u32 %v619_v18, 7  ;;  %v6444_v18 = vld [vmem:[#allocation2 + $0x20] ss:$16 sps:$4 sm:$0xff]  }
  0x6e   : > { %1368 = vmatpush1.bf16.msra.mxu0 %v6330_v22  ;;  %v7219_v20 = vsub.s32 0, %v7216_v19  ;;  %v7222_v21 = vsub.s32 1, %v7216_v19 }
  0x6f   : > { %1409 = vmatpush1.bf16.msra.mxu1 %v6333_v23  ;;  %1369 = vmatprep.subr.bf16.mxu0 %v6338_v24 }
  0x70   : > { %1410 = vmatprep.subr.bf16.mxu1 %v6341_v25  ;;  %v7230_v25 = vsub.s32 2, %v7216_v19 }
  0x72   : > { %1370 = vmatpush1.bf16.msra.mxu0 %v6336_v26  ;;  %v7237_v26 = vsub.s32 3, %v7216_v19 }
  0x73   : > { %1411 = vmatpush1.bf16.msra.mxu1 %v6339_v27  ;;  %1371 = vmatprep.subr.bf16.mxu0 %v6344_v28 }
  0x74   : > { %1412 = vmatprep.subr.bf16.mxu1 %v6347_v29 }
  0x76   : > { %1372 = vmatpush1.bf16.msra.mxu0 %v6342_v30  ;;  %v481_v30 = vld [vmem:[%s465_s17] sm:$0xff] }
  0x77   : > { %1413 = vmatpush1.bf16.msra.mxu1 %v6345_v31  ;;  %1373 = vmatprep.subr.bf16.mxu0 %v6350_v32  ;;  %v482_v31 = vld [vmem:[%s465_s17 + $0x8] sm:$0xff] }
  0x78   : > { %1414 = vmatprep.subr.bf16.mxu1 %v6353_v33 }
  0x7a   : > { %1374 = vmatpush1.bf16.msra.mxu0 %v6348_v34 }
  0x7b   : > { %1415 = vmatpush1.bf16.msra.mxu1 %v6351_v35  ;;  %1375 = vmatprep.subr.bf16.mxu0 %v6356_v36 }
  0x7c   : > { %1416 = vmatprep.subr.bf16.mxu1 %v6359_v37 }
  0x7e   : > { %1376 = vmatpush1.bf16.msra.mxu0 %v6354_v38  ;;  %v483_v38 = vld [vmem:[%s465_s17 + $0x10] sm:$0xff] }
  0x7f   : > { %1417 = vmatpush1.bf16.msra.mxu1 %v6357_v39  ;;  %1377 = vmatprep.subr.bf16.mxu0 %v6362_v40 }
  0x80   : > { %1418 = vmatprep.subr.bf16.mxu1 %v6365_v41 }
  0x82   : > { %1378 = vmatpush2.bf16.msra.mxu0 %v6360_v42 }
  0x83   : > { %1419 = vmatpush2.bf16.msra.mxu1 %v6363_v43  ;;  %1379 = vmatprep.subr.bf16.mxu0 %v6368_v44 }
  0x84   : > { %1420 = vmatprep.subr.bf16.mxu1 %v6371_v45  ;;  %v484_v45 = vld [vmem:[%s465_s17 + $0x18] sm:$0xff] }
  0x86   : > { %1380 = vmatpush2.bf16.msra.mxu0 %v6366_v46 }
  0x87   : > { %1421 = vmatpush2.bf16.msra.mxu1 %v6369_v47  ;;  %1381 = vmatprep.subr.bf16.mxu0 %v6374_v48 }
  0x88   : > { %1422 = vmatprep.subr.bf16.mxu1 %v6377_v49 }
  0x8a   : > { %1382 = vmatpush2.bf16.msra.mxu0 %v6372_v50 }
  0x8b   : > { %1423 = vmatpush2.bf16.msra.mxu1 %v6375_v51  ;;  %1383 = vmatprep.subr.bf16.mxu0 %v6380_v52 }
  0x8c   : > { %1424 = vmatprep.subr.bf16.mxu1 %v6383_v53 }
  0x8e   : > { %1384 = vmatpush2.bf16.msra.mxu0 %v6378_v54  ;;  %v6408_v54 = vld [vmem:[#allocation2 + $0xe0] ss:$16 sps:$4 sm:$0xff]  }
  0x8f   : > { %1425 = vmatpush2.bf16.msra.mxu1 %v6381_v55  ;;  %1385 = vmatprep.subr.bf16.mxu0 %v6386_v56  ;;  %v6410_v55 = vld [vmem:[#allocation2 + $0xe4] ss:$16 sps:$4 sm:$0xff]   ;;  %v6411_v56 = vld [vmem:[#allocation2 + $0x2e0] ss:$16 sps:$4 sm:$0xff]  }
  0x90   : > { %1426 = vmatprep.subr.bf16.mxu1 %v6389_v57  ;;  %v6413_v57 = vld [vmem:[#allocation2 + $0x2e4] ss:$16 sps:$4 sm:$0xff]  }
  0x92   : > { %1386 = vmatpush2.bf16.msra.mxu0 %v6384_v58  ;;  %v6416_v58 = vld [vmem:[#allocation2 + $0xc4] ss:$16 sps:$4 sm:$0xff]  }
  0x93   : > { %1427 = vmatpush2.bf16.msra.mxu1 %v6387_v59  ;;  %1387 = vmatprep.subr.bf16.mxu0 %v6392_v60  ;;  %v6419_v59 = vld [vmem:[#allocation2 + $0x2c4] ss:$16 sps:$4 sm:$0xff]   ;;  %v6414_v60 = vld [vmem:[#allocation2 + $0xc0] ss:$16 sps:$4 sm:$0xff]  }
  0x94   : > { %1428 = vmatprep.subr.bf16.mxu1 %v6395_v61  ;;  %v6417_v61 = vld [vmem:[#allocation2 + $0x2c0] ss:$16 sps:$4 sm:$0xff]  }
  0x96   : > { %1388 = vmatpush2.bf16.msra.mxu0 %v6390_v62  ;;  %v6422_v62 = vld [vmem:[#allocation2 + $0xa4] ss:$16 sps:$4 sm:$0xff]  }
  0x97   : > { %1429 = vmatpush2.bf16.msra.mxu1 %v6393_v63  ;;  %1389 = vmatprep.subr.bf16.mxu0 %v6398_v0  ;;  %v6425_v63 = vld [vmem:[#allocation2 + $0x2a4] ss:$16 sps:$4 sm:$0xff]   ;;  %v6420_v0 = vld [vmem:[#allocation2 + $0xa0] ss:$16 sps:$4 sm:$0xff]  }
  0x98   : > { %1430 = vmatprep.subr.bf16.mxu1 %v6401_v1  ;;  %v6423_v1 = vld [vmem:[#allocation2 + $0x2a0] ss:$16 sps:$4 sm:$0xff]  }
  0x9a   : > { %1390 = vmatpush2.bf16.msra.mxu0 %v6396_v2  ;;  %v6428_v2 = vld [vmem:[#allocation2 + $0x84] ss:$16 sps:$4 sm:$0xff]  }
  0x9b   : > { %1431 = vmatpush2.bf16.msra.mxu1 %v6399_v3  ;;  %1391 = vmatprep.subr.bf16.mxu0 %v6404_v4  ;;  %v6431_v3 = vld [vmem:[#allocation2 + $0x284] ss:$16 sps:$4 sm:$0xff]   ;;  %v6426_v4 = vld [vmem:[#allocation2 + $0x80] ss:$16 sps:$4 sm:$0xff]  }
  0x9c   : > { %1432 = vmatprep.subr.bf16.mxu1 %v6407_v5  ;;  %v6429_v5 = vld [vmem:[#allocation2 + $0x280] ss:$16 sps:$4 sm:$0xff]  }
  0x9e   : > { %1392 = vmatpush2.bf16.msra.mxu0 %v6402_v6  ;;  %v6434_v6 = vld [vmem:[#allocation2 + $0x64] ss:$16 sps:$4 sm:$0xff]  }
  0x9f   : > { %1433 = vmatpush2.bf16.msra.mxu1 %v6405_v7  ;;  %2324 = vmatprep.subr.bf16.mxu0 %v6410_v55  ;;  %v6437_v7 = vld [vmem:[#allocation2 + $0x264] ss:$16 sps:$4 sm:$0xff]  }
  0xa0   : > { %2365 = vmatprep.subr.bf16.mxu1 %v6413_v57  ;;  %v6479_v55 = vld [vmem:[#allocation2 + $0x384] ss:$16 sps:$4 sm:$0xff]  }
  0xa1   : > { %1394 = vmatmul.mubr.bf16.vlgmr.msra.gmra.mxu0 %v7021_v8  ;;  %v617_v8 = vld [vmem:[%s8358_s4] sm:$0xf]  ;;  %v6485_v57 = vld [vmem:[#allocation2 + $0x364] ss:$16 sps:$4 sm:$0xff]  }
  0xa2   : > { %1435 = vmatmul.mubr.bf16.vlgmr.msra.gmra.mxu1 %v7023_v9  ;;  %v622_v9 = vrot.slane %v617_v8, %v7219_v20  ;;  %v626_v22 = vrot.slane %v617_v8, %v7222_v21  ;;  %v630_v29 = vrot.slane %v617_v8, %v7230_v25  ;;  %v634_v32 = vrot.slane %v617_v8, %v7237_v26  ;;  %v6447_v8 = vld [vmem:[#allocation2 + $0x220] ss:$16 sps:$4 sm:$0xff]  }
  0xa3   : > { %2325 = vmatpush1.bf16.msra.mxu0 %v6408_v54  ;;  %2366 = vmatpush1.bf16.msra.mxu1 %v6411_v56  ;;  %v6477_v54 = vld [vmem:[#allocation2 + $0x380] ss:$16 sps:$4 sm:$0xff]   ;;  %v6482_v56 = vld [vmem:[#allocation2 + $0x164] ss:$16 sps:$4 sm:$0xff]  }
  0xa4   : > { %2326 = vmatprep.subr.bf16.mxu0 %v6416_v58  ;;  %2367 = vmatprep.subr.bf16.mxu1 %v6419_v59  ;;  %v6480_v58 = vld [vmem:[#allocation2 + $0x160] ss:$16 sps:$4 sm:$0xff]  }
  0xa5   : > { %v6483_v59 = vld [vmem:[#allocation2 + $0x360] ss:$16 sps:$4 sm:$0xff]  }
  0xa7   : > { %2327 = vmatpush1.bf16.msra.mxu0 %v6414_v60  ;;  %2368 = vmatpush1.bf16.msra.mxu1 %v6417_v61  ;;  %v6488_v60 = vld [vmem:[#allocation2 + $0x144] ss:$16 sps:$4 sm:$0xff]  }
  0xa8   : > { %2328 = vmatprep.subr.bf16.mxu0 %v6422_v62  ;;  %2369 = vmatprep.subr.bf16.mxu1 %v6425_v63  ;;  %v6491_v61 = vld [vmem:[#allocation2 + $0x344] ss:$16 sps:$4 sm:$0xff]   ;;  %v6486_v62 = vld [vmem:[#allocation2 + $0x140] ss:$16 sps:$4 sm:$0xff]  }
  0xa9   : > { %v6489_v63 = vld [vmem:[#allocation2 + $0x340] ss:$16 sps:$4 sm:$0xff]  }
  0xab   : > { %2329 = vmatpush1.bf16.msra.mxu0 %v6420_v0  ;;  %2370 = vmatpush1.bf16.msra.mxu1 %v6423_v1  ;;  %v6494_v0 = vld [vmem:[#allocation2 + $0x124] ss:$16 sps:$4 sm:$0xff]  }
  0xac   : > { %2330 = vmatprep.subr.bf16.mxu0 %v6428_v2  ;;  %2371 = vmatprep.subr.bf16.mxu1 %v6431_v3  ;;  %v6497_v1 = vld [vmem:[#allocation2 + $0x324] ss:$16 sps:$4 sm:$0xff]   ;;  %v6492_v2 = vld [vmem:[#allocation2 + $0x120] ss:$16 sps:$4 sm:$0xff]  }
  0xad   : > { %v6495_v3 = vld [vmem:[#allocation2 + $0x320] ss:$16 sps:$4 sm:$0xff]  }
  0xaf   : > { %2331 = vmatpush1.bf16.msra.mxu0 %v6426_v4  ;;  %2372 = vmatpush1.bf16.msra.mxu1 %v6429_v5  ;;  %v6500_v4 = vld [vmem:[#allocation2 + $0x104] ss:$16 sps:$4 sm:$0xff]  }
  0xb0   : > { %2332 = vmatprep.subr.bf16.mxu0 %v6434_v6  ;;  %2373 = vmatprep.subr.bf16.mxu1 %v6437_v7  ;;  %v6503_v5 = vld [vmem:[#allocation2 + $0x304] ss:$16 sps:$4 sm:$0xff]   ;;  %v6498_v6 = vld [vmem:[#allocation2 + $0x100] ss:$16 sps:$4 sm:$0xff]  }
  0xb1   : > { %v6501_v7 = vld [vmem:[#allocation2 + $0x300] ss:$16 sps:$4 sm:$0xff]  }
 0x121   : > { %v1313_v10 = vpop.f32.mrf.mxu0 }
 0x122   : > { %v1354_v11 = vpop.f32.mrf.mxu1  ;;  %v1314_v23 = vadd.f32 %v1313_v10, %v622_v9  ;;  %v6432_v10 = vld [vmem:[#allocation2 + $0x60] ss:$16 sps:$4 sm:$0xff]   ;;  %v6452_v9 = vld [vmem:[#allocation2 + $0x4] ss:$16 sps:$4 sm:$0xff]  }
 0x123   : > { %v1315_v12 = vpop.f32.mrf.mxu0  ;;  %2333 = vmatpush1.bf16.msra.mxu0 %v6432_v10  ;;  %v6506_v10 = vld [vmem:[#allocation2 + $0xec] ss:$16 sps:$4 sm:$0xff]  }
 0x124   : > { %v1356_v13 = vpop.f32.mrf.mxu1  ;;  %v1316_v24 = vadd.f32 %v1315_v12, %v626_v22  ;;  %v1355_v27 = vadd.f32 %v1354_v11, %v1314_v23  ;;  %v6435_v11 = vld [vmem:[#allocation2 + $0x260] ss:$16 sps:$4 sm:$0xff]   ;;  %v6440_v12 = vld [vmem:[#allocation2 + $0x44] ss:$16 sps:$4 sm:$0xff]  }
 0x125   : > { %v1317_v14 = vpop.f32.mrf.mxu0  ;;  %2374 = vmatpush1.bf16.msra.mxu1 %v6435_v11  ;;  %2334 = vmatprep.subr.bf16.mxu0 %v6440_v12  ;;  %v6455_v22 = vld [vmem:[#allocation2 + $0x204] ss:$16 sps:$4 sm:$0xff]   ;;  %v6450_v23 = vld [vmem:[#allocation2] ss:$16 sps:$4 sm:$0xff]   ;;  %v6509_v11 = vld [vmem:[#allocation2 + $0x2ec] ss:$16 sps:$4 sm:$0xff]  }
 0x126   : > { %v1358_v15 = vpop.f32.mrf.mxu1  ;;  %v1357_v28 = vadd.f32 %v1356_v13, %v1316_v24  ;;  %v7241_v35 = vadd.f32 %v1355_v27, %v481_v30  ;;  %v6443_v13 = vld [vmem:[#allocation2 + $0x244] ss:$16 sps:$4 sm:$0xff]   ;;  %v6438_v14 = vld [vmem:[#allocation2 + $0x40] ss:$16 sps:$4 sm:$0xff]  }
 0x127   : > { %v1318_v16 = vpop.f32.mrf.mxu0  ;;  %v6441_v15 = vld [vmem:[#allocation2 + $0x240] ss:$16 sps:$4 sm:$0xff]   ;;  %2375 = vmatprep.subr.bf16.mxu1 %v6443_v13  ;;  %2335 = vmatpush1.bf16.msra.mxu0 %v6438_v14  ;;  %v6458_v27 = vld [vmem:[#allocation2 + $0x1e4] ss:$16 sps:$4 sm:$0xff]  }
 0x128   : > { %v1359_v17 = vpop.f32.mrf.mxu1  ;;  %v7243_v36 = vadd.f32 %v1357_v28, %v482_v31  ;;  %v6446_v16 = vld [vmem:[#allocation2 + $0x24] ss:$16 sps:$4 sm:$0xff]   ;;  %v6453_v24 = vld [vmem:[#allocation2 + $0x200] ss:$16 sps:$4 sm:$0xff]  }
 0x129   : > { %v6449_v17 = vld [vmem:[#allocation2 + $0x224] ss:$16 sps:$4 sm:$0xff]   ;;  %2376 = vmatpush1.bf16.msra.mxu1 %v6441_v15  ;;  %2336 = vmatprep.subr.bf16.mxu0 %v6446_v16  ;;  %v6459_v30 = vld [vmem:[#allocation2 + $0x3e0] ss:$16 sps:$4 sm:$0xff]  }
 0x12a   : > { %v1449_v48 = vadd.f32 %v7243_v36, %v7241_v35  ;;  %2377 = vmatprep.subr.bf16.mxu1 %v6449_v17  ;;  %v6461_v28 = vld [vmem:[#allocation2 + $0x3e4] ss:$16 sps:$4 sm:$0xff]   ;;  %v1447_v15 = vld [vmem:[%s8359_s5] sm:$0xf] }
 0x12b   : > { %2337 = vmatpush1.bf16.msra.mxu0 %v6444_v18  ;;  %v6464_v31 = vld [vmem:[#allocation2 + $0x1c4] ss:$16 sps:$4 sm:$0xff]   ;;  %v1448_v16 = vld [vmem:[%s8360_s6] sm:$0xf]  ;;  %v1484_v17 = vrot.slane %v1447_v15, %v7222_v21  ;;  %v1492_v18 = vrot.slane %v1447_v15, %v7237_v26 }
 0x12c   : > { %2338 = vmatprep.subr.bf16.mxu0 %v6452_v9  ;;  %v1488_v9 = vrot.slane %v1447_v15, %v7230_v25 }
 0x12d   : > { %2378 = vmatpush1.bf16.msra.mxu1 %v6447_v8  ;;  %v1480_v8 = vrot.slane %v1447_v15, %v7219_v20  ;;  %v6552_v15 = vld [vmem:[#allocation2 + $0x1e8] ss:$16 sps:$4 sm:$0xff]  }
 0x12e   : > { %2379 = vmatprep.subr.bf16.mxu1 %v6455_v22 }
 0x12f   : > { %2339 = vmatpush1.bf16.msra.mxu0 %v6450_v23  ;;  %v1509_v23 = vrot.slane %v1448_v16, %v7222_v21 }
 0x130   : > { %2340 = vmatprep.subr.bf16.mxu0 %v6458_v27  ;;  %v1505_v27 = vrot.slane %v1448_v16, %v7219_v20 }
 0x131   : > { %2380 = vmatpush1.bf16.msra.mxu1 %v6453_v24  ;;  %v1517_v24 = vrot.slane %v1448_v16, %v7237_v26 }
 0x132   : > { %2381 = vmatprep.subr.bf16.mxu1 %v6461_v28  ;;  %v1513_v28 = vrot.slane %v1448_v16, %v7230_v25  ;;  %v6555_v16 = vld [vmem:[#allocation2 + $0x3e8] ss:$16 sps:$4 sm:$0xff]  }
 0x135   : > { %2382 = vmatpush2.bf16.msra.mxu1 %v6459_v30 }
 0x161   : > { %v1395_v33 = vpop.f32.mrf.mxu0 }
 0x162   : > { %v1436_v34 = vpop.f32.mrf.mxu1  ;;  %v1396_v37 = vadd.f32 %v1395_v33, %v630_v29  ;;  %v6456_v29 = vld [vmem:[#allocation2 + $0x1e0] ss:$16 sps:$4 sm:$0xff]  }
 0x163   : > { %v1397_v39 = vpop.f32.mrf.mxu0  ;;  %2341 = vmatpush2.bf16.msra.mxu0 %v6456_v29  ;;  %v6462_v33 = vld [vmem:[#allocation2 + $0x1c0] ss:$16 sps:$4 sm:$0xff]  }
 0x164   : > { %v1438_v40 = vpop.f32.mrf.mxu1  ;;  %v1437_v41 = vadd.f32 %v1436_v34, %v1396_v37  ;;  %v1398_v42 = vadd.f32 %v1397_v39, %v634_v32  ;;  %v6467_v32 = vld [vmem:[#allocation2 + $0x3c4] ss:$16 sps:$4 sm:$0xff]   ;;  %2342 = vmatprep.subr.bf16.mxu0 %v6464_v31  ;;  %v6465_v34 = vld [vmem:[#allocation2 + $0x3c0] ss:$16 sps:$4 sm:$0xff]  }
 0x165   : > { %v1399_v43 = vpop.f32.mrf.mxu0  ;;  %2383 = vmatprep.subr.bf16.mxu1 %v6467_v32 }
 0x166   : > { %v1440_v44 = vpop.f32.mrf.mxu1  ;;  %v7245_v46 = vadd.f32 %v1437_v41, %v483_v38  ;;  %v1439_v47 = vadd.f32 %v1438_v40, %v1398_v42  ;;  %2384 = vmatpush2.bf16.msra.mxu1 %v6465_v34 }
 0x167   : > { %v1400_v49 = vpop.f32.mrf.mxu0  ;;  %2343 = vmatpush2.bf16.msra.mxu0 %v6462_v33 }
 0x168   : > { %v1441_v50 = vpop.f32.mrf.mxu1  ;;  %v7249_v51 = vadd.f32 %v1439_v47, %v484_v45  ;;  %v1450_v52 = vadd.f32 %v1449_v48, %v7245_v46  ;;  %v6473_v49 = vld [vmem:[#allocation2 + $0x3a4] ss:$16 sps:$4 sm:$0xff]  }
 0x169   : > { %v6468_v50 = vld [vmem:[#allocation2 + $0x1a0] ss:$16 sps:$4 sm:$0xff]   ;;  %2385 = vmatprep.subr.bf16.mxu1 %v6473_v49  ;;  %v6510_v49 = vld [vmem:[#allocation2 + $0xc8] ss:$16 sps:$4 sm:$0xff]  }
 0x16a   : > { %v1451_v53 = vadd.f32 %v1450_v52, %v7249_v51  ;;  %v6474_v52 = vld [vmem:[#allocation2 + $0x180] ss:$16 sps:$4 sm:$0xff]  }
 0x16c   : > { %1452 = vadd.xlane.f32.xlu0 %v1451_v53  ;;  %v6476_v53 = vld [vmem:[#allocation2 + $0x184] ss:$16 sps:$4 sm:$0xff]  }
 0x1f5   : > { %v1453_v37 = vpop.xlane.xlu0 %1452 }
 0x1f6   : > { %v1455_v38 = vmul.f32 0.001953125, %v1453_v37 }
 0x1f8   : > { %v7254_v39 = vsub.f32 %v7241_v35, %v1455_v38  ;;  %v7257_v40 = vsub.f32 %v7243_v36, %v1455_v38  ;;  %v7260_v41 = vsub.f32 %v7245_v46, %v1455_v38  ;;  %v7263_v42 = vsub.f32 %v7249_v51, %v1455_v38  ;;  %v6470_v46 = vld [vmem:[#allocation2 + $0x1a4] ss:$16 sps:$4 sm:$0xff]   ;;  %v6471_v51 = vld [vmem:[#allocation2 + $0x3a0] ss:$16 sps:$4 sm:$0xff]  }
 0x1f9   : > { %2344 = vmatprep.subr.bf16.mxu0 %v6470_v46  ;;  %2386 = vmatpush2.bf16.msra.mxu1 %v6471_v51  ;;  %v6515_v46 = vld [vmem:[#allocation2 + $0x2cc] ss:$16 sps:$4 sm:$0xff]  }
 0x1fa   : > { %v1460_v43 = vmul.f32 %v7254_v39, %v7254_v39  ;;  %v1461_v44 = vmul.f32 %v7257_v40, %v7257_v40  ;;  %v1462_v45 = vmul.f32 %v7260_v41, %v7260_v41  ;;  %v1463_v36 = vmul.f32 %v7263_v42, %v7263_v42  ;;  %2345 = vmatpush2.bf16.msra.mxu0 %v6468_v50  ;;  %v6513_v50 = vld [vmem:[#allocation2 + $0x2c8] ss:$16 sps:$4 sm:$0xff]   ;;  %v6518_v51 = vld [vmem:[#allocation2 + $0xac] ss:$16 sps:$4 sm:$0xff]  }
 0x1fb   : > { %2346 = vmatprep.subr.bf16.mxu0 %v6476_v53  ;;  %2387 = vmatprep.subr.bf16.mxu1 %v6479_v55  ;;  %v6516_v53 = vld [vmem:[#allocation2 + $0xa8] ss:$16 sps:$4 sm:$0xff]   ;;  %v6524_v55 = vld [vmem:[#allocation2 + $0x8c] ss:$16 sps:$4 sm:$0xff]  }
 0x1fc   : > { %v1464_v35 = vadd.f32 %v1461_v44, %v1460_v43 }
 0x1fd   : > { %2388 = vmatpush2.bf16.msra.mxu1 %v6477_v54  ;;  %v6519_v54 = vld [vmem:[#allocation2 + $0x2a8] ss:$16 sps:$4 sm:$0xff]  }
 0x1fe   : > { %v1465_v47 = vadd.f32 %v1464_v35, %v1462_v45  ;;  %2347 = vmatpush2.bf16.msra.mxu0 %v6474_v52  ;;  %2389 = vmatprep.subr.bf16.mxu1 %v6485_v57  ;;  %v6521_v52 = vld [vmem:[#allocation2 + $0x2ac] ss:$16 sps:$4 sm:$0xff]   ;;  %v6522_v57 = vld [vmem:[#allocation2 + $0x88] ss:$16 sps:$4 sm:$0xff]  }
 0x1ff   : > { %2348 = vmatprep.subr.bf16.mxu0 %v6482_v56  ;;  %v6527_v56 = vld [vmem:[#allocation2 + $0x28c] ss:$16 sps:$4 sm:$0xff]  }
 0x200   : > { %v1466_v48 = vadd.f32 %v1465_v47, %v1463_v36  ;;  %v6504_v36 = vld [vmem:[#allocation2 + $0xe8] ss:$16 sps:$4 sm:$0xff]  }
 0x201   : > { %2390 = vmatpush2.bf16.msra.mxu1 %v6483_v59  ;;  %v6530_v59 = vld [vmem:[#allocation2 + $0x6c] ss:$16 sps:$4 sm:$0xff]  }
 0x202   : > { %1467 = vadd.xlane.f32.xlu0 %v1466_v48  ;;  %2349 = vmatpush2.bf16.msra.mxu0 %v6480_v58  ;;  %v6512_v48 = vld [vmem:[#allocation2 + $0xcc] ss:$16 sps:$4 sm:$0xff]   ;;  %v6525_v58 = vld [vmem:[#allocation2 + $0x288] ss:$16 sps:$4 sm:$0xff]  }
 0x203   : > { %2350 = vmatprep.subr.bf16.mxu0 %v6488_v60  ;;  %2391 = vmatprep.subr.bf16.mxu1 %v6491_v61  ;;  %v6533_v60 = vld [vmem:[#allocation2 + $0x26c] ss:$16 sps:$4 sm:$0xff]   ;;  %v6528_v61 = vld [vmem:[#allocation2 + $0x68] ss:$16 sps:$4 sm:$0xff]  }
 0x205   : > { %2392 = vmatpush2.bf16.msra.mxu1 %v6489_v63  ;;  %v6536_v63 = vld [vmem:[#allocation2 + $0x4c] ss:$16 sps:$4 sm:$0xff]  }
 0x206   : > { %2351 = vmatpush2.bf16.msra.mxu0 %v6486_v62  ;;  %2393 = vmatprep.subr.bf16.mxu1 %v6497_v1  ;;  %v6531_v62 = vld [vmem:[#allocation2 + $0x268] ss:$16 sps:$4 sm:$0xff]  }
 0x207   : > { %2352 = vmatprep.subr.bf16.mxu0 %v6494_v0  ;;  %v6539_v0 = vld [vmem:[#allocation2 + $0x24c] ss:$16 sps:$4 sm:$0xff]   ;;  %v6534_v1 = vld [vmem:[#allocation2 + $0x48] ss:$16 sps:$4 sm:$0xff]  }
 0x209   : > { %2394 = vmatpush2.bf16.msra.mxu1 %v6495_v3  ;;  %v6542_v3 = vld [vmem:[#allocation2 + $0x2c] ss:$16 sps:$4 sm:$0xff]  }
 0x20a   : > { %2353 = vmatpush2.bf16.msra.mxu0 %v6492_v2  ;;  %2395 = vmatprep.subr.bf16.mxu1 %v6503_v5  ;;  %v6537_v2 = vld [vmem:[#allocation2 + $0x248] ss:$16 sps:$4 sm:$0xff]  }
 0x20b   : > { %2354 = vmatprep.subr.bf16.mxu0 %v6500_v4  ;;  %v6545_v4 = vld [vmem:[#allocation2 + $0x22c] ss:$16 sps:$4 sm:$0xff]   ;;  %v6540_v5 = vld [vmem:[#allocation2 + $0x28] ss:$16 sps:$4 sm:$0xff]  }
 0x20d   : > { %2396 = vmatpush2.bf16.msra.mxu1 %v6501_v7  ;;  %v6548_v7 = vld [vmem:[#allocation2 + $0xc] ss:$16 sps:$4 sm:$0xff]  }
 0x20e   : > { %2355 = vmatpush2.bf16.msra.mxu0 %v6498_v6  ;;  %2447 = vmatprep.subr.bf16.mxu1 %v6509_v11  ;;  %v6543_v6 = vld [vmem:[#allocation2 + $0x228] ss:$16 sps:$4 sm:$0xff]  }
 0x20f   : > { %2406 = vmatprep.subr.bf16.mxu0 %v6506_v10  ;;  %v6551_v10 = vld [vmem:[#allocation2 + $0x20c] ss:$16 sps:$4 sm:$0xff]   ;;  %v6546_v11 = vld [vmem:[#allocation2 + $0x8] ss:$16 sps:$4 sm:$0xff]  }
 0x28b   : > { %v1468_v12 = vpop.xlane.xlu0 %1467 }
 0x28c   : > { %v1469_v13 = vmul.f32 0.001953125, %v1468_v12  ;;  %v6549_v12 = vld [vmem:[#allocation2 + $0x208] ss:$16 sps:$4 sm:$0xff]  }
 0x28e   : > { %v1470_v14 = vadd.f32 1e-05, %v1469_v13  ;;  %v6554_v13 = vld [vmem:[#allocation2 + $0x1ec] ss:$16 sps:$4 sm:$0xff]  }
 0x290   : > { %6600 = vrsqrt.f32 %v1470_v14  ;;  %v6557_v14 = vld [vmem:[#allocation2 + $0x3ec] ss:$16 sps:$4 sm:$0xff]  }
 0x29d   : > { %v6601_v22 = vpop.eup %6600 }
 0x29e   : > { %v1473_v29 = vmul.f32 %v6601_v22, %v7257_v40  ;;  %v1475_v30 = vmul.f32 %v6601_v22, %v7263_v42  ;;  %v1472_v31 = vmul.f32 %v6601_v22, %v7254_v39  ;;  %v1474_v32 = vmul.f32 %v6601_v22, %v7260_v41  ;;  %v6507_v39 = vld [vmem:[#allocation2 + $0x2e8] ss:$16 sps:$4 sm:$0xff]   ;;  %v6566_v22 = vld [vmem:[#allocation2 + $0x1ac] ss:$16 sps:$4 sm:$0xff]  }
 0x2a0   : > { %v1498_v33 = vmul.f32 %v1484_v17, %v1473_v29  ;;  %v1500_v34 = vmul.f32 %v1492_v18, %v1475_v30  ;;  %v1497_v37 = vmul.f32 %v1480_v8, %v1472_v31  ;;  %v1499_v38 = vmul.f32 %v1488_v9, %v1474_v32  ;;  %v6560_v17 = vld [vmem:[#allocation2 + $0x1cc] ss:$16 sps:$4 sm:$0xff]   ;;  %v6558_v8 = vld [vmem:[#allocation2 + $0x1c8] ss:$16 sps:$4 sm:$0xff]  }
 0x2a1   : > { %v6563_v18 = vld [vmem:[#allocation2 + $0x3cc] ss:$16 sps:$4 sm:$0xff]   ;;  %v6561_v9 = vld [vmem:[#allocation2 + $0x3c8] ss:$16 sps:$4 sm:$0xff]  }
 0x2a2   : > { %v1523_v43 = vadd.f32 %v1509_v23, %v1498_v33  ;;  %v1525_v44 = vadd.f32 %v1517_v24, %v1500_v34  ;;  %v1522_v45 = vadd.f32 %v1505_v27, %v1497_v37  ;;  %v1524_v35 = vadd.f32 %v1513_v28, %v1499_v38  ;;  %v6569_v23 = vld [vmem:[#allocation2 + $0x3ac] ss:$16 sps:$4 sm:$0xff]   ;;  %v6564_v24 = vld [vmem:[#allocation2 + $0x1a8] ss:$16 sps:$4 sm:$0xff]  }
 0x2a3   : > { %v6567_v27 = vld [vmem:[#allocation2 + $0x3a8] ss:$16 sps:$4 sm:$0xff]   ;;  %v6572_v28 = vld [vmem:[#allocation2 + $0x18c] ss:$16 sps:$4 sm:$0xff]  }
 0x2a4   : > { %1527 = vst [vmem:[%s475_s14 + $0x8] sm:$0xff] %v1523_v43  ;;  %v1531_v40 = vpack.c.bf16 %v1523_v43, %v1523_v43  ;;  %1529 = vst [vmem:[%s475_s14 + $0x18] sm:$0xff] %v1525_v44  ;;  %v1533_v42 = vpack.c.bf16 %v1525_v44, %v1525_v44  ;;  %v7295_v41 = vpack.c.bf16 %v1522_v45, %v1522_v45  ;;  %v6575_v29 = vld [vmem:[#allocation2 + $0x38c] ss:$16 sps:$4 sm:$0xff]   ;;  %v6570_v30 = vld [vmem:[#allocation2 + $0x188] ss:$16 sps:$4 sm:$0xff]  }
 0x2a5   : > { %1526 = vst [vmem:[%s475_s14] sm:$0xff] %v1522_v45  ;;  %1528 = vst [vmem:[%s475_s14 + $0x10] sm:$0xff] %v1524_v35  ;;  %v7297_v47 = vpack.c.bf16 %v1524_v35, %v1524_v35  ;;  %v6573_v31 = vld [vmem:[#allocation2 + $0x388] ss:$16 sps:$4 sm:$0xff]   ;;  %v6578_v32 = vld [vmem:[#allocation2 + $0x16c] ss:$16 sps:$4 sm:$0xff]   ;;  %s7317_s14 = scalar_lea.vmem %s8356_s2, %s6931_s19  ;;  %s8312_s19 = scalar_lea.vmem [#allocation4], %s5496_s20 }
 0x2a6   : > { %2356 = vmatprep.mubr.bf16.mxu0 %v1531_v40  ;;  %2397 = vmatprep.mubr.bf16.mxu1 %v1533_v42  ;;  %v6581_v33 = vld [vmem:[#allocation2 + $0x36c] ss:$16 sps:$4 sm:$0xff]   ;;  %v6576_v34 = vld [vmem:[#allocation2 + $0x168] ss:$16 sps:$4 sm:$0xff]  }
 0x2a7   : > { %2357 = vmatmul.mubr.bf16.vlgmr.msra.gmra.mxu0 %v7295_v41  ;;  %2398 = vmatmul.mubr.bf16.vlgmr.msra.gmra.mxu1 %v7297_v47  ;;  %v6579_v37 = vld [vmem:[#allocation2 + $0x368] ss:$16 sps:$4 sm:$0xff]   ;;  %v6584_v38 = vld [vmem:[#allocation2 + $0x14c] ss:$16 sps:$4 sm:$0xff]  }
 0x2a8   : > { %2407 = vmatpush1.bf16.msra.mxu0 %v6504_v36  ;;  %2448 = vmatpush1.bf16.msra.mxu1 %v6507_v39  ;;  %v6587_v43 = vld [vmem:[#allocation2 + $0x34c] ss:$16 sps:$4 sm:$0xff]   ;;  %v6582_v44 = vld [vmem:[#allocation2 + $0x148] ss:$16 sps:$4 sm:$0xff]  }
 0x2a9   : > { %2438 = vmatprep.mubr.bf16.mxu0 %v1531_v40  ;;  %2479 = vmatprep.mubr.bf16.mxu1 %v1533_v42  ;;  %v6585_v45 = vld [vmem:[#allocation2 + $0x348] ss:$16 sps:$4 sm:$0xff]   ;;  %v6590_v35 = vld [vmem:[#allocation2 + $0x12c] ss:$16 sps:$4 sm:$0xff]  }
 0x2aa   : > { %2408 = vmatprep.subr.bf16.mxu0 %v6512_v48  ;;  %2449 = vmatprep.subr.bf16.mxu1 %v6515_v46  ;;  %v6593_v40 = vld [vmem:[#allocation2 + $0x32c] ss:$16 sps:$4 sm:$0xff]   ;;  %v6588_v42 = vld [vmem:[#allocation2 + $0x128] ss:$16 sps:$4 sm:$0xff]   ;;  %v2552_v46 = vld [vmem:[%s8363_s9 + $0x1c0] sm:$0xff] }
 0x2ab   : > { %v6591_v36 = vld [vmem:[#allocation2 + $0x328] ss:$16 sps:$4 sm:$0xff]   ;;  %v6596_v39 = vld [vmem:[#allocation2 + $0x10c] ss:$16 sps:$4 sm:$0xff]  }
 0x2ac   : > { %2409 = vmatpush1.bf16.msra.mxu0 %v6510_v49  ;;  %2450 = vmatpush1.bf16.msra.mxu1 %v6513_v50  ;;  %v6599_v48 = vld [vmem:[#allocation2 + $0x30c] ss:$16 sps:$4 sm:$0xff]   ;;  %v2556_v49 = vld [vmem:[%s8363_s9 + $0x1e0] sm:$0xff] }
 0x2ad   : > { %2410 = vmatprep.subr.bf16.mxu0 %v6518_v51  ;;  %2451 = vmatprep.subr.bf16.mxu1 %v6521_v52  ;;  %v2680_v50 = vld [vmem:[%s8363_s9 + $0x5c0] sm:$0xff]  ;;  %v6594_v52 = vld [vmem:[#allocation2 + $0x108] ss:$16 sps:$4 sm:$0xff]  }
 0x2ae   : > { %v2684_v51 = vld [vmem:[%s8363_s9 + $0x5e0] sm:$0xff] }
 0x2b0   : > { %2411 = vmatpush1.bf16.msra.mxu0 %v6516_v53  ;;  %2452 = vmatpush1.bf16.msra.mxu1 %v6519_v54  ;;  %v6597_v53 = vld [vmem:[#allocation2 + $0x308] ss:$16 sps:$4 sm:$0xff]   ;;  %v5818_v54 = vcombine.high %v2552_v46, %v2556_v49 }
 0x2b1   : > { %2412 = vmatprep.subr.bf16.mxu0 %v6524_v55  ;;  %2453 = vmatprep.subr.bf16.mxu1 %v6527_v56  ;;  %v5946_v55 = vcombine.high %v2680_v50, %v2684_v51  ;;  %v2544_v56 = vld [vmem:[%s8363_s9 + $0x180] sm:$0xff] }
 0x2b4   : > { %2413 = vmatpush1.bf16.msra.mxu0 %v6522_v57  ;;  %2454 = vmatpush1.bf16.msra.mxu1 %v6525_v58  ;;  %v2548_v57 = vld [vmem:[%s8363_s9 + $0x1a0] sm:$0xff] }
 0x2b5   : > { %2414 = vmatprep.subr.bf16.mxu0 %v6530_v59  ;;  %2455 = vmatprep.subr.bf16.mxu1 %v6533_v60  ;;  %v2672_v58 = vld [vmem:[%s8363_s9 + $0x580] sm:$0xff]  ;;  %v2489_v60 = vld [vmem:[%s7317_s14 + $0x8] sm:$0xff] }
 0x2b6   : > { %v2676_v59 = vld [vmem:[%s8363_s9 + $0x5a0] sm:$0xff] }
 0x2b8   : > { %2415 = vmatpush1.bf16.msra.mxu0 %v6528_v61  ;;  %2456 = vmatpush1.bf16.msra.mxu1 %v6531_v62  ;;  %v2491_v61 = vld [vmem:[%s7317_s14 + $0x18] sm:$0xff]  ;;  %v5817_v62 = vcombine.low %v2552_v46, %v2556_v49  ;;  %v2496_v49 = vld [vmem:[%s8363_s9] sm:$0xff] }
 0x2b9   : > { %2416 = vmatprep.subr.bf16.mxu0 %v6536_v63  ;;  %2457 = vmatprep.subr.bf16.mxu1 %v6539_v0  ;;  %v5945_v63 = vcombine.low %v2680_v50, %v2684_v51  ;;  %v5810_v0 = vcombine.high %v2544_v56, %v2548_v57  ;;  %v2500_v50 = vld [vmem:[%s8363_s9 + $0x20] sm:$0xff] }
 0x2ba   : > { %v2624_v51 = vld [vmem:[%s8363_s9 + $0x400] sm:$0xff] }
 0x2bc   : > { %2417 = vmatpush1.bf16.msra.mxu0 %v6534_v1  ;;  %2458 = vmatpush1.bf16.msra.mxu1 %v6537_v2  ;;  %v5938_v1 = vcombine.high %v2672_v58, %v2676_v59  ;;  %v2536_v2 = vld [vmem:[%s8363_s9 + $0x140] sm:$0xff] }
 0x2bd   : > { %2418 = vmatprep.subr.bf16.mxu0 %v6542_v3  ;;  %2459 = vmatprep.subr.bf16.mxu1 %v6545_v4  ;;  %v2540_v3 = vld [vmem:[%s8363_s9 + $0x160] sm:$0xff] }
 0x2be   : > { %v2664_v4 = vld [vmem:[%s8363_s9 + $0x540] sm:$0xff] }
 0x2c0   : > { %2419 = vmatpush1.bf16.msra.mxu0 %v6540_v5  ;;  %2460 = vmatpush1.bf16.msra.mxu1 %v6543_v6  ;;  %v2668_v5 = vld [vmem:[%s8363_s9 + $0x560] sm:$0xff]  ;;  %v7345_v6 = vpack.c.bf16 %v2489_v60, %v2489_v60 }
 0x2c1   : > { %2420 = vmatprep.subr.bf16.mxu0 %v6548_v7  ;;  %2461 = vmatprep.subr.bf16.mxu1 %v6551_v10  ;;  %v7347_v7 = vpack.c.bf16 %v2491_v61, %v2491_v61  ;;  %v5809_v10 = vcombine.low %v2544_v56, %v2548_v57  ;;  %v2616_v57 = vld [vmem:[%s8363_s9 + $0x3c0] sm:$0xff]  ;;  %v5761_v61 = vcombine.low %v2496_v49, %v2500_v50 }
 0x2c2   : > { %v2748_v60 = vld [vmem:[%s8363_s9 + $0x7e0] sm:$0xff] }
 0x2c4   : > { %2421 = vmatpush1.bf16.msra.mxu0 %v6546_v11  ;;  %2462 = vmatpush1.bf16.msra.mxu1 %v6549_v12  ;;  %v5937_v11 = vcombine.low %v2672_v58, %v2676_v59  ;;  %v5802_v12 = vcombine.high %v2536_v2, %v2540_v3  ;;  %v2620_v58 = vld [vmem:[%s8363_s9 + $0x3e0] sm:$0xff] }
 0x2c5   : > { %2422 = vmatprep.subr.bf16.mxu0 %v6554_v13  ;;  %2463 = vmatprep.subr.bf16.mxu1 %v6557_v14  ;;  %v5930_v13 = vcombine.high %v2664_v4, %v2668_v5  ;;  %v2528_v14 = vld [vmem:[%s8363_s9 + $0x100] sm:$0xff] }
 0x2c6   : > { %v2744_v59 = vld [vmem:[%s8363_s9 + $0x7c0] sm:$0xff] }
 0x2c8   : > { %2423 = vmatpush2.bf16.msra.mxu0 %v6552_v15  ;;  %2464 = vmatpush2.bf16.msra.mxu1 %v6555_v16  ;;  %v2532_v15 = vld [vmem:[%s8363_s9 + $0x120] sm:$0xff]  ;;  %v5801_v16 = vcombine.low %v2536_v2, %v2540_v3 }
 0x2c9   : > { %2424 = vmatprep.subr.bf16.mxu0 %v6560_v17  ;;  %2465 = vmatprep.subr.bf16.mxu1 %v6563_v18  ;;  %v5929_v17 = vcombine.low %v2664_v4, %v2668_v5  ;;  %v5794_v18 = vcombine.high %v2528_v14, %v2532_v15  ;;  %v2612_v2 = vld [vmem:[%s8363_s9 + $0x3a0] sm:$0xff]  ;;  %v5881_v5 = vcombine.low %v2616_v57, %v2620_v58 }
 0x2ca   : > { %v2736_v3 = vld [vmem:[%s8363_s9 + $0x780] sm:$0xff] }
 0x2cb   : > { %v2740_v4 = vld [vmem:[%s8363_s9 + $0x7a0] sm:$0xff] }
 0x2cc   : > { %2425 = vmatpush2.bf16.msra.mxu0 %v6558_v8  ;;  %2466 = vmatpush2.bf16.msra.mxu1 %v6561_v9  ;;  %v2520_v9 = vld [vmem:[%s8363_s9 + $0xc0] sm:$0xff] }
 0x2cd   : > { %2426 = vmatprep.subr.bf16.mxu0 %v6566_v22  ;;  %2467 = vmatprep.subr.bf16.mxu1 %v6569_v23  ;;  %v2524_v22 = vld [vmem:[%s8363_s9 + $0xe0] sm:$0xff] }
 0x2ce   : > { %v2648_v23 = vld [vmem:[%s8363_s9 + $0x4c0] sm:$0xff] }
 0x2d0   : > { %2427 = vmatpush2.bf16.msra.mxu0 %v6564_v24  ;;  %2468 = vmatpush2.bf16.msra.mxu1 %v6567_v27  ;;  %v2652_v24 = vld [vmem:[%s8363_s9 + $0x4e0] sm:$0xff]  ;;  %v5793_v27 = vcombine.low %v2528_v14, %v2532_v15 }
 0x2d1   : > { %2428 = vmatprep.subr.bf16.mxu0 %v6572_v28  ;;  %2469 = vmatprep.subr.bf16.mxu1 %v6575_v29  ;;  %v5786_v29 = vcombine.high %v2520_v9, %v2524_v22  ;;  %v2604_v14 = vld [vmem:[%s8363_s9 + $0x360] sm:$0xff] }
 0x2d2   : > { %v2728_v15 = vld [vmem:[%s8363_s9 + $0x740] sm:$0xff] }
 0x2d4   : > { %2429 = vmatpush2.bf16.msra.mxu0 %v6570_v30  ;;  %2470 = vmatpush2.bf16.msra.mxu1 %v6573_v31  ;;  %v5914_v30 = vcombine.high %v2648_v23, %v2652_v24  ;;  %v2512_v31 = vld [vmem:[%s8363_s9 + $0x80] sm:$0xff] }
 0x2d5   : > { %2430 = vmatprep.subr.bf16.mxu0 %v6578_v32  ;;  %2471 = vmatprep.subr.bf16.mxu1 %v6581_v33  ;;  %v2516_v32 = vld [vmem:[%s8363_s9 + $0xa0] sm:$0xff] }
 0x2d6   : > { %v2640_v33 = vld [vmem:[%s8363_s9 + $0x480] sm:$0xff] }
 0x2d8   : > { %2431 = vmatpush2.bf16.msra.mxu0 %v6576_v34  ;;  %2472 = vmatpush2.bf16.msra.mxu1 %v6579_v37  ;;  %v2644_v34 = vld [vmem:[%s8363_s9 + $0x4a0] sm:$0xff]  ;;  %v5785_v37 = vcombine.low %v2520_v9, %v2524_v22 }
 0x2d9   : > { %2432 = vmatprep.subr.bf16.mxu0 %v6584_v38  ;;  %2473 = vmatprep.subr.bf16.mxu1 %v6587_v43  ;;  %v5913_v38 = vcombine.low %v2648_v23, %v2652_v24  ;;  %v5778_v43 = vcombine.high %v2512_v31, %v2516_v32  ;;  %v2596_v9 = vld [vmem:[%s8363_s9 + $0x320] sm:$0xff] }
 0x2da   : > { %v2720_v22 = vld [vmem:[%s8363_s9 + $0x700] sm:$0xff] }
 0x2db   : > { %v2724_v23 = vld [vmem:[%s8363_s9 + $0x720] sm:$0xff] }
 0x2dc   : > { %2433 = vmatpush2.bf16.msra.mxu0 %v6582_v44  ;;  %2474 = vmatpush2.bf16.msra.mxu1 %v6585_v45  ;;  %v5906_v44 = vcombine.high %v2640_v33, %v2644_v34  ;;  %v2504_v45 = vld [vmem:[%s8363_s9 + $0x40] sm:$0xff] }
 0x2dd   : > { %2434 = vmatprep.subr.bf16.mxu0 %v6590_v35  ;;  %2475 = vmatprep.subr.bf16.mxu1 %v6593_v40  ;;  %v2508_v35 = vld [vmem:[%s8363_s9 + $0x60] sm:$0xff] }
 0x2de   : > { %v2632_v40 = vld [vmem:[%s8363_s9 + $0x440] sm:$0xff] }
 0x2e0   : > { %2435 = vmatpush2.bf16.msra.mxu0 %v6588_v42  ;;  %2476 = vmatpush2.bf16.msra.mxu1 %v6591_v36  ;;  %v2636_v42 = vld [vmem:[%s8363_s9 + $0x460] sm:$0xff]  ;;  %v5777_v36 = vcombine.low %v2512_v31, %v2516_v32 }
 0x2e1   : > { %2436 = vmatprep.subr.bf16.mxu0 %v6596_v39  ;;  %2477 = vmatprep.subr.bf16.mxu1 %v6599_v48  ;;  %v5905_v39 = vcombine.low %v2640_v33, %v2644_v34  ;;  %v5770_v48 = vcombine.high %v2504_v45, %v2508_v35  ;;  %v5898_v46 = vcombine.high %v2632_v40, %v2636_v42  ;;  %v2588_v31 = vld [vmem:[%s8363_s9 + $0x2e0] sm:$0xff] }
 0x2e2   : > { %v2712_v32 = vld [vmem:[%s8363_s9 + $0x6c0] sm:$0xff] }
 0x2e3   : > { %v2716_v33 = vld [vmem:[%s8363_s9 + $0x6e0] sm:$0xff] }
 0x2e4   : > { %2437 = vmatpush2.bf16.msra.mxu0 %v6594_v52  ;;  %2478 = vmatpush2.bf16.msra.mxu1 %v6597_v53  ;;  %v2628_v52 = vld [vmem:[%s8363_s9 + $0x420] sm:$0xff]  ;;  %v5769_v53 = vcombine.low %v2504_v45, %v2508_v35 }
 0x2e5   : > { %4074 = vmatprep.subr.bf16.mxu0 %v5818_v54  ;;  %4115 = vmatprep.subr.bf16.mxu1 %v5946_v55  ;;  %v5897_v54 = vcombine.low %v2632_v40, %v2636_v42  ;;  %v5762_v55 = vcombine.high %v2496_v49, %v2500_v50  ;;  %v5890_v56 = vcombine.high %v2624_v51, %v2628_v52  ;;  %v2580_v45 = vld [vmem:[%s8363_s9 + $0x2a0] sm:$0xff] }
 0x2e6   : > { %v2704_v35 = vld [vmem:[%s8363_s9 + $0x680] sm:$0xff] }
 0x2e7   : > { %2439 = vmatmul.mubr.bf16.vlgmr.msra.gmra.mxu0 %v7295_v41  ;;  %2480 = vmatmul.mubr.bf16.vlgmr.msra.gmra.mxu1 %v7297_v47  ;;  %v2656_v41 = vld [vmem:[%s8363_s9 + $0x500] sm:$0xff] }
 0x2e8   : > { %4075 = vmatpush1.bf16.msra.mxu0 %v5817_v62  ;;  %4116 = vmatpush1.bf16.msra.mxu1 %v5945_v63  ;;  %v2660_v47 = vld [vmem:[%s8363_s9 + $0x520] sm:$0xff]  ;;  %v5889_v62 = vcombine.low %v2624_v51, %v2628_v52  ;;  %v5882_v63 = vcombine.high %v2616_v57, %v2620_v58 }
 0x2e9   : > { %4076 = vmatprep.subr.bf16.mxu0 %v5810_v0  ;;  %4117 = vmatprep.subr.bf16.mxu1 %v5938_v1  ;;  %v5922_v8 = vcombine.high %v2656_v41, %v2660_v47  ;;  %v5921_v28 = vcombine.low %v2656_v41, %v2660_v47  ;;  %v6010_v0 = vcombine.high %v2744_v59, %v2748_v60  ;;  %v2608_v1 = vld [vmem:[%s8363_s9 + $0x380] sm:$0xff] }
 0x2ea   : > { %4106 = vmatprep.mubr.bf16.mxu0 %v7345_v6  ;;  %4147 = vmatprep.mubr.bf16.mxu1 %v7347_v7  ;;  %v2732_v41 = vld [vmem:[%s8363_s9 + $0x760] sm:$0xff]  ;;  %v5873_v47 = vcombine.low %v2608_v1, %v2612_v2 }
 0x2eb   : > { %v2708_v40 = vld [vmem:[%s8363_s9 + $0x6a0] sm:$0xff] }
 0x2ec   : > { %4077 = vmatpush1.bf16.msra.mxu0 %v5809_v10  ;;  %4118 = vmatpush1.bf16.msra.mxu1 %v5937_v11  ;;  %v6009_v10 = vcombine.low %v2744_v59, %v2748_v60  ;;  %v5874_v11 = vcombine.high %v2608_v1, %v2612_v2  ;;  %v2572_v49 = vld [vmem:[%s8363_s9 + $0x260] sm:$0xff]  ;;  %v2557_v1 = vld [vmem:[%s8363_s9 + $0x1e8] sm:$0xff] }
 0x2ed   : > { %4078 = vmatprep.subr.bf16.mxu0 %v5802_v12  ;;  %4119 = vmatprep.subr.bf16.mxu1 %v5930_v13  ;;  %v6002_v12 = vcombine.high %v2736_v3, %v2740_v4  ;;  %v2600_v13 = vld [vmem:[%s8363_s9 + $0x340] sm:$0xff]  ;;  %v2681_v2 = vld [vmem:[%s8363_s9 + $0x5c8] sm:$0xff] }
 0x2ee   : > { %v5865_v24 = vcombine.low %v2600_v13, %v2604_v14  ;;  %v2696_v50 = vld [vmem:[%s8363_s9 + $0x640] sm:$0xff] }
 0x2ef   : > { %v2700_v51 = vld [vmem:[%s8363_s9 + $0x660] sm:$0xff] }
 0x2f0   : > { %4079 = vmatpush1.bf16.msra.mxu0 %v5801_v16  ;;  %4120 = vmatpush1.bf16.msra.mxu1 %v5929_v17  ;;  %v6001_v16 = vcombine.low %v2736_v3, %v2740_v4  ;;  %v5866_v17 = vcombine.high %v2600_v13, %v2604_v14  ;;  %v2564_v57 = vld [vmem:[%s8363_s9 + $0x220] sm:$0xff]  ;;  %v2685_v3 = vld [vmem:[%s8363_s9 + $0x5e8] sm:$0xff] }
 0x2f1   : > { %4080 = vmatprep.subr.bf16.mxu0 %v5794_v18  ;;  %4121 = vmatprep.subr.bf16.mxu1 %v5922_v8  ;;  %v5994_v18 = vcombine.high %v2728_v15, %v2732_v41  ;;  %v2592_v8 = vld [vmem:[%s8363_s9 + $0x300] sm:$0xff]  ;;  %v5948_v13 = vcombine.high %v2681_v2, %v2685_v3  ;;  %v2545_v14 = vld [vmem:[%s8363_s9 + $0x188] sm:$0xff] }
 0x2f2   : > { %v5857_v34 = vcombine.low %v2592_v8, %v2596_v9  ;;  %v2688_v58 = vld [vmem:[%s8363_s9 + $0x600] sm:$0xff] }
 0x2f3   : > { %v2692_v59 = vld [vmem:[%s8363_s9 + $0x620] sm:$0xff] }
 0x2f4   : > { %4081 = vmatpush1.bf16.msra.mxu0 %v5793_v27  ;;  %4122 = vmatpush1.bf16.msra.mxu1 %v5921_v28  ;;  %v5993_v27 = vcombine.low %v2728_v15, %v2732_v41  ;;  %v5858_v28 = vcombine.high %v2592_v8, %v2596_v9  ;;  %v2549_v15 = vld [vmem:[%s8363_s9 + $0x1a8] sm:$0xff]  ;;  %v5947_v8 = vcombine.low %v2681_v2, %v2685_v3 }
 0x2f5   : > { %4082 = vmatprep.subr.bf16.mxu0 %v5786_v29  ;;  %4123 = vmatprep.subr.bf16.mxu1 %v5914_v30  ;;  %v5986_v29 = vcombine.high %v2720_v22, %v2724_v23  ;;  %v2584_v30 = vld [vmem:[%s8363_s9 + $0x2c0] sm:$0xff]  ;;  %v2673_v41 = vld [vmem:[%s8363_s9 + $0x588] sm:$0xff]  ;;  %v5812_v9 = vcombine.high %v2545_v14, %v2549_v15 }
 0x2f6   : > { %v5849_v42 = vcombine.low %v2584_v30, %v2588_v31  ;;  %v2497_v3 = vld [vmem:[%s8363_s9 + $0x8] sm:$0xff] }
 0x2f8   : > { %4083 = vmatpush1.bf16.msra.mxu0 %v5785_v37  ;;  %4124 = vmatpush1.bf16.msra.mxu1 %v5913_v38  ;;  %v5985_v37 = vcombine.low %v2720_v22, %v2724_v23  ;;  %v5850_v38 = vcombine.high %v2584_v30, %v2588_v31  ;;  %v2537_v23 = vld [vmem:[%s8363_s9 + $0x148] sm:$0xff] }
 0x2f9   : > { %4084 = vmatprep.subr.bf16.mxu0 %v5778_v43  ;;  %4125 = vmatprep.subr.bf16.mxu1 %v5906_v44  ;;  %v5978_v43 = vcombine.high %v2712_v32, %v2716_v33  ;;  %v2576_v44 = vld [vmem:[%s8363_s9 + $0x280] sm:$0xff] }
 0x2fa   : > { %v5841_v52 = vcombine.low %v2576_v44, %v2580_v45 }
 0x2fc   : > { %4085 = vmatpush1.bf16.msra.mxu0 %v5777_v36  ;;  %4126 = vmatpush1.bf16.msra.mxu1 %v5905_v39  ;;  %v5977_v36 = vcombine.low %v2712_v32, %v2716_v33  ;;  %v5842_v39 = vcombine.high %v2576_v44, %v2580_v45  ;;  %v2529_v33 = vld [vmem:[%s8363_s9 + $0x108] sm:$0xff] }
 0x2fd   : > { %4086 = vmatprep.subr.bf16.mxu0 %v5770_v48  ;;  %4127 = vmatprep.subr.bf16.mxu1 %v5898_v46  ;;  %v5970_v48 = vcombine.high %v2704_v35, %v2708_v40  ;;  %v2568_v46 = vld [vmem:[%s8363_s9 + $0x240] sm:$0xff] }
 0x2fe   : > { %v5833_v60 = vcombine.low %v2568_v46, %v2572_v49 }
 0x300   : > { %4087 = vmatpush1.bf16.msra.mxu0 %v5769_v53  ;;  %4128 = vmatpush1.bf16.msra.mxu1 %v5897_v54  ;;  %v5969_v53 = vcombine.low %v2704_v35, %v2708_v40  ;;  %v5834_v54 = vcombine.high %v2568_v46, %v2572_v49  ;;  %v2521_v40 = vld [vmem:[%s8363_s9 + $0xc8] sm:$0xff] }
 0x301   : > { %4088 = vmatprep.subr.bf16.mxu0 %v5762_v55  ;;  %4129 = vmatprep.subr.bf16.mxu1 %v5890_v56  ;;  %v5962_v55 = vcombine.high %v2696_v50, %v2700_v51  ;;  %v2560_v56 = vld [vmem:[%s8363_s9 + $0x200] sm:$0xff] }
 0x302   : > { %v5825_v4 = vcombine.low %v2560_v56, %v2564_v57 }
 0x304   : > { %4089 = vmatpush1.bf16.msra.mxu0 %v5761_v61  ;;  %4130 = vmatpush1.bf16.msra.mxu1 %v5889_v62  ;;  %v5961_v61 = vcombine.low %v2696_v50, %v2700_v51  ;;  %v5826_v62 = vcombine.high %v2560_v56, %v2564_v57  ;;  %v2513_v51 = vld [vmem:[%s8363_s9 + $0x88] sm:$0xff] }
 0x305   : > { %4090 = vmatprep.subr.bf16.mxu0 %v5882_v63  ;;  %4131 = vmatprep.subr.bf16.mxu1 %v6010_v0  ;;  %v5954_v63 = vcombine.high %v2688_v58, %v2692_v59  ;;  %v2553_v0 = vld [vmem:[%s8363_s9 + $0x1c8] sm:$0xff] }
 0x308   : > { %4091 = vmatpush2.bf16.msra.mxu0 %v5881_v5  ;;  %4132 = vmatpush2.bf16.msra.mxu1 %v6009_v10  ;;  %v5953_v5 = vcombine.low %v2688_v58, %v2692_v59  ;;  %v2488_v10 = vld [vmem:[%s7317_s14] sm:$0xff]  ;;  %v2505_v59 = vld [vmem:[%s8363_s9 + $0x48] sm:$0xff] }
 0x309   : > { %4092 = vmatprep.subr.bf16.mxu0 %v5874_v11  ;;  %4133 = vmatprep.subr.bf16.mxu1 %v6002_v12  ;;  %v2490_v11 = vld [vmem:[%s7317_s14 + $0x10] sm:$0xff]  ;;  %v5820_v12 = vcombine.high %v2553_v0, %v2557_v1  ;;  %s6693_s14 = smov 64  }
 0x30c   : > { %4093 = vmatpush2.bf16.msra.mxu0 %v5873_v47  ;;  %4134 = vmatpush2.bf16.msra.mxu1 %v6001_v16  ;;  %v2677_v47 = vld [vmem:[%s8363_s9 + $0x5a8] sm:$0xff]  ;;  %v7535_v16 = vpack.c.bf16 %v2488_v10, %v2488_v10 }
 0x30d   : > { %4094 = vmatprep.subr.bf16.mxu0 %v5866_v17  ;;  %4135 = vmatprep.subr.bf16.mxu1 %v5994_v18  ;;  %v7537_v17 = vpack.c.bf16 %v2490_v11, %v2490_v11  ;;  %v5819_v18 = vcombine.low %v2553_v0, %v2557_v1  ;;  %v5940_v22 = vcombine.high %v2673_v41, %v2677_v47  ;;  %v2629_v10 = vld [vmem:[%s8363_s9 + $0x428] sm:$0xff] }
 0x30e   : > { %v5939_v30 = vcombine.low %v2673_v41, %v2677_v47  ;;  %v2621_v41 = vld [vmem:[%s8363_s9 + $0x3e8] sm:$0xff] }
 0x30f   : > { %v2745_v47 = vld [vmem:[%s8363_s9 + $0x7c8] sm:$0xff] }
 0x310   : > { %4095 = vmatpush2.bf16.msra.mxu0 %v5865_v24  ;;  %4136 = vmatpush2.bf16.msra.mxu1 %v5993_v27  ;;  %v2541_v24 = vld [vmem:[%s8363_s9 + $0x168] sm:$0xff] }
 0x311   : > { %4096 = vmatprep.subr.bf16.mxu0 %v5858_v28  ;;  %4137 = vmatprep.subr.bf16.mxu1 %v5986_v29  ;;  %v2665_v27 = vld [vmem:[%s8363_s9 + $0x548] sm:$0xff]  ;;  %v5811_v29 = vcombine.low %v2545_v14, %v2549_v15  ;;  %v5804_v31 = vcombine.high %v2537_v23, %v2541_v24 }
 0x312   : > { %v2669_v28 = vld [vmem:[%s8363_s9 + $0x568] sm:$0xff] }
 0x313   : > { %v5932_v32 = vcombine.high %v2665_v27, %v2669_v28  ;;  %v5931_v44 = vcombine.low %v2665_v27, %v2669_v28  ;;  %v2617_v15 = vld [vmem:[%s8363_s9 + $0x3c8] sm:$0xff] }
 0x314   : > { %4097 = vmatpush2.bf16.msra.mxu0 %v5857_v34  ;;  %4138 = vmatpush2.bf16.msra.mxu1 %v5985_v37  ;;  %v2533_v34 = vld [vmem:[%s8363_s9 + $0x128] sm:$0xff] }
 0x315   : > { %4098 = vmatprep.subr.bf16.mxu0 %v5850_v38  ;;  %4139 = vmatprep.subr.bf16.mxu1 %v5978_v43  ;;  %v2657_v37 = vld [vmem:[%s8363_s9 + $0x508] sm:$0xff]  ;;  %v5803_v43 = vcombine.low %v2537_v23, %v2541_v24  ;;  %v5796_v45 = vcombine.high %v2529_v33, %v2533_v34 }
 0x316   : > { %v2661_v38 = vld [vmem:[%s8363_s9 + $0x528] sm:$0xff] }
 0x317   : > { %v5924_v35 = vcombine.high %v2657_v37, %v2661_v38  ;;  %v5923_v46 = vcombine.low %v2657_v37, %v2661_v38  ;;  %v2609_v24 = vld [vmem:[%s8363_s9 + $0x388] sm:$0xff] }
 0x318   : > { %4099 = vmatpush2.bf16.msra.mxu0 %v5849_v42  ;;  %4140 = vmatpush2.bf16.msra.mxu1 %v5977_v36  ;;  %v2525_v42 = vld [vmem:[%s8363_s9 + $0xe8] sm:$0xff] }
 0x319   : > { %4100 = vmatprep.subr.bf16.mxu0 %v5842_v39  ;;  %4141 = vmatprep.subr.bf16.mxu1 %v5970_v48  ;;  %v2649_v36 = vld [vmem:[%s8363_s9 + $0x4c8] sm:$0xff]  ;;  %v5795_v48 = vcombine.low %v2529_v33, %v2533_v34  ;;  %v5788_v49 = vcombine.high %v2521_v40, %v2525_v42 }
 0x31a   : > { %v2653_v39 = vld [vmem:[%s8363_s9 + $0x4e8] sm:$0xff] }
 0x31b   : > { %v5916_v50 = vcombine.high %v2649_v36, %v2653_v39  ;;  %v5915_v56 = vcombine.low %v2649_v36, %v2653_v39  ;;  %v2613_v27 = vld [vmem:[%s8363_s9 + $0x3a8] sm:$0xff] }
 0x31c   : > { %4101 = vmatpush2.bf16.msra.mxu0 %v5841_v52  ;;  %4142 = vmatpush2.bf16.msra.mxu1 %v5969_v53  ;;  %v2517_v52 = vld [vmem:[%s8363_s9 + $0xa8] sm:$0xff] }
 0x31d   : > { %4102 = vmatprep.subr.bf16.mxu0 %v5834_v54  ;;  %4143 = vmatprep.subr.bf16.mxu1 %v5962_v55  ;;  %v2641_v53 = vld [vmem:[%s8363_s9 + $0x488] sm:$0xff]  ;;  %v5787_v55 = vcombine.low %v2521_v40, %v2525_v42  ;;  %v5780_v57 = vcombine.high %v2513_v51, %v2517_v52 }
 0x31e   : > { %v2645_v54 = vld [vmem:[%s8363_s9 + $0x4a8] sm:$0xff] }
 0x31f   : > { %v5908_v58 = vcombine.high %v2641_v53, %v2645_v54  ;;  %v5907_v0 = vcombine.low %v2641_v53, %v2645_v54  ;;  %v2737_v28 = vld [vmem:[%s8363_s9 + $0x788] sm:$0xff] }
 0x320   : > { %4103 = vmatpush2.bf16.msra.mxu0 %v5833_v60  ;;  %4144 = vmatpush2.bf16.msra.mxu1 %v5961_v61  ;;  %v2509_v60 = vld [vmem:[%s8363_s9 + $0x68] sm:$0xff] }
 0x321   : > { %4104 = vmatprep.subr.bf16.mxu0 %v5826_v62  ;;  %4145 = vmatprep.subr.bf16.mxu1 %v5954_v63  ;;  %v2633_v61 = vld [vmem:[%s8363_s9 + $0x448] sm:$0xff]  ;;  %v5779_v63 = vcombine.low %v2513_v51, %v2517_v52  ;;  %v5772_v1 = vcombine.high %v2505_v59, %v2509_v60  ;;  %v5771_v11 = vcombine.low %v2505_v59, %v2509_v60 }
 0x322   : > { %v2637_v62 = vld [vmem:[%s8363_s9 + $0x468] sm:$0xff] }
 0x323   : > { %v5900_v2 = vcombine.high %v2633_v61, %v2637_v62  ;;  %v2601_v34 = vld [vmem:[%s8363_s9 + $0x348] sm:$0xff] }
 0x324   : > { %4105 = vmatpush2.bf16.msra.mxu0 %v5825_v4  ;;  %4146 = vmatpush2.bf16.msra.mxu1 %v5953_v5  ;;  %v2501_v4 = vld [vmem:[%s8363_s9 + $0x28] sm:$0xff] }
 0x325   : > { %4156 = vmatprep.subr.bf16.mxu0 %v5820_v12  ;;  %4197 = vmatprep.subr.bf16.mxu1 %v5948_v13  ;;  %v2625_v5 = vld [vmem:[%s8363_s9 + $0x408] sm:$0xff]  ;;  %v5899_v12 = vcombine.low %v2633_v61, %v2637_v62  ;;  %v5764_v13 = vcombine.high %v2497_v3, %v2501_v4 }
 0x326   : > { %v5892_v14 = vcombine.high %v2625_v5, %v2629_v10  ;;  %v2605_v37 = vld [vmem:[%s8363_s9 + $0x368] sm:$0xff] }
 0x327   : > { %4107 = vmatmul.mubr.bf16.vlgmr.msra.gmra.mxu0 %v7535_v16  ;;  %4148 = vmatmul.mubr.bf16.vlgmr.msra.gmra.mxu1 %v7537_v17  ;;  %v2729_v38 = vld [vmem:[%s8363_s9 + $0x748] sm:$0xff] }
 0x328   : > { %4157 = vmatpush1.bf16.msra.mxu0 %v5819_v18  ;;  %4198 = vmatpush1.bf16.msra.mxu1 %v5947_v8  ;;  %v2749_v18 = vld [vmem:[%s8363_s9 + $0x7e8] sm:$0xff]  ;;  %v5763_v8 = vcombine.low %v2497_v3, %v2501_v4 }
 0x329   : > { %4158 = vmatprep.subr.bf16.mxu0 %v5812_v9  ;;  %4199 = vmatprep.subr.bf16.mxu1 %v5940_v22  ;;  %v5891_v9 = vcombine.low %v2625_v5, %v2629_v10  ;;  %v5884_v22 = vcombine.high %v2617_v15, %v2621_v41  ;;  %v6012_v23 = vcombine.high %v2745_v47, %v2749_v18  ;;  %v2593_v42 = vld [vmem:[%s8363_s9 + $0x308] sm:$0xff] }
 0x32a   : > { %4188 = vmatprep.mubr.bf16.mxu0 %v7345_v6  ;;  %4229 = vmatprep.mubr.bf16.mxu1 %v7347_v7  ;;  %v2597_v36 = vld [vmem:[%s8363_s9 + $0x328] sm:$0xff] }
 0x32b   : > { %v2721_v39 = vld [vmem:[%s8363_s9 + $0x708] sm:$0xff] }
 0x32c   : > { %4159 = vmatpush1.bf16.msra.mxu0 %v5811_v29  ;;  %4200 = vmatpush1.bf16.msra.mxu1 %v5939_v30  ;;  %v2741_v29 = vld [vmem:[%s8363_s9 + $0x7a8] sm:$0xff]  ;;  %v5883_v30 = vcombine.low %v2617_v15, %v2621_v41 }
 0x32d   : > { %4160 = vmatprep.subr.bf16.mxu0 %v5804_v31  ;;  %4201 = vmatprep.subr.bf16.mxu1 %v5932_v32  ;;  %v6011_v31 = vcombine.low %v2745_v47, %v2749_v18  ;;  %v5876_v32 = vcombine.high %v2609_v24, %v2613_v27  ;;  %v6004_v33 = vcombine.high %v2737_v28, %v2741_v29  ;;  %v2585_v52 = vld [vmem:[%s8363_s9 + $0x2c8] sm:$0xff] }
 0x32e   : > { %v2589_v53 = vld [vmem:[%s8363_s9 + $0x2e8] sm:$0xff] }
 0x32f   : > { %v2713_v54 = vld [vmem:[%s8363_s9 + $0x6c8] sm:$0xff] }
 0x330   : > { %4161 = vmatpush1.bf16.msra.mxu0 %v5803_v43  ;;  %4202 = vmatpush1.bf16.msra.mxu1 %v5931_v44  ;;  %v2733_v43 = vld [vmem:[%s8363_s9 + $0x768] sm:$0xff]  ;;  %v5875_v44 = vcombine.low %v2609_v24, %v2613_v27  ;;  %v2554_v27 = vld [vmem:[%s8363_s9 + $0x1d0] sm:$0xff] }
 0x331   : > { %4162 = vmatprep.subr.bf16.mxu0 %v5796_v45  ;;  %4203 = vmatprep.subr.bf16.mxu1 %v5924_v35  ;;  %v6003_v45 = vcombine.low %v2737_v28, %v2741_v29  ;;  %v5868_v35 = vcombine.high %v2601_v34, %v2605_v37  ;;  %v5996_v40 = vcombine.high %v2729_v38, %v2733_v43  ;;  %v2577_v60 = vld [vmem:[%s8363_s9 + $0x288] sm:$0xff]  ;;  %v2558_v28 = vld [vmem:[%s8363_s9 + $0x1f0] sm:$0xff] }
 0x332   : > { %v2581_v61 = vld [vmem:[%s8363_s9 + $0x2a8] sm:$0xff]  ;;  %v2682_v29 = vld [vmem:[%s8363_s9 + $0x5d0] sm:$0xff] }
 0x333   : > { %v2705_v62 = vld [vmem:[%s8363_s9 + $0x688] sm:$0xff] }
 0x334   : > { %4163 = vmatpush1.bf16.msra.mxu0 %v5795_v48  ;;  %4204 = vmatpush1.bf16.msra.mxu1 %v5923_v46  ;;  %v2725_v48 = vld [vmem:[%s8363_s9 + $0x728] sm:$0xff]  ;;  %v5867_v46 = vcombine.low %v2601_v34, %v2605_v37  ;;  %v5822_v34 = vcombine.high %v2554_v27, %v2558_v28 }
 0x335   : > { %4164 = vmatprep.subr.bf16.mxu0 %v5788_v49  ;;  %4205 = vmatprep.subr.bf16.mxu1 %v5916_v50  ;;  %v5995_v49 = vcombine.low %v2729_v38, %v2733_v43  ;;  %v5860_v50 = vcombine.high %v2593_v42, %v2597_v36  ;;  %v5988_v51 = vcombine.high %v2721_v39, %v2725_v48  ;;  %v2569_v4 = vld [vmem:[%s8363_s9 + $0x248] sm:$0xff]  ;;  %v2546_v38 = vld [vmem:[%s8363_s9 + $0x190] sm:$0xff] }
 0x336   : > { %v2573_v5 = vld [vmem:[%s8363_s9 + $0x268] sm:$0xff]  ;;  %v2550_v43 = vld [vmem:[%s8363_s9 + $0x1b0] sm:$0xff] }
 0x337   : > { %v2697_v10 = vld [vmem:[%s8363_s9 + $0x648] sm:$0xff] }
 0x338   : > { %4165 = vmatpush1.bf16.msra.mxu0 %v5787_v55  ;;  %4206 = vmatpush1.bf16.msra.mxu1 %v5915_v56  ;;  %v2717_v55 = vld [vmem:[%s8363_s9 + $0x6e8] sm:$0xff]  ;;  %v5859_v56 = vcombine.low %v2593_v42, %v2597_v36  ;;  %v5814_v42 = vcombine.high %v2546_v38, %v2550_v43 }
 0x339   : > { %4166 = vmatprep.subr.bf16.mxu0 %v5780_v57  ;;  %4207 = vmatprep.subr.bf16.mxu1 %v5908_v58  ;;  %v5987_v57 = vcombine.low %v2721_v39, %v2725_v48  ;;  %v5852_v58 = vcombine.high %v2585_v52, %v2589_v53  ;;  %v5980_v59 = vcombine.high %v2713_v54, %v2717_v55  ;;  %v2561_v41 = vld [vmem:[%s8363_s9 + $0x208] sm:$0xff]  ;;  %v2538_v48 = vld [vmem:[%s8363_s9 + $0x150] sm:$0xff] }
 0x33a   : > { %v2565_v47 = vld [vmem:[%s8363_s9 + $0x228] sm:$0xff] }
 0x33b   : > { %v2689_v18 = vld [vmem:[%s8363_s9 + $0x608] sm:$0xff] }
 0x33c   : > { %4167 = vmatpush1.bf16.msra.mxu0 %v5779_v63  ;;  %4208 = vmatpush1.bf16.msra.mxu1 %v5907_v0  ;;  %v2709_v63 = vld [vmem:[%s8363_s9 + $0x6a8] sm:$0xff]  ;;  %v5851_v0 = vcombine.low %v2585_v52, %v2589_v53  ;;  %v2666_v52 = vld [vmem:[%s8363_s9 + $0x550] sm:$0xff] }
 0x33d   : > { %4168 = vmatprep.subr.bf16.mxu0 %v5772_v1  ;;  %4209 = vmatprep.subr.bf16.mxu1 %v5900_v2  ;;  %v5979_v1 = vcombine.low %v2713_v54, %v2717_v55  ;;  %v5844_v2 = vcombine.high %v2577_v60, %v2581_v61  ;;  %v5972_v3 = vcombine.high %v2705_v62, %v2709_v63  ;;  %v2670_v53 = vld [vmem:[%s8363_s9 + $0x570] sm:$0xff] }
 0x33e   : > { %v5813_v55 = vcombine.low %v2546_v38, %v2550_v43  ;;  %v2510_v38 = vld [vmem:[%s8363_s9 + $0x70] sm:$0xff] }
 0x340   : > { %4169 = vmatpush1.bf16.msra.mxu0 %v5771_v11  ;;  %4210 = vmatpush1.bf16.msra.mxu1 %v5899_v12  ;;  %v2701_v11 = vld [vmem:[%s8363_s9 + $0x668] sm:$0xff]  ;;  %v5843_v12 = vcombine.low %v2577_v60, %v2581_v61 }
 0x341   : > { %4170 = vmatprep.subr.bf16.mxu0 %v5764_v13  ;;  %4211 = vmatprep.subr.bf16.mxu1 %v5892_v14  ;;  %v5971_v13 = vcombine.low %v2705_v62, %v2709_v63  ;;  %v5836_v14 = vcombine.high %v2569_v4, %v2573_v5  ;;  %v5964_v15 = vcombine.high %v2697_v10, %v2701_v11  ;;  %v2530_v62 = vld [vmem:[%s8363_s9 + $0x110] sm:$0xff] }
 0x342   : > { %v2534_v63 = vld [vmem:[%s8363_s9 + $0x130] sm:$0xff] }
 0x344   : > { %4171 = vmatpush1.bf16.msra.mxu0 %v5763_v8  ;;  %4212 = vmatpush1.bf16.msra.mxu1 %v5891_v9  ;;  %v2693_v8 = vld [vmem:[%s8363_s9 + $0x628] sm:$0xff]  ;;  %v5835_v9 = vcombine.low %v2569_v4, %v2573_v5  ;;  %v2662_v4 = vld [vmem:[%s8363_s9 + $0x530] sm:$0xff] }
 0x345   : > { %4172 = vmatprep.subr.bf16.mxu0 %v5884_v22  ;;  %4213 = vmatprep.subr.bf16.mxu1 %v6012_v23  ;;  %v5963_v22 = vcombine.low %v2697_v10, %v2701_v11  ;;  %v5828_v23 = vcombine.high %v2561_v41, %v2565_v47  ;;  %v5956_v24 = vcombine.high %v2689_v18, %v2693_v8 }
 0x348   : > { %4173 = vmatpush2.bf16.msra.mxu0 %v5883_v30  ;;  %4214 = vmatpush2.bf16.msra.mxu1 %v6011_v31  ;;  %v2686_v30 = vld [vmem:[%s8363_s9 + $0x5f0] sm:$0xff]  ;;  %v5827_v31 = vcombine.low %v2561_v41, %v2565_v47 }
 0x349   : > { %4174 = vmatprep.subr.bf16.mxu0 %v5876_v32  ;;  %4215 = vmatprep.subr.bf16.mxu1 %v6004_v33  ;;  %v5955_v32 = vcombine.low %v2689_v18, %v2693_v8  ;;  %v7726_v33 = vld [vmem:[%s8362_s8] sm:$0xf]  ;;  %v5950_v37 = vcombine.high %v2682_v29, %v2686_v30  ;;  %v5949_v36 = vcombine.low %v2682_v29, %v2686_v30  ;;  %v2526_v41 = vld [vmem:[%s8363_s9 + $0xf0] sm:$0xff] }
 0x34a   : > { %v1671_v39 = vrot.slane %v7726_v33, %v7222_v21  ;;  %v2650_v18 = vld [vmem:[%s8363_s9 + $0x4d0] sm:$0xff] }
 0x34b   : > { %v2654_v8 = vld [vmem:[%s8363_s9 + $0x4f0] sm:$0xff] }
 0x34c   : > { %4175 = vmatpush2.bf16.msra.mxu0 %v5875_v44  ;;  %4216 = vmatpush2.bf16.msra.mxu1 %v6003_v45  ;;  %v2674_v44 = vld [vmem:[%s8363_s9 + $0x590] sm:$0xff] }
 0x34d   : > { %4176 = vmatprep.subr.bf16.mxu0 %v5868_v35  ;;  %4217 = vmatprep.subr.bf16.mxu1 %v5996_v40  ;;  %v2678_v45 = vld [vmem:[%s8363_s9 + $0x5b0] sm:$0xff]  ;;  %v1667_v35 = vrot.slane %v7726_v33, %v7219_v20  ;;  %v5821_v40 = vcombine.low %v2554_v27, %v2558_v28  ;;  %v5918_v28 = vcombine.high %v2650_v18, %v2654_v8 }
 0x34e   : > { %v2518_v27 = vld [vmem:[%s8363_s9 + $0xb0] sm:$0xff] }
 0x34f   : > { %v2642_v29 = vld [vmem:[%s8363_s9 + $0x490] sm:$0xff] }
 0x350   : > { %4177 = vmatpush2.bf16.msra.mxu0 %v5867_v46  ;;  %4218 = vmatpush2.bf16.msra.mxu1 %v5995_v49  ;;  %v2542_v46 = vld [vmem:[%s8363_s9 + $0x170] sm:$0xff]  ;;  %v5942_v49 = vcombine.high %v2674_v44, %v2678_v45 }
 0x351   : > { %4178 = vmatprep.subr.bf16.mxu0 %v5860_v50  ;;  %4219 = vmatprep.subr.bf16.mxu1 %v5988_v51  ;;  %v5805_v10 = vcombine.low %v2538_v48, %v2542_v46  ;;  %v2646_v30 = vld [vmem:[%s8363_s9 + $0x4b0] sm:$0xff] }
 0x352   : > { %v5910_v43 = vcombine.high %v2642_v29, %v2646_v30 }
 0x354   : > { %4179 = vmatpush2.bf16.msra.mxu0 %v5859_v56  ;;  %4220 = vmatpush2.bf16.msra.mxu1 %v5987_v57 }
 0x355   : > { %4180 = vmatprep.subr.bf16.mxu0 %v5852_v58  ;;  %4221 = vmatprep.subr.bf16.mxu1 %v5980_v59  ;;  %v5806_v58 = vcombine.high %v2538_v48, %v2542_v46  ;;  %v5941_v59 = vcombine.low %v2674_v44, %v2678_v45  ;;  %v2634_v44 = vld [vmem:[%s8363_s9 + $0x450] sm:$0xff] }
 0x356   : > { %v2638_v45 = vld [vmem:[%s8363_s9 + $0x470] sm:$0xff] }
 0x357   : > { %v5902_v48 = vcombine.high %v2634_v44, %v2638_v45  ;;  %v2626_v46 = vld [vmem:[%s8363_s9 + $0x410] sm:$0xff] }
 0x358   : > { %4181 = vmatpush2.bf16.msra.mxu0 %v5851_v0  ;;  %4222 = vmatpush2.bf16.msra.mxu1 %v5979_v1  ;;  %v5934_v0 = vcombine.high %v2666_v52, %v2670_v53 }
 0x359   : > { %4182 = vmatprep.subr.bf16.mxu0 %v5844_v2  ;;  %4223 = vmatprep.subr.bf16.mxu1 %v5972_v3  ;;  %v2658_v3 = vld [vmem:[%s8363_s9 + $0x510] sm:$0xff] }
 0x35a   : > { %v5926_v47 = vcombine.high %v2658_v3, %v2662_v4 }
 0x35c   : > { %4183 = vmatpush2.bf16.msra.mxu0 %v5843_v12  ;;  %4224 = vmatpush2.bf16.msra.mxu1 %v5971_v13  ;;  %v5798_v13 = vcombine.high %v2530_v62, %v2534_v63 }
 0x35d   : > { %4184 = vmatprep.subr.bf16.mxu0 %v5836_v14  ;;  %4225 = vmatprep.subr.bf16.mxu1 %v5964_v15  ;;  %v5933_v14 = vcombine.low %v2666_v52, %v2670_v53  ;;  %v2522_v15 = vld [vmem:[%s8363_s9 + $0xd0] sm:$0xff]  ;;  %v5901_v52 = vcombine.low %v2634_v44, %v2638_v45 }
 0x35e   : > { %v2618_v53 = vld [vmem:[%s8363_s9 + $0x3d0] sm:$0xff] }
 0x35f   : > { %v2578_v45 = vld [vmem:[%s8363_s9 + $0x290] sm:$0xff] }
 0x360   : > { %4185 = vmatpush2.bf16.msra.mxu0 %v5835_v9  ;;  %4226 = vmatpush2.bf16.msra.mxu1 %v5963_v22  ;;  %v5797_v9 = vcombine.low %v2530_v62, %v2534_v63  ;;  %v5790_v22 = vcombine.high %v2522_v15, %v2526_v41  ;;  %v2610_v62 = vld [vmem:[%s8363_s9 + $0x390] sm:$0xff] }
 0x361   : > { %4186 = vmatprep.subr.bf16.mxu0 %v5828_v23  ;;  %4227 = vmatprep.subr.bf16.mxu1 %v5956_v24  ;;  %v5925_v23 = vcombine.low %v2658_v3, %v2662_v4  ;;  %v2514_v24 = vld [vmem:[%s8363_s9 + $0x90] sm:$0xff] }
 0x362   : > { %v2614_v63 = vld [vmem:[%s8363_s9 + $0x3b0] sm:$0xff] }
 0x363   : > { %v5878_v4 = vcombine.high %v2610_v62, %v2614_v63 }
 0x364   : > { %4187 = vmatpush2.bf16.msra.mxu0 %v5827_v31  ;;  %4228 = vmatpush2.bf16.msra.mxu1 %v5955_v32  ;;  %v5789_v31 = vcombine.low %v2522_v15, %v2526_v41  ;;  %v5782_v32 = vcombine.high %v2514_v24, %v2518_v27  ;;  %v2734_v15 = vld [vmem:[%s8363_s9 + $0x770] sm:$0xff]  ;;  %v5877_v41 = vcombine.low %v2610_v62, %v2614_v63 }
 0x365   : > { %4238 = vmatprep.subr.bf16.mxu0 %v5822_v34  ;;  %4279 = vmatprep.subr.bf16.mxu1 %v5950_v37  ;;  %v5917_v34 = vcombine.low %v2650_v18, %v2654_v8  ;;  %v2506_v37 = vld [vmem:[%s8363_s9 + $0x50] sm:$0xff] }
 0x366   : > { %v2594_v8 = vld [vmem:[%s8363_s9 + $0x310] sm:$0xff] }
 0x367   : > { %4189 = vmatmul.mubr.bf16.vlgmr.msra.gmra.mxu0 %v7535_v16  ;;  %4230 = vmatmul.mubr.bf16.vlgmr.msra.gmra.mxu1 %v7537_v17  ;;  %v2358_v50 = vpop.f32.mrf.mxu0  ;;  %v2399_v51 = vpop.f32.mrf.mxu1  ;;  %v2694_v62 = vld [vmem:[%s8363_s9 + $0x630] sm:$0xff] }
 0x368   : > { %v2359_v54 = vadd.f32 %v2358_v50, %v1667_v35  ;;  %4239 = vmatpush1.bf16.msra.mxu0 %v5821_v40  ;;  %4270 = vmatprep.mubr.bf16.mxu0 %v7345_v6  ;;  %v5781_v35 = vcombine.low %v2514_v24, %v2518_v27  ;;  %v5774_v40 = vcombine.high %v2506_v37, %v2510_v38  ;;  %v2726_v24 = vld [vmem:[%s8363_s9 + $0x730] sm:$0xff] }
 0x369   : > { %v2360_v56 = vpop.f32.mrf.mxu0  ;;  %v2401_v57 = vpop.f32.mrf.mxu1  ;;  %4240 = vmatprep.subr.bf16.mxu0 %v5814_v42  ;;  %4280 = vmatpush1.bf16.msra.mxu1 %v5949_v36  ;;  %v5909_v42 = vcombine.low %v2642_v29, %v2646_v30  ;;  %v2498_v36 = vld [vmem:[%s8363_s9 + $0x10] sm:$0xff]  ;;  %v5773_v50 = vcombine.low %v2506_v37, %v2510_v38 }
 0x36a   : > { %v7759_v60 = vadd.f32 %v2399_v51, %v2359_v54  ;;  %v2361_v61 = vadd.f32 %v2360_v56, %v1671_v39  ;;  %4281 = vmatprep.subr.bf16.mxu1 %v5942_v49  ;;  %4311 = vmatprep.mubr.bf16.mxu1 %v7347_v7  ;;  %v2502_v39 = vld [vmem:[%s8363_s9 + $0x30] sm:$0xff] }
 0x36b   : > { %v2362_v1 = vpop.f32.mrf.mxu0  ;;  %v2403_v2 = vpop.f32.mrf.mxu1  ;;  %v2630_v49 = vld [vmem:[%s8363_s9 + $0x430] sm:$0xff]  ;;  %v5766_v51 = vcombine.high %v2498_v36, %v2502_v39 }
 0x36c   : > { %v7774_v5 = vadd.f32 %v2401_v57, %v2361_v61  ;;  %4241 = vmatpush1.bf16.msra.mxu0 %v5813_v55  ;;  %v2622_v54 = vld [vmem:[%s8363_s9 + $0x3f0] sm:$0xff]  ;;  %v5894_v55 = vcombine.high %v2626_v46, %v2630_v49  ;;  %v5893_v61 = vcombine.low %v2626_v46, %v2630_v49 }
 0x36d   : > { %v2363_v11 = vpop.f32.mrf.mxu0  ;;  %v2404_v12 = vpop.f32.mrf.mxu1  ;;  %4242 = vmatprep.subr.bf16.mxu0 %v5806_v58  ;;  %4282 = vmatpush1.bf16.msra.mxu1 %v5941_v59  ;;  %v2746_v56 = vld [vmem:[%s8363_s9 + $0x7d0] sm:$0xff]  ;;  %v5765_v58 = vcombine.low %v2498_v36, %v2502_v39  ;;  %v5886_v59 = vcombine.high %v2618_v53, %v2622_v54  ;;  %v5885_v3 = vcombine.low %v2618_v53, %v2622_v54 }
 0x36e   : > { %4283 = vmatprep.subr.bf16.mxu1 %v5934_v0  ;;  %v2750_v57 = vld [vmem:[%s8363_s9 + $0x7f0] sm:$0xff] }
 0x36f   : > { %v6014_v0 = vcombine.high %v2746_v56, %v2750_v57  ;;  %v2738_v1 = vld [vmem:[%s8363_s9 + $0x790] sm:$0xff] }
 0x370   : > { %4243 = vmatpush1.bf16.msra.mxu0 %v5805_v10  ;;  %v2742_v2 = vld [vmem:[%s8363_s9 + $0x7b0] sm:$0xff]  ;;  %v6013_v10 = vcombine.low %v2746_v56, %v2750_v57 }
 0x371   : > { %4244 = vmatprep.subr.bf16.mxu0 %v5798_v13  ;;  %4284 = vmatpush1.bf16.msra.mxu1 %v5933_v14  ;;  %v2602_v11 = vld [vmem:[%s8363_s9 + $0x350] sm:$0xff]  ;;  %v6006_v13 = vcombine.high %v2738_v1, %v2742_v2  ;;  %v6005_v18 = vcombine.low %v2738_v1, %v2742_v2  ;;  %v2555_v2 = vld [vmem:[%s8363_s9 + $0x1d8] sm:$0xff] }
 0x372   : > { %4285 = vmatprep.subr.bf16.mxu1 %v5926_v47  ;;  %v2606_v12 = vld [vmem:[%s8363_s9 + $0x370] sm:$0xff] }
 0x373   : > { %v2730_v14 = vld [vmem:[%s8363_s9 + $0x750] sm:$0xff]  ;;  %v5870_v47 = vcombine.high %v2602_v11, %v2606_v12  ;;  %v5869_v27 = vcombine.low %v2602_v11, %v2606_v12  ;;  %v2687_v11 = vld [vmem:[%s8363_s9 + $0x5f8] sm:$0xff] }
 0x374   : > { %4245 = vmatpush1.bf16.msra.mxu0 %v5797_v9  ;;  %v2598_v9 = vld [vmem:[%s8363_s9 + $0x330] sm:$0xff]  ;;  %v5997_v29 = vcombine.low %v2730_v14, %v2734_v15 }
 0x375   : > { %4246 = vmatprep.subr.bf16.mxu0 %v5790_v22  ;;  %4286 = vmatpush1.bf16.msra.mxu1 %v5925_v23  ;;  %v5998_v22 = vcombine.high %v2730_v14, %v2734_v15  ;;  %v2722_v23 = vld [vmem:[%s8363_s9 + $0x710] sm:$0xff]  ;;  %v5861_v38 = vcombine.low %v2594_v8, %v2598_v9  ;;  %v2547_v15 = vld [vmem:[%s8363_s9 + $0x198] sm:$0xff] }
 0x376   : > { %4287 = vmatprep.subr.bf16.mxu1 %v5918_v28  ;;  %v5862_v28 = vcombine.high %v2594_v8, %v2598_v9  ;;  %v2586_v30 = vld [vmem:[%s8363_s9 + $0x2d0] sm:$0xff]  ;;  %v5989_v44 = vcombine.low %v2722_v23, %v2726_v24  ;;  %v2675_v9 = vld [vmem:[%s8363_s9 + $0x598] sm:$0xff] }
 0x377   : > { %v2718_v37 = vld [vmem:[%s8363_s9 + $0x6f0] sm:$0xff] }
 0x378   : > { %4247 = vmatpush1.bf16.msra.mxu0 %v5789_v31  ;;  %v2590_v31 = vld [vmem:[%s8363_s9 + $0x2f0] sm:$0xff] }
 0x379   : > { %4248 = vmatprep.subr.bf16.mxu0 %v5782_v32  ;;  %4288 = vmatpush1.bf16.msra.mxu1 %v5917_v34  ;;  %v5990_v32 = vcombine.high %v2722_v23, %v2726_v24  ;;  %v2714_v34 = vld [vmem:[%s8363_s9 + $0x6d0] sm:$0xff]  ;;  %v5853_v39 = vcombine.low %v2586_v30, %v2590_v31  ;;  %v1679_v24 = vrot.slane %v7726_v33, %v7237_v26 }
 0x37a   : > { %4289 = vmatprep.subr.bf16.mxu1 %v5910_v43  ;;  %v5854_v43 = vcombine.high %v2586_v30, %v2590_v31  ;;  %v2710_v36 = vld [vmem:[%s8363_s9 + $0x6b0] sm:$0xff]  ;;  %v5981_v46 = vcombine.low %v2714_v34, %v2718_v37 }
 0x37b   : > { %v2570_v49 = vld [vmem:[%s8363_s9 + $0x250] sm:$0xff] }
 0x37c   : > { %4249 = vmatpush1.bf16.msra.mxu0 %v5781_v35  ;;  %v2582_v35 = vld [vmem:[%s8363_s9 + $0x2b0] sm:$0xff] }
 0x37d   : > { %4250 = vmatprep.subr.bf16.mxu0 %v5774_v40  ;;  %4290 = vmatpush1.bf16.msra.mxu1 %v5909_v42  ;;  %v5982_v40 = vcombine.high %v2714_v34, %v2718_v37  ;;  %v2706_v42 = vld [vmem:[%s8363_s9 + $0x690] sm:$0xff]  ;;  %v5845_v54 = vcombine.low %v2578_v45, %v2582_v35 }
 0x37e   : > { %4291 = vmatprep.subr.bf16.mxu1 %v5902_v48  ;;  %v5846_v48 = vcombine.high %v2578_v45, %v2582_v35  ;;  %v2702_v53 = vld [vmem:[%s8363_s9 + $0x670] sm:$0xff]  ;;  %v5973_v56 = vcombine.low %v2706_v42, %v2710_v36 }
 0x37f   : > { %v2562_v57 = vld [vmem:[%s8363_s9 + $0x210] sm:$0xff] }
 0x380   : > { %4251 = vmatpush1.bf16.msra.mxu0 %v5773_v50  ;;  %v2574_v50 = vld [vmem:[%s8363_s9 + $0x270] sm:$0xff] }
 0x381   : > { %4252 = vmatprep.subr.bf16.mxu0 %v5766_v51  ;;  %4292 = vmatpush1.bf16.msra.mxu1 %v5901_v52  ;;  %v5974_v51 = vcombine.high %v2706_v42, %v2710_v36  ;;  %v2698_v52 = vld [vmem:[%s8363_s9 + $0x650] sm:$0xff]  ;;  %v5837_v63 = vcombine.low %v2570_v49, %v2574_v50  ;;  %v2535_v42 = vld [vmem:[%s8363_s9 + $0x138] sm:$0xff] }
 0x382   : > { %4293 = vmatprep.subr.bf16.mxu1 %v5894_v55  ;;  %v5838_v55 = vcombine.high %v2570_v49, %v2574_v50  ;;  %v5965_v1 = vcombine.low %v2698_v52, %v2702_v53 }
 0x384   : > { %4253 = vmatpush1.bf16.msra.mxu0 %v5765_v58  ;;  %v2566_v58 = vld [vmem:[%s8363_s9 + $0x230] sm:$0xff] }
 0x385   : > { %4254 = vmatprep.subr.bf16.mxu0 %v5886_v59  ;;  %4294 = vmatpush1.bf16.msra.mxu1 %v5893_v61  ;;  %v5966_v59 = vcombine.high %v2698_v52, %v2702_v53  ;;  %v2690_v61 = vld [vmem:[%s8363_s9 + $0x610] sm:$0xff]  ;;  %v5829_v12 = vcombine.low %v2562_v57, %v2566_v58  ;;  %v2663_v52 = vld [vmem:[%s8363_s9 + $0x538] sm:$0xff] }
 0x386   : > { %4295 = vmatprep.subr.bf16.mxu1 %v6014_v0  ;;  %v5830_v0 = vcombine.high %v2562_v57, %v2566_v58  ;;  %v5957_v14 = vcombine.low %v2690_v61, %v2694_v62 }
 0x388   : > { %4255 = vmatpush2.bf16.msra.mxu0 %v5885_v3  ;;  %v2559_v3 = vld [vmem:[%s8363_s9 + $0x1f8] sm:$0xff] }
 0x389   : > { %4256 = vmatprep.subr.bf16.mxu0 %v5878_v4  ;;  %4296 = vmatpush2.bf16.msra.mxu1 %v6013_v10  ;;  %v5958_v4 = vcombine.high %v2690_v61, %v2694_v62  ;;  %v2683_v10 = vld [vmem:[%s8363_s9 + $0x5d8] sm:$0xff]  ;;  %v5823_v8 = vcombine.low %v2555_v2, %v2559_v3 }
 0x38a   : > { %4297 = vmatprep.subr.bf16.mxu1 %v6006_v13  ;;  %v5824_v13 = vcombine.high %v2555_v2, %v2559_v3  ;;  %v2651_v61 = vld [vmem:[%s8363_s9 + $0x4d8] sm:$0xff] }
 0x38b   : > { %v2655_v62 = vld [vmem:[%s8363_s9 + $0x4f8] sm:$0xff] }
 0x38c   : > { %4257 = vmatpush2.bf16.msra.mxu0 %v5877_v41  ;;  %v2551_v41 = vld [vmem:[%s8363_s9 + $0x1b8] sm:$0xff]  ;;  %v5920_v3 = vcombine.high %v2651_v61, %v2655_v62 }
 0x38d   : > { %4258 = vmatprep.subr.bf16.mxu0 %v5870_v47  ;;  %4298 = vmatpush2.bf16.msra.mxu1 %v6005_v18  ;;  %v5952_v47 = vcombine.high %v2683_v10, %v2687_v11  ;;  %v1675_v18 = vrot.slane %v7726_v33, %v7230_v25  ;;  %v5816_v23 = vcombine.high %v2547_v15, %v2551_v41  ;;  %v2667_v33 = vld [vmem:[%s8363_s9 + $0x558] sm:$0xff] }
 0x38e   : > { %4299 = vmatprep.subr.bf16.mxu1 %v5998_v22  ;;  %v2679_v22 = vld [vmem:[%s8363_s9 + $0x5b8] sm:$0xff]  ;;  %v5815_v37 = vcombine.low %v2547_v15, %v2551_v41  ;;  %v5919_v15 = vcombine.low %v2651_v61, %v2655_v62 }
 0x38f   : > { %v5943_v36 = vcombine.low %v2675_v9, %v2679_v22 }
 0x390   : > { %4259 = vmatpush2.bf16.msra.mxu0 %v5869_v27  ;;  %v2539_v27 = vld [vmem:[%s8363_s9 + $0x158] sm:$0xff] }
 0x391   : > { %4260 = vmatprep.subr.bf16.mxu0 %v5862_v28  ;;  %4300 = vmatpush2.bf16.msra.mxu1 %v5997_v29  ;;  %v2543_v28 = vld [vmem:[%s8363_s9 + $0x178] sm:$0xff]  ;;  %v5951_v29 = vcombine.low %v2683_v10, %v2687_v11 }
 0x392   : > { %4301 = vmatprep.subr.bf16.mxu1 %v5990_v32  ;;  %v5944_v32 = vcombine.high %v2675_v9, %v2679_v22  ;;  %v5808_v45 = vcombine.high %v2539_v27, %v2543_v28  ;;  %v5807_v50 = vcombine.low %v2539_v27, %v2543_v28  ;;  %v2643_v10 = vld [vmem:[%s8363_s9 + $0x498] sm:$0xff] }
 0x393   : > { %v2647_v11 = vld [vmem:[%s8363_s9 + $0x4b8] sm:$0xff] }
 0x394   : > { %4261 = vmatpush2.bf16.msra.mxu0 %v5861_v38  ;;  %v2671_v38 = vld [vmem:[%s8363_s9 + $0x578] sm:$0xff]  ;;  %v5912_v41 = vcombine.high %v2643_v10, %v2647_v11 }
 0x395   : > { %4262 = vmatprep.subr.bf16.mxu0 %v5854_v43  ;;  %4302 = vmatpush2.bf16.msra.mxu1 %v5989_v44  ;;  %v5935_v57 = vcombine.low %v2667_v33, %v2671_v38  ;;  %v2499_v22 = vld [vmem:[%s8363_s9 + $0x18] sm:$0xff] }
 0x396   : > { %4303 = vmatprep.subr.bf16.mxu1 %v5982_v40 }
 0x398   : > { %4263 = vmatpush2.bf16.msra.mxu0 %v5853_v39 }
 0x399   : > { %4264 = vmatprep.subr.bf16.mxu0 %v5846_v48  ;;  %4304 = vmatpush2.bf16.msra.mxu1 %v5981_v46  ;;  %v5936_v46 = vcombine.high %v2667_v33, %v2671_v38 }
 0x39a   : > { %4305 = vmatprep.subr.bf16.mxu1 %v5974_v51  ;;  %v2659_v51 = vld [vmem:[%s8363_s9 + $0x518] sm:$0xff] }
 0x39b   : > { %v5928_v58 = vcombine.high %v2659_v51, %v2663_v52  ;;  %v5927_v2 = vcombine.low %v2659_v51, %v2663_v52  ;;  %v2603_v51 = vld [vmem:[%s8363_s9 + $0x358] sm:$0xff] }
 0x39c   : > { %4265 = vmatpush2.bf16.msra.mxu0 %v5845_v54  ;;  %v2607_v52 = vld [vmem:[%s8363_s9 + $0x378] sm:$0xff] }
 0x39d   : > { %4266 = vmatprep.subr.bf16.mxu0 %v5838_v55  ;;  %4306 = vmatpush2.bf16.msra.mxu1 %v5973_v56  ;;  %v2523_v55 = vld [vmem:[%s8363_s9 + $0xd8] sm:$0xff] }
 0x39e   : > { %4307 = vmatprep.subr.bf16.mxu1 %v5966_v59  ;;  %v2527_v56 = vld [vmem:[%s8363_s9 + $0xf8] sm:$0xff] }
 0x3a0   : > { %4267 = vmatpush2.bf16.msra.mxu0 %v5837_v63  ;;  %v5792_v63 = vcombine.high %v2523_v55, %v2527_v56 }
 0x3a1   : > { %4268 = vmatprep.subr.bf16.mxu0 %v5830_v0  ;;  %4308 = vmatpush2.bf16.msra.mxu1 %v5965_v1  ;;  %v2515_v0 = vld [vmem:[%s8363_s9 + $0x98] sm:$0xff] }
 0x3a2   : > { %4309 = vmatprep.subr.bf16.mxu1 %v5958_v4  ;;  %v2519_v1 = vld [vmem:[%s8363_s9 + $0xb8] sm:$0xff]  ;;  %v5791_v4 = vcombine.low %v2523_v55, %v2527_v56 }
 0x3a3   : > { %v2731_v55 = vld [vmem:[%s8363_s9 + $0x758] sm:$0xff] }
 0x3a4   : > { %4269 = vmatpush2.bf16.msra.mxu0 %v5829_v12  ;;  %v5784_v12 = vcombine.high %v2515_v0, %v2519_v1  ;;  %v2735_v56 = vld [vmem:[%s8363_s9 + $0x778] sm:$0xff] }
 0x3a5   : > { %4320 = vmatprep.subr.bf16.mxu0 %v5824_v13  ;;  %4310 = vmatpush2.bf16.msra.mxu1 %v5957_v14  ;;  %v2507_v13 = vld [vmem:[%s8363_s9 + $0x58] sm:$0xff]  ;;  %v6000_v62 = vcombine.high %v2731_v55, %v2735_v56 }
 0x3a6   : > { %4361 = vmatprep.subr.bf16.mxu1 %v5952_v47  ;;  %v2511_v14 = vld [vmem:[%s8363_s9 + $0x78] sm:$0xff]  ;;  %v5783_v47 = vcombine.low %v2515_v0, %v2519_v1 }
 0x3a7   : > { %v2440_v30 = vpop.f32.mrf.mxu0  ;;  %v2481_v31 = vpop.f32.mrf.mxu1  ;;  %4271 = vmatmul.mubr.bf16.vlgmr.msra.gmra.mxu0 %v7535_v16  ;;  %v5776_v9 = vcombine.high %v2507_v13, %v2511_v14  ;;  %v5775_v28 = vcombine.low %v2507_v13, %v2511_v14  ;;  %v2723_v0 = vld [vmem:[%s8363_s9 + $0x718] sm:$0xff] }
 0x3a8   : > { %v2441_v34 = vadd.f32 %v2440_v30, %v1675_v18  ;;  %4321 = vmatpush1.bf16.msra.mxu0 %v5823_v8  ;;  %4352 = vmatprep.mubr.bf16.mxu0 %v7345_v6  ;;  %v2531_v6 = vld [vmem:[%s8363_s9 + $0x118] sm:$0xff] }
 0x3a9   : > { %v2442_v43 = vpop.f32.mrf.mxu0  ;;  %v2483_v44 = vpop.f32.mrf.mxu1  ;;  %4322 = vmatprep.subr.bf16.mxu0 %v5816_v23  ;;  %4312 = vmatmul.mubr.bf16.vlgmr.msra.gmra.mxu1 %v7537_v17  ;;  %v5799_v59 = vcombine.low %v2531_v6, %v2535_v42  ;;  %v2635_v18 = vld [vmem:[%s8363_s9 + $0x458] sm:$0xff] }
 0x3aa   : > { %v7963_v35 = vadd.f32 %v2481_v31, %v2441_v34  ;;  %v2443_v40 = vadd.f32 %v2442_v43, %v1679_v24  ;;  %4362 = vmatpush1.bf16.msra.mxu1 %v5951_v29  ;;  %4393 = vmatprep.mubr.bf16.mxu1 %v7347_v7  ;;  %v5800_v7 = vcombine.high %v2531_v6, %v2535_v42  ;;  %v2639_v8 = vld [vmem:[%s8363_s9 + $0x478] sm:$0xff] }
 0x3ab   : > { %v2444_v39 = vpop.f32.mrf.mxu0  ;;  %v2485_v48 = vpop.f32.mrf.mxu1  ;;  %4363 = vmatprep.subr.bf16.mxu1 %v5944_v32  ;;  %v2503_v23 = vld [vmem:[%s8363_s9 + $0x38] sm:$0xff]  ;;  %v5911_v24 = vcombine.low %v2643_v10, %v2647_v11  ;;  %v5904_v27 = vcombine.high %v2635_v18, %v2639_v8  ;;  %v5999_v10 = vcombine.low %v2731_v55, %v2735_v56 }
 0x3ac   : > { %v7972_v49 = vadd.f32 %v2483_v44, %v2443_v40  ;;  %4323 = vmatpush1.bf16.msra.mxu0 %v5815_v37  ;;  %v2627_v29 = vld [vmem:[%s8363_s9 + $0x418] sm:$0xff]  ;;  %v5768_v31 = vcombine.high %v2499_v22, %v2503_v23  ;;  %v5903_v37 = vcombine.low %v2635_v18, %v2639_v8  ;;  %v5767_v38 = vcombine.low %v2499_v22, %v2503_v23 }
 0x3ad   : > { %v2445_v53 = vpop.f32.mrf.mxu0  ;;  %v2486_v54 = vpop.f32.mrf.mxu1  ;;  %4324 = vmatprep.subr.bf16.mxu0 %v5808_v45  ;;  %v2631_v30 = vld [vmem:[%s8363_s9 + $0x438] sm:$0xff] }
 0x3ae   : > { %4364 = vmatpush1.bf16.msra.mxu1 %v5943_v36  ;;  %v2619_v32 = vld [vmem:[%s8363_s9 + $0x3d8] sm:$0xff]  ;;  %v5896_v33 = vcombine.high %v2627_v29, %v2631_v30  ;;  %v5895_v42 = vcombine.low %v2627_v29, %v2631_v30 }
 0x3af   : > { %4365 = vmatprep.subr.bf16.mxu1 %v5936_v46  ;;  %v2623_v34 = vld [vmem:[%s8363_s9 + $0x3f8] sm:$0xff] }
 0x3b0   : > { %4325 = vmatpush1.bf16.msra.mxu0 %v5807_v50  ;;  %v2747_v43 = vld [vmem:[%s8363_s9 + $0x7d8] sm:$0xff]  ;;  %v5888_v45 = vcombine.high %v2619_v32, %v2623_v34  ;;  %v5887_v39 = vcombine.low %v2619_v32, %v2623_v34 }
 0x3b1   : > { %4326 = vmatprep.subr.bf16.mxu0 %v5800_v7  ;;  %v2751_v44 = vld [vmem:[%s8363_s9 + $0x7f8] sm:$0xff] }
 0x3b2   : > { %4366 = vmatpush1.bf16.msra.mxu1 %v5935_v57  ;;  %v2611_v40 = vld [vmem:[%s8363_s9 + $0x398] sm:$0xff]  ;;  %v6016_v36 = vcombine.high %v2747_v43, %v2751_v44  ;;  %v6015_v53 = vcombine.low %v2747_v43, %v2751_v44  ;;  %v5872_v57 = vcombine.high %v2603_v51, %v2607_v52 }
 0x3b3   : > { %4367 = vmatprep.subr.bf16.mxu1 %v5928_v58  ;;  %v2615_v6 = vld [vmem:[%s8363_s9 + $0x3b8] sm:$0xff] }
 0x3b4   : > { %4327 = vmatpush1.bf16.msra.mxu0 %v5799_v59  ;;  %v2739_v48 = vld [vmem:[%s8363_s9 + $0x798] sm:$0xff]  ;;  %v5880_v50 = vcombine.high %v2611_v40, %v2615_v6  ;;  %v5879_v7 = vcombine.low %v2611_v40, %v2615_v6 }
 0x3b5   : > { %4328 = vmatprep.subr.bf16.mxu0 %v5792_v63  ;;  %v2743_v46 = vld [vmem:[%s8363_s9 + $0x7b8] sm:$0xff]  ;;  %v5871_v63 = vcombine.low %v2603_v51, %v2607_v52  ;;  %v6691_v52 = vmov 0.0  }
 0x3b6   : > { %4368 = vmatpush1.bf16.msra.mxu1 %v5927_v2  ;;  %v6008_v54 = vcombine.high %v2739_v48, %v2743_v46  ;;  %v2595_v58 = vld [vmem:[%s8363_s9 + $0x318] sm:$0xff]  ;;  %v6007_v61 = vcombine.low %v2739_v48, %v2743_v46  ;;  %v8127_v46 = vld [vmem:[%s8364_s10] sm:$0xff] }
 0x3b7   : > { %4369 = vmatprep.subr.bf16.mxu1 %v5920_v3  ;;  %v2599_v59 = vld [vmem:[%s8363_s9 + $0x338] sm:$0xff]  ;;  %v2757_v51 = vrot.slane %v8127_v46, %v7219_v20 }
 0x3b8   : > { %4329 = vmatpush1.bf16.msra.mxu0 %v5791_v4  ;;  %v2727_v1 = vld [vmem:[%s8363_s9 + $0x738] sm:$0xff]  ;;  %v5864_v2 = vcombine.high %v2595_v58, %v2599_v59 }
 0x3b9   : > { %4330 = vmatprep.subr.bf16.mxu0 %v5784_v12  ;;  %v2587_v3 = vld [vmem:[%s8363_s9 + $0x2d8] sm:$0xff]  ;;  %v5992_v11 = vcombine.high %v2723_v0, %v2727_v1  ;;  %v5863_v12 = vcombine.low %v2595_v58, %v2599_v59  ;;  %v5991_v18 = vcombine.low %v2723_v0, %v2727_v1 }
 0x3ba   : > { %4370 = vmatpush1.bf16.msra.mxu1 %v5919_v15  ;;  %v2591_v4 = vld [vmem:[%s8363_s9 + $0x2f8] sm:$0xff] }
 0x3bb   : > { %4371 = vmatprep.subr.bf16.mxu1 %v5912_v41  ;;  %v2715_v13 = vld [vmem:[%s8363_s9 + $0x6d8] sm:$0xff]  ;;  %v5856_v15 = vcombine.high %v2587_v3, %v2591_v4 }
 0x3bc   : > { %4331 = vmatpush1.bf16.msra.mxu0 %v5783_v47  ;;  %v2719_v14 = vld [vmem:[%s8363_s9 + $0x6f8] sm:$0xff] }
 0x3bd   : > { %4332 = vmatprep.subr.bf16.mxu0 %v5776_v9  ;;  %v2579_v41 = vld [vmem:[%s8363_s9 + $0x298] sm:$0xff]  ;;  %v5984_v8 = vcombine.high %v2715_v13, %v2719_v14  ;;  %v5855_v9 = vcombine.low %v2587_v3, %v2591_v4  ;;  %v5983_v29 = vcombine.low %v2715_v13, %v2719_v14  ;;  %v2765_v3 = vrot.slane %v8127_v46, %v7230_v25 }
 0x3be   : > { %4372 = vmatpush1.bf16.msra.mxu1 %v5911_v24  ;;  %v2583_v47 = vld [vmem:[%s8363_s9 + $0x2b8] sm:$0xff]  ;;  %v4852_v25 = vpack.c.bf16 %v7963_v35, %v7963_v35  ;;  %v2776_v35 = vsub.s32 5, %v7216_v19 }
 0x3bf   : > { %4373 = vmatprep.subr.bf16.mxu1 %v5904_v27  ;;  %v2707_v22 = vld [vmem:[%s8363_s9 + $0x698] sm:$0xff]  ;;  %v5848_v24 = vcombine.high %v2579_v41, %v2583_v47 }
 0x3c0   : > { %4333 = vmatpush1.bf16.msra.mxu0 %v5775_v28  ;;  %v2711_v23 = vld [vmem:[%s8363_s9 + $0x6b8] sm:$0xff] }
 0x3c1   : > { %4334 = vmatprep.subr.bf16.mxu0 %v5768_v31  ;;  %v2571_v27 = vld [vmem:[%s8363_s9 + $0x258] sm:$0xff]  ;;  %v5976_v30 = vcombine.high %v2707_v22, %v2711_v23  ;;  %v5847_v31 = vcombine.low %v2579_v41, %v2583_v47  ;;  %v5975_v43 = vcombine.low %v2707_v22, %v2711_v23 }
 0x3c2   : > { %4374 = vmatpush1.bf16.msra.mxu1 %v5903_v37  ;;  %v2575_v28 = vld [vmem:[%s8363_s9 + $0x278] sm:$0xff] }
 0x3c3   : > { %4375 = vmatprep.subr.bf16.mxu1 %v5896_v33  ;;  %v2699_v32 = vld [vmem:[%s8363_s9 + $0x658] sm:$0xff]  ;;  %v5840_v37 = vcombine.high %v2571_v27, %v2575_v28 }
 0x3c4   : > { %4335 = vmatpush1.bf16.msra.mxu0 %v5767_v38  ;;  %v2703_v34 = vld [vmem:[%s8363_s9 + $0x678] sm:$0xff] }
 0x3c5   : > { %4336 = vmatprep.subr.bf16.mxu0 %v5888_v45  ;;  %v2563_v33 = vld [vmem:[%s8363_s9 + $0x218] sm:$0xff]  ;;  %v5968_v44 = vcombine.high %v2699_v32, %v2703_v34  ;;  %v5839_v45 = vcombine.low %v2571_v27, %v2575_v28 }
 0x3c6   : > { %4376 = vmatpush1.bf16.msra.mxu1 %v5895_v42  ;;  %v2567_v38 = vld [vmem:[%s8363_s9 + $0x238] sm:$0xff] }
 0x3c7   : > { %4377 = vmatprep.subr.bf16.mxu1 %v6016_v36  ;;  %v2691_v40 = vld [vmem:[%s8363_s9 + $0x618] sm:$0xff]  ;;  %v5832_v42 = vcombine.high %v2563_v33, %v2567_v38  ;;  %v5967_v36 = vcombine.low %v2699_v32, %v2703_v34  ;;  %v5831_v48 = vcombine.low %v2563_v33, %v2567_v38 }
 0x3c8   : > { %4337 = vmatpush2.bf16.msra.mxu0 %v5887_v39  ;;  %v2695_v6 = vld [vmem:[%s8363_s9 + $0x638] sm:$0xff] }
 0x3c9   : > { %4338 = vmatprep.subr.bf16.mxu0 %v5880_v50  ;;  %v5960_v39 = vcombine.high %v2691_v40, %v2695_v6  ;;  %v5959_v50 = vcombine.low %v2691_v40, %v2695_v6 }
 0x3ca   : > { %4378 = vmatpush2.bf16.msra.mxu1 %v6015_v53  ;;  %v2761_v53 = vrot.slane %v8127_v46, %v7222_v21 }
 0x3cb   : > { %4379 = vmatprep.subr.bf16.mxu1 %v6008_v54 }
 0x3cc   : > { %4339 = vmatpush2.bf16.msra.mxu0 %v5879_v7 }
 0x3cd   : > { %4340 = vmatprep.subr.bf16.mxu0 %v5872_v57 }
 0x3ce   : > { %4380 = vmatpush2.bf16.msra.mxu1 %v6007_v61 }
 0x3cf   : > { %4381 = vmatprep.subr.bf16.mxu1 %v6000_v62 }
 0x3d0   : > { %4341 = vmatpush2.bf16.msra.mxu0 %v5871_v63 }
 0x3d1   : > { %4342 = vmatprep.subr.bf16.mxu0 %v5864_v2  ;;  %v4628_v2 = vpack.c.bf16 %v7774_v5, %v7774_v5 }
 0x3d2   : > { %4382 = vmatpush2.bf16.msra.mxu1 %v5999_v10 }
 0x3d3   : > { %4383 = vmatprep.subr.bf16.mxu1 %v5992_v11  ;;  %v2769_v11 = vrot.slane %v8127_v46, %v7237_v26  ;;  %v8165_v26 = vpack.c.bf16 %v7972_v49, %v7972_v49 }
 0x3d4   : > { %4343 = vmatpush2.bf16.msra.mxu0 %v5863_v12 }
 0x3d5   : > { %4344 = vmatprep.subr.bf16.mxu0 %v5856_v15 }
 0x3d6   : > { %4384 = vmatpush2.bf16.msra.mxu1 %v5991_v18 }
 0x3d7   : > { %4385 = vmatprep.subr.bf16.mxu1 %v5984_v8 }
 0x3d8   : > { %4345 = vmatpush2.bf16.msra.mxu0 %v5855_v9 }
 0x3d9   : > { %4346 = vmatprep.subr.bf16.mxu0 %v5848_v24  ;;  %v2772_v24 = vsub.s32 4, %v7216_v19 }
 0x3da   : > { %4386 = vmatpush2.bf16.msra.mxu1 %v5983_v29  ;;  %v2777_v29 = vrot.slane %v8127_v46, %v2776_v35 }
 0x3db   : > { %4387 = vmatprep.subr.bf16.mxu1 %v5976_v30  ;;  %v2773_v28 = vrot.slane %v8127_v46, %v2772_v24 }
 0x3dc   : > { %4347 = vmatpush2.bf16.msra.mxu0 %v5847_v31 }
 0x3dd   : > { %4348 = vmatprep.subr.bf16.mxu0 %v5840_v37 }
 0x3de   : > { %4388 = vmatpush2.bf16.msra.mxu1 %v5975_v43 }
 0x3df   : > { %4389 = vmatprep.subr.bf16.mxu1 %v5968_v44 }
 0x3e0   : > { %4349 = vmatpush2.bf16.msra.mxu0 %v5839_v45 }
 0x3e1   : > { %4350 = vmatprep.subr.bf16.mxu0 %v5832_v42 }
 0x3e2   : > { %4390 = vmatpush2.bf16.msra.mxu1 %v5967_v36 }
 0x3e3   : > { %4391 = vmatprep.subr.bf16.mxu1 %v5960_v39 }
 0x3e4   : > { %4351 = vmatpush2.bf16.msra.mxu0 %v5831_v48 }
 0x3e5   : > { %6080 = vmatprep.subr.bf16.mxu0 %v6691_v52 }
 0x3e6   : > { %4392 = vmatpush2.bf16.msra.mxu1 %v5959_v50 }
 0x3e7   : > { %v4108_v54 = vpop.f32.mrf.mxu0  ;;  %v4149_v7 = vpop.f32.mrf.mxu1  ;;  %4353 = vmatmul.mubr.bf16.vlgmr.msra.gmra.mxu0 %v7535_v16  ;;  %6086 = vmatprep.subr.bf16.mxu1 %v6691_v52 }
 0x3e8   : > { %v4109_v55 = vadd.f32 %v4108_v54, %v2757_v51  ;;  %6082 = vmatprep.mubr.msk.bf16.mxu0 %vm6692_vm0, %v6691_v52 }
 0x3e9   : > { %v4110_v20 = vpop.f32.mrf.mxu0  ;;  %v4151_v56 = vpop.f32.mrf.mxu1  ;;  %4394 = vmatmul.mubr.bf16.vlgmr.msra.gmra.mxu1 %v7537_v17  ;;  %v4402_v17 = vpack.c.bf16 %v7759_v60, %v7759_v60 }
 0x3ea   : > { %v4150_v57 = vadd.f32 %v4149_v7, %v4109_v55  ;;  %v4111_v58 = vadd.f32 %v4110_v20, %v2761_v53  ;;  %6088 = vmatprep.mubr.msk.bf16.mxu1 %vm6692_vm0, %v6691_v52  ;;  %v2780_v7 = vsub.s32 6, %v7216_v19  ;;  %v2784_v20 = vsub.s32 7, %v7216_v19 }
 0x3eb   : > { %v4112_v21 = vpop.f32.mrf.mxu0  ;;  %v4153_v59 = vpop.f32.mrf.mxu1 }
 0x3ec   : > { %v4403_v16 = vpack.c.bf16 %v4150_v57, %v4150_v57  ;;  %v4152_v61 = vadd.f32 %v4151_v56, %v4111_v58  ;;  %v2781_v56 = vrot.slane %v8127_v46, %v2780_v7  ;;  %v2785_v57 = vrot.slane %v8127_v46, %v2784_v20 }
 0x3ed   : > { %v4113_v62 = vpop.f32.mrf.mxu0  ;;  %v4154_v63 = vpop.f32.mrf.mxu1 }
 0x3ee   : > { %v4410_v0 = vsel %vm4405_vm1, %v4403_v16, 0  ;;  %v4629_v1 = vpack.c.bf16 %v4152_v61, %v4152_v61  ;;  %4517 = vrot.lane.b32.xlu1 %v4403_v16, %s6693_s14 }
 0x3ef   : > { %6081 = vmatpush3.bf16.xpose.msra.mxu0 %v4410_v0 }
 0x3f0   : > { %4741 = vrot.lane.b32.xlu0 %v4629_v1, %s6693_s14  ;;  %6092 = vmatprep.subr.bf16.mxu0 %v6691_v52  ;;  %v4635_v32 = vsel %vm4405_vm1, %v4629_v1, 0 }
 0x3f2   : > { %4514 = vrot.lane.b32.xlu1 %v4402_v17, %s6693_s14 }
 0x3f6   : > { %4738 = vrot.lane.b32.xlu1 %v4628_v2, %s6693_s14  ;;  %6083 = vmatmul.mubr.msk.bf16.vlgmr.msra.gmra.mxu0 %vm4405_vm1, %v4402_v17 }
 0x3f7   : > { %6094 = vmatprep.mubr.msk.bf16.mxu0 %vm6692_vm0, %v6691_v52 }
 0x427   : > { %v4190_v60 = vpop.f32.mrf.mxu0  ;;  %v4231_v4 = vpop.f32.mrf.mxu1 }
 0x428   : > { %v4191_v10 = vadd.f32 %v4190_v60, %v2765_v3 }
 0x429   : > { %v4192_v12 = vpop.f32.mrf.mxu0  ;;  %v4233_v13 = vpop.f32.mrf.mxu1 }
 0x42a   : > { %v4232_v14 = vadd.f32 %v4231_v4, %v4191_v10  ;;  %v4193_v47 = vadd.f32 %v4192_v12, %v2769_v11 }
 0x42b   : > { %v4194_v5 = vpop.f32.mrf.mxu0  ;;  %v4235_v15 = vpop.f32.mrf.mxu1 }
 0x42c   : > { %v4853_v41 = vpack.c.bf16 %v4232_v14, %v4232_v14  ;;  %v4234_v9 = vadd.f32 %v4233_v13, %v4193_v47 }
 0x42d   : > { %v4195_v18 = vpop.f32.mrf.mxu0  ;;  %v4236_v8 = vpop.f32.mrf.mxu1 }
 0x42e   : > { %4965 = vrot.lane.b32.xlu1 %v4853_v41, %s6693_s14  ;;  %v5077_v22 = vpack.c.bf16 %v4234_v9, %v4234_v9  ;;  %v4859_v53 = vsel %vm4405_vm1, %v4853_v41, 0 }
 0x430   : > { %v5083_v16 = vsel %vm4405_vm1, %v5077_v22, 0 }
 0x432   : > { %4962 = vrot.lane.b32.xlu1 %v4852_v25, %s6693_s14 }
 0x436   : > { %5189 = vrot.lane.b32.xlu1 %v5077_v22, %s6693_s14 }
 0x43a   : > { %5186 = vrot.lane.b32.xlu1 %v8165_v26, %s6693_s14 }
 0x460   : > { %v4518_v23 = vpop.permute.xlu1 %4517 }
 0x461   : > { %v4523_v27 = vsel %vm4405_vm1, %v4518_v23, 0 }
 0x462   : > { %6093 = vmatpush3.bf16.xpose.msra.mxu0 %v4523_v27  ;;  %v4742_v36 = vpop.permute.xlu0 %4741 }
 0x463   : > { %6104 = vmatprep.subr.bf16.mxu0 %v6691_v52  ;;  %v4747_v50 = vsel %vm4405_vm1, %v4742_v36, 0 }
 0x464   : > { %v4515_v49 = vpop.permute.xlu1 %4514 }
 0x467   : > { %v4272_v30 = vpop.f32.mrf.mxu0 }
 0x468   : > { %v4273_v31 = vadd.f32 %v4272_v30, %v2773_v28  ;;  %v4739_v51 = vpop.permute.xlu1 %4738 }
 0x469   : > { %6095 = vmatmul.mubr.msk.bf16.vlgmr.msra.gmra.mxu0 %vm4405_vm1, %v4515_v49  ;;  %v4274_v34 = vpop.f32.mrf.mxu0  ;;  %v4313_v37 = vpop.f32.mrf.mxu1 }
 0x46a   : > { %6105 = vmatpush3.bf16.xpose.msra.mxu0 %v4635_v32  ;;  %6106 = vmatprep.mubr.msk.bf16.mxu0 %vm6692_vm0, %v6691_v52  ;;  %v4275_v33 = vadd.f32 %v4274_v34, %v2777_v29  ;;  %v4314_v38 = vadd.f32 %v4313_v37, %v4273_v31 }
 0x46b   : > { %6116 = vmatprep.subr.bf16.mxu0 %v6691_v52  ;;  %v4276_v43 = vpop.f32.mrf.mxu0  ;;  %v4315_v44 = vpop.f32.mrf.mxu1 }
 0x46c   : > { %v8180_v45 = vpack.c.bf16 %v4314_v38, %v4314_v38  ;;  %v8182_v40 = vadd.f32 %v4315_v44, %v4275_v33 }
 0x46d   : > { %v4277_v6 = vpop.f32.mrf.mxu0  ;;  %v4317_v42 = vpop.f32.mrf.mxu1 }
 0x46e   : > { %v4470_v39 = vsel %vm4468_vm2, %v8180_v45, 0 }
 0x46f   : > { %6087 = vmatpush3.bf16.msra.mxu1 %v4470_v39  ;;  %v4318_v48 = vpop.f32.mrf.mxu1 }
 0x470   : > { %6098 = vmatprep.subr.bf16.mxu1 %v6691_v52 }
 0x471   : > { %6107 = vmatmul.mubr.msk.bf16.vlgmr.msra.gmra.mxu0 %vm4405_vm1, %v4628_v2 }
 0x472   : > { %6117 = vmatpush3.bf16.xpose.msra.mxu0 %v4747_v50  ;;  %6118 = vmatprep.mubr.msk.bf16.mxu0 %vm6692_vm0, %v6691_v52 }
 0x473   : > { %6128 = vmatprep.subr.bf16.mxu0 %v6691_v52 }
 0x479   : > { %6119 = vmatmul.mubr.msk.bf16.vlgmr.msra.gmra.mxu0 %vm4405_vm1, %v4739_v51 }
 0x47a   : > { %6129 = vmatpush3.bf16.xpose.msra.mxu0 %v4859_v53  ;;  %6130 = vmatprep.mubr.msk.bf16.mxu0 %vm6692_vm0, %v6691_v52 }
 0x47b   : > { %6140 = vmatprep.subr.bf16.mxu0 %v6691_v52 }
 0x481   : > { %6131 = vmatmul.mubr.msk.bf16.vlgmr.msra.gmra.mxu0 %vm4405_vm1, %v4852_v25 }
 0x482   : > { %6142 = vmatprep.mubr.msk.bf16.mxu0 %vm6692_vm0, %v6691_v52 }
 0x4a0   : > { %v4966_v54 = vpop.permute.xlu1 %4965 }
 0x4a1   : > { %v4971_v55 = vsel %vm4405_vm1, %v4966_v54, 0 }
 0x4a2   : > { %6141 = vmatpush3.bf16.xpose.msra.mxu0 %v4971_v55 }
 0x4a3   : > { %6152 = vmatprep.subr.bf16.mxu0 %v6691_v52 }
 0x4a4   : > { %v4963_v21 = vpop.permute.xlu1 %4962 }
 0x4a7   : > { %v4354_v58 = vpop.f32.mrf.mxu0 }
 0x4a8   : > { %v4355_v59 = vadd.f32 %v4354_v58, %v2781_v56  ;;  %v5190_v3 = vpop.permute.xlu1 %5189 }
 0x4a9   : > { %6143 = vmatmul.mubr.msk.bf16.vlgmr.msra.gmra.mxu0 %vm4405_vm1, %v4963_v21  ;;  %v4356_v61 = vpop.f32.mrf.mxu0  ;;  %v4395_v62 = vpop.f32.mrf.mxu1  ;;  %v5195_v4 = vsel %vm4405_vm1, %v5190_v3, 0 }
 0x4aa   : > { %6153 = vmatpush3.bf16.xpose.msra.mxu0 %v5083_v16  ;;  %v4357_v63 = vadd.f32 %v4356_v61, %v2785_v57  ;;  %6154 = vmatprep.mubr.msk.bf16.mxu0 %vm6692_vm0, %v6691_v52  ;;  %v8210_v19 = vadd.f32 %v4395_v62, %v4355_v59 }
 0x4ab   : > { %6164 = vmatprep.subr.bf16.mxu0 %v6691_v52  ;;  %v4358_v0 = vpop.f32.mrf.mxu0  ;;  %v4397_v46 = vpop.f32.mrf.mxu1 }
 0x4ac   : > { %v8213_v1 = vadd.f32 %v4397_v46, %v4357_v63  ;;  %v5187_v12 = vpop.permute.xlu1 %5186 }
 0x4ad   : > { %v4359_v17 = vpop.f32.mrf.mxu0  ;;  %v4399_v2 = vpop.f32.mrf.mxu1 }
 0x4af   : > { %v4400_v60 = vpop.f32.mrf.mxu1 }
 0x4b1   : > { %6155 = vmatmul.mubr.msk.bf16.vlgmr.msra.gmra.mxu0 %vm4405_vm1, %v8165_v26 }
 0x4b2   : > { %6165 = vmatpush3.bf16.xpose.msra.mxu0 %v5195_v4  ;;  %6166 = vmatprep.mubr.msk.bf16.mxu0 %vm6692_vm0, %v6691_v52 }
 0x4b6   : > { %v4446_v10 = vpop.f32.mrf.mxu0 }
 0x4b7   : > { %v4453_v11 = vsel %vm4452_vm3, %v4446_v10, -inf }
 0x4b8   : > { %4454 = vmax.xlane.f32.xlu1 %v4453_v11  ;;  %v6084_v13 = vpop.f32.mrf.mxu0 }
 0x4b9   : > { %6167 = vmatmul.mubr.msk.bf16.vlgmr.msra.gmra.mxu0 %vm4405_vm1, %v5187_v12  ;;  %v4630_v12 = vpack.c.bf16 %v8182_v40, %v8182_v40 }
 0x4ba   : > { %v4449_v14 = vpop.f32.mrf.mxu0 }
 0x4bc   : > { %v6085_v5 = vpop.f32.mrf.mxu0 }
 0x529   : > { %v4559_v15 = vpop.f32.mrf.mxu0 }
 0x52a   : > { %v4565_v41 = vsel %vm4452_vm3, %v4559_v15, -inf }
 0x52b   : > { %4566 = vmax.xlane.f32.xlu0 %v4565_v41  ;;  %v6096_v47 = vpop.f32.mrf.mxu0 }
 0x52d   : > { %v4562_v18 = vpop.f32.mrf.mxu0 }
 0x52f   : > { %v6097_v8 = vpop.f32.mrf.mxu0 }
 0x531   : > { %v4671_v25 = vpop.f32.mrf.mxu0 }
 0x532   : > { %v4677_v9 = vsel %vm4452_vm3, %v4671_v25, -inf }
 0x533   : > { %4678 = vmax.xlane.f32.xlu0 %v4677_v9  ;;  %v6108_v22 = vpop.f32.mrf.mxu0 }
 0x535   : > { %v4674_v26 = vpop.f32.mrf.mxu0 }
 0x537   : > { %v6109_v23 = vpop.f32.mrf.mxu0 }
 0x539   : > { %v4783_v24 = vpop.f32.mrf.mxu0 }
 0x53a   : > { %v4789_v27 = vsel %vm4452_vm3, %v4783_v24, -inf }
 0x53b   : > { %4790 = vmax.xlane.f32.xlu1 %v4789_v27  ;;  %v6120_v35 = vpop.f32.mrf.mxu0 }
 0x53d   : > { %v4786_v28 = vpop.f32.mrf.mxu0 }
 0x53f   : > { %v6121_v29 = vpop.f32.mrf.mxu0 }
 0x541   : > { %v4895_v30 = vpop.f32.mrf.mxu0  ;;  %v4455_v37 = vpop.xlane.xlu1 %4454 }
 0x542   : > { %v4901_v49 = vsel %vm4452_vm3, %v4895_v30, -inf  ;;  %v4456_v33 = vsub.f32 %v4446_v10, %v4455_v37  ;;  %v5078_v37 = vpack.c.bf16 %v8213_v1, %v8213_v1  ;;  %v4693_v1 = vsel %vm4468_vm2, %v4630_v12, 0 }
 0x543   : > { %4902 = vmax.xlane.f32.xlu0 %v4901_v49  ;;  %v6132_v31 = vpop.f32.mrf.mxu0 }
 0x544   : > { %v4457_v38 = vmul.f32 1.442695, %v4456_v33 }
 0x545   : > { %v4898_v32 = vpop.f32.mrf.mxu0 }
 0x546   : > { %6602 = vpow2.f32 %v4457_v38 }
 0x547   : > { %v6133_v34 = vpop.f32.mrf.mxu0 }
 0x548   : > { %v4854_v34 = vpack.c.bf16 %v8210_v19, %v8210_v19 }
 0x553   : > { %v8228_v50 = vpop.eup %6602 }
 0x554   : > { %v4459_v54 = vsel %vm4452_vm3, %v8228_v50, 0.0 }
 0x569   : > { %v5007_v43 = vpop.f32.mrf.mxu0 }
 0x56a   : > { %v5013_v44 = vsel %vm4452_vm3, %v5007_v43, -inf }
 0x56b   : > { %5014 = vmax.xlane.f32.xlu1 %v5013_v44  ;;  %v6144_v6 = vpop.f32.mrf.mxu0 }
 0x56d   : > { %v5010_v42 = vpop.f32.mrf.mxu0 }
 0x56f   : > { %v6145_v36 = vpop.f32.mrf.mxu0 }
 0x571   : > { %v5119_v39 = vpop.f32.mrf.mxu0 }
 0x572   : > { %v5125_v48 = vsel %vm4452_vm3, %v5119_v39, -inf }
 0x573   : > { %5126 = vmax.xlane.f32.xlu0 %v5125_v48  ;;  %v6156_v51 = vpop.f32.mrf.mxu0 }
 0x575   : > { %v5122_v53 = vpop.f32.mrf.mxu0 }
 0x577   : > { %4460 = vadd.xlane.f32.xlu0 %v4459_v54  ;;  %v6157_v7 = vpop.f32.mrf.mxu0 }
 0x579   : > { %v5231_v55 = vpop.f32.mrf.mxu0 }
 0x57a   : > { %v5237_v20 = vsel %vm4452_vm3, %v5231_v55, -inf }
 0x57b   : > { %5238 = vmax.xlane.f32.xlu1 %v5237_v20  ;;  %v6168_v56 = vpop.f32.mrf.mxu0  ;;  %v4917_v20 = vsel %vm4468_vm2, %v4854_v34, 0 }
 0x57d   : > { %v5234_v57 = vpop.f32.mrf.mxu0 }
 0x57f   : > { %v6169_v58 = vpop.f32.mrf.mxu0 }
 0x5b4   : > { %v4567_v21 = vpop.xlane.xlu0 %4566 }
 0x5b5   : > { %v4568_v59 = vsub.f32 %v4559_v15, %v4567_v21 }
 0x5b7   : > { %v4569_v16 = vmul.f32 1.442695, %v4568_v59 }
 0x5b9   : > { %6604 = vpow2.f32 %v4569_v16 }
 0x5bc   : > { %v4679_v61 = vpop.xlane.xlu0 %4678 }
 0x5bd   : > { %v4680_v62 = vsub.f32 %v4671_v25, %v4679_v61 }
 0x5bf   : > { %v4681_v63 = vmul.f32 1.442695, %v4680_v62 }
 0x5c1   : > { %6606 = vpow2.f32 %v4681_v63 }
 0x5c4   : > { %v4791_v0 = vpop.xlane.xlu1 %4790 }
 0x5c5   : > { %v4792_v46 = vsub.f32 %v4783_v24, %v4791_v0 }
 0x5c6   : > { %v6605_v17 = vpop.eup %6604 }
 0x5c7   : > { %v4793_v2 = vmul.f32 1.442695, %v4792_v46  ;;  %v4571_v3 = vsel %vm4452_vm3, %v6605_v17, 0.0 }
 0x5c8   : > { %4572 = vadd.xlane.f32.xlu1 %v4571_v3  ;;  %v5141_v3 = vsel %vm4468_vm2, %v5078_v37, 0 }
 0x5c9   : > { %6608 = vpow2.f32 %v4793_v2 }
 0x5cc   : > { %v4903_v13 = vpop.xlane.xlu0 %4902 }
 0x5cd   : > { %v4904_v14 = vsub.f32 %v4895_v30, %v4903_v13 }
 0x5ce   : > { %v8234_v60 = vpop.eup %6606 }
 0x5cf   : > { %v4683_v4 = vsel %vm4452_vm3, %v8234_v60, 0.0  ;;  %v4905_v5 = vmul.f32 1.442695, %v4904_v14 }
 0x5d0   : > { %4684 = vadd.xlane.f32.xlu0 %v4683_v4 }
 0x5d1   : > { %6610 = vpow2.f32 %v4905_v5 }
 0x5d6   : > { %v8238_v10 = vpop.eup %6608 }
 0x5d7   : > { %v4795_v11 = vsel %vm4452_vm3, %v8238_v10, 0.0 }
 0x5d8   : > { %4796 = vadd.xlane.f32.xlu1 %v4795_v11 }
 0x5de   : > { %v8247_v22 = vpop.eup %6610 }
 0x5df   : > { %v4907_v26 = vsel %vm4452_vm3, %v8247_v22, 0.0 }
 0x5e6   : > { %4802 = vrot.lane.b32.xlu0 %v4630_v12, %s6693_s14 }
 0x5e9   : > { %4578 = vrot.lane.b32.xlu1 %v8180_v45, %s6693_s14 }
 0x5f4   : > { %v5015_v15 = vpop.xlane.xlu1 %5014 }
 0x5f5   : > { %v5016_v41 = vsub.f32 %v5007_v43, %v5015_v15 }
 0x5f7   : > { %v5017_v47 = vmul.f32 1.442695, %v5016_v41 }
 0x5f9   : > { %6612 = vpow2.f32 %v5017_v47 }
 0x5fc   : > { %v5127_v18 = vpop.xlane.xlu0 %5126 }
 0x5fd   : > { %v5128_v8 = vsub.f32 %v5119_v39, %v5127_v18 }
 0x5ff   : > { %v5129_v25 = vmul.f32 1.442695, %v5128_v8 }
 0x600   : > { %v4461_v9 = vpop.xlane.xlu0 %4460 }
 0x601   : > { %6614 = vpow2.f32 %v5129_v25 }
 0x602   : > { %6616 = vrcp.f32 %v4461_v9 }
 0x604   : > { %v5239_v40 = vpop.xlane.xlu1 %5238 }
 0x605   : > { %v5240_v45 = vsub.f32 %v5231_v55, %v5239_v40  ;;  %4908 = vadd.xlane.f32.xlu0 %v4907_v26 }
 0x606   : > { %v8251_v23 = vpop.eup %6612 }
 0x607   : > { %v5241_v24 = vmul.f32 1.442695, %v5240_v45  ;;  %v5019_v27 = vsel %vm4452_vm3, %v8251_v23, 0.0 }
 0x609   : > { %6618 = vpow2.f32 %v5241_v24  ;;  %5020 = vadd.xlane.f32.xlu0 %v5019_v27 }
 0x60e   : > { %v8255_v35 = vpop.eup %6614 }
 0x60f   : > { %v6617_v28 = vpop.eup %6616  ;;  %v5131_v29 = vsel %vm4452_vm3, %v8255_v35, 0.0 }
 0x610   : > { %5132 = vadd.xlane.f32.xlu0 %v5131_v29  ;;  %v4463_v30 = vmul.f32 %v6617_v28, %v8228_v50 }
 0x612   : > { %v4464_v49 = vpack.c.bf16 %v4463_v30, %v4463_v30 }
 0x614   : > { %6089 = vmatmul.mubr.msk.bf16.vlgmr.msra.gmra.mxu1 %vm4452_vm3, %v4464_v49 }
 0x615   : > { %6100 = vmatprep.mubr.msk.bf16.mxu1 %vm6692_vm0, %v6691_v52 }
 0x616   : > { %v8263_v31 = vpop.eup %6618 }
 0x617   : > { %v5243_v32 = vsel %vm4452_vm3, %v8263_v31, 0.0 }
 0x618   : > { %5244 = vadd.xlane.f32.xlu1 %v5243_v32 }
 0x626   : > { %5026 = vrot.lane.b32.xlu0 %v4854_v34, %s6693_s14 }
 0x62a   : > { %5250 = vrot.lane.b32.xlu0 %v5078_v37, %s6693_s14 }
 0x651   : > { %v4573_v33 = vpop.xlane.xlu1 %4572 }
 0x652   : > { %6620 = vrcp.f32 %v4573_v33 }
 0x659   : > { %v4685_v38 = vpop.xlane.xlu0 %4684 }
 0x65a   : > { %6622 = vrcp.f32 %v4685_v38 }
 0x65d   : > { %v4803_v50 = vpop.permute.xlu0 %4802 }
 0x65e   : > { %v4808_v54 = vsel %vm4468_vm2, %v4803_v50, 0 }
 0x65f   : > { %v6621_v43 = vpop.eup %6620 }
 0x660   : > { %v4575_v6 = vmul.f32 %v6621_v43, %v6605_v17 }
 0x661   : > { %v4797_v44 = vpop.xlane.xlu1 %4796 }
 0x662   : > { %6624 = vrcp.f32 %v4797_v44  ;;  %v4576_v19 = vpack.c.bf16 %v4575_v6, %v4575_v6 }
 0x665   : > { %v4579_v42 = vpop.permute.xlu1 %4578 }
 0x666   : > { %v4584_v36 = vsel %vm4468_vm2, %v4579_v42, 0 }
 0x667   : > { %6099 = vmatpush3.bf16.msra.mxu1 %v4584_v36  ;;  %v6623_v39 = vpop.eup %6622 }
 0x668   : > { %6110 = vmatprep.subr.bf16.mxu1 %v6691_v52  ;;  %v4687_v48 = vmul.f32 %v6623_v39, %v8234_v60 }
 0x66a   : > { %6101 = vmatmul.mubr.msk.bf16.vlgmr.msra.gmra.mxu1 %vm4452_vm3, %v4576_v19  ;;  %v4688_v51 = vpack.c.bf16 %v4687_v48, %v4687_v48 }
 0x66b   : > { %6111 = vmatpush3.bf16.msra.mxu1 %v4693_v1  ;;  %6112 = vmatprep.mubr.msk.bf16.mxu1 %vm6692_vm0, %v6691_v52 }
 0x66c   : > { %6122 = vmatprep.subr.bf16.mxu1 %v6691_v52 }
 0x66f   : > { %v6625_v53 = vpop.eup %6624 }
 0x670   : > { %v4799_v7 = vmul.f32 %v6625_v53, %v8238_v10 }
 0x672   : > { %6113 = vmatmul.mubr.msk.bf16.vlgmr.msra.gmra.mxu1 %vm4452_vm3, %v4688_v51  ;;  %v4800_v55 = vpack.c.bf16 %v4799_v7, %v4799_v7 }
 0x673   : > { %6123 = vmatpush3.bf16.msra.mxu1 %v4808_v54  ;;  %6124 = vmatprep.mubr.msk.bf16.mxu1 %vm6692_vm0, %v6691_v52 }
 0x674   : > { %6134 = vmatprep.subr.bf16.mxu1 %v6691_v52 }
 0x67a   : > { %6125 = vmatmul.mubr.msk.bf16.vlgmr.msra.gmra.mxu1 %vm4452_vm3, %v4800_v55 }
 0x67b   : > { %6135 = vmatpush3.bf16.msra.mxu1 %v4917_v20  ;;  %6136 = vmatprep.mubr.msk.bf16.mxu1 %vm6692_vm0, %v6691_v52 }
 0x67c   : > { %6146 = vmatprep.subr.bf16.mxu1 %v6691_v52 }
 0x68e   : > { %v4909_v56 = vpop.xlane.xlu0 %4908 }
 0x68f   : > { %6626 = vrcp.f32 %v4909_v56 }
 0x692   : > { %v5021_v57 = vpop.xlane.xlu0 %5020 }
 0x693   : > { %6628 = vrcp.f32 %v5021_v57 }
 0x699   : > { %v5133_v58 = vpop.xlane.xlu0 %5132 }
 0x69a   : > { %6630 = vrcp.f32 %v5133_v58 }
 0x69c   : > { %v6627_v21 = vpop.eup %6626 }
 0x69d   : > { %v4911_v59 = vmul.f32 %v6627_v21, %v8247_v22  ;;  %v5027_v16 = vpop.permute.xlu0 %5026 }
 0x69e   : > { %v5032_v63 = vsel %vm4468_vm2, %v5027_v16, 0 }
 0x69f   : > { %v4912_v61 = vpack.c.bf16 %v4911_v59, %v4911_v59 }
 0x6a0   : > { %v6629_v62 = vpop.eup %6628 }
 0x6a1   : > { %6137 = vmatmul.mubr.msk.bf16.vlgmr.msra.gmra.mxu1 %vm4452_vm3, %v4912_v61  ;;  %v5245_v0 = vpop.xlane.xlu1 %5244  ;;  %v5023_v46 = vmul.f32 %v6629_v62, %v8251_v23  ;;  %v5251_v4 = vpop.permute.xlu0 %5250 }
 0x6a2   : > { %6147 = vmatpush3.bf16.msra.mxu1 %v5032_v63  ;;  %6148 = vmatprep.mubr.msk.bf16.mxu1 %vm6692_vm0, %v6691_v52  ;;  %6632 = vrcp.f32 %v5245_v0  ;;  %v5256_v12 = vsel %vm4468_vm2, %v5251_v4, 0 }
 0x6a3   : > { %6158 = vmatprep.subr.bf16.mxu1 %v6691_v52  ;;  %v5024_v17 = vpack.c.bf16 %v5023_v46, %v5023_v46 }
 0x6a7   : > { %v6631_v2 = vpop.eup %6630 }
 0x6a8   : > { %v5135_v60 = vmul.f32 %v6631_v2, %v8255_v35 }
 0x6a9   : > { %6149 = vmatmul.mubr.msk.bf16.vlgmr.msra.gmra.mxu1 %vm4452_vm3, %v5024_v17 }
 0x6aa   : > { %6159 = vmatpush3.bf16.msra.mxu1 %v5141_v3  ;;  %6160 = vmatprep.mubr.msk.bf16.mxu1 %vm6692_vm0, %v6691_v52  ;;  %v5136_v10 = vpack.c.bf16 %v5135_v60, %v5135_v60 }
 0x6ab   : > { %6170 = vmatprep.subr.bf16.mxu1 %v6691_v52 }
 0x6af   : > { %v6633_v11 = vpop.eup %6632 }
 0x6b0   : > { %v5247_v13 = vmul.f32 %v6633_v11, %v8263_v31 }
 0x6b1   : > { %6161 = vmatmul.mubr.msk.bf16.vlgmr.msra.gmra.mxu1 %vm4452_vm3, %v5136_v10 }
 0x6b2   : > { %6171 = vmatpush3.bf16.msra.mxu1 %v5256_v12  ;;  %6172 = vmatprep.mubr.msk.bf16.mxu1 %vm6692_vm0, %v6691_v52  ;;  %v5248_v14 = vpack.c.bf16 %v5247_v13, %v5247_v13 }
 0x6b9   : > { %6173 = vmatmul.mubr.msk.bf16.vlgmr.msra.gmra.mxu1 %vm4452_vm3, %v5248_v14 }
 0x6d4   : > { %v4506_v5 = vpop.f32.mrf.mxu1 }
 0x6d5   : > { %4512 = vst.msk [vmem:[%s8312_s19] sm:$0xff] %vm4405_vm1, %v4506_v5 }
 0x6d6   : > { %v6090_v15 = vpop.f32.mrf.mxu1 }
 0x6d8   : > { %v4509_v41 = vpop.f32.mrf.mxu1 }
 0x6da   : > { %v6091_v47 = vpop.f32.mrf.mxu1 }
 0x6dc   : > { %v5359_v19 = vld [vmem:[%s8312_s19] sm:$0xff] (%p6784_p4) }
 0x6dd   : > { %5360 = vst [vmem:[%s5316_s13] sm:$0xff] (%p6784_p4), %v5359_v19 }
 0x72a   : > { %v4620_v52 = vpop.f32.mrf.mxu1 }
 0x72b   : > { %6021 = vst.msk [vmem:[%s8312_s19 + $0x8] sm:$0xff] %vm4405_vm1, %v4620_v52 }
 0x72c   : > { %v6102_v18 = vpop.f32.mrf.mxu1 }
 0x72e   : > { %v4623_v8 = vpop.f32.mrf.mxu1 }
 0x730   : > { %v6103_v25 = vpop.f32.mrf.mxu1 }
 0x732   : > { %v4729_v9 = vpop.f32.mrf.mxu1  ;;  %v5361_v39 = vld [vmem:[%s8312_s19 + $0x8] sm:$0xff] (%p6784_p4) }
 0x733   : > { %6024 = vst.msk [vmem:[%s8312_s19 + $0x10] sm:$0xff] %vm4405_vm1, %v4729_v9  ;;  %5362 = vst [vmem:[%s5316_s13 + $0x10] sm:$0xff] (%p6784_p4), %v5361_v39 }
 0x734   : > { %v6114_v22 = vpop.f32.mrf.mxu1 }
 0x736   : > { %v4732_v40 = vpop.f32.mrf.mxu1 }
 0x738   : > { %v6115_v26 = vpop.f32.mrf.mxu1 }
 0x73a   : > { %v4844_v45 = vpop.f32.mrf.mxu1  ;;  %v5363_v1 = vld [vmem:[%s8312_s19 + $0x10] sm:$0xff] (%p6784_p4) }
 0x73b   : > { %6027 = vst.msk [vmem:[%s8312_s19 + $0x18] sm:$0xff] %vm4405_vm1, %v4844_v45  ;;  %5364 = vst [vmem:[%s5316_s13 + $0x20] sm:$0xff] (%p6784_p4), %v5363_v1 }
 0x73c   : > { %v6126_v23 = vpop.f32.mrf.mxu1 }
 0x73e   : > { %v4847_v24 = vpop.f32.mrf.mxu1 }
 0x740   : > { %v6127_v27 = vpop.f32.mrf.mxu1 }
 0x742   : > { %v5365_v48 = vld [vmem:[%s8312_s19 + $0x18] sm:$0xff] (%p6784_p4) }
 0x743   : > { %5366 = vst [vmem:[%s5316_s13 + $0x30] sm:$0xff] (%p6784_p4), %v5365_v48 }
 0x761   : > { %v4953_v35 = vpop.f32.mrf.mxu1 }
 0x762   : > { %6030 = vst.msk [vmem:[%s8312_s19 + $0x20] sm:$0xff] %vm4405_vm1, %v4953_v35 }
 0x763   : > { %v6138_v28 = vpop.f32.mrf.mxu1 }
 0x765   : > { %v4956_v29 = vpop.f32.mrf.mxu1 }
 0x767   : > { %v6139_v30 = vpop.f32.mrf.mxu1 }
 0x769   : > { %v5068_v49 = vpop.f32.mrf.mxu1  ;;  %v5367_v50 = vld [vmem:[%s8312_s19 + $0x20] sm:$0xff] (%p6784_p4) }
 0x76a   : > { %6033 = vst.msk [vmem:[%s8312_s19 + $0x28] sm:$0xff] %vm4405_vm1, %v5068_v49  ;;  %5368 = vst [vmem:[%s5316_s13 + $0x40] sm:$0xff] (%p6784_p4), %v5367_v50 }
 0x76b   : > { %v6150_v31 = vpop.f32.mrf.mxu1 }
 0x76d   : > { %v5071_v32 = vpop.f32.mrf.mxu1 }
 0x76f   : > { %v6151_v34 = vpop.f32.mrf.mxu1 }
 0x771   : > { %v5177_v37 = vpop.f32.mrf.mxu1  ;;  %v5369_v51 = vld [vmem:[%s8312_s19 + $0x28] sm:$0xff] (%p6784_p4) }
 0x772   : > { %6036 = vst.msk [vmem:[%s8312_s19 + $0x30] sm:$0xff] %vm4405_vm1, %v5177_v37  ;;  %5370 = vst [vmem:[%s5316_s13 + $0x50] sm:$0xff] (%p6784_p4), %v5369_v51 }
 0x773   : > { %v6162_v33 = vpop.f32.mrf.mxu1 }
 0x775   : > { %v5180_v38 = vpop.f32.mrf.mxu1 }
 0x777   : > { %v6163_v43 = vpop.f32.mrf.mxu1 }
 0x779   : > { %v5292_v44 = vpop.f32.mrf.mxu1  ;;  %v5371_v53 = vld [vmem:[%s8312_s19 + $0x30] sm:$0xff] (%p6784_p4) }
 0x77a   : > { %6039 = vst.msk [vmem:[%s8312_s19 + $0x38] sm:$0xff] %vm4405_vm1, %v5292_v44  ;;  %5372 = vst [vmem:[%s5316_s13 + $0x60] sm:$0xff] (%p6784_p4), %v5371_v53 }
 0x77b   : > { %v6174_v6 = vpop.f32.mrf.mxu1  ;;  %5314 = sbr.rel (!%p6784_p4) target bundleno = 1923 (0x783), region = 76 }
 0x77d   : > { %v5295_v42 = vpop.f32.mrf.mxu1 }
 0x77f   : > { %v6175_v36 = vpop.f32.mrf.mxu1 }
 0x781   : > { %v5373_v54 = vld [vmem:[%s8312_s19 + $0x38] sm:$0xff] }
 0x782   : > { %5374 = vst [vmem:[%s5316_s13 + $0x70] sm:$0xff] %v5373_v54 }
 0x783 PF: > { %p21_p4 = scmp.ge.s32.totalorder %s6774_s25, 4   ;;  %s8369_s21 = smov %s6682_s22 }
 0x784   : > { %s8370_s22 = smov %s6782_s28  ;;  %s8371_s23 = smov %s6774_s25 }
 0x785   :  { %23 = sbr.rel (!%p21_p4) target bundleno = 2 (0x2), region = 162 }
 0x78a   :  { %5398 = vsyncpa [#allocation3], 1 }
 0x78b   :  { %5400 = vsyncpa [#allocation3 + $0x1], 1 }

</bundles_post_ra>
